<compile_context>
chip_gen: v6e
topology: v6e:2x2x1
jax: 0.10.0
libtpu: 0.0.40
codegen_flags: <defaults>
</compile_context>

<pallas_src>
import functools
import numpy as np
import jax
import jax.numpy as jnp
from jax import lax
from jax.experimental import pallas as pl
from jax.experimental.pallas import tpu as pltpu


_VMEM_SPEC = pl.BlockSpec(memory_space=pltpu.MemorySpace.VMEM)


def _round_up(x, m):
    return (x + m - 1) // m * m


# ----------------------------------------------------------------------------
# Tiled fused matmul kernel:  out = act((A @ W) * scale + shift)
# (bias is folded into shift on the host: shift' = bias*scale + shift)
# ----------------------------------------------------------------------------
def matmul_fused_kernel(*refs, relu, has_scale):
    if has_scale:
        a_ref, w_ref, scale_ref, shift_ref, o_ref, acc_ref = refs
    else:
        a_ref, w_ref, shift_ref, o_ref, acc_ref = refs
        scale_ref = None

    @pl.when(pl.program_id(2) == 0)
    def _():
        acc_ref[...] = jnp.zeros_like(acc_ref)

    acc_ref[...] += jnp.dot(a_ref[...], w_ref[...],
                            preferred_element_type=jnp.float32)

    @pl.when(pl.program_id(2) == pl.num_programs(2) - 1)
    def _():
        r = acc_ref[...]
        if has_scale:
            r = r * scale_ref[...]
        r = r + shift_ref[...]
        if relu:
            r = jnp.maximum(r, 0.0)
        o_ref[...] = r.astype(o_ref.dtype)


def matmul_fused(a, w, bias=None, scale=None, shift=None, *, relu=False):
    """a: (M, K) f32, w: (K, N) f32 -> (M, N) f32.  MXU operands are cast to bf16."""
    M, K = a.shape
    Kw, N = w.shape
    assert K == Kw
    has_scale = scale is not None

    scale_v = scale.reshape(N).astype(jnp.float32) if has_scale else None
    shift_v = (jnp.zeros((N,), jnp.float32) if shift is None
               else shift.reshape(N).astype(jnp.float32))
    if bias is not None:
        b = bias.reshape(N).astype(jnp.float32)
        shift_v = shift_v + (b * scale_v if has_scale else b)

    # Tile sizes (small enough that double-buffered blocks fit v7x's 64 MiB VMEM).
    TM = 256 if M >= 256 else _round_up(M, 8)
    Mp = _round_up(M, TM)
    Np = _round_up(N, 128)
    TN = 256 if Np % 256 == 0 else 128
    Kp = _round_up(K, 128)
    TK = next(t for t in (512, 256, 128) if Kp % t == 0)

    a_p = jnp.pad(a.astype(jnp.bfloat16), ((0, Mp - M), (0, Kp - K)))
    w_p = jnp.pad(w.astype(jnp.bfloat16), ((0, Kp - K), (0, Np - N)))

    operands = [a_p, w_p]
    in_specs = [pl.BlockSpec((TM, TK), lambda i, j, k: (i, k)),
                pl.BlockSpec((TK, TN), lambda i, j, k: (k, j))]
    if has_scale:
        operands.append(jnp.pad(scale_v, (0, Np - N)).reshape(1, Np))
        in_specs.append(pl.BlockSpec((1, TN), lambda i, j, k: (0, j)))
    operands.append(jnp.pad(shift_v, (0, Np - N)).reshape(1, Np))
    in_specs.append(pl.BlockSpec((1, TN), lambda i, j, k: (0, j)))

    out = pl.pallas_call(
        functools.partial(matmul_fused_kernel, relu=relu, has_scale=has_scale),
        out_shape=jax.ShapeDtypeStruct((Mp, Np), jnp.float32),
        grid=(Mp // TM, Np // TN, Kp // TK),
        in_specs=in_specs,
        out_specs=pl.BlockSpec((TM, TN), lambda i, j, k: (i, j)),
        scratch_shapes=[pltpu.VMEM((TM, TN), jnp.float32)],
        compiler_params=pltpu.CompilerParams(
            dimension_semantics=("parallel", "parallel", "arbitrary")),
    )(*operands)
    return out[:M, :N]


# ----------------------------------------------------------------------------
# Convolution = im2col (glue) + fused Pallas matmul (conv + folded BN + ReLU)
# ----------------------------------------------------------------------------
def im2col(x, kh, kw, pad):
    """x: (N, H, W, C) NHWC -> (N*Ho*Wo, kh*kw*C) with (kh, kw, C) flattening."""
    N, H, W, C = x.shape
    if pad:
        x = jnp.pad(x, ((0, 0), (pad, pad), (pad, pad), (0, 0)))
    Ho = H + 2 * pad - kh + 1
    Wo = W + 2 * pad - kw + 1
    cols = [x[:, i:i + Ho, j:j + Wo, :] for i in range(kh) for j in range(kw)]
    patches = jnp.concatenate(cols, axis=-1)                # (N, Ho, Wo, kh*kw*C)
    return patches.reshape(N * Ho * Wo, kh * kw * C), (N, Ho, Wo)


def conv2d_fused(x, w, b, *, pad, bn=None, relu=True):
    """x NHWC, w (kh, kw, Cin, Cout).  Conv + (folded BN) + ReLU via Pallas matmul."""
    kh, kw, cin, cout = w.shape
    a, (N, Ho, Wo) = im2col(x, kh, kw, pad)
    wmat = w.reshape(kh * kw * cin, cout)
    if bn is not None:
        gamma, beta, mean, var, eps = bn
        s = gamma / jnp.sqrt(var + eps)
        out = matmul_fused(a, wmat, bias=b, scale=s, shift=beta - mean * s, relu=relu)
    else:
        out = matmul_fused(a, wmat, bias=b, relu=relu)
    return out.reshape(N, Ho, Wo, cout)


# ----------------------------------------------------------------------------
# MaxPool: one Pallas kernel gridded over (N, H_out).  H-reduction via static
# indexing; W-reduction via exact one-hot selection matmuls (no strided slices).
# ----------------------------------------------------------------------------
def maxpool_kernel(x_ref, o_ref, *, ph, pw):
    # x_ref: (ph, W, C) rows of one pooling band; o_ref: (Wo, C)
    y = x_ref[0]
    for i in range(1, ph):
        y = jnp.maximum(y, x_ref[i])
    if pw == 1:
        o_ref[...] = y
    else:
        W, C = y.shape
        Wo = W // pw
        row = lax.broadcasted_iota(jnp.int32, (Wo, W), 0)
        col = lax.broadcasted_iota(jnp.int32, (Wo, W), 1)
        acc = None
        for j in range(pw):
            sel = (col == pw * row + j).astype(y.dtype)     # one-hot -> exact pick
            v = jnp.dot(sel, y, preferred_element_type=jnp.float32)
            acc = v if acc is None else jnp.maximum(acc, v)
        o_ref[...] = acc.astype(o_ref.dtype)


def maxpool(x, ph, pw):
    N, H, W, C = x.shape
    Ho, Wo = H // ph, W // pw
    return pl.pallas_call(
        functools.partial(maxpool_kernel, ph=ph, pw=pw),
        out_shape=jax.ShapeDtypeStruct((N, Ho, Wo, C), x.dtype),
        grid=(N, Ho),
        in_specs=[pl.BlockSpec((None, ph, W, C), lambda n, h: (n, h, 0, 0))],
        out_specs=pl.BlockSpec((None, None, Wo, C), lambda n, h: (n, h, 0, 0)),
        compiler_params=pltpu.CompilerParams(
            dimension_semantics=("parallel", "parallel")),
    )(x)


# ----------------------------------------------------------------------------
# Fused bidirectional LSTM recurrence (both directions in one kernel, time-major,
# statically unrolled, W_hh hoisted, reversal handled by in-kernel indexing).
# ----------------------------------------------------------------------------
def bilstm_kernel(xg_ref, whh_f_ref, whh_r_ref, out_f_ref, out_r_ref, *, T, Hd):
    """xg_ref: (T, B, 8H) = [fwd gates | bwd gates] precomputed x-projections.
    Gate order along each 4H half: i, f, g, o (PyTorch convention)."""
    B = out_f_ref.shape[1]
    whh_f = whh_f_ref[...]                      # hoisted out of the recurrence
    whh_r = whh_r_ref[...]

    h_f = jnp.zeros((B, Hd), jnp.float32)
    c_f = jnp.zeros((B, Hd), jnp.float32)
    h_r = jnp.zeros((B, Hd), jnp.float32)
    c_r = jnp.zeros((B, Hd), jnp.float32)

    def cell(g, c_prev):
        i_g = jax.nn.sigmoid(g[:, 0 * Hd:1 * Hd])
        f_g = jax.nn.sigmoid(g[:, 1 * Hd:2 * Hd])
        g_g = jnp.tanh(g[:, 2 * Hd:3 * Hd])
        o_g = jax.nn.sigmoid(g[:, 3 * Hd:4 * Hd])
        c_new = f_g * c_prev + i_g * g_g
        h_new = o_g * jnp.tanh(c_new)
        return h_new, c_new

    for t in range(T):                          # static full unroll (T is small)
        rt = T - 1 - t
        g_f = xg_ref[t][:, :4 * Hd] + jnp.dot(h_f, whh_f,
                                              preferred_element_type=jnp.float32)
        g_r = xg_ref[rt][:, 4 * Hd:] + jnp.dot(h_r, whh_r,
                                               preferred_element_type=jnp.float32)
        h_f, c_f = cell(g_f, c_f)
        h_r, c_r = cell(g_r, c_r)
        out_f_ref[t] = h_f
        out_r_ref[rt] = h_r


def bilstm_layer(h_tm, wih_f, whh_f, b_f, wih_r, whh_r, b_r):
    """h_tm: time-major (T, B, In) -> (T, B, 2H)."""
    T, B, In = h_tm.shape
    Hd = whh_f.shape[0]
    # merged input projection for both directions: (T*B, In) @ (In, 8H)
    wih = jnp.concatenate([wih_f, wih_r], axis=1)            # (In, 8H)
    bias = jnp.concatenate([b_f, b_r], axis=0)               # (8H,)
    xg = matmul_fused(h_tm.reshape(T * B, In), wih, bias=bias)
    xg = xg.reshape(T, B, 8 * Hd)
    out_f, out_r = pl.pallas_call(
        functools.partial(bilstm_kernel, T=T, Hd=Hd),
        out_shape=(jax.ShapeDtypeStruct((T, B, Hd), jnp.float32),
                   jax.ShapeDtypeStruct((T, B, Hd), jnp.float32)),
        in_specs=[_VMEM_SPEC, _VMEM_SPEC, _VMEM_SPEC],
        out_specs=(_VMEM_SPEC, _VMEM_SPEC),
    )(xg, whh_f, whh_r)
    return jnp.concatenate([out_f, out_r], axis=-1)          # (T, B, 2H)


# ----------------------------------------------------------------------------
# Parameter construction (deterministic, PyTorch-like uniform fan-in scaling)
# ----------------------------------------------------------------------------
CONV_DEFS = [  # (kh, kw, cin, cout, has_bn, pad)
    (3, 3, 3, 64, False, 1),
    (3, 3, 64, 128, False, 1),
    (3, 3, 128, 256, True, 1),
    (3, 3, 256, 256, False, 1),
    (3, 3, 256, 512, True, 1),
    (3, 3, 512, 512, False, 1),
    (2, 2, 512, 512, True, 0),
]


def init_params(key, vocab_size, hidden_size):
    params = {}
    keys = iter(jax.random.split(key, 64))

    def u(shape, bound):
        return jax.random.uniform(next(keys), shape, jnp.float32, -bound, bound)

    for idx, (kh, kw, cin, cout, has_bn, _pad) in enumerate(CONV_DEFS, 1):
        bound = 1.0 / np.sqrt(kh * kw * cin)
        params[f"c{idx}_w"] = u((kh, kw, cin, cout), bound)
        params[f"c{idx}_b"] = u((cout,), bound)
        if has_bn:  # gamma, beta, running_mean, running_var, eps (fresh BN stats)
            params[f"bn{idx}"] = (jnp.ones((cout,), jnp.float32),
                                  jnp.zeros((cout,), jnp.float32),
                                  jnp.zeros((cout,), jnp.float32),
                                  jnp.ones((cout,), jnp.float32),
                                  1e-5)

    H = hidden_size
    in_sizes = [512, 2 * H]
    for layer in range(2):
        for tag in ("f", "r"):
            bound = 1.0 / np.sqrt(H)
            params[f"l{layer}_wih_{tag}"] = u((in_sizes[layer], 4 * H), bound)  # W_ih.T
            params[f"l{layer}_whh_{tag}"] = u((H, 4 * H), bound)                # W_hh.T
            params[f"l{layer}_b_{tag}"] = u((4 * H,), bound) + u((4 * H,), bound)  # b_ih + b_hh

    bound = 1.0 / np.sqrt(2 * H)
    params["cls_w"] = u((2 * H, vocab_size), bound)
    params["cls_b"] = u((vocab_size,), bound)
    return params


# ----------------------------------------------------------------------------
# Forward pass (mirrors CRNN.forward)
# ----------------------------------------------------------------------------
def crnn_forward(x_nchw, params):
    p = params
    x = jnp.transpose(x_nchw, (0, 2, 3, 1))                  # NCHW -> NHWC

    x = conv2d_fused(x, p["c1_w"], p["c1_b"], pad=1)
    x = maxpool(x, 2, 2)
    x = conv2d_fused(x, p["c2_w"], p["c2_b"], pad=1)
    x = maxpool(x, 2, 2)
    x = conv2d_fused(x, p["c3_w"], p["c3_b"], pad=1, bn=p["bn3"])
    x = conv2d_fused(x, p["c4_w"], p["c4_b"], pad=1)
    x = maxpool(x, 2, 1)
    x = conv2d_fused(x, p["c5_w"], p["c5_b"], pad=1, bn=p["bn5"])
    x = conv2d_fused(x, p["c6_w"], p["c6_b"], pad=1)
    x = maxpool(x, 2, 1)
    x = conv2d_fused(x, p["c7_w"], p["c7_b"], pad=0, bn=p["bn7"])

    # conv out NHWC is (B, 1, W', 512); torch view(b, c*h, w).permute(0, 2, 1)
    # with h == 1 is exactly the (B, W', C) squeeze.  Go time-major once for the RNN.
    B, Hh, Wd, C = x.shape
    h = jnp.transpose(x.reshape(B, Wd, C), (1, 0, 2))        # (T, B, 512)
    T = Wd

    for layer in range(2):
        h = bilstm_layer(h, p[f"l{layer}_wih_f"], p[f"l{layer}_whh_f"], p[f"l{layer}_b_f"],
                         p[f"l{layer}_wih_r"], p[f"l{layer}_whh_r"], p[f"l{layer}_b_r"])
        # TODO(synk): nn.LSTM inter-layer dropout(0.5) is train-mode only; inference is a no-op.

    D = h.shape[-1]
    logits = matmul_fused(h.reshape(T * B, D), p["cls_w"], bias=p["cls_b"])
    V = logits.shape[-1]
    return jnp.transpose(logits.reshape(T, B, V), (1, 0, 2))  # (B, T, vocab)


# ----------------------------------------------------------------------------
if __name__ == "__main__":
    VOCAB = 32
    HIDDEN = 32            # CRNN(vocab_size=32, hidden_size=32)
    key = jax.random.PRNGKey(0)
    k_x, k_p = jax.random.split(key)

    # Input must have H=32 (architecture fixes feature_size = 512 * 1); small W=32.
    x = jax.random.normal(k_x, (2, 3, 32, 32), jnp.float32)   # NCHW like PyTorch
    params = init_params(k_p, VOCAB, HIDDEN)

    out = jax.jit(crnn_forward)(x, params)
    out = jax.block_until_ready(out)
    assert out.shape == (2, 7, VOCAB), out.shape
    assert bool(jnp.all(jnp.isfinite(out)))
    print("KERNEL_OK")
</pallas_src>

<mosaic_0001>
module attributes {stable_mosaic.version = 11 : i64} {
  func.func @maxpool_kernel(%arg0: i32, %arg1: i32, %arg2: memref<1x2x32x64xf32, #tpu.memory_space<vmem>>, %arg3: memref<1x1x16x64xf32, #tpu.memory_space<vmem>>) attributes {dimension_semantics = [#tpu.dimension_semantics<parallel>, #tpu.dimension_semantics<parallel>], iteration_bounds = array<i64: 2, 16>, scalar_prefetch = 0 : i64, scratch_operands = 0 : i64, tpu.core_type = #tpu.core_type<tc>, window_params = [{transform_indices = @transform_0, window_bounds = array<i64: 1, 2, 32, 64>}, {transform_indices = @transform_1, window_bounds = array<i64: 1, 1, 16, 64>}]} {
    %c0 = arith.constant 0 : index
    %c0_0 = arith.constant 0 : index
    %c0_1 = arith.constant 0 : index
    %c0_2 = arith.constant 0 : index
    %0 = vector.load %arg2[%c0, %c0_0, %c0_1, %c0_2] : memref<1x2x32x64xf32, #tpu.memory_space<vmem>>, vector<1x1x32x64xf32>
    %1 = vector.shape_cast %0 : vector<1x1x32x64xf32> to vector<32x64xf32>
    %c0_3 = arith.constant 0 : index
    %c1 = arith.constant 1 : index
    %c0_4 = arith.constant 0 : index
    %c0_5 = arith.constant 0 : index
    %2 = vector.load %arg2[%c0_3, %c1, %c0_4, %c0_5] : memref<1x2x32x64xf32, #tpu.memory_space<vmem>>, vector<1x1x32x64xf32>
    %3 = vector.shape_cast %2 : vector<1x1x32x64xf32> to vector<32x64xf32>
    %4 = arith.maximumf %1, %3 : vector<32x64xf32>
    %5 = tpu.iota {dimensions = array<i32: 0>} : vector<16x32xi32>
    %6 = tpu.iota {dimensions = array<i32: 1>} : vector<16x32xi32>
    %c2_i32 = arith.constant 2 : i32
    %7 = vector.broadcast %c2_i32 : i32 to vector<16x32xi32>
    %8 = arith.muli %7, %5 : vector<16x32xi32>
    %c0_i32 = arith.constant 0 : i32
    %9 = vector.broadcast %c0_i32 : i32 to vector<16x32xi32>
    %10 = arith.addi %8, %9 : vector<16x32xi32>
    %11 = arith.cmpi eq, %6, %10 : vector<16x32xi32>
    %12 = arith.extui %11 : vector<16x32xi1> to vector<16x32xi32>
    %13 = arith.sitofp %12 : vector<16x32xi32> to vector<16x32xf32>
    %cst = arith.constant dense<0.000000e+00> : vector<16x64xf32>
    %14 = tpu.matmul %13, %4, %cst {dimension_numbers = #tpu.dot_dimension_numbers<[1], [0], [0], [1], [0, 0, 1, 1], [], []>} : vector<16x32xf32>, vector<32x64xf32>, vector<16x64xf32> -> vector<16x64xf32>
    %c2_i32_6 = arith.constant 2 : i32
    %15 = vector.broadcast %c2_i32_6 : i32 to vector<16x32xi32>
    %16 = arith.muli %15, %5 : vector<16x32xi32>
    %c1_i32 = arith.constant 1 : i32
    %17 = vector.broadcast %c1_i32 : i32 to vector<16x32xi32>
    %18 = arith.addi %16, %17 : vector<16x32xi32>
    %19 = arith.cmpi eq, %6, %18 : vector<16x32xi32>
    %20 = arith.extui %19 : vector<16x32xi1> to vector<16x32xi32>
    %21 = arith.sitofp %20 : vector<16x32xi32> to vector<16x32xf32>
    %cst_7 = arith.constant dense<0.000000e+00> : vector<16x64xf32>
    %22 = tpu.matmul %21, %4, %cst_7 {dimension_numbers = #tpu.dot_dimension_numbers<[1], [0], [0], [1], [0, 0, 1, 1], [], []>} : vector<16x32xf32>, vector<32x64xf32>, vector<16x64xf32> -> vector<16x64xf32>
    %23 = arith.maximumf %14, %22 : vector<16x64xf32>
    %c0_8 = arith.constant 0 : index
    %c0_9 = arith.constant 0 : index
    %c0_10 = arith.constant 0 : index
    %c0_11 = arith.constant 0 : index
    %24 = vector.load %arg3[%c0_8, %c0_9, %c0_10, %c0_11] : memref<1x1x16x64xf32, #tpu.memory_space<vmem>>, vector<1x1x16x64xf32>
    %25 = vector.shape_cast %24 : vector<1x1x16x64xf32> to vector<16x64xf32>
    %26 = vector.shape_cast %23 : vector<16x64xf32> to vector<1x1x16x64xf32>
    tpu.vector_store %arg3[%c0_8, %c0_9, %c0_10, %c0_11], %26 {strides = array<i32>} : memref<1x1x16x64xf32, #tpu.memory_space<vmem>>, vector<1x1x16x64xf32>,
    return
  }
  func.func @transform_0(%arg0: i32, %arg1: i32) -> (i32, i32, i32, i32) {
    %c0_i32 = arith.constant 0 : i32
    %c0_i32_0 = arith.constant 0 : i32
    %c0_i32_1 = arith.constant 0 : i32
    return %arg0, %arg1, %c0_i32, %c0_i32_0 : i32, i32, i32, i32
  }
  func.func @transform_1(%arg0: i32, %arg1: i32) -> (i32, i32, i32, i32) {
    %c0_i32 = arith.constant 0 : i32
    %c0_i32_0 = arith.constant 0 : i32
    %c0_i32_1 = arith.constant 0 : i32
    return %arg0, %arg1, %c0_i32, %c0_i32_0 : i32, i32, i32, i32
  }
}

module attributes {stable_mosaic.version = 11 : i64} {
  func.func @matmul_fused_kernel(%arg0: i32, %arg1: i32, %arg2: i32, %arg3: memref<256x128xbf16, #tpu.memory_space<vmem>>, %arg4: memref<128x128xbf16, #tpu.memory_space<vmem>>, %arg5: memref<1x128xf32, #tpu.memory_space<vmem>>, %arg6: memref<256x128xf32, #tpu.memory_space<vmem>>, %arg7: memref<256x128xf32, #tpu.memory_space<vmem>>) attributes {dimension_semantics = [#tpu.dimension_semantics<parallel>, #tpu.dimension_semantics<parallel>, #tpu.dimension_semantics<arbitrary>], iteration_bounds = array<i64: 8, 1, 1>, scalar_prefetch = 0 : i64, scratch_operands = 1 : i64, tpu.core_type = #tpu.core_type<tc>, window_params = [{transform_indices = @transform_0, window_bounds = array<i64: 256, 128>}, {transform_indices = @transform_1, window_bounds = array<i64: 128, 128>}, {transform_indices = @transform_2, window_bounds = array<i64: 1, 128>}, {transform_indices = @transform_3, window_bounds = array<i64: 256, 128>}]} {
    %c0_i32 = arith.constant 0 : i32
    %0 = arith.cmpi eq, %arg2, %c0_i32 : i32
    %1 = arith.extui %0 : i1 to i32
    %c0_i32_0 = arith.constant 0 : i32
    %2 = arith.cmpi ne, %1, %c0_i32_0 : i32
    scf.if %2 {
      %cst_10 = arith.constant 0.000000e+00 : f32
      %12 = vector.broadcast %cst_10 : f32 to vector<256x128xf32>
      %c0_11 = arith.constant 0 : index
      %c0_12 = arith.constant 0 : index
      %13 = vector.load %arg7[%c0_11, %c0_12] : memref<256x128xf32, #tpu.memory_space<vmem>>, vector<256x128xf32>
      tpu.vector_store %arg7[%c0_11, %c0_12], %12 {strides = array<i32>} : memref<256x128xf32, #tpu.memory_space<vmem>>, vector<256x128xf32>,
    } else {
    }
    %c0 = arith.constant 0 : index
    %c0_1 = arith.constant 0 : index
    %3 = vector.load %arg7[%c0, %c0_1] : memref<256x128xf32, #tpu.memory_space<vmem>>, vector<256x128xf32>
    %c0_2 = arith.constant 0 : index
    %c0_3 = arith.constant 0 : index
    %4 = vector.load %arg3[%c0_2, %c0_3] : memref<256x128xbf16, #tpu.memory_space<vmem>>, vector<256x128xbf16>
    %c0_4 = arith.constant 0 : index
    %c0_5 = arith.constant 0 : index
    %5 = vector.load %arg4[%c0_4, %c0_5] : memref<128x128xbf16, #tpu.memory_space<vmem>>, vector<128x128xbf16>
    %cst = arith.constant dense<0.000000e+00> : vector<256x128xf32>
    %6 = tpu.matmul %4, %5, %cst {dimension_numbers = #tpu.dot_dimension_numbers<[1], [0], [0], [1], [0, 0, 1, 1], [], []>} : vector<256x128xbf16>, vector<128x128xbf16>, vector<256x128xf32> -> vector<256x128xf32>
    %7 = arith.addf %3, %6 : vector<256x128xf32>
    %c0_6 = arith.constant 0 : index
    %c0_7 = arith.constant 0 : index
    %8 = vector.load %arg7[%c0_6, %c0_7] : memref<256x128xf32, #tpu.memory_space<vmem>>, vector<256x128xf32>
    tpu.vector_store %arg7[%c0_6, %c0_7], %7 {strides = array<i32>} : memref<256x128xf32, #tpu.memory_space<vmem>>, vector<256x128xf32>,
    %c0_i32_8 = arith.constant 0 : i32
    %9 = arith.cmpi eq, %arg2, %c0_i32_8 : i32
    %10 = arith.extui %9 : i1 to i32
    %c0_i32_9 = arith.constant 0 : i32
    %11 = arith.cmpi ne, %10, %c0_i32_9 : i32
    scf.if %11 {
      %c0_10 = arith.constant 0 : index
      %c0_11 = arith.constant 0 : index
      %12 = vector.load %arg7[%c0_10, %c0_11] : memref<256x128xf32, #tpu.memory_space<vmem>>, vector<256x128xf32>
      %c0_12 = arith.constant 0 : index
      %c0_13 = arith.constant 0 : index
      %13 = vector.load %arg5[%c0_12, %c0_13] : memref<1x128xf32, #tpu.memory_space<vmem>>, vector<1x128xf32>
      %14 = vector.broadcast %13 : vector<1x128xf32> to vector<256x128xf32>
      %15 = arith.addf %12, %14 : vector<256x128xf32>
      %cst_14 = arith.constant 0.000000e+00 : f32
      %16 = vector.broadcast %cst_14 : f32 to vector<256x128xf32>
      %17 = arith.maximumf %15, %16 : vector<256x128xf32>
      %c0_15 = arith.constant 0 : index
      %c0_16 = arith.constant 0 : index
      %18 = vector.load %arg6[%c0_15, %c0_16] : memref<256x128xf32, #tpu.memory_space<vmem>>, vector<256x128xf32>
      tpu.vector_store %arg6[%c0_15, %c0_16], %17 {strides = array<i32>} : memref<256x128xf32, #tpu.memory_space<vmem>>, vector<256x128xf32>,
    } else {
    }
    return
  }
  func.func @transform_0(%arg0: i32, %arg1: i32, %arg2: i32) -> (i32, i32) {
    %c0_i32 = arith.constant 0 : i32
    return %arg0, %arg2 : i32, i32
  }
  func.func @transform_1(%arg0: i32, %arg1: i32, %arg2: i32) -> (i32, i32) {
    %c0_i32 = arith.constant 0 : i32
    return %arg2, %arg1 : i32, i32
  }
  func.func @transform_2(%arg0: i32, %arg1: i32, %arg2: i32) -> (i32, i32) {
    %c0_i32 = arith.constant 0 : i32
    %c0_i32_0 = arith.constant 0 : i32
    return %c0_i32, %arg1 : i32, i32
  }
  func.func @transform_3(%arg0: i32, %arg1: i32, %arg2: i32) -> (i32, i32) {
    %c0_i32 = arith.constant 0 : i32
    return %arg0, %arg1 : i32, i32
  }
}

module attributes {stable_mosaic.version = 11 : i64} {
  func.func @matmul_fused_kernel(%arg0: i32, %arg1: i32, %arg2: i32, %arg3: memref<256x128xbf16, #tpu.memory_space<vmem>>, %arg4: memref<128x128xbf16, #tpu.memory_space<vmem>>, %arg5: memref<1x128xf32, #tpu.memory_space<vmem>>, %arg6: memref<256x128xf32, #tpu.memory_space<vmem>>, %arg7: memref<256x128xf32, #tpu.memory_space<vmem>>) attributes {dimension_semantics = [#tpu.dimension_semantics<parallel>, #tpu.dimension_semantics<parallel>, #tpu.dimension_semantics<arbitrary>], iteration_bounds = array<i64: 2, 1, 5>, scalar_prefetch = 0 : i64, scratch_operands = 1 : i64, tpu.core_type = #tpu.core_type<tc>, window_params = [{transform_indices = @transform_0, window_bounds = array<i64: 256, 128>}, {transform_indices = @transform_1, window_bounds = array<i64: 128, 128>}, {transform_indices = @transform_2, window_bounds = array<i64: 1, 128>}, {transform_indices = @transform_3, window_bounds = array<i64: 256, 128>}]} {
    %c0_i32 = arith.constant 0 : i32
    %0 = arith.cmpi eq, %arg2, %c0_i32 : i32
    %1 = arith.extui %0 : i1 to i32
    %c0_i32_0 = arith.constant 0 : i32
    %2 = arith.cmpi ne, %1, %c0_i32_0 : i32
    scf.if %2 {
      %cst_9 = arith.constant 0.000000e+00 : f32
      %12 = vector.broadcast %cst_9 : f32 to vector<256x128xf32>
      %c0_10 = arith.constant 0 : index
      %c0_11 = arith.constant 0 : index
      %13 = vector.load %arg7[%c0_10, %c0_11] : memref<256x128xf32, #tpu.memory_space<vmem>>, vector<256x128xf32>
      tpu.vector_store %arg7[%c0_10, %c0_11], %12 {strides = array<i32>} : memref<256x128xf32, #tpu.memory_space<vmem>>, vector<256x128xf32>,
    } else {
    }
    %c0 = arith.constant 0 : index
    %c0_1 = arith.constant 0 : index
    %3 = vector.load %arg7[%c0, %c0_1] : memref<256x128xf32, #tpu.memory_space<vmem>>, vector<256x128xf32>
    %c0_2 = arith.constant 0 : index
    %c0_3 = arith.constant 0 : index
    %4 = vector.load %arg3[%c0_2, %c0_3] : memref<256x128xbf16, #tpu.memory_space<vmem>>, vector<256x128xbf16>
    %c0_4 = arith.constant 0 : index
    %c0_5 = arith.constant 0 : index
    %5 = vector.load %arg4[%c0_4, %c0_5] : memref<128x128xbf16, #tpu.memory_space<vmem>>, vector<128x128xbf16>
    %cst = arith.constant dense<0.000000e+00> : vector<256x128xf32>
    %6 = tpu.matmul %4, %5, %cst {dimension_numbers = #tpu.dot_dimension_numbers<[1], [0], [0], [1], [0, 0, 1, 1], [], []>} : vector<256x128xbf16>, vector<128x128xbf16>, vector<256x128xf32> -> vector<256x128xf32>
    %7 = arith.addf %3, %6 : vector<256x128xf32>
    %c0_6 = arith.constant 0 : index
    %c0_7 = arith.constant 0 : index
    %8 = vector.load %arg7[%c0_6, %c0_7] : memref<256x128xf32, #tpu.memory_space<vmem>>, vector<256x128xf32>
    tpu.vector_store %arg7[%c0_6, %c0_7], %7 {strides = array<i32>} : memref<256x128xf32, #tpu.memory_space<vmem>>, vector<256x128xf32>,
    %c4_i32 = arith.constant 4 : i32
    %9 = arith.cmpi eq, %arg2, %c4_i32 : i32
    %10 = arith.extui %9 : i1 to i32
    %c0_i32_8 = arith.constant 0 : i32
    %11 = arith.cmpi ne, %10, %c0_i32_8 : i32
    scf.if %11 {
      %c0_9 = arith.constant 0 : index
      %c0_10 = arith.constant 0 : index
      %12 = vector.load %arg7[%c0_9, %c0_10] : memref<256x128xf32, #tpu.memory_space<vmem>>, vector<256x128xf32>
      %c0_11 = arith.constant 0 : index
      %c0_12 = arith.constant 0 : index
      %13 = vector.load %arg5[%c0_11, %c0_12] : memref<1x128xf32, #tpu.memory_space<vmem>>, vector<1x128xf32>
      %14 = vector.broadcast %13 : vector<1x128xf32> to vector<256x128xf32>
      %15 = arith.addf %12, %14 : vector<256x128xf32>
      %cst_13 = arith.constant 0.000000e+00 : f32
      %16 = vector.broadcast %cst_13 : f32 to vector<256x128xf32>
      %17 = arith.maximumf %15, %16 : vector<256x128xf32>
      %c0_14 = arith.constant 0 : index
      %c0_15 = arith.constant 0 : index
      %18 = vector.load %arg6[%c0_14, %c0_15] : memref<256x128xf32, #tpu.memory_space<vmem>>, vector<256x128xf32>
      tpu.vector_store %arg6[%c0_14, %c0_15], %17 {strides = array<i32>} : memref<256x128xf32, #tpu.memory_space<vmem>>, vector<256x128xf32>,
    } else {
    }
    return
  }
  func.func @transform_0(%arg0: i32, %arg1: i32, %arg2: i32) -> (i32, i32) {
    %c0_i32 = arith.constant 0 : i32
    return %arg0, %arg2 : i32, i32
  }
  func.func @transform_1(%arg0: i32, %arg1: i32, %arg2: i32) -> (i32, i32) {
    %c0_i32 = arith.constant 0 : i32
    return %arg2, %arg1 : i32, i32
  }
  func.func @transform_2(%arg0: i32, %arg1: i32, %arg2: i32) -> (i32, i32) {
    %c0_i32 = arith.constant 0 : i32
    %c0_i32_0 = arith.constant 0 : i32
    return %c0_i32, %arg1 : i32, i32
  }
  func.func @transform_3(%arg0: i32, %arg1: i32, %arg2: i32) -> (i32, i32) {
    %c0_i32 = arith.constant 0 : i32
    return %arg0, %arg1 : i32, i32
  }
}

module attributes {stable_mosaic.version = 11 : i64} {
  func.func @maxpool_kernel(%arg0: i32, %arg1: i32, %arg2: memref<1x2x16x128xf32, #tpu.memory_space<vmem>>, %arg3: memref<1x1x8x128xf32, #tpu.memory_space<vmem>>) attributes {dimension_semantics = [#tpu.dimension_semantics<parallel>, #tpu.dimension_semantics<parallel>], iteration_bounds = array<i64: 2, 8>, scalar_prefetch = 0 : i64, scratch_operands = 0 : i64, tpu.core_type = #tpu.core_type<tc>, window_params = [{transform_indices = @transform_0, window_bounds = array<i64: 1, 2, 16, 128>}, {transform_indices = @transform_1, window_bounds = array<i64: 1, 1, 8, 128>}]} {
    %c0 = arith.constant 0 : index
    %c0_0 = arith.constant 0 : index
    %c0_1 = arith.constant 0 : index
    %c0_2 = arith.constant 0 : index
    %0 = vector.load %arg2[%c0, %c0_0, %c0_1, %c0_2] : memref<1x2x16x128xf32, #tpu.memory_space<vmem>>, vector<1x1x16x128xf32>
    %1 = vector.shape_cast %0 : vector<1x1x16x128xf32> to vector<16x128xf32>
    %c0_3 = arith.constant 0 : index
    %c1 = arith.constant 1 : index
    %c0_4 = arith.constant 0 : index
    %c0_5 = arith.constant 0 : index
    %2 = vector.load %arg2[%c0_3, %c1, %c0_4, %c0_5] : memref<1x2x16x128xf32, #tpu.memory_space<vmem>>, vector<1x1x16x128xf32>
    %3 = vector.shape_cast %2 : vector<1x1x16x128xf32> to vector<16x128xf32>
    %4 = arith.maximumf %1, %3 : vector<16x128xf32>
    %5 = tpu.iota {dimensions = array<i32: 0>} : vector<8x16xi32>
    %6 = tpu.iota {dimensions = array<i32: 1>} : vector<8x16xi32>
    %c2_i32 = arith.constant 2 : i32
    %7 = vector.broadcast %c2_i32 : i32 to vector<8x16xi32>
    %8 = arith.muli %7, %5 : vector<8x16xi32>
    %c0_i32 = arith.constant 0 : i32
    %9 = vector.broadcast %c0_i32 : i32 to vector<8x16xi32>
    %10 = arith.addi %8, %9 : vector<8x16xi32>
    %11 = arith.cmpi eq, %6, %10 : vector<8x16xi32>
    %12 = arith.extui %11 : vector<8x16xi1> to vector<8x16xi32>
    %13 = arith.sitofp %12 : vector<8x16xi32> to vector<8x16xf32>
    %cst = arith.constant dense<0.000000e+00> : vector<8x128xf32>
    %14 = tpu.matmul %13, %4, %cst {dimension_numbers = #tpu.dot_dimension_numbers<[1], [0], [0], [1], [0, 0, 1, 1], [], []>} : vector<8x16xf32>, vector<16x128xf32>, vector<8x128xf32> -> vector<8x128xf32>
    %c2_i32_6 = arith.constant 2 : i32
    %15 = vector.broadcast %c2_i32_6 : i32 to vector<8x16xi32>
    %16 = arith.muli %15, %5 : vector<8x16xi32>
    %c1_i32 = arith.constant 1 : i32
    %17 = vector.broadcast %c1_i32 : i32 to vector<8x16xi32>
    %18 = arith.addi %16, %17 : vector<8x16xi32>
    %19 = arith.cmpi eq, %6, %18 : vector<8x16xi32>
    %20 = arith.extui %19 : vector<8x16xi1> to vector<8x16xi32>
    %21 = arith.sitofp %20 : vector<8x16xi32> to vector<8x16xf32>
    %cst_7 = arith.constant dense<0.000000e+00> : vector<8x128xf32>
    %22 = tpu.matmul %21, %4, %cst_7 {dimension_numbers = #tpu.dot_dimension_numbers<[1], [0], [0], [1], [0, 0, 1, 1], [], []>} : vector<8x16xf32>, vector<16x128xf32>, vector<8x128xf32> -> vector<8x128xf32>
    %23 = arith.maximumf %14, %22 : vector<8x128xf32>
    %c0_8 = arith.constant 0 : index
    %c0_9 = arith.constant 0 : index
    %c0_10 = arith.constant 0 : index
    %c0_11 = arith.constant 0 : index
    %24 = vector.load %arg3[%c0_8, %c0_9, %c0_10, %c0_11] : memref<1x1x8x128xf32, #tpu.memory_space<vmem>>, vector<1x1x8x128xf32>
    %25 = vector.shape_cast %24 : vector<1x1x8x128xf32> to vector<8x128xf32>
    %26 = vector.shape_cast %23 : vector<8x128xf32> to vector<1x1x8x128xf32>
    tpu.vector_store %arg3[%c0_8, %c0_9, %c0_10, %c0_11], %26 {strides = array<i32>} : memref<1x1x8x128xf32, #tpu.memory_space<vmem>>, vector<1x1x8x128xf32>,
    return
  }
  func.func @transform_0(%arg0: i32, %arg1: i32) -> (i32, i32, i32, i32) {
    %c0_i32 = arith.constant 0 : i32
    %c0_i32_0 = arith.constant 0 : i32
    %c0_i32_1 = arith.constant 0 : i32
    return %arg0, %arg1, %c0_i32, %c0_i32_0 : i32, i32, i32, i32
  }
  func.func @transform_1(%arg0: i32, %arg1: i32) -> (i32, i32, i32, i32) {
    %c0_i32 = arith.constant 0 : i32
    %c0_i32_0 = arith.constant 0 : i32
    %c0_i32_1 = arith.constant 0 : i32
    return %arg0, %arg1, %c0_i32, %c0_i32_0 : i32, i32, i32, i32
  }
}

module attributes {stable_mosaic.version = 11 : i64} {
  func.func @matmul_fused_kernel(%arg0: i32, %arg1: i32, %arg2: i32, %arg3: memref<128x128xbf16, #tpu.memory_space<vmem>>, %arg4: memref<128x256xbf16, #tpu.memory_space<vmem>>, %arg5: memref<1x256xf32, #tpu.memory_space<vmem>>, %arg6: memref<1x256xf32, #tpu.memory_space<vmem>>, %arg7: memref<128x256xf32, #tpu.memory_space<vmem>>, %arg8: memref<128x256xf32, #tpu.memory_space<vmem>>) attributes {dimension_semantics = [#tpu.dimension_semantics<parallel>, #tpu.dimension_semantics<parallel>, #tpu.dimension_semantics<arbitrary>], iteration_bounds = array<i64: 1, 1, 9>, scalar_prefetch = 0 : i64, scratch_operands = 1 : i64, tpu.core_type = #tpu.core_type<tc>, window_params = [{transform_indices = @transform_0, window_bounds = array<i64: 128, 128>}, {transform_indices = @transform_1, window_bounds = array<i64: 128, 256>}, {transform_indices = @transform_2, window_bounds = array<i64: 1, 256>}, {transform_indices = @transform_3, window_bounds = array<i64: 1, 256>}, {transform_indices = @transform_4, window_bounds = array<i64: 128, 256>}]} {
    %c0_i32 = arith.constant 0 : i32
    %0 = arith.cmpi eq, %arg2, %c0_i32 : i32
    %1 = arith.extui %0 : i1 to i32
    %c0_i32_0 = arith.constant 0 : i32
    %2 = arith.cmpi ne, %1, %c0_i32_0 : i32
    scf.if %2 {
      %cst_9 = arith.constant 0.000000e+00 : f32
      %12 = vector.broadcast %cst_9 : f32 to vector<128x256xf32>
      %c0_10 = arith.constant 0 : index
      %c0_11 = arith.constant 0 : index
      %13 = vector.load %arg8[%c0_10, %c0_11] : memref<128x256xf32, #tpu.memory_space<vmem>>, vector<128x256xf32>
      tpu.vector_store %arg8[%c0_10, %c0_11], %12 {strides = array<i32>} : memref<128x256xf32, #tpu.memory_space<vmem>>, vector<128x256xf32>,
    } else {
    }
    %c0 = arith.constant 0 : index
    %c0_1 = arith.constant 0 : index
    %3 = vector.load %arg8[%c0, %c0_1] : memref<128x256xf32, #tpu.memory_space<vmem>>, vector<128x256xf32>
    %c0_2 = arith.constant 0 : index
    %c0_3 = arith.constant 0 : index
    %4 = vector.load %arg3[%c0_2, %c0_3] : memref<128x128xbf16, #tpu.memory_space<vmem>>, vector<128x128xbf16>
    %c0_4 = arith.constant 0 : index
    %c0_5 = arith.constant 0 : index
    %5 = vector.load %arg4[%c0_4, %c0_5] : memref<128x256xbf16, #tpu.memory_space<vmem>>, vector<128x256xbf16>
    %cst = arith.constant dense<0.000000e+00> : vector<128x256xf32>
    %6 = tpu.matmul %4, %5, %cst {dimension_numbers = #tpu.dot_dimension_numbers<[1], [0], [0], [1], [0, 0, 1, 1], [], []>} : vector<128x128xbf16>, vector<128x256xbf16>, vector<128x256xf32> -> vector<128x256xf32>
    %7 = arith.addf %3, %6 : vector<128x256xf32>
    %c0_6 = arith.constant 0 : index
    %c0_7 = arith.constant 0 : index
    %8 = vector.load %arg8[%c0_6, %c0_7] : memref<128x256xf32, #tpu.memory_space<vmem>>, vector<128x256xf32>
    tpu.vector_store %arg8[%c0_6, %c0_7], %7 {strides = array<i32>} : memref<128x256xf32, #tpu.memory_space<vmem>>, vector<128x256xf32>,
    %c8_i32 = arith.constant 8 : i32
    %9 = arith.cmpi eq, %arg2, %c8_i32 : i32
    %10 = arith.extui %9 : i1 to i32
    %c0_i32_8 = arith.constant 0 : i32
    %11 = arith.cmpi ne, %10, %c0_i32_8 : i32
    scf.if %11 {
      %c0_9 = arith.constant 0 : index
      %c0_10 = arith.constant 0 : index
      %12 = vector.load %arg8[%c0_9, %c0_10] : memref<128x256xf32, #tpu.memory_space<vmem>>, vector<128x256xf32>
      %c0_11 = arith.constant 0 : index
      %c0_12 = arith.constant 0 : index
      %13 = vector.load %arg5[%c0_11, %c0_12] : memref<1x256xf32, #tpu.memory_space<vmem>>, vector<1x256xf32>
      %14 = vector.broadcast %13 : vector<1x256xf32> to vector<128x256xf32>
      %15 = arith.mulf %12, %14 : vector<128x256xf32>
      %c0_13 = arith.constant 0 : index
      %c0_14 = arith.constant 0 : index
      %16 = vector.load %arg6[%c0_13, %c0_14] : memref<1x256xf32, #tpu.memory_space<vmem>>, vector<1x256xf32>
      %17 = vector.broadcast %16 : vector<1x256xf32> to vector<128x256xf32>
      %18 = arith.addf %15, %17 : vector<128x256xf32>
      %cst_15 = arith.constant 0.000000e+00 : f32
      %19 = vector.broadcast %cst_15 : f32 to vector<128x256xf32>
      %20 = arith.maximumf %18, %19 : vector<128x256xf32>
      %c0_16 = arith.constant 0 : index
      %c0_17 = arith.constant 0 : index
      %21 = vector.load %arg7[%c0_16, %c0_17] : memref<128x256xf32, #tpu.memory_space<vmem>>, vector<128x256xf32>
      tpu.vector_store %arg7[%c0_16, %c0_17], %20 {strides = array<i32>} : memref<128x256xf32, #tpu.memory_space<vmem>>, vector<128x256xf32>,
    } else {
    }
    return
  }
  func.func @transform_0(%arg0: i32, %arg1: i32, %arg2: i32) -> (i32, i32) {
    %c0_i32 = arith.constant 0 : i32
    return %arg0, %arg2 : i32, i32
  }
  func.func @transform_1(%arg0: i32, %arg1: i32, %arg2: i32) -> (i32, i32) {
    %c0_i32 = arith.constant 0 : i32
    return %arg2, %arg1 : i32, i32
  }
  func.func @transform_2(%arg0: i32, %arg1: i32, %arg2: i32) -> (i32, i32) {
    %c0_i32 = arith.constant 0 : i32
    %c0_i32_0 = arith.constant 0 : i32
    return %c0_i32, %arg1 : i32, i32
  }
  func.func @transform_3(%arg0: i32, %arg1: i32, %arg2: i32) -> (i32, i32) {
    %c0_i32 = arith.constant 0 : i32
    %c0_i32_0 = arith.constant 0 : i32
    return %c0_i32, %arg1 : i32, i32
  }
  func.func @transform_4(%arg0: i32, %arg1: i32, %arg2: i32) -> (i32, i32) {
    %c0_i32 = arith.constant 0 : i32
    return %arg0, %arg1 : i32, i32
  }
}

module attributes {stable_mosaic.version = 11 : i64} {
  func.func @matmul_fused_kernel(%arg0: i32, %arg1: i32, %arg2: i32, %arg3: memref<128x256xbf16, #tpu.memory_space<vmem>>, %arg4: memref<256x256xbf16, #tpu.memory_space<vmem>>, %arg5: memref<1x256xf32, #tpu.memory_space<vmem>>, %arg6: memref<128x256xf32, #tpu.memory_space<vmem>>, %arg7: memref<128x256xf32, #tpu.memory_space<vmem>>) attributes {dimension_semantics = [#tpu.dimension_semantics<parallel>, #tpu.dimension_semantics<parallel>, #tpu.dimension_semantics<arbitrary>], iteration_bounds = array<i64: 1, 1, 9>, scalar_prefetch = 0 : i64, scratch_operands = 1 : i64, tpu.core_type = #tpu.core_type<tc>, window_params = [{transform_indices = @transform_0, window_bounds = array<i64: 128, 256>}, {transform_indices = @transform_1, window_bounds = array<i64: 256, 256>}, {transform_indices = @transform_2, window_bounds = array<i64: 1, 256>}, {transform_indices = @transform_3, window_bounds = array<i64: 128, 256>}]} {
    %c0_i32 = arith.constant 0 : i32
    %0 = arith.cmpi eq, %arg2, %c0_i32 : i32
    %1 = arith.extui %0 : i1 to i32
    %c0_i32_0 = arith.constant 0 : i32
    %2 = arith.cmpi ne, %1, %c0_i32_0 : i32
    scf.if %2 {
      %cst_9 = arith.constant 0.000000e+00 : f32
      %12 = vector.broadcast %cst_9 : f32 to vector<128x256xf32>
      %c0_10 = arith.constant 0 : index
      %c0_11 = arith.constant 0 : index
      %13 = vector.load %arg7[%c0_10, %c0_11] : memref<128x256xf32, #tpu.memory_space<vmem>>, vector<128x256xf32>
      tpu.vector_store %arg7[%c0_10, %c0_11], %12 {strides = array<i32>} : memref<128x256xf32, #tpu.memory_space<vmem>>, vector<128x256xf32>,
    } else {
    }
    %c0 = arith.constant 0 : index
    %c0_1 = arith.constant 0 : index
    %3 = vector.load %arg7[%c0, %c0_1] : memref<128x256xf32, #tpu.memory_space<vmem>>, vector<128x256xf32>
    %c0_2 = arith.constant 0 : index
    %c0_3 = arith.constant 0 : index
    %4 = vector.load %arg3[%c0_2, %c0_3] : memref<128x256xbf16, #tpu.memory_space<vmem>>, vector<128x256xbf16>
    %c0_4 = arith.constant 0 : index
    %c0_5 = arith.constant 0 : index
    %5 = vector.load %arg4[%c0_4, %c0_5] : memref<256x256xbf16, #tpu.memory_space<vmem>>, vector<256x256xbf16>
    %cst = arith.constant dense<0.000000e+00> : vector<128x256xf32>
    %6 = tpu.matmul %4, %5, %cst {dimension_numbers = #tpu.dot_dimension_numbers<[1], [0], [0], [1], [0, 0, 1, 1], [], []>} : vector<128x256xbf16>, vector<256x256xbf16>, vector<128x256xf32> -> vector<128x256xf32>
    %7 = arith.addf %3, %6 : vector<128x256xf32>
    %c0_6 = arith.constant 0 : index
    %c0_7 = arith.constant 0 : index
    %8 = vector.load %arg7[%c0_6, %c0_7] : memref<128x256xf32, #tpu.memory_space<vmem>>, vector<128x256xf32>
    tpu.vector_store %arg7[%c0_6, %c0_7], %7 {strides = array<i32>} : memref<128x256xf32, #tpu.memory_space<vmem>>, vector<128x256xf32>,
    %c8_i32 = arith.constant 8 : i32
    %9 = arith.cmpi eq, %arg2, %c8_i32 : i32
    %10 = arith.extui %9 : i1 to i32
    %c0_i32_8 = arith.constant 0 : i32
    %11 = arith.cmpi ne, %10, %c0_i32_8 : i32
    scf.if %11 {
      %c0_9 = arith.constant 0 : index
      %c0_10 = arith.constant 0 : index
      %12 = vector.load %arg7[%c0_9, %c0_10] : memref<128x256xf32, #tpu.memory_space<vmem>>, vector<128x256xf32>
      %c0_11 = arith.constant 0 : index
      %c0_12 = arith.constant 0 : index
      %13 = vector.load %arg5[%c0_11, %c0_12] : memref<1x256xf32, #tpu.memory_space<vmem>>, vector<1x256xf32>
      %14 = vector.broadcast %13 : vector<1x256xf32> to vector<128x256xf32>
      %15 = arith.addf %12, %14 : vector<128x256xf32>
      %cst_13 = arith.constant 0.000000e+00 : f32
      %16 = vector.broadcast %cst_13 : f32 to vector<128x256xf32>
      %17 = arith.maximumf %15, %16 : vector<128x256xf32>
      %c0_14 = arith.constant 0 : index
      %c0_15 = arith.constant 0 : index
      %18 = vector.load %arg6[%c0_14, %c0_15] : memref<128x256xf32, #tpu.memory_space<vmem>>, vector<128x256xf32>
      tpu.vector_store %arg6[%c0_14, %c0_15], %17 {strides = array<i32>} : memref<128x256xf32, #tpu.memory_space<vmem>>, vector<128x256xf32>,
    } else {
    }
    return
  }
  func.func @transform_0(%arg0: i32, %arg1: i32, %arg2: i32) -> (i32, i32) {
    %c0_i32 = arith.constant 0 : i32
    return %arg0, %arg2 : i32, i32
  }
  func.func @transform_1(%arg0: i32, %arg1: i32, %arg2: i32) -> (i32, i32) {
    %c0_i32 = arith.constant 0 : i32
    return %arg2, %arg1 : i32, i32
  }
  func.func @transform_2(%arg0: i32, %arg1: i32, %arg2: i32) -> (i32, i32) {
    %c0_i32 = arith.constant 0 : i32
    %c0_i32_0 = arith.constant 0 : i32
    return %c0_i32, %arg1 : i32, i32
  }
  func.func @transform_3(%arg0: i32, %arg1: i32, %arg2: i32) -> (i32, i32) {
    %c0_i32 = arith.constant 0 : i32
    return %arg0, %arg1 : i32, i32
  }
}

module attributes {stable_mosaic.version = 11 : i64} {
  func.func @maxpool_kernel(%arg0: i32, %arg1: i32, %arg2: memref<1x2x8x256xf32, #tpu.memory_space<vmem>>, %arg3: memref<1x1x8x256xf32, #tpu.memory_space<vmem>>) attributes {dimension_semantics = [#tpu.dimension_semantics<parallel>, #tpu.dimension_semantics<parallel>], iteration_bounds = array<i64: 2, 4>, scalar_prefetch = 0 : i64, scratch_operands = 0 : i64, tpu.core_type = #tpu.core_type<tc>, window_params = [{transform_indices = @transform_0, window_bounds = array<i64: 1, 2, 8, 256>}, {transform_indices = @transform_1, window_bounds = array<i64: 1, 1, 8, 256>}]} {
    %c0 = arith.constant 0 : index
    %c0_0 = arith.constant 0 : index
    %c0_1 = arith.constant 0 : index
    %c0_2 = arith.constant 0 : index
    %0 = vector.load %arg2[%c0, %c0_0, %c0_1, %c0_2] : memref<1x2x8x256xf32, #tpu.memory_space<vmem>>, vector<1x1x8x256xf32>
    %1 = vector.shape_cast %0 : vector<1x1x8x256xf32> to vector<8x256xf32>
    %c0_3 = arith.constant 0 : index
    %c1 = arith.constant 1 : index
    %c0_4 = arith.constant 0 : index
    %c0_5 = arith.constant 0 : index
    %2 = vector.load %arg2[%c0_3, %c1, %c0_4, %c0_5] : memref<1x2x8x256xf32, #tpu.memory_space<vmem>>, vector<1x1x8x256xf32>
    %3 = vector.shape_cast %2 : vector<1x1x8x256xf32> to vector<8x256xf32>
    %4 = arith.maximumf %1, %3 : vector<8x256xf32>
    %c0_6 = arith.constant 0 : index
    %c0_7 = arith.constant 0 : index
    %c0_8 = arith.constant 0 : index
    %c0_9 = arith.constant 0 : index
    %5 = vector.load %arg3[%c0_6, %c0_7, %c0_8, %c0_9] : memref<1x1x8x256xf32, #tpu.memory_space<vmem>>, vector<1x1x8x256xf32>
    %6 = vector.shape_cast %5 : vector<1x1x8x256xf32> to vector<8x256xf32>
    %7 = vector.shape_cast %4 : vector<8x256xf32> to vector<1x1x8x256xf32>
    tpu.vector_store %arg3[%c0_6, %c0_7, %c0_8, %c0_9], %7 {strides = array<i32>} : memref<1x1x8x256xf32, #tpu.memory_space<vmem>>, vector<1x1x8x256xf32>,
    return
  }
  func.func @transform_0(%arg0: i32, %arg1: i32) -> (i32, i32, i32, i32) {
    %c0_i32 = arith.constant 0 : i32
    %c0_i32_0 = arith.constant 0 : i32
    %c0_i32_1 = arith.constant 0 : i32
    return %arg0, %arg1, %c0_i32, %c0_i32_0 : i32, i32, i32, i32
  }
  func.func @transform_1(%arg0: i32, %arg1: i32) -> (i32, i32, i32, i32) {
    %c0_i32 = arith.constant 0 : i32
    %c0_i32_0 = arith.constant 0 : i32
    %c0_i32_1 = arith.constant 0 : i32
    return %arg0, %arg1, %c0_i32, %c0_i32_0 : i32, i32, i32, i32
  }
}

module attributes {stable_mosaic.version = 11 : i64} {
  func.func @matmul_fused_kernel(%arg0: i32, %arg1: i32, %arg2: i32, %arg3: memref<64x256xbf16, #tpu.memory_space<vmem>>, %arg4: memref<256x256xbf16, #tpu.memory_space<vmem>>, %arg5: memref<1x256xf32, #tpu.memory_space<vmem>>, %arg6: memref<1x256xf32, #tpu.memory_space<vmem>>, %arg7: memref<64x256xf32, #tpu.memory_space<vmem>>, %arg8: memref<64x256xf32, #tpu.memory_space<vmem>>) attributes {dimension_semantics = [#tpu.dimension_semantics<parallel>, #tpu.dimension_semantics<parallel>, #tpu.dimension_semantics<arbitrary>], iteration_bounds = array<i64: 1, 2, 9>, scalar_prefetch = 0 : i64, scratch_operands = 1 : i64, tpu.core_type = #tpu.core_type<tc>, window_params = [{transform_indices = @transform_0, window_bounds = array<i64: 64, 256>}, {transform_indices = @transform_1, window_bounds = array<i64: 256, 256>}, {transform_indices = @transform_2, window_bounds = array<i64: 1, 256>}, {transform_indices = @transform_3, window_bounds = array<i64: 1, 256>}, {transform_indices = @transform_4, window_bounds = array<i64: 64, 256>}]} {
    %c0_i32 = arith.constant 0 : i32
    %0 = arith.cmpi eq, %arg2, %c0_i32 : i32
    %1 = arith.extui %0 : i1 to i32
    %c0_i32_0 = arith.constant 0 : i32
    %2 = arith.cmpi ne, %1, %c0_i32_0 : i32
    scf.if %2 {
      %cst_9 = arith.constant 0.000000e+00 : f32
      %12 = vector.broadcast %cst_9 : f32 to vector<64x256xf32>
      %c0_10 = arith.constant 0 : index
      %c0_11 = arith.constant 0 : index
      %13 = vector.load %arg8[%c0_10, %c0_11] : memref<64x256xf32, #tpu.memory_space<vmem>>, vector<64x256xf32>
      tpu.vector_store %arg8[%c0_10, %c0_11], %12 {strides = array<i32>} : memref<64x256xf32, #tpu.memory_space<vmem>>, vector<64x256xf32>,
    } else {
    }
    %c0 = arith.constant 0 : index
    %c0_1 = arith.constant 0 : index
    %3 = vector.load %arg8[%c0, %c0_1] : memref<64x256xf32, #tpu.memory_space<vmem>>, vector<64x256xf32>
    %c0_2 = arith.constant 0 : index
    %c0_3 = arith.constant 0 : index
    %4 = vector.load %arg3[%c0_2, %c0_3] : memref<64x256xbf16, #tpu.memory_space<vmem>>, vector<64x256xbf16>
    %c0_4 = arith.constant 0 : index
    %c0_5 = arith.constant 0 : index
    %5 = vector.load %arg4[%c0_4, %c0_5] : memref<256x256xbf16, #tpu.memory_space<vmem>>, vector<256x256xbf16>
    %cst = arith.constant dense<0.000000e+00> : vector<64x256xf32>
    %6 = tpu.matmul %4, %5, %cst {dimension_numbers = #tpu.dot_dimension_numbers<[1], [0], [0], [1], [0, 0, 1, 1], [], []>} : vector<64x256xbf16>, vector<256x256xbf16>, vector<64x256xf32> -> vector<64x256xf32>
    %7 = arith.addf %3, %6 : vector<64x256xf32>
    %c0_6 = arith.constant 0 : index
    %c0_7 = arith.constant 0 : index
    %8 = vector.load %arg8[%c0_6, %c0_7] : memref<64x256xf32, #tpu.memory_space<vmem>>, vector<64x256xf32>
    tpu.vector_store %arg8[%c0_6, %c0_7], %7 {strides = array<i32>} : memref<64x256xf32, #tpu.memory_space<vmem>>, vector<64x256xf32>,
    %c8_i32 = arith.constant 8 : i32
    %9 = arith.cmpi eq, %arg2, %c8_i32 : i32
    %10 = arith.extui %9 : i1 to i32
    %c0_i32_8 = arith.constant 0 : i32
    %11 = arith.cmpi ne, %10, %c0_i32_8 : i32
    scf.if %11 {
      %c0_9 = arith.constant 0 : index
      %c0_10 = arith.constant 0 : index
      %12 = vector.load %arg8[%c0_9, %c0_10] : memref<64x256xf32, #tpu.memory_space<vmem>>, vector<64x256xf32>
      %c0_11 = arith.constant 0 : index
      %c0_12 = arith.constant 0 : index
      %13 = vector.load %arg5[%c0_11, %c0_12] : memref<1x256xf32, #tpu.memory_space<vmem>>, vector<1x256xf32>
      %14 = vector.broadcast %13 : vector<1x256xf32> to vector<64x256xf32>
      %15 = arith.mulf %12, %14 : vector<64x256xf32>
      %c0_13 = arith.constant 0 : index
      %c0_14 = arith.constant 0 : index
      %16 = vector.load %arg6[%c0_13, %c0_14] : memref<1x256xf32, #tpu.memory_space<vmem>>, vector<1x256xf32>
      %17 = vector.broadcast %16 : vector<1x256xf32> to vector<64x256xf32>
      %18 = arith.addf %15, %17 : vector<64x256xf32>
      %cst_15 = arith.constant 0.000000e+00 : f32
      %19 = vector.broadcast %cst_15 : f32 to vector<64x256xf32>
      %20 = arith.maximumf %18, %19 : vector<64x256xf32>
      %c0_16 = arith.constant 0 : index
      %c0_17 = arith.constant 0 : index
      %21 = vector.load %arg7[%c0_16, %c0_17] : memref<64x256xf32, #tpu.memory_space<vmem>>, vector<64x256xf32>
      tpu.vector_store %arg7[%c0_16, %c0_17], %20 {strides = array<i32>} : memref<64x256xf32, #tpu.memory_space<vmem>>, vector<64x256xf32>,
    } else {
    }
    return
  }
  func.func @transform_0(%arg0: i32, %arg1: i32, %arg2: i32) -> (i32, i32) {
    %c0_i32 = arith.constant 0 : i32
    return %arg0, %arg2 : i32, i32
  }
  func.func @transform_1(%arg0: i32, %arg1: i32, %arg2: i32) -> (i32, i32) {
    %c0_i32 = arith.constant 0 : i32
    return %arg2, %arg1 : i32, i32
  }
  func.func @transform_2(%arg0: i32, %arg1: i32, %arg2: i32) -> (i32, i32) {
    %c0_i32 = arith.constant 0 : i32
    %c0_i32_0 = arith.constant 0 : i32
    return %c0_i32, %arg1 : i32, i32
  }
  func.func @transform_3(%arg0: i32, %arg1: i32, %arg2: i32) -> (i32, i32) {
    %c0_i32 = arith.constant 0 : i32
    %c0_i32_0 = arith.constant 0 : i32
    return %c0_i32, %arg1 : i32, i32
  }
  func.func @transform_4(%arg0: i32, %arg1: i32, %arg2: i32) -> (i32, i32) {
    %c0_i32 = arith.constant 0 : i32
    return %arg0, %arg1 : i32, i32
  }
}

module attributes {stable_mosaic.version = 11 : i64} {
  func.func @matmul_fused_kernel(%arg0: i32, %arg1: i32, %arg2: i32, %arg3: memref<64x512xbf16, #tpu.memory_space<vmem>>, %arg4: memref<512x256xbf16, #tpu.memory_space<vmem>>, %arg5: memref<1x256xf32, #tpu.memory_space<vmem>>, %arg6: memref<64x256xf32, #tpu.memory_space<vmem>>, %arg7: memref<64x256xf32, #tpu.memory_space<vmem>>) attributes {dimension_semantics = [#tpu.dimension_semantics<parallel>, #tpu.dimension_semantics<parallel>, #tpu.dimension_semantics<arbitrary>], iteration_bounds = array<i64: 1, 2, 9>, scalar_prefetch = 0 : i64, scratch_operands = 1 : i64, tpu.core_type = #tpu.core_type<tc>, window_params = [{transform_indices = @transform_0, window_bounds = array<i64: 64, 512>}, {transform_indices = @transform_1, window_bounds = array<i64: 512, 256>}, {transform_indices = @transform_2, window_bounds = array<i64: 1, 256>}, {transform_indices = @transform_3, window_bounds = array<i64: 64, 256>}]} {
    %c0_i32 = arith.constant 0 : i32
    %0 = arith.cmpi eq, %arg2, %c0_i32 : i32
    %1 = arith.extui %0 : i1 to i32
    %c0_i32_0 = arith.constant 0 : i32
    %2 = arith.cmpi ne, %1, %c0_i32_0 : i32
    scf.if %2 {
      %cst_9 = arith.constant 0.000000e+00 : f32
      %12 = vector.broadcast %cst_9 : f32 to vector<64x256xf32>
      %c0_10 = arith.constant 0 : index
      %c0_11 = arith.constant 0 : index
      %13 = vector.load %arg7[%c0_10, %c0_11] : memref<64x256xf32, #tpu.memory_space<vmem>>, vector<64x256xf32>
      tpu.vector_store %arg7[%c0_10, %c0_11], %12 {strides = array<i32>} : memref<64x256xf32, #tpu.memory_space<vmem>>, vector<64x256xf32>,
    } else {
    }
    %c0 = arith.constant 0 : index
    %c0_1 = arith.constant 0 : index
    %3 = vector.load %arg7[%c0, %c0_1] : memref<64x256xf32, #tpu.memory_space<vmem>>, vector<64x256xf32>
    %c0_2 = arith.constant 0 : index
    %c0_3 = arith.constant 0 : index
    %4 = vector.load %arg3[%c0_2, %c0_3] : memref<64x512xbf16, #tpu.memory_space<vmem>>, vector<64x512xbf16>
    %c0_4 = arith.constant 0 : index
    %c0_5 = arith.constant 0 : index
    %5 = vector.load %arg4[%c0_4, %c0_5] : memref<512x256xbf16, #tpu.memory_space<vmem>>, vector<512x256xbf16>
    %cst = arith.constant dense<0.000000e+00> : vector<64x256xf32>
    %6 = tpu.matmul %4, %5, %cst {dimension_numbers = #tpu.dot_dimension_numbers<[1], [0], [0], [1], [0, 0, 1, 1], [], []>} : vector<64x512xbf16>, vector<512x256xbf16>, vector<64x256xf32> -> vector<64x256xf32>
    %7 = arith.addf %3, %6 : vector<64x256xf32>
    %c0_6 = arith.constant 0 : index
    %c0_7 = arith.constant 0 : index
    %8 = vector.load %arg7[%c0_6, %c0_7] : memref<64x256xf32, #tpu.memory_space<vmem>>, vector<64x256xf32>
    tpu.vector_store %arg7[%c0_6, %c0_7], %7 {strides = array<i32>} : memref<64x256xf32, #tpu.memory_space<vmem>>, vector<64x256xf32>,
    %c8_i32 = arith.constant 8 : i32
    %9 = arith.cmpi eq, %arg2, %c8_i32 : i32
    %10 = arith.extui %9 : i1 to i32
    %c0_i32_8 = arith.constant 0 : i32
    %11 = arith.cmpi ne, %10, %c0_i32_8 : i32
    scf.if %11 {
      %c0_9 = arith.constant 0 : index
      %c0_10 = arith.constant 0 : index
      %12 = vector.load %arg7[%c0_9, %c0_10] : memref<64x256xf32, #tpu.memory_space<vmem>>, vector<64x256xf32>
      %c0_11 = arith.constant 0 : index
      %c0_12 = arith.constant 0 : index
      %13 = vector.load %arg5[%c0_11, %c0_12] : memref<1x256xf32, #tpu.memory_space<vmem>>, vector<1x256xf32>
      %14 = vector.broadcast %13 : vector<1x256xf32> to vector<64x256xf32>
      %15 = arith.addf %12, %14 : vector<64x256xf32>
      %cst_13 = arith.constant 0.000000e+00 : f32
      %16 = vector.broadcast %cst_13 : f32 to vector<64x256xf32>
      %17 = arith.maximumf %15, %16 : vector<64x256xf32>
      %c0_14 = arith.constant 0 : index
      %c0_15 = arith.constant 0 : index
      %18 = vector.load %arg6[%c0_14, %c0_15] : memref<64x256xf32, #tpu.memory_space<vmem>>, vector<64x256xf32>
      tpu.vector_store %arg6[%c0_14, %c0_15], %17 {strides = array<i32>} : memref<64x256xf32, #tpu.memory_space<vmem>>, vector<64x256xf32>,
    } else {
    }
    return
  }
  func.func @transform_0(%arg0: i32, %arg1: i32, %arg2: i32) -> (i32, i32) {
    %c0_i32 = arith.constant 0 : i32
    return %arg0, %arg2 : i32, i32
  }
  func.func @transform_1(%arg0: i32, %arg1: i32, %arg2: i32) -> (i32, i32) {
    %c0_i32 = arith.constant 0 : i32
    return %arg2, %arg1 : i32, i32
  }
  func.func @transform_2(%arg0: i32, %arg1: i32, %arg2: i32) -> (i32, i32) {
    %c0_i32 = arith.constant 0 : i32
    %c0_i32_0 = arith.constant 0 : i32
    return %c0_i32, %arg1 : i32, i32
  }
  func.func @transform_3(%arg0: i32, %arg1: i32, %arg2: i32) -> (i32, i32) {
    %c0_i32 = arith.constant 0 : i32
    return %arg0, %arg1 : i32, i32
  }
}

module attributes {stable_mosaic.version = 11 : i64} {
  func.func @maxpool_kernel(%arg0: i32, %arg1: i32, %arg2: memref<1x2x8x512xf32, #tpu.memory_space<vmem>>, %arg3: memref<1x1x8x512xf32, #tpu.memory_space<vmem>>) attributes {dimension_semantics = [#tpu.dimension_semantics<parallel>, #tpu.dimension_semantics<parallel>], iteration_bounds = array<i64: 2, 2>, scalar_prefetch = 0 : i64, scratch_operands = 0 : i64, tpu.core_type = #tpu.core_type<tc>, window_params = [{transform_indices = @transform_0, window_bounds = array<i64: 1, 2, 8, 512>}, {transform_indices = @transform_1, window_bounds = array<i64: 1, 1, 8, 512>}]} {
    %c0 = arith.constant 0 : index
    %c0_0 = arith.constant 0 : index
    %c0_1 = arith.constant 0 : index
    %c0_2 = arith.constant 0 : index
    %0 = vector.load %arg2[%c0, %c0_0, %c0_1, %c0_2] : memref<1x2x8x512xf32, #tpu.memory_space<vmem>>, vector<1x1x8x512xf32>
    %1 = vector.shape_cast %0 : vector<1x1x8x512xf32> to vector<8x512xf32>
    %c0_3 = arith.constant 0 : index
    %c1 = arith.constant 1 : index
    %c0_4 = arith.constant 0 : index
    %c0_5 = arith.constant 0 : index
    %2 = vector.load %arg2[%c0_3, %c1, %c0_4, %c0_5] : memref<1x2x8x512xf32, #tpu.memory_space<vmem>>, vector<1x1x8x512xf32>
    %3 = vector.shape_cast %2 : vector<1x1x8x512xf32> to vector<8x512xf32>
    %4 = arith.maximumf %1, %3 : vector<8x512xf32>
    %c0_6 = arith.constant 0 : index
    %c0_7 = arith.constant 0 : index
    %c0_8 = arith.constant 0 : index
    %c0_9 = arith.constant 0 : index
    %5 = vector.load %arg3[%c0_6, %c0_7, %c0_8, %c0_9] : memref<1x1x8x512xf32, #tpu.memory_space<vmem>>, vector<1x1x8x512xf32>
    %6 = vector.shape_cast %5 : vector<1x1x8x512xf32> to vector<8x512xf32>
    %7 = vector.shape_cast %4 : vector<8x512xf32> to vector<1x1x8x512xf32>
    tpu.vector_store %arg3[%c0_6, %c0_7, %c0_8, %c0_9], %7 {strides = array<i32>} : memref<1x1x8x512xf32, #tpu.memory_space<vmem>>, vector<1x1x8x512xf32>,
    return
  }
  func.func @transform_0(%arg0: i32, %arg1: i32) -> (i32, i32, i32, i32) {
    %c0_i32 = arith.constant 0 : i32
    %c0_i32_0 = arith.constant 0 : i32
    %c0_i32_1 = arith.constant 0 : i32
    return %arg0, %arg1, %c0_i32, %c0_i32_0 : i32, i32, i32, i32
  }
  func.func @transform_1(%arg0: i32, %arg1: i32) -> (i32, i32, i32, i32) {
    %c0_i32 = arith.constant 0 : i32
    %c0_i32_0 = arith.constant 0 : i32
    %c0_i32_1 = arith.constant 0 : i32
    return %arg0, %arg1, %c0_i32, %c0_i32_0 : i32, i32, i32, i32
  }
}

module attributes {stable_mosaic.version = 11 : i64} {
  func.func @matmul_fused_kernel(%arg0: i32, %arg1: i32, %arg2: i32, %arg3: memref<16x512xbf16, #tpu.memory_space<vmem>>, %arg4: memref<512x256xbf16, #tpu.memory_space<vmem>>, %arg5: memref<1x256xf32, #tpu.memory_space<vmem>>, %arg6: memref<1x256xf32, #tpu.memory_space<vmem>>, %arg7: memref<16x256xf32, #tpu.memory_space<vmem>>, %arg8: memref<16x256xf32, #tpu.memory_space<vmem>>) attributes {dimension_semantics = [#tpu.dimension_semantics<parallel>, #tpu.dimension_semantics<parallel>, #tpu.dimension_semantics<arbitrary>], iteration_bounds = array<i64: 1, 2, 4>, scalar_prefetch = 0 : i64, scratch_operands = 1 : i64, tpu.core_type = #tpu.core_type<tc>, window_params = [{transform_indices = @transform_0, window_bounds = array<i64: 16, 512>}, {transform_indices = @transform_1, window_bounds = array<i64: 512, 256>}, {transform_indices = @transform_2, window_bounds = array<i64: 1, 256>}, {transform_indices = @transform_3, window_bounds = array<i64: 1, 256>}, {transform_indices = @transform_4, window_bounds = array<i64: 16, 256>}]} {
    %c0_i32 = arith.constant 0 : i32
    %0 = arith.cmpi eq, %arg2, %c0_i32 : i32
    %1 = arith.extui %0 : i1 to i32
    %c0_i32_0 = arith.constant 0 : i32
    %2 = arith.cmpi ne, %1, %c0_i32_0 : i32
    scf.if %2 {
      %cst_9 = arith.constant 0.000000e+00 : f32
      %12 = vector.broadcast %cst_9 : f32 to vector<16x256xf32>
      %c0_10 = arith.constant 0 : index
      %c0_11 = arith.constant 0 : index
      %13 = vector.load %arg8[%c0_10, %c0_11] : memref<16x256xf32, #tpu.memory_space<vmem>>, vector<16x256xf32>
      tpu.vector_store %arg8[%c0_10, %c0_11], %12 {strides = array<i32>} : memref<16x256xf32, #tpu.memory_space<vmem>>, vector<16x256xf32>,
    } else {
    }
    %c0 = arith.constant 0 : index
    %c0_1 = arith.constant 0 : index
    %3 = vector.load %arg8[%c0, %c0_1] : memref<16x256xf32, #tpu.memory_space<vmem>>, vector<16x256xf32>
    %c0_2 = arith.constant 0 : index
    %c0_3 = arith.constant 0 : index
    %4 = vector.load %arg3[%c0_2, %c0_3] : memref<16x512xbf16, #tpu.memory_space<vmem>>, vector<16x512xbf16>
    %c0_4 = arith.constant 0 : index
    %c0_5 = arith.constant 0 : index
    %5 = vector.load %arg4[%c0_4, %c0_5] : memref<512x256xbf16, #tpu.memory_space<vmem>>, vector<512x256xbf16>
    %cst = arith.constant dense<0.000000e+00> : vector<16x256xf32>
    %6 = tpu.matmul %4, %5, %cst {dimension_numbers = #tpu.dot_dimension_numbers<[1], [0], [0], [1], [0, 0, 1, 1], [], []>} : vector<16x512xbf16>, vector<512x256xbf16>, vector<16x256xf32> -> vector<16x256xf32>
    %7 = arith.addf %3, %6 : vector<16x256xf32>
    %c0_6 = arith.constant 0 : index
    %c0_7 = arith.constant 0 : index
    %8 = vector.load %arg8[%c0_6, %c0_7] : memref<16x256xf32, #tpu.memory_space<vmem>>, vector<16x256xf32>
    tpu.vector_store %arg8[%c0_6, %c0_7], %7 {strides = array<i32>} : memref<16x256xf32, #tpu.memory_space<vmem>>, vector<16x256xf32>,
    %c3_i32 = arith.constant 3 : i32
    %9 = arith.cmpi eq, %arg2, %c3_i32 : i32
    %10 = arith.extui %9 : i1 to i32
    %c0_i32_8 = arith.constant 0 : i32
    %11 = arith.cmpi ne, %10, %c0_i32_8 : i32
    scf.if %11 {
      %c0_9 = arith.constant 0 : index
      %c0_10 = arith.constant 0 : index
      %12 = vector.load %arg8[%c0_9, %c0_10] : memref<16x256xf32, #tpu.memory_space<vmem>>, vector<16x256xf32>
      %c0_11 = arith.constant 0 : index
      %c0_12 = arith.constant 0 : index
      %13 = vector.load %arg5[%c0_11, %c0_12] : memref<1x256xf32, #tpu.memory_space<vmem>>, vector<1x256xf32>
      %14 = vector.broadcast %13 : vector<1x256xf32> to vector<16x256xf32>
      %15 = arith.mulf %12, %14 : vector<16x256xf32>
      %c0_13 = arith.constant 0 : index
      %c0_14 = arith.constant 0 : index
      %16 = vector.load %arg6[%c0_13, %c0_14] : memref<1x256xf32, #tpu.memory_space<vmem>>, vector<1x256xf32>
      %17 = vector.broadcast %16 : vector<1x256xf32> to vector<16x256xf32>
      %18 = arith.addf %15, %17 : vector<16x256xf32>
      %cst_15 = arith.constant 0.000000e+00 : f32
      %19 = vector.broadcast %cst_15 : f32 to vector<16x256xf32>
      %20 = arith.maximumf %18, %19 : vector<16x256xf32>
      %c0_16 = arith.constant 0 : index
      %c0_17 = arith.constant 0 : index
      %21 = vector.load %arg7[%c0_16, %c0_17] : memref<16x256xf32, #tpu.memory_space<vmem>>, vector<16x256xf32>
      tpu.vector_store %arg7[%c0_16, %c0_17], %20 {strides = array<i32>} : memref<16x256xf32, #tpu.memory_space<vmem>>, vector<16x256xf32>,
    } else {
    }
    return
  }
  func.func @transform_0(%arg0: i32, %arg1: i32, %arg2: i32) -> (i32, i32) {
    %c0_i32 = arith.constant 0 : i32
    return %arg0, %arg2 : i32, i32
  }
  func.func @transform_1(%arg0: i32, %arg1: i32, %arg2: i32) -> (i32, i32) {
    %c0_i32 = arith.constant 0 : i32
    return %arg2, %arg1 : i32, i32
  }
  func.func @transform_2(%arg0: i32, %arg1: i32, %arg2: i32) -> (i32, i32) {
    %c0_i32 = arith.constant 0 : i32
    %c0_i32_0 = arith.constant 0 : i32
    return %c0_i32, %arg1 : i32, i32
  }
  func.func @transform_3(%arg0: i32, %arg1: i32, %arg2: i32) -> (i32, i32) {
    %c0_i32 = arith.constant 0 : i32
    %c0_i32_0 = arith.constant 0 : i32
    return %c0_i32, %arg1 : i32, i32
  }
  func.func @transform_4(%arg0: i32, %arg1: i32, %arg2: i32) -> (i32, i32) {
    %c0_i32 = arith.constant 0 : i32
    return %arg0, %arg1 : i32, i32
  }
}

module attributes {stable_mosaic.version = 11 : i64} {
  func.func @matmul_fused_kernel(%arg0: i32, %arg1: i32, %arg2: i32, %arg3: memref<16x512xbf16, #tpu.memory_space<vmem>>, %arg4: memref<512x256xbf16, #tpu.memory_space<vmem>>, %arg5: memref<1x256xf32, #tpu.memory_space<vmem>>, %arg6: memref<16x256xf32, #tpu.memory_space<vmem>>, %arg7: memref<16x256xf32, #tpu.memory_space<vmem>>) attributes {dimension_semantics = [#tpu.dimension_semantics<parallel>, #tpu.dimension_semantics<parallel>, #tpu.dimension_semantics<arbitrary>], iteration_bounds = array<i64: 1, 1, 1>, scalar_prefetch = 0 : i64, scratch_operands = 1 : i64, tpu.core_type = #tpu.core_type<tc>, window_params = [{transform_indices = @transform_0, window_bounds = array<i64: 16, 512>}, {transform_indices = @transform_1, window_bounds = array<i64: 512, 256>}, {transform_indices = @transform_2, window_bounds = array<i64: 1, 256>}, {transform_indices = @transform_3, window_bounds = array<i64: 16, 256>}]} {
    %c0_i32 = arith.constant 0 : i32
    %0 = arith.cmpi eq, %arg2, %c0_i32 : i32
    %1 = arith.extui %0 : i1 to i32
    %c0_i32_0 = arith.constant 0 : i32
    %2 = arith.cmpi ne, %1, %c0_i32_0 : i32
    scf.if %2 {
      %cst_10 = arith.constant 0.000000e+00 : f32
      %12 = vector.broadcast %cst_10 : f32 to vector<16x256xf32>
      %c0_11 = arith.constant 0 : index
      %c0_12 = arith.constant 0 : index
      %13 = vector.load %arg7[%c0_11, %c0_12] : memref<16x256xf32, #tpu.memory_space<vmem>>, vector<16x256xf32>
      tpu.vector_store %arg7[%c0_11, %c0_12], %12 {strides = array<i32>} : memref<16x256xf32, #tpu.memory_space<vmem>>, vector<16x256xf32>,
    } else {
    }
    %c0 = arith.constant 0 : index
    %c0_1 = arith.constant 0 : index
    %3 = vector.load %arg7[%c0, %c0_1] : memref<16x256xf32, #tpu.memory_space<vmem>>, vector<16x256xf32>
    %c0_2 = arith.constant 0 : index
    %c0_3 = arith.constant 0 : index
    %4 = vector.load %arg3[%c0_2, %c0_3] : memref<16x512xbf16, #tpu.memory_space<vmem>>, vector<16x512xbf16>
    %c0_4 = arith.constant 0 : index
    %c0_5 = arith.constant 0 : index
    %5 = vector.load %arg4[%c0_4, %c0_5] : memref<512x256xbf16, #tpu.memory_space<vmem>>, vector<512x256xbf16>
    %cst = arith.constant dense<0.000000e+00> : vector<16x256xf32>
    %6 = tpu.matmul %4, %5, %cst {dimension_numbers = #tpu.dot_dimension_numbers<[1], [0], [0], [1], [0, 0, 1, 1], [], []>} : vector<16x512xbf16>, vector<512x256xbf16>, vector<16x256xf32> -> vector<16x256xf32>
    %7 = arith.addf %3, %6 : vector<16x256xf32>
    %c0_6 = arith.constant 0 : index
    %c0_7 = arith.constant 0 : index
    %8 = vector.load %arg7[%c0_6, %c0_7] : memref<16x256xf32, #tpu.memory_space<vmem>>, vector<16x256xf32>
    tpu.vector_store %arg7[%c0_6, %c0_7], %7 {strides = array<i32>} : memref<16x256xf32, #tpu.memory_space<vmem>>, vector<16x256xf32>,
    %c0_i32_8 = arith.constant 0 : i32
    %9 = arith.cmpi eq, %arg2, %c0_i32_8 : i32
    %10 = arith.extui %9 : i1 to i32
    %c0_i32_9 = arith.constant 0 : i32
    %11 = arith.cmpi ne, %10, %c0_i32_9 : i32
    scf.if %11 {
      %c0_10 = arith.constant 0 : index
      %c0_11 = arith.constant 0 : index
      %12 = vector.load %arg7[%c0_10, %c0_11] : memref<16x256xf32, #tpu.memory_space<vmem>>, vector<16x256xf32>
      %c0_12 = arith.constant 0 : index
      %c0_13 = arith.constant 0 : index
      %13 = vector.load %arg5[%c0_12, %c0_13] : memref<1x256xf32, #tpu.memory_space<vmem>>, vector<1x256xf32>
      %14 = vector.broadcast %13 : vector<1x256xf32> to vector<16x256xf32>
      %15 = arith.addf %12, %14 : vector<16x256xf32>
      %c0_14 = arith.constant 0 : index
      %c0_15 = arith.constant 0 : index
      %16 = vector.load %arg6[%c0_14, %c0_15] : memref<16x256xf32, #tpu.memory_space<vmem>>, vector<16x256xf32>
      tpu.vector_store %arg6[%c0_14, %c0_15], %15 {strides = array<i32>} : memref<16x256xf32, #tpu.memory_space<vmem>>, vector<16x256xf32>,
    } else {
    }
    return
  }
  func.func @transform_0(%arg0: i32, %arg1: i32, %arg2: i32) -> (i32, i32) {
    %c0_i32 = arith.constant 0 : i32
    return %arg0, %arg2 : i32, i32
  }
  func.func @transform_1(%arg0: i32, %arg1: i32, %arg2: i32) -> (i32, i32) {
    %c0_i32 = arith.constant 0 : i32
    return %arg2, %arg1 : i32, i32
  }
  func.func @transform_2(%arg0: i32, %arg1: i32, %arg2: i32) -> (i32, i32) {
    %c0_i32 = arith.constant 0 : i32
    %c0_i32_0 = arith.constant 0 : i32
    return %c0_i32, %arg1 : i32, i32
  }
  func.func @transform_3(%arg0: i32, %arg1: i32, %arg2: i32) -> (i32, i32) {
    %c0_i32 = arith.constant 0 : i32
    return %arg0, %arg1 : i32, i32
  }
}

module attributes {stable_mosaic.version = 11 : i64} {
  func.func @bilstm_kernel(%arg0: memref<7x2x256xf32, #tpu.memory_space<vmem>>, %arg1: memref<32x128xf32, #tpu.memory_space<vmem>>, %arg2: memref<32x128xf32, #tpu.memory_space<vmem>>, %arg3: memref<7x2x32xf32, #tpu.memory_space<vmem>>, %arg4: memref<7x2x32xf32, #tpu.memory_space<vmem>>) attributes {dimension_semantics = [], scalar_prefetch = 0 : i64, scratch_operands = 0 : i64, tpu.core_type = #tpu.core_type<tc>} {
    %c0 = arith.constant 0 : index
    %c0_0 = arith.constant 0 : index
    %0 = vector.load %arg1[%c0, %c0_0] : memref<32x128xf32, #tpu.memory_space<vmem>>, vector<32x128xf32>
    %c0_1 = arith.constant 0 : index
    %c0_2 = arith.constant 0 : index
    %1 = vector.load %arg2[%c0_1, %c0_2] : memref<32x128xf32, #tpu.memory_space<vmem>>, vector<32x128xf32>
    %cst = arith.constant 0.000000e+00 : f32
    %2 = vector.broadcast %cst : f32 to vector<2x32xf32>
    %cst_3 = arith.constant 0.000000e+00 : f32
    %3 = vector.broadcast %cst_3 : f32 to vector<2x32xf32>
    %cst_4 = arith.constant 0.000000e+00 : f32
    %4 = vector.broadcast %cst_4 : f32 to vector<2x32xf32>
    %cst_5 = arith.constant 0.000000e+00 : f32
    %5 = vector.broadcast %cst_5 : f32 to vector<2x32xf32>
    %c0_6 = arith.constant 0 : index
    %c0_7 = arith.constant 0 : index
    %c0_8 = arith.constant 0 : index
    %6 = vector.load %arg0[%c0_6, %c0_7, %c0_8] : memref<7x2x256xf32, #tpu.memory_space<vmem>>, vector<1x2x256xf32>
    %7 = vector.shape_cast %6 : vector<1x2x256xf32> to vector<2x256xf32>
    %8 = vector.extract_strided_slice %7 {offsets = [0, 0], sizes = [2, 128], strides = [1, 1]} : vector<2x256xf32> to vector<2x128xf32>
    %cst_9 = arith.constant dense<0.000000e+00> : vector<2x128xf32>
    %9 = tpu.matmul %2, %0, %cst_9 {dimension_numbers = #tpu.dot_dimension_numbers<[1], [0], [0], [1], [0, 0, 1, 1], [], []>} : vector<2x32xf32>, vector<32x128xf32>, vector<2x128xf32> -> vector<2x128xf32>
    %10 = arith.addf %8, %9 : vector<2x128xf32>
    %c6 = arith.constant 6 : index
    %c0_10 = arith.constant 0 : index
    %c0_11 = arith.constant 0 : index
    %11 = vector.load %arg0[%c6, %c0_10, %c0_11] : memref<7x2x256xf32, #tpu.memory_space<vmem>>, vector<1x2x256xf32>
    %12 = vector.shape_cast %11 : vector<1x2x256xf32> to vector<2x256xf32>
    %13 = vector.extract_strided_slice %12 {offsets = [0, 128], sizes = [2, 128], strides = [1, 1]} : vector<2x256xf32> to vector<2x128xf32>
    %cst_12 = arith.constant dense<0.000000e+00> : vector<2x128xf32>
    %14 = tpu.matmul %4, %1, %cst_12 {dimension_numbers = #tpu.dot_dimension_numbers<[1], [0], [0], [1], [0, 0, 1, 1], [], []>} : vector<2x32xf32>, vector<32x128xf32>, vector<2x128xf32> -> vector<2x128xf32>
    %15 = arith.addf %13, %14 : vector<2x128xf32>
    %16 = vector.extract_strided_slice %10 {offsets = [0, 0], sizes = [2, 32], strides = [1, 1]} : vector<2x128xf32> to vector<2x32xf32>
    %17 = arith.negf %16 : vector<2x32xf32>
    %18 = math.exp %17 : vector<2x32xf32>
    %cst_13 = arith.constant 1.000000e+00 : f32
    %19 = vector.broadcast %cst_13 : f32 to vector<2x32xf32>
    %20 = arith.addf %19, %18 : vector<2x32xf32>
    %21 = arith.divf %19, %20 : vector<2x32xf32>
    %22 = vector.extract_strided_slice %10 {offsets = [0, 32], sizes = [2, 32], strides = [1, 1]} : vector<2x128xf32> to vector<2x32xf32>
    %23 = arith.negf %22 : vector<2x32xf32>
    %24 = math.exp %23 : vector<2x32xf32>
    %cst_14 = arith.constant 1.000000e+00 : f32
    %25 = vector.broadcast %cst_14 : f32 to vector<2x32xf32>
    %26 = arith.addf %25, %24 : vector<2x32xf32>
    %27 = arith.divf %25, %26 : vector<2x32xf32>
    %28 = vector.extract_strided_slice %10 {offsets = [0, 64], sizes = [2, 32], strides = [1, 1]} : vector<2x128xf32> to vector<2x32xf32>
    %29 = math.tanh %28 : vector<2x32xf32>
    %30 = vector.extract_strided_slice %10 {offsets = [0, 96], sizes = [2, 32], strides = [1, 1]} : vector<2x128xf32> to vector<2x32xf32>
    %31 = arith.negf %30 : vector<2x32xf32>
    %32 = math.exp %31 : vector<2x32xf32>
    %cst_15 = arith.constant 1.000000e+00 : f32
    %33 = vector.broadcast %cst_15 : f32 to vector<2x32xf32>
    %34 = arith.addf %33, %32 : vector<2x32xf32>
    %35 = arith.divf %33, %34 : vector<2x32xf32>
    %36 = arith.mulf %27, %3 : vector<2x32xf32>
    %37 = arith.mulf %21, %29 : vector<2x32xf32>
    %38 = arith.addf %36, %37 : vector<2x32xf32>
    %39 = math.tanh %38 : vector<2x32xf32>
    %40 = arith.mulf %35, %39 : vector<2x32xf32>
    %41 = vector.extract_strided_slice %15 {offsets = [0, 0], sizes = [2, 32], strides = [1, 1]} : vector<2x128xf32> to vector<2x32xf32>
    %42 = arith.negf %41 : vector<2x32xf32>
    %43 = math.exp %42 : vector<2x32xf32>
    %cst_16 = arith.constant 1.000000e+00 : f32
    %44 = vector.broadcast %cst_16 : f32 to vector<2x32xf32>
    %45 = arith.addf %44, %43 : vector<2x32xf32>
    %46 = arith.divf %44, %45 : vector<2x32xf32>
    %47 = vector.extract_strided_slice %15 {offsets = [0, 32], sizes = [2, 32], strides = [1, 1]} : vector<2x128xf32> to vector<2x32xf32>
    %48 = arith.negf %47 : vector<2x32xf32>
    %49 = math.exp %48 : vector<2x32xf32>
    %cst_17 = arith.constant 1.000000e+00 : f32
    %50 = vector.broadcast %cst_17 : f32 to vector<2x32xf32>
    %51 = arith.addf %50, %49 : vector<2x32xf32>
    %52 = arith.divf %50, %51 : vector<2x32xf32>
    %53 = vector.extract_strided_slice %15 {offsets = [0, 64], sizes = [2, 32], strides = [1, 1]} : vector<2x128xf32> to vector<2x32xf32>
    %54 = math.tanh %53 : vector<2x32xf32>
    %55 = vector.extract_strided_slice %15 {offsets = [0, 96], sizes = [2, 32], strides = [1, 1]} : vector<2x128xf32> to vector<2x32xf32>
    %56 = arith.negf %55 : vector<2x32xf32>
    %57 = math.exp %56 : vector<2x32xf32>
    %cst_18 = arith.constant 1.000000e+00 : f32
    %58 = vector.broadcast %cst_18 : f32 to vector<2x32xf32>
    %59 = arith.addf %58, %57 : vector<2x32xf32>
    %60 = arith.divf %58, %59 : vector<2x32xf32>
    %61 = arith.mulf %52, %5 : vector<2x32xf32>
    %62 = arith.mulf %46, %54 : vector<2x32xf32>
    %63 = arith.addf %61, %62 : vector<2x32xf32>
    %64 = math.tanh %63 : vector<2x32xf32>
    %65 = arith.mulf %60, %64 : vector<2x32xf32>
    %c0_19 = arith.constant 0 : index
    %c0_20 = arith.constant 0 : index
    %c0_21 = arith.constant 0 : index
    %66 = vector.load %arg3[%c0_19, %c0_20, %c0_21] : memref<7x2x32xf32, #tpu.memory_space<vmem>>, vector<1x2x32xf32>
    %67 = vector.shape_cast %66 : vector<1x2x32xf32> to vector<2x32xf32>
    %68 = vector.shape_cast %40 : vector<2x32xf32> to vector<1x2x32xf32>
    tpu.vector_store %arg3[%c0_19, %c0_20, %c0_21], %68 {strides = array<i32>} : memref<7x2x32xf32, #tpu.memory_space<vmem>>, vector<1x2x32xf32>,
    %c6_22 = arith.constant 6 : index
    %c0_23 = arith.constant 0 : index
    %c0_24 = arith.constant 0 : index
    %69 = vector.load %arg4[%c6_22, %c0_23, %c0_24] : memref<7x2x32xf32, #tpu.memory_space<vmem>>, vector<1x2x32xf32>
    %70 = vector.shape_cast %69 : vector<1x2x32xf32> to vector<2x32xf32>
    %71 = vector.shape_cast %65 : vector<2x32xf32> to vector<1x2x32xf32>
    tpu.vector_store %arg4[%c6_22, %c0_23, %c0_24], %71 {strides = array<i32>} : memref<7x2x32xf32, #tpu.memory_space<vmem>>, vector<1x2x32xf32>,
    %c1 = arith.constant 1 : index
    %c0_25 = arith.constant 0 : index
    %c0_26 = arith.constant 0 : index
    %72 = vector.load %arg0[%c1, %c0_25, %c0_26] : memref<7x2x256xf32, #tpu.memory_space<vmem>>, vector<1x2x256xf32>
    %73 = vector.shape_cast %72 : vector<1x2x256xf32> to vector<2x256xf32>
    %74 = vector.extract_strided_slice %73 {offsets = [0, 0], sizes = [2, 128], strides = [1, 1]} : vector<2x256xf32> to vector<2x128xf32>
    %cst_27 = arith.constant dense<0.000000e+00> : vector<2x128xf32>
    %75 = tpu.matmul %40, %0, %cst_27 {dimension_numbers = #tpu.dot_dimension_numbers<[1], [0], [0], [1], [0, 0, 1, 1], [], []>} : vector<2x32xf32>, vector<32x128xf32>, vector<2x128xf32> -> vector<2x128xf32>
    %76 = arith.addf %74, %75 : vector<2x128xf32>
    %c5 = arith.constant 5 : index
    %c0_28 = arith.constant 0 : index
    %c0_29 = arith.constant 0 : index
    %77 = vector.load %arg0[%c5, %c0_28, %c0_29] : memref<7x2x256xf32, #tpu.memory_space<vmem>>, vector<1x2x256xf32>
    %78 = vector.shape_cast %77 : vector<1x2x256xf32> to vector<2x256xf32>
    %79 = vector.extract_strided_slice %78 {offsets = [0, 128], sizes = [2, 128], strides = [1, 1]} : vector<2x256xf32> to vector<2x128xf32>
    %cst_30 = arith.constant dense<0.000000e+00> : vector<2x128xf32>
    %80 = tpu.matmul %65, %1, %cst_30 {dimension_numbers = #tpu.dot_dimension_numbers<[1], [0], [0], [1], [0, 0, 1, 1], [], []>} : vector<2x32xf32>, vector<32x128xf32>, vector<2x128xf32> -> vector<2x128xf32>
    %81 = arith.addf %79, %80 : vector<2x128xf32>
    %82 = vector.extract_strided_slice %76 {offsets = [0, 0], sizes = [2, 32], strides = [1, 1]} : vector<2x128xf32> to vector<2x32xf32>
    %83 = arith.negf %82 : vector<2x32xf32>
    %84 = math.exp %83 : vector<2x32xf32>
    %cst_31 = arith.constant 1.000000e+00 : f32
    %85 = vector.broadcast %cst_31 : f32 to vector<2x32xf32>
    %86 = arith.addf %85, %84 : vector<2x32xf32>
    %87 = arith.divf %85, %86 : vector<2x32xf32>
    %88 = vector.extract_strided_slice %76 {offsets = [0, 32], sizes = [2, 32], strides = [1, 1]} : vector<2x128xf32> to vector<2x32xf32>
    %89 = arith.negf %88 : vector<2x32xf32>
    %90 = math.exp %89 : vector<2x32xf32>
    %cst_32 = arith.constant 1.000000e+00 : f32
    %91 = vector.broadcast %cst_32 : f32 to vector<2x32xf32>
    %92 = arith.addf %91, %90 : vector<2x32xf32>
    %93 = arith.divf %91, %92 : vector<2x32xf32>
    %94 = vector.extract_strided_slice %76 {offsets = [0, 64], sizes = [2, 32], strides = [1, 1]} : vector<2x128xf32> to vector<2x32xf32>
    %95 = math.tanh %94 : vector<2x32xf32>
    %96 = vector.extract_strided_slice %76 {offsets = [0, 96], sizes = [2, 32], strides = [1, 1]} : vector<2x128xf32> to vector<2x32xf32>
    %97 = arith.negf %96 : vector<2x32xf32>
    %98 = math.exp %97 : vector<2x32xf32>
    %cst_33 = arith.constant 1.000000e+00 : f32
    %99 = vector.broadcast %cst_33 : f32 to vector<2x32xf32>
    %100 = arith.addf %99, %98 : vector<2x32xf32>
    %101 = arith.divf %99, %100 : vector<2x32xf32>
    %102 = arith.mulf %93, %38 : vector<2x32xf32>
    %103 = arith.mulf %87, %95 : vector<2x32xf32>
    %104 = arith.addf %102, %103 : vector<2x32xf32>
    %105 = math.tanh %104 : vector<2x32xf32>
    %106 = arith.mulf %101, %105 : vector<2x32xf32>
    %107 = vector.extract_strided_slice %81 {offsets = [0, 0], sizes = [2, 32], strides = [1, 1]} : vector<2x128xf32> to vector<2x32xf32>
    %108 = arith.negf %107 : vector<2x32xf32>
    %109 = math.exp %108 : vector<2x32xf32>
    %cst_34 = arith.constant 1.000000e+00 : f32
    %110 = vector.broadcast %cst_34 : f32 to vector<2x32xf32>
    %111 = arith.addf %110, %109 : vector<2x32xf32>
    %112 = arith.divf %110, %111 : vector<2x32xf32>
    %113 = vector.extract_strided_slice %81 {offsets = [0, 32], sizes = [2, 32], strides = [1, 1]} : vector<2x128xf32> to vector<2x32xf32>
    %114 = arith.negf %113 : vector<2x32xf32>
    %115 = math.exp %114 : vector<2x32xf32>
    %cst_35 = arith.constant 1.000000e+00 : f32
    %116 = vector.broadcast %cst_35 : f32 to vector<2x32xf32>
    %117 = arith.addf %116, %115 : vector<2x32xf32>
    %118 = arith.divf %116, %117 : vector<2x32xf32>
    %119 = vector.extract_strided_slice %81 {offsets = [0, 64], sizes = [2, 32], strides = [1, 1]} : vector<2x128xf32> to vector<2x32xf32>
    %120 = math.tanh %119 : vector<2x32xf32>
    %121 = vector.extract_strided_slice %81 {offsets = [0, 96], sizes = [2, 32], strides = [1, 1]} : vector<2x128xf32> to vector<2x32xf32>
    %122 = arith.negf %121 : vector<2x32xf32>
    %123 = math.exp %122 : vector<2x32xf32>
    %cst_36 = arith.constant 1.000000e+00 : f32
    %124 = vector.broadcast %cst_36 : f32 to vector<2x32xf32>
    %125 = arith.addf %124, %123 : vector<2x32xf32>
    %126 = arith.divf %124, %125 : vector<2x32xf32>
    %127 = arith.mulf %118, %63 : vector<2x32xf32>
    %128 = arith.mulf %112, %120 : vector<2x32xf32>
    %129 = arith.addf %127, %128 : vector<2x32xf32>
    %130 = math.tanh %129 : vector<2x32xf32>
    %131 = arith.mulf %126, %130 : vector<2x32xf32>
    %c1_37 = arith.constant 1 : index
    %c0_38 = arith.constant 0 : index
    %c0_39 = arith.constant 0 : index
    %132 = vector.load %arg3[%c1_37, %c0_38, %c0_39] : memref<7x2x32xf32, #tpu.memory_space<vmem>>, vector<1x2x32xf32>
    %133 = vector.shape_cast %132 : vector<1x2x32xf32> to vector<2x32xf32>
    %134 = vector.shape_cast %106 : vector<2x32xf32> to vector<1x2x32xf32>
    tpu.vector_store %arg3[%c1_37, %c0_38, %c0_39], %134 {strides = array<i32>} : memref<7x2x32xf32, #tpu.memory_space<vmem>>, vector<1x2x32xf32>,
    %c5_40 = arith.constant 5 : index
    %c0_41 = arith.constant 0 : index
    %c0_42 = arith.constant 0 : index
    %135 = vector.load %arg4[%c5_40, %c0_41, %c0_42] : memref<7x2x32xf32, #tpu.memory_space<vmem>>, vector<1x2x32xf32>
    %136 = vector.shape_cast %135 : vector<1x2x32xf32> to vector<2x32xf32>
    %137 = vector.shape_cast %131 : vector<2x32xf32> to vector<1x2x32xf32>
    tpu.vector_store %arg4[%c5_40, %c0_41, %c0_42], %137 {strides = array<i32>} : memref<7x2x32xf32, #tpu.memory_space<vmem>>, vector<1x2x32xf32>,
    %c2 = arith.constant 2 : index
    %c0_43 = arith.constant 0 : index
    %c0_44 = arith.constant 0 : index
    %138 = vector.load %arg0[%c2, %c0_43, %c0_44] : memref<7x2x256xf32, #tpu.memory_space<vmem>>, vector<1x2x256xf32>
    %139 = vector.shape_cast %138 : vector<1x2x256xf32> to vector<2x256xf32>
    %140 = vector.extract_strided_slice %139 {offsets = [0, 0], sizes = [2, 128], strides = [1, 1]} : vector<2x256xf32> to vector<2x128xf32>
    %cst_45 = arith.constant dense<0.000000e+00> : vector<2x128xf32>
    %141 = tpu.matmul %106, %0, %cst_45 {dimension_numbers = #tpu.dot_dimension_numbers<[1], [0], [0], [1], [0, 0, 1, 1], [], []>} : vector<2x32xf32>, vector<32x128xf32>, vector<2x128xf32> -> vector<2x128xf32>
    %142 = arith.addf %140, %141 : vector<2x128xf32>
    %c4 = arith.constant 4 : index
    %c0_46 = arith.constant 0 : index
    %c0_47 = arith.constant 0 : index
    %143 = vector.load %arg0[%c4, %c0_46, %c0_47] : memref<7x2x256xf32, #tpu.memory_space<vmem>>, vector<1x2x256xf32>
    %144 = vector.shape_cast %143 : vector<1x2x256xf32> to vector<2x256xf32>
    %145 = vector.extract_strided_slice %144 {offsets = [0, 128], sizes = [2, 128], strides = [1, 1]} : vector<2x256xf32> to vector<2x128xf32>
    %cst_48 = arith.constant dense<0.000000e+00> : vector<2x128xf32>
    %146 = tpu.matmul %131, %1, %cst_48 {dimension_numbers = #tpu.dot_dimension_numbers<[1], [0], [0], [1], [0, 0, 1, 1], [], []>} : vector<2x32xf32>, vector<32x128xf32>, vector<2x128xf32> -> vector<2x128xf32>
    %147 = arith.addf %145, %146 : vector<2x128xf32>
    %148 = vector.extract_strided_slice %142 {offsets = [0, 0], sizes = [2, 32], strides = [1, 1]} : vector<2x128xf32> to vector<2x32xf32>
    %149 = arith.negf %148 : vector<2x32xf32>
    %150 = math.exp %149 : vector<2x32xf32>
    %cst_49 = arith.constant 1.000000e+00 : f32
    %151 = vector.broadcast %cst_49 : f32 to vector<2x32xf32>
    %152 = arith.addf %151, %150 : vector<2x32xf32>
    %153 = arith.divf %151, %152 : vector<2x32xf32>
    %154 = vector.extract_strided_slice %142 {offsets = [0, 32], sizes = [2, 32], strides = [1, 1]} : vector<2x128xf32> to vector<2x32xf32>
    %155 = arith.negf %154 : vector<2x32xf32>
    %156 = math.exp %155 : vector<2x32xf32>
    %cst_50 = arith.constant 1.000000e+00 : f32
    %157 = vector.broadcast %cst_50 : f32 to vector<2x32xf32>
    %158 = arith.addf %157, %156 : vector<2x32xf32>
    %159 = arith.divf %157, %158 : vector<2x32xf32>
    %160 = vector.extract_strided_slice %142 {offsets = [0, 64], sizes = [2, 32], strides = [1, 1]} : vector<2x128xf32> to vector<2x32xf32>
    %161 = math.tanh %160 : vector<2x32xf32>
    %162 = vector.extract_strided_slice %142 {offsets = [0, 96], sizes = [2, 32], strides = [1, 1]} : vector<2x128xf32> to vector<2x32xf32>
    %163 = arith.negf %162 : vector<2x32xf32>
    %164 = math.exp %163 : vector<2x32xf32>
    %cst_51 = arith.constant 1.000000e+00 : f32
    %165 = vector.broadcast %cst_51 : f32 to vector<2x32xf32>
    %166 = arith.addf %165, %164 : vector<2x32xf32>
    %167 = arith.divf %165, %166 : vector<2x32xf32>
    %168 = arith.mulf %159, %104 : vector<2x32xf32>
    %169 = arith.mulf %153, %161 : vector<2x32xf32>
    %170 = arith.addf %168, %169 : vector<2x32xf32>
    %171 = math.tanh %170 : vector<2x32xf32>
    %172 = arith.mulf %167, %171 : vector<2x32xf32>
    %173 = vector.extract_strided_slice %147 {offsets = [0, 0], sizes = [2, 32], strides = [1, 1]} : vector<2x128xf32> to vector<2x32xf32>
    %174 = arith.negf %173 : vector<2x32xf32>
    %175 = math.exp %174 : vector<2x32xf32>
    %cst_52 = arith.constant 1.000000e+00 : f32
    %176 = vector.broadcast %cst_52 : f32 to vector<2x32xf32>
    %177 = arith.addf %176, %175 : vector<2x32xf32>
    %178 = arith.divf %176, %177 : vector<2x32xf32>
    %179 = vector.extract_strided_slice %147 {offsets = [0, 32], sizes = [2, 32], strides = [1, 1]} : vector<2x128xf32> to vector<2x32xf32>
    %180 = arith.negf %179 : vector<2x32xf32>
    %181 = math.exp %180 : vector<2x32xf32>
    %cst_53 = arith.constant 1.000000e+00 : f32
    %182 = vector.broadcast %cst_53 : f32 to vector<2x32xf32>
    %183 = arith.addf %182, %181 : vector<2x32xf32>
    %184 = arith.divf %182, %183 : vector<2x32xf32>
    %185 = vector.extract_strided_slice %147 {offsets = [0, 64], sizes = [2, 32], strides = [1, 1]} : vector<2x128xf32> to vector<2x32xf32>
    %186 = math.tanh %185 : vector<2x32xf32>
    %187 = vector.extract_strided_slice %147 {offsets = [0, 96], sizes = [2, 32], strides = [1, 1]} : vector<2x128xf32> to vector<2x32xf32>
    %188 = arith.negf %187 : vector<2x32xf32>
    %189 = math.exp %188 : vector<2x32xf32>
    %cst_54 = arith.constant 1.000000e+00 : f32
    %190 = vector.broadcast %cst_54 : f32 to vector<2x32xf32>
    %191 = arith.addf %190, %189 : vector<2x32xf32>
    %192 = arith.divf %190, %191 : vector<2x32xf32>
    %193 = arith.mulf %184, %129 : vector<2x32xf32>
    %194 = arith.mulf %178, %186 : vector<2x32xf32>
    %195 = arith.addf %193, %194 : vector<2x32xf32>
    %196 = math.tanh %195 : vector<2x32xf32>
    %197 = arith.mulf %192, %196 : vector<2x32xf32>
    %c2_55 = arith.constant 2 : index
    %c0_56 = arith.constant 0 : index
    %c0_57 = arith.constant 0 : index
    %198 = vector.load %arg3[%c2_55, %c0_56, %c0_57] : memref<7x2x32xf32, #tpu.memory_space<vmem>>, vector<1x2x32xf32>
    %199 = vector.shape_cast %198 : vector<1x2x32xf32> to vector<2x32xf32>
    %200 = vector.shape_cast %172 : vector<2x32xf32> to vector<1x2x32xf32>
    tpu.vector_store %arg3[%c2_55, %c0_56, %c0_57], %200 {strides = array<i32>} : memref<7x2x32xf32, #tpu.memory_space<vmem>>, vector<1x2x32xf32>,
    %c4_58 = arith.constant 4 : index
    %c0_59 = arith.constant 0 : index
    %c0_60 = arith.constant 0 : index
    %201 = vector.load %arg4[%c4_58, %c0_59, %c0_60] : memref<7x2x32xf32, #tpu.memory_space<vmem>>, vector<1x2x32xf32>
    %202 = vector.shape_cast %201 : vector<1x2x32xf32> to vector<2x32xf32>
    %203 = vector.shape_cast %197 : vector<2x32xf32> to vector<1x2x32xf32>
    tpu.vector_store %arg4[%c4_58, %c0_59, %c0_60], %203 {strides = array<i32>} : memref<7x2x32xf32, #tpu.memory_space<vmem>>, vector<1x2x32xf32>,
    %c3 = arith.constant 3 : index
    %c0_61 = arith.constant 0 : index
    %c0_62 = arith.constant 0 : index
    %204 = vector.load %arg0[%c3, %c0_61, %c0_62] : memref<7x2x256xf32, #tpu.memory_space<vmem>>, vector<1x2x256xf32>
    %205 = vector.shape_cast %204 : vector<1x2x256xf32> to vector<2x256xf32>
    %206 = vector.extract_strided_slice %205 {offsets = [0, 0], sizes = [2, 128], strides = [1, 1]} : vector<2x256xf32> to vector<2x128xf32>
    %cst_63 = arith.constant dense<0.000000e+00> : vector<2x128xf32>
    %207 = tpu.matmul %172, %0, %cst_63 {dimension_numbers = #tpu.dot_dimension_numbers<[1], [0], [0], [1], [0, 0, 1, 1], [], []>} : vector<2x32xf32>, vector<32x128xf32>, vector<2x128xf32> -> vector<2x128xf32>
    %208 = arith.addf %206, %207 : vector<2x128xf32>
    %c3_64 = arith.constant 3 : index
    %c0_65 = arith.constant 0 : index
    %c0_66 = arith.constant 0 : index
    %209 = vector.load %arg0[%c3_64, %c0_65, %c0_66] : memref<7x2x256xf32, #tpu.memory_space<vmem>>, vector<1x2x256xf32>
    %210 = vector.shape_cast %209 : vector<1x2x256xf32> to vector<2x256xf32>
    %211 = vector.extract_strided_slice %210 {offsets = [0, 128], sizes = [2, 128], strides = [1, 1]} : vector<2x256xf32> to vector<2x128xf32>
    %cst_67 = arith.constant dense<0.000000e+00> : vector<2x128xf32>
    %212 = tpu.matmul %197, %1, %cst_67 {dimension_numbers = #tpu.dot_dimension_numbers<[1], [0], [0], [1], [0, 0, 1, 1], [], []>} : vector<2x32xf32>, vector<32x128xf32>, vector<2x128xf32> -> vector<2x128xf32>
    %213 = arith.addf %211, %212 : vector<2x128xf32>
    %214 = vector.extract_strided_slice %208 {offsets = [0, 0], sizes = [2, 32], strides = [1, 1]} : vector<2x128xf32> to vector<2x32xf32>
    %215 = arith.negf %214 : vector<2x32xf32>
    %216 = math.exp %215 : vector<2x32xf32>
    %cst_68 = arith.constant 1.000000e+00 : f32
    %217 = vector.broadcast %cst_68 : f32 to vector<2x32xf32>
    %218 = arith.addf %217, %216 : vector<2x32xf32>
    %219 = arith.divf %217, %218 : vector<2x32xf32>
    %220 = vector.extract_strided_slice %208 {offsets = [0, 32], sizes = [2, 32], strides = [1, 1]} : vector<2x128xf32> to vector<2x32xf32>
    %221 = arith.negf %220 : vector<2x32xf32>
    %222 = math.exp %221 : vector<2x32xf32>
    %cst_69 = arith.constant 1.000000e+00 : f32
    %223 = vector.broadcast %cst_69 : f32 to vector<2x32xf32>
    %224 = arith.addf %223, %222 : vector<2x32xf32>
    %225 = arith.divf %223, %224 : vector<2x32xf32>
    %226 = vector.extract_strided_slice %208 {offsets = [0, 64], sizes = [2, 32], strides = [1, 1]} : vector<2x128xf32> to vector<2x32xf32>
    %227 = math.tanh %226 : vector<2x32xf32>
    %228 = vector.extract_strided_slice %208 {offsets = [0, 96], sizes = [2, 32], strides = [1, 1]} : vector<2x128xf32> to vector<2x32xf32>
    %229 = arith.negf %228 : vector<2x32xf32>
    %230 = math.exp %229 : vector<2x32xf32>
    %cst_70 = arith.constant 1.000000e+00 : f32
    %231 = vector.broadcast %cst_70 : f32 to vector<2x32xf32>
    %232 = arith.addf %231, %230 : vector<2x32xf32>
    %233 = arith.divf %231, %232 : vector<2x32xf32>
    %234 = arith.mulf %225, %170 : vector<2x32xf32>
    %235 = arith.mulf %219, %227 : vector<2x32xf32>
    %236 = arith.addf %234, %235 : vector<2x32xf32>
    %237 = math.tanh %236 : vector<2x32xf32>
    %238 = arith.mulf %233, %237 : vector<2x32xf32>
    %239 = vector.extract_strided_slice %213 {offsets = [0, 0], sizes = [2, 32], strides = [1, 1]} : vector<2x128xf32> to vector<2x32xf32>
    %240 = arith.negf %239 : vector<2x32xf32>
    %241 = math.exp %240 : vector<2x32xf32>
    %cst_71 = arith.constant 1.000000e+00 : f32
    %242 = vector.broadcast %cst_71 : f32 to vector<2x32xf32>
    %243 = arith.addf %242, %241 : vector<2x32xf32>
    %244 = arith.divf %242, %243 : vector<2x32xf32>
    %245 = vector.extract_strided_slice %213 {offsets = [0, 32], sizes = [2, 32], strides = [1, 1]} : vector<2x128xf32> to vector<2x32xf32>
    %246 = arith.negf %245 : vector<2x32xf32>
    %247 = math.exp %246 : vector<2x32xf32>
    %cst_72 = arith.constant 1.000000e+00 : f32
    %248 = vector.broadcast %cst_72 : f32 to vector<2x32xf32>
    %249 = arith.addf %248, %247 : vector<2x32xf32>
    %250 = arith.divf %248, %249 : vector<2x32xf32>
    %251 = vector.extract_strided_slice %213 {offsets = [0, 64], sizes = [2, 32], strides = [1, 1]} : vector<2x128xf32> to vector<2x32xf32>
    %252 = math.tanh %251 : vector<2x32xf32>
    %253 = vector.extract_strided_slice %213 {offsets = [0, 96], sizes = [2, 32], strides = [1, 1]} : vector<2x128xf32> to vector<2x32xf32>
    %254 = arith.negf %253 : vector<2x32xf32>
    %255 = math.exp %254 : vector<2x32xf32>
    %cst_73 = arith.constant 1.000000e+00 : f32
    %256 = vector.broadcast %cst_73 : f32 to vector<2x32xf32>
    %257 = arith.addf %256, %255 : vector<2x32xf32>
    %258 = arith.divf %256, %257 : vector<2x32xf32>
    %259 = arith.mulf %250, %195 : vector<2x32xf32>
    %260 = arith.mulf %244, %252 : vector<2x32xf32>
    %261 = arith.addf %259, %260 : vector<2x32xf32>
    %262 = math.tanh %261 : vector<2x32xf32>
    %263 = arith.mulf %258, %262 : vector<2x32xf32>
    %c3_74 = arith.constant 3 : index
    %c0_75 = arith.constant 0 : index
    %c0_76 = arith.constant 0 : index
    %264 = vector.load %arg3[%c3_74, %c0_75, %c0_76] : memref<7x2x32xf32, #tpu.memory_space<vmem>>, vector<1x2x32xf32>
    %265 = vector.shape_cast %264 : vector<1x2x32xf32> to vector<2x32xf32>
    %266 = vector.shape_cast %238 : vector<2x32xf32> to vector<1x2x32xf32>
    tpu.vector_store %arg3[%c3_74, %c0_75, %c0_76], %266 {strides = array<i32>} : memref<7x2x32xf32, #tpu.memory_space<vmem>>, vector<1x2x32xf32>,
    %c3_77 = arith.constant 3 : index
    %c0_78 = arith.constant 0 : index
    %c0_79 = arith.constant 0 : index
    %267 = vector.load %arg4[%c3_77, %c0_78, %c0_79] : memref<7x2x32xf32, #tpu.memory_space<vmem>>, vector<1x2x32xf32>
    %268 = vector.shape_cast %267 : vector<1x2x32xf32> to vector<2x32xf32>
    %269 = vector.shape_cast %263 : vector<2x32xf32> to vector<1x2x32xf32>
    tpu.vector_store %arg4[%c3_77, %c0_78, %c0_79], %269 {strides = array<i32>} : memref<7x2x32xf32, #tpu.memory_space<vmem>>, vector<1x2x32xf32>,
    %c4_80 = arith.constant 4 : index
    %c0_81 = arith.constant 0 : index
    %c0_82 = arith.constant 0 : index
    %270 = vector.load %arg0[%c4_80, %c0_81, %c0_82] : memref<7x2x256xf32, #tpu.memory_space<vmem>>, vector<1x2x256xf32>
    %271 = vector.shape_cast %270 : vector<1x2x256xf32> to vector<2x256xf32>
    %272 = vector.extract_strided_slice %271 {offsets = [0, 0], sizes = [2, 128], strides = [1, 1]} : vector<2x256xf32> to vector<2x128xf32>
    %cst_83 = arith.constant dense<0.000000e+00> : vector<2x128xf32>
    %273 = tpu.matmul %238, %0, %cst_83 {dimension_numbers = #tpu.dot_dimension_numbers<[1], [0], [0], [1], [0, 0, 1, 1], [], []>} : vector<2x32xf32>, vector<32x128xf32>, vector<2x128xf32> -> vector<2x128xf32>
    %274 = arith.addf %272, %273 : vector<2x128xf32>
    %c2_84 = arith.constant 2 : index
    %c0_85 = arith.constant 0 : index
    %c0_86 = arith.constant 0 : index
    %275 = vector.load %arg0[%c2_84, %c0_85, %c0_86] : memref<7x2x256xf32, #tpu.memory_space<vmem>>, vector<1x2x256xf32>
    %276 = vector.shape_cast %275 : vector<1x2x256xf32> to vector<2x256xf32>
    %277 = vector.extract_strided_slice %276 {offsets = [0, 128], sizes = [2, 128], strides = [1, 1]} : vector<2x256xf32> to vector<2x128xf32>
    %cst_87 = arith.constant dense<0.000000e+00> : vector<2x128xf32>
    %278 = tpu.matmul %263, %1, %cst_87 {dimension_numbers = #tpu.dot_dimension_numbers<[1], [0], [0], [1], [0, 0, 1, 1], [], []>} : vector<2x32xf32>, vector<32x128xf32>, vector<2x128xf32> -> vector<2x128xf32>
    %279 = arith.addf %277, %278 : vector<2x128xf32>
    %280 = vector.extract_strided_slice %274 {offsets = [0, 0], sizes = [2, 32], strides = [1, 1]} : vector<2x128xf32> to vector<2x32xf32>
    %281 = arith.negf %280 : vector<2x32xf32>
    %282 = math.exp %281 : vector<2x32xf32>
    %cst_88 = arith.constant 1.000000e+00 : f32
    %283 = vector.broadcast %cst_88 : f32 to vector<2x32xf32>
    %284 = arith.addf %283, %282 : vector<2x32xf32>
    %285 = arith.divf %283, %284 : vector<2x32xf32>
    %286 = vector.extract_strided_slice %274 {offsets = [0, 32], sizes = [2, 32], strides = [1, 1]} : vector<2x128xf32> to vector<2x32xf32>
    %287 = arith.negf %286 : vector<2x32xf32>
    %288 = math.exp %287 : vector<2x32xf32>
    %cst_89 = arith.constant 1.000000e+00 : f32
    %289 = vector.broadcast %cst_89 : f32 to vector<2x32xf32>
    %290 = arith.addf %289, %288 : vector<2x32xf32>
    %291 = arith.divf %289, %290 : vector<2x32xf32>
    %292 = vector.extract_strided_slice %274 {offsets = [0, 64], sizes = [2, 32], strides = [1, 1]} : vector<2x128xf32> to vector<2x32xf32>
    %293 = math.tanh %292 : vector<2x32xf32>
    %294 = vector.extract_strided_slice %274 {offsets = [0, 96], sizes = [2, 32], strides = [1, 1]} : vector<2x128xf32> to vector<2x32xf32>
    %295 = arith.negf %294 : vector<2x32xf32>
    %296 = math.exp %295 : vector<2x32xf32>
    %cst_90 = arith.constant 1.000000e+00 : f32
    %297 = vector.broadcast %cst_90 : f32 to vector<2x32xf32>
    %298 = arith.addf %297, %296 : vector<2x32xf32>
    %299 = arith.divf %297, %298 : vector<2x32xf32>
    %300 = arith.mulf %291, %236 : vector<2x32xf32>
    %301 = arith.mulf %285, %293 : vector<2x32xf32>
    %302 = arith.addf %300, %301 : vector<2x32xf32>
    %303 = math.tanh %302 : vector<2x32xf32>
    %304 = arith.mulf %299, %303 : vector<2x32xf32>
    %305 = vector.extract_strided_slice %279 {offsets = [0, 0], sizes = [2, 32], strides = [1, 1]} : vector<2x128xf32> to vector<2x32xf32>
    %306 = arith.negf %305 : vector<2x32xf32>
    %307 = math.exp %306 : vector<2x32xf32>
    %cst_91 = arith.constant 1.000000e+00 : f32
    %308 = vector.broadcast %cst_91 : f32 to vector<2x32xf32>
    %309 = arith.addf %308, %307 : vector<2x32xf32>
    %310 = arith.divf %308, %309 : vector<2x32xf32>
    %311 = vector.extract_strided_slice %279 {offsets = [0, 32], sizes = [2, 32], strides = [1, 1]} : vector<2x128xf32> to vector<2x32xf32>
    %312 = arith.negf %311 : vector<2x32xf32>
    %313 = math.exp %312 : vector<2x32xf32>
    %cst_92 = arith.constant 1.000000e+00 : f32
    %314 = vector.broadcast %cst_92 : f32 to vector<2x32xf32>
    %315 = arith.addf %314, %313 : vector<2x32xf32>
    %316 = arith.divf %314, %315 : vector<2x32xf32>
    %317 = vector.extract_strided_slice %279 {offsets = [0, 64], sizes = [2, 32], strides = [1, 1]} : vector<2x128xf32> to vector<2x32xf32>
    %318 = math.tanh %317 : vector<2x32xf32>
    %319 = vector.extract_strided_slice %279 {offsets = [0, 96], sizes = [2, 32], strides = [1, 1]} : vector<2x128xf32> to vector<2x32xf32>
    %320 = arith.negf %319 : vector<2x32xf32>
    %321 = math.exp %320 : vector<2x32xf32>
    %cst_93 = arith.constant 1.000000e+00 : f32
    %322 = vector.broadcast %cst_93 : f32 to vector<2x32xf32>
    %323 = arith.addf %322, %321 : vector<2x32xf32>
    %324 = arith.divf %322, %323 : vector<2x32xf32>
    %325 = arith.mulf %316, %261 : vector<2x32xf32>
    %326 = arith.mulf %310, %318 : vector<2x32xf32>
    %327 = arith.addf %325, %326 : vector<2x32xf32>
    %328 = math.tanh %327 : vector<2x32xf32>
    %329 = arith.mulf %324, %328 : vector<2x32xf32>
    %c4_94 = arith.constant 4 : index
    %c0_95 = arith.constant 0 : index
    %c0_96 = arith.constant 0 : index
    %330 = vector.load %arg3[%c4_94, %c0_95, %c0_96] : memref<7x2x32xf32, #tpu.memory_space<vmem>>, vector<1x2x32xf32>
    %331 = vector.shape_cast %330 : vector<1x2x32xf32> to vector<2x32xf32>
    %332 = vector.shape_cast %304 : vector<2x32xf32> to vector<1x2x32xf32>
    tpu.vector_store %arg3[%c4_94, %c0_95, %c0_96], %332 {strides = array<i32>} : memref<7x2x32xf32, #tpu.memory_space<vmem>>, vector<1x2x32xf32>,
    %c2_97 = arith.constant 2 : index
    %c0_98 = arith.constant 0 : index
    %c0_99 = arith.constant 0 : index
    %333 = vector.load %arg4[%c2_97, %c0_98, %c0_99] : memref<7x2x32xf32, #tpu.memory_space<vmem>>, vector<1x2x32xf32>
    %334 = vector.shape_cast %333 : vector<1x2x32xf32> to vector<2x32xf32>
    %335 = vector.shape_cast %329 : vector<2x32xf32> to vector<1x2x32xf32>
    tpu.vector_store %arg4[%c2_97, %c0_98, %c0_99], %335 {strides = array<i32>} : memref<7x2x32xf32, #tpu.memory_space<vmem>>, vector<1x2x32xf32>,
    %c5_100 = arith.constant 5 : index
    %c0_101 = arith.constant 0 : index
    %c0_102 = arith.constant 0 : index
    %336 = vector.load %arg0[%c5_100, %c0_101, %c0_102] : memref<7x2x256xf32, #tpu.memory_space<vmem>>, vector<1x2x256xf32>
    %337 = vector.shape_cast %336 : vector<1x2x256xf32> to vector<2x256xf32>
    %338 = vector.extract_strided_slice %337 {offsets = [0, 0], sizes = [2, 128], strides = [1, 1]} : vector<2x256xf32> to vector<2x128xf32>
    %cst_103 = arith.constant dense<0.000000e+00> : vector<2x128xf32>
    %339 = tpu.matmul %304, %0, %cst_103 {dimension_numbers = #tpu.dot_dimension_numbers<[1], [0], [0], [1], [0, 0, 1, 1], [], []>} : vector<2x32xf32>, vector<32x128xf32>, vector<2x128xf32> -> vector<2x128xf32>
    %340 = arith.addf %338, %339 : vector<2x128xf32>
    %c1_104 = arith.constant 1 : index
    %c0_105 = arith.constant 0 : index
    %c0_106 = arith.constant 0 : index
    %341 = vector.load %arg0[%c1_104, %c0_105, %c0_106] : memref<7x2x256xf32, #tpu.memory_space<vmem>>, vector<1x2x256xf32>
    %342 = vector.shape_cast %341 : vector<1x2x256xf32> to vector<2x256xf32>
    %343 = vector.extract_strided_slice %342 {offsets = [0, 128], sizes = [2, 128], strides = [1, 1]} : vector<2x256xf32> to vector<2x128xf32>
    %cst_107 = arith.constant dense<0.000000e+00> : vector<2x128xf32>
    %344 = tpu.matmul %329, %1, %cst_107 {dimension_numbers = #tpu.dot_dimension_numbers<[1], [0], [0], [1], [0, 0, 1, 1], [], []>} : vector<2x32xf32>, vector<32x128xf32>, vector<2x128xf32> -> vector<2x128xf32>
    %345 = arith.addf %343, %344 : vector<2x128xf32>
    %346 = vector.extract_strided_slice %340 {offsets = [0, 0], sizes = [2, 32], strides = [1, 1]} : vector<2x128xf32> to vector<2x32xf32>
    %347 = arith.negf %346 : vector<2x32xf32>
    %348 = math.exp %347 : vector<2x32xf32>
    %cst_108 = arith.constant 1.000000e+00 : f32
    %349 = vector.broadcast %cst_108 : f32 to vector<2x32xf32>
    %350 = arith.addf %349, %348 : vector<2x32xf32>
    %351 = arith.divf %349, %350 : vector<2x32xf32>
    %352 = vector.extract_strided_slice %340 {offsets = [0, 32], sizes = [2, 32], strides = [1, 1]} : vector<2x128xf32> to vector<2x32xf32>
    %353 = arith.negf %352 : vector<2x32xf32>
    %354 = math.exp %353 : vector<2x32xf32>
    %cst_109 = arith.constant 1.000000e+00 : f32
    %355 = vector.broadcast %cst_109 : f32 to vector<2x32xf32>
    %356 = arith.addf %355, %354 : vector<2x32xf32>
    %357 = arith.divf %355, %356 : vector<2x32xf32>
    %358 = vector.extract_strided_slice %340 {offsets = [0, 64], sizes = [2, 32], strides = [1, 1]} : vector<2x128xf32> to vector<2x32xf32>
    %359 = math.tanh %358 : vector<2x32xf32>
    %360 = vector.extract_strided_slice %340 {offsets = [0, 96], sizes = [2, 32], strides = [1, 1]} : vector<2x128xf32> to vector<2x32xf32>
    %361 = arith.negf %360 : vector<2x32xf32>
    %362 = math.exp %361 : vector<2x32xf32>
    %cst_110 = arith.constant 1.000000e+00 : f32
    %363 = vector.broadcast %cst_110 : f32 to vector<2x32xf32>
    %364 = arith.addf %363, %362 : vector<2x32xf32>
    %365 = arith.divf %363, %364 : vector<2x32xf32>
    %366 = arith.mulf %357, %302 : vector<2x32xf32>
    %367 = arith.mulf %351, %359 : vector<2x32xf32>
    %368 = arith.addf %366, %367 : vector<2x32xf32>
    %369 = math.tanh %368 : vector<2x32xf32>
    %370 = arith.mulf %365, %369 : vector<2x32xf32>
    %371 = vector.extract_strided_slice %345 {offsets = [0, 0], sizes = [2, 32], strides = [1, 1]} : vector<2x128xf32> to vector<2x32xf32>
    %372 = arith.negf %371 : vector<2x32xf32>
    %373 = math.exp %372 : vector<2x32xf32>
    %cst_111 = arith.constant 1.000000e+00 : f32
    %374 = vector.broadcast %cst_111 : f32 to vector<2x32xf32>
    %375 = arith.addf %374, %373 : vector<2x32xf32>
    %376 = arith.divf %374, %375 : vector<2x32xf32>
    %377 = vector.extract_strided_slice %345 {offsets = [0, 32], sizes = [2, 32], strides = [1, 1]} : vector<2x128xf32> to vector<2x32xf32>
    %378 = arith.negf %377 : vector<2x32xf32>
    %379 = math.exp %378 : vector<2x32xf32>
    %cst_112 = arith.constant 1.000000e+00 : f32
    %380 = vector.broadcast %cst_112 : f32 to vector<2x32xf32>
    %381 = arith.addf %380, %379 : vector<2x32xf32>
    %382 = arith.divf %380, %381 : vector<2x32xf32>
    %383 = vector.extract_strided_slice %345 {offsets = [0, 64], sizes = [2, 32], strides = [1, 1]} : vector<2x128xf32> to vector<2x32xf32>
    %384 = math.tanh %383 : vector<2x32xf32>
    %385 = vector.extract_strided_slice %345 {offsets = [0, 96], sizes = [2, 32], strides = [1, 1]} : vector<2x128xf32> to vector<2x32xf32>
    %386 = arith.negf %385 : vector<2x32xf32>
    %387 = math.exp %386 : vector<2x32xf32>
    %cst_113 = arith.constant 1.000000e+00 : f32
    %388 = vector.broadcast %cst_113 : f32 to vector<2x32xf32>
    %389 = arith.addf %388, %387 : vector<2x32xf32>
    %390 = arith.divf %388, %389 : vector<2x32xf32>
    %391 = arith.mulf %382, %327 : vector<2x32xf32>
    %392 = arith.mulf %376, %384 : vector<2x32xf32>
    %393 = arith.addf %391, %392 : vector<2x32xf32>
    %394 = math.tanh %393 : vector<2x32xf32>
    %395 = arith.mulf %390, %394 : vector<2x32xf32>
    %c5_114 = arith.constant 5 : index
    %c0_115 = arith.constant 0 : index
    %c0_116 = arith.constant 0 : index
    %396 = vector.load %arg3[%c5_114, %c0_115, %c0_116] : memref<7x2x32xf32, #tpu.memory_space<vmem>>, vector<1x2x32xf32>
    %397 = vector.shape_cast %396 : vector<1x2x32xf32> to vector<2x32xf32>
    %398 = vector.shape_cast %370 : vector<2x32xf32> to vector<1x2x32xf32>
    tpu.vector_store %arg3[%c5_114, %c0_115, %c0_116], %398 {strides = array<i32>} : memref<7x2x32xf32, #tpu.memory_space<vmem>>, vector<1x2x32xf32>,
    %c1_117 = arith.constant 1 : index
    %c0_118 = arith.constant 0 : index
    %c0_119 = arith.constant 0 : index
    %399 = vector.load %arg4[%c1_117, %c0_118, %c0_119] : memref<7x2x32xf32, #tpu.memory_space<vmem>>, vector<1x2x32xf32>
    %400 = vector.shape_cast %399 : vector<1x2x32xf32> to vector<2x32xf32>
    %401 = vector.shape_cast %395 : vector<2x32xf32> to vector<1x2x32xf32>
    tpu.vector_store %arg4[%c1_117, %c0_118, %c0_119], %401 {strides = array<i32>} : memref<7x2x32xf32, #tpu.memory_space<vmem>>, vector<1x2x32xf32>,
    %c6_120 = arith.constant 6 : index
    %c0_121 = arith.constant 0 : index
    %c0_122 = arith.constant 0 : index
    %402 = vector.load %arg0[%c6_120, %c0_121, %c0_122] : memref<7x2x256xf32, #tpu.memory_space<vmem>>, vector<1x2x256xf32>
    %403 = vector.shape_cast %402 : vector<1x2x256xf32> to vector<2x256xf32>
    %404 = vector.extract_strided_slice %403 {offsets = [0, 0], sizes = [2, 128], strides = [1, 1]} : vector<2x256xf32> to vector<2x128xf32>
    %cst_123 = arith.constant dense<0.000000e+00> : vector<2x128xf32>
    %405 = tpu.matmul %370, %0, %cst_123 {dimension_numbers = #tpu.dot_dimension_numbers<[1], [0], [0], [1], [0, 0, 1, 1], [], []>} : vector<2x32xf32>, vector<32x128xf32>, vector<2x128xf32> -> vector<2x128xf32>
    %406 = arith.addf %404, %405 : vector<2x128xf32>
    %c0_124 = arith.constant 0 : index
    %c0_125 = arith.constant 0 : index
    %c0_126 = arith.constant 0 : index
    %407 = vector.load %arg0[%c0_124, %c0_125, %c0_126] : memref<7x2x256xf32, #tpu.memory_space<vmem>>, vector<1x2x256xf32>
    %408 = vector.shape_cast %407 : vector<1x2x256xf32> to vector<2x256xf32>
    %409 = vector.extract_strided_slice %408 {offsets = [0, 128], sizes = [2, 128], strides = [1, 1]} : vector<2x256xf32> to vector<2x128xf32>
    %cst_127 = arith.constant dense<0.000000e+00> : vector<2x128xf32>
    %410 = tpu.matmul %395, %1, %cst_127 {dimension_numbers = #tpu.dot_dimension_numbers<[1], [0], [0], [1], [0, 0, 1, 1], [], []>} : vector<2x32xf32>, vector<32x128xf32>, vector<2x128xf32> -> vector<2x128xf32>
    %411 = arith.addf %409, %410 : vector<2x128xf32>
    %412 = vector.extract_strided_slice %406 {offsets = [0, 0], sizes = [2, 32], strides = [1, 1]} : vector<2x128xf32> to vector<2x32xf32>
    %413 = arith.negf %412 : vector<2x32xf32>
    %414 = math.exp %413 : vector<2x32xf32>
    %cst_128 = arith.constant 1.000000e+00 : f32
    %415 = vector.broadcast %cst_128 : f32 to vector<2x32xf32>
    %416 = arith.addf %415, %414 : vector<2x32xf32>
    %417 = arith.divf %415, %416 : vector<2x32xf32>
    %418 = vector.extract_strided_slice %406 {offsets = [0, 32], sizes = [2, 32], strides = [1, 1]} : vector<2x128xf32> to vector<2x32xf32>
    %419 = arith.negf %418 : vector<2x32xf32>
    %420 = math.exp %419 : vector<2x32xf32>
    %cst_129 = arith.constant 1.000000e+00 : f32
    %421 = vector.broadcast %cst_129 : f32 to vector<2x32xf32>
    %422 = arith.addf %421, %420 : vector<2x32xf32>
    %423 = arith.divf %421, %422 : vector<2x32xf32>
    %424 = vector.extract_strided_slice %406 {offsets = [0, 64], sizes = [2, 32], strides = [1, 1]} : vector<2x128xf32> to vector<2x32xf32>
    %425 = math.tanh %424 : vector<2x32xf32>
    %426 = vector.extract_strided_slice %406 {offsets = [0, 96], sizes = [2, 32], strides = [1, 1]} : vector<2x128xf32> to vector<2x32xf32>
    %427 = arith.negf %426 : vector<2x32xf32>
    %428 = math.exp %427 : vector<2x32xf32>
    %cst_130 = arith.constant 1.000000e+00 : f32
    %429 = vector.broadcast %cst_130 : f32 to vector<2x32xf32>
    %430 = arith.addf %429, %428 : vector<2x32xf32>
    %431 = arith.divf %429, %430 : vector<2x32xf32>
    %432 = arith.mulf %423, %368 : vector<2x32xf32>
    %433 = arith.mulf %417, %425 : vector<2x32xf32>
    %434 = arith.addf %432, %433 : vector<2x32xf32>
    %435 = math.tanh %434 : vector<2x32xf32>
    %436 = arith.mulf %431, %435 : vector<2x32xf32>
    %437 = vector.extract_strided_slice %411 {offsets = [0, 0], sizes = [2, 32], strides = [1, 1]} : vector<2x128xf32> to vector<2x32xf32>
    %438 = arith.negf %437 : vector<2x32xf32>
    %439 = math.exp %438 : vector<2x32xf32>
    %cst_131 = arith.constant 1.000000e+00 : f32
    %440 = vector.broadcast %cst_131 : f32 to vector<2x32xf32>
    %441 = arith.addf %440, %439 : vector<2x32xf32>
    %442 = arith.divf %440, %441 : vector<2x32xf32>
    %443 = vector.extract_strided_slice %411 {offsets = [0, 32], sizes = [2, 32], strides = [1, 1]} : vector<2x128xf32> to vector<2x32xf32>
    %444 = arith.negf %443 : vector<2x32xf32>
    %445 = math.exp %444 : vector<2x32xf32>
    %cst_132 = arith.constant 1.000000e+00 : f32
    %446 = vector.broadcast %cst_132 : f32 to vector<2x32xf32>
    %447 = arith.addf %446, %445 : vector<2x32xf32>
    %448 = arith.divf %446, %447 : vector<2x32xf32>
    %449 = vector.extract_strided_slice %411 {offsets = [0, 64], sizes = [2, 32], strides = [1, 1]} : vector<2x128xf32> to vector<2x32xf32>
    %450 = math.tanh %449 : vector<2x32xf32>
    %451 = vector.extract_strided_slice %411 {offsets = [0, 96], sizes = [2, 32], strides = [1, 1]} : vector<2x128xf32> to vector<2x32xf32>
    %452 = arith.negf %451 : vector<2x32xf32>
    %453 = math.exp %452 : vector<2x32xf32>
    %cst_133 = arith.constant 1.000000e+00 : f32
    %454 = vector.broadcast %cst_133 : f32 to vector<2x32xf32>
    %455 = arith.addf %454, %453 : vector<2x32xf32>
    %456 = arith.divf %454, %455 : vector<2x32xf32>
    %457 = arith.mulf %448, %393 : vector<2x32xf32>
    %458 = arith.mulf %442, %450 : vector<2x32xf32>
    %459 = arith.addf %457, %458 : vector<2x32xf32>
    %460 = math.tanh %459 : vector<2x32xf32>
    %461 = arith.mulf %456, %460 : vector<2x32xf32>
    %c6_134 = arith.constant 6 : index
    %c0_135 = arith.constant 0 : index
    %c0_136 = arith.constant 0 : index
    %462 = vector.load %arg3[%c6_134, %c0_135, %c0_136] : memref<7x2x32xf32, #tpu.memory_space<vmem>>, vector<1x2x32xf32>
    %463 = vector.shape_cast %462 : vector<1x2x32xf32> to vector<2x32xf32>
    %464 = vector.shape_cast %436 : vector<2x32xf32> to vector<1x2x32xf32>
    tpu.vector_store %arg3[%c6_134, %c0_135, %c0_136], %464 {strides = array<i32>} : memref<7x2x32xf32, #tpu.memory_space<vmem>>, vector<1x2x32xf32>,
    %c0_137 = arith.constant 0 : index
    %c0_138 = arith.constant 0 : index
    %c0_139 = arith.constant 0 : index
    %465 = vector.load %arg4[%c0_137, %c0_138, %c0_139] : memref<7x2x32xf32, #tpu.memory_space<vmem>>, vector<1x2x32xf32>
    %466 = vector.shape_cast %465 : vector<1x2x32xf32> to vector<2x32xf32>
    %467 = vector.shape_cast %461 : vector<2x32xf32> to vector<1x2x32xf32>
    tpu.vector_store %arg4[%c0_137, %c0_138, %c0_139], %467 {strides = array<i32>} : memref<7x2x32xf32, #tpu.memory_space<vmem>>, vector<1x2x32xf32>,
    return
  }
}

module attributes {stable_mosaic.version = 11 : i64} {
  func.func @matmul_fused_kernel(%arg0: i32, %arg1: i32, %arg2: i32, %arg3: memref<16x128xbf16, #tpu.memory_space<vmem>>, %arg4: memref<128x256xbf16, #tpu.memory_space<vmem>>, %arg5: memref<1x256xf32, #tpu.memory_space<vmem>>, %arg6: memref<16x256xf32, #tpu.memory_space<vmem>>, %arg7: memref<16x256xf32, #tpu.memory_space<vmem>>) attributes {dimension_semantics = [#tpu.dimension_semantics<parallel>, #tpu.dimension_semantics<parallel>, #tpu.dimension_semantics<arbitrary>], iteration_bounds = array<i64: 1, 1, 1>, scalar_prefetch = 0 : i64, scratch_operands = 1 : i64, tpu.core_type = #tpu.core_type<tc>, window_params = [{transform_indices = @transform_0, window_bounds = array<i64: 16, 128>}, {transform_indices = @transform_1, window_bounds = array<i64: 128, 256>}, {transform_indices = @transform_2, window_bounds = array<i64: 1, 256>}, {transform_indices = @transform_3, window_bounds = array<i64: 16, 256>}]} {
    %c0_i32 = arith.constant 0 : i32
    %0 = arith.cmpi eq, %arg2, %c0_i32 : i32
    %1 = arith.extui %0 : i1 to i32
    %c0_i32_0 = arith.constant 0 : i32
    %2 = arith.cmpi ne, %1, %c0_i32_0 : i32
    scf.if %2 {
      %cst_10 = arith.constant 0.000000e+00 : f32
      %12 = vector.broadcast %cst_10 : f32 to vector<16x256xf32>
      %c0_11 = arith.constant 0 : index
      %c0_12 = arith.constant 0 : index
      %13 = vector.load %arg7[%c0_11, %c0_12] : memref<16x256xf32, #tpu.memory_space<vmem>>, vector<16x256xf32>
      tpu.vector_store %arg7[%c0_11, %c0_12], %12 {strides = array<i32>} : memref<16x256xf32, #tpu.memory_space<vmem>>, vector<16x256xf32>,
    } else {
    }
    %c0 = arith.constant 0 : index
    %c0_1 = arith.constant 0 : index
    %3 = vector.load %arg7[%c0, %c0_1] : memref<16x256xf32, #tpu.memory_space<vmem>>, vector<16x256xf32>
    %c0_2 = arith.constant 0 : index
    %c0_3 = arith.constant 0 : index
    %4 = vector.load %arg3[%c0_2, %c0_3] : memref<16x128xbf16, #tpu.memory_space<vmem>>, vector<16x128xbf16>
    %c0_4 = arith.constant 0 : index
    %c0_5 = arith.constant 0 : index
    %5 = vector.load %arg4[%c0_4, %c0_5] : memref<128x256xbf16, #tpu.memory_space<vmem>>, vector<128x256xbf16>
    %cst = arith.constant dense<0.000000e+00> : vector<16x256xf32>
    %6 = tpu.matmul %4, %5, %cst {dimension_numbers = #tpu.dot_dimension_numbers<[1], [0], [0], [1], [0, 0, 1, 1], [], []>} : vector<16x128xbf16>, vector<128x256xbf16>, vector<16x256xf32> -> vector<16x256xf32>
    %7 = arith.addf %3, %6 : vector<16x256xf32>
    %c0_6 = arith.constant 0 : index
    %c0_7 = arith.constant 0 : index
    %8 = vector.load %arg7[%c0_6, %c0_7] : memref<16x256xf32, #tpu.memory_space<vmem>>, vector<16x256xf32>
    tpu.vector_store %arg7[%c0_6, %c0_7], %7 {strides = array<i32>} : memref<16x256xf32, #tpu.memory_space<vmem>>, vector<16x256xf32>,
    %c0_i32_8 = arith.constant 0 : i32
    %9 = arith.cmpi eq, %arg2, %c0_i32_8 : i32
    %10 = arith.extui %9 : i1 to i32
    %c0_i32_9 = arith.constant 0 : i32
    %11 = arith.cmpi ne, %10, %c0_i32_9 : i32
    scf.if %11 {
      %c0_10 = arith.constant 0 : index
      %c0_11 = arith.constant 0 : index
      %12 = vector.load %arg7[%c0_10, %c0_11] : memref<16x256xf32, #tpu.memory_space<vmem>>, vector<16x256xf32>
      %c0_12 = arith.constant 0 : index
      %c0_13 = arith.constant 0 : index
      %13 = vector.load %arg5[%c0_12, %c0_13] : memref<1x256xf32, #tpu.memory_space<vmem>>, vector<1x256xf32>
      %14 = vector.broadcast %13 : vector<1x256xf32> to vector<16x256xf32>
      %15 = arith.addf %12, %14 : vector<16x256xf32>
      %c0_14 = arith.constant 0 : index
      %c0_15 = arith.constant 0 : index
      %16 = vector.load %arg6[%c0_14, %c0_15] : memref<16x256xf32, #tpu.memory_space<vmem>>, vector<16x256xf32>
      tpu.vector_store %arg6[%c0_14, %c0_15], %15 {strides = array<i32>} : memref<16x256xf32, #tpu.memory_space<vmem>>, vector<16x256xf32>,
    } else {
    }
    return
  }
  func.func @transform_0(%arg0: i32, %arg1: i32, %arg2: i32) -> (i32, i32) {
    %c0_i32 = arith.constant 0 : i32
    return %arg0, %arg2 : i32, i32
  }
  func.func @transform_1(%arg0: i32, %arg1: i32, %arg2: i32) -> (i32, i32) {
    %c0_i32 = arith.constant 0 : i32
    return %arg2, %arg1 : i32, i32
  }
  func.func @transform_2(%arg0: i32, %arg1: i32, %arg2: i32) -> (i32, i32) {
    %c0_i32 = arith.constant 0 : i32
    %c0_i32_0 = arith.constant 0 : i32
    return %c0_i32, %arg1 : i32, i32
  }
  func.func @transform_3(%arg0: i32, %arg1: i32, %arg2: i32) -> (i32, i32) {
    %c0_i32 = arith.constant 0 : i32
    return %arg0, %arg1 : i32, i32
  }
}

module attributes {stable_mosaic.version = 11 : i64} {
  func.func @matmul_fused_kernel(%arg0: i32, %arg1: i32, %arg2: i32, %arg3: memref<16x128xbf16, #tpu.memory_space<vmem>>, %arg4: memref<128x128xbf16, #tpu.memory_space<vmem>>, %arg5: memref<1x128xf32, #tpu.memory_space<vmem>>, %arg6: memref<16x128xf32, #tpu.memory_space<vmem>>, %arg7: memref<16x128xf32, #tpu.memory_space<vmem>>) attributes {dimension_semantics = [#tpu.dimension_semantics<parallel>, #tpu.dimension_semantics<parallel>, #tpu.dimension_semantics<arbitrary>], iteration_bounds = array<i64: 1, 1, 1>, scalar_prefetch = 0 : i64, scratch_operands = 1 : i64, tpu.core_type = #tpu.core_type<tc>, window_params = [{transform_indices = @transform_0, window_bounds = array<i64: 16, 128>}, {transform_indices = @transform_1, window_bounds = array<i64: 128, 128>}, {transform_indices = @transform_2, window_bounds = array<i64: 1, 128>}, {transform_indices = @transform_3, window_bounds = array<i64: 16, 128>}]} {
    %c0_i32 = arith.constant 0 : i32
    %0 = arith.cmpi eq, %arg2, %c0_i32 : i32
    %1 = arith.extui %0 : i1 to i32
    %c0_i32_0 = arith.constant 0 : i32
    %2 = arith.cmpi ne, %1, %c0_i32_0 : i32
    scf.if %2 {
      %cst_10 = arith.constant 0.000000e+00 : f32
      %12 = vector.broadcast %cst_10 : f32 to vector<16x128xf32>
      %c0_11 = arith.constant 0 : index
      %c0_12 = arith.constant 0 : index
      %13 = vector.load %arg7[%c0_11, %c0_12] : memref<16x128xf32, #tpu.memory_space<vmem>>, vector<16x128xf32>
      tpu.vector_store %arg7[%c0_11, %c0_12], %12 {strides = array<i32>} : memref<16x128xf32, #tpu.memory_space<vmem>>, vector<16x128xf32>,
    } else {
    }
    %c0 = arith.constant 0 : index
    %c0_1 = arith.constant 0 : index
    %3 = vector.load %arg7[%c0, %c0_1] : memref<16x128xf32, #tpu.memory_space<vmem>>, vector<16x128xf32>
    %c0_2 = arith.constant 0 : index
    %c0_3 = arith.constant 0 : index
    %4 = vector.load %arg3[%c0_2, %c0_3] : memref<16x128xbf16, #tpu.memory_space<vmem>>, vector<16x128xbf16>
    %c0_4 = arith.constant 0 : index
    %c0_5 = arith.constant 0 : index
    %5 = vector.load %arg4[%c0_4, %c0_5] : memref<128x128xbf16, #tpu.memory_space<vmem>>, vector<128x128xbf16>
    %cst = arith.constant dense<0.000000e+00> : vector<16x128xf32>
    %6 = tpu.matmul %4, %5, %cst {dimension_numbers = #tpu.dot_dimension_numbers<[1], [0], [0], [1], [0, 0, 1, 1], [], []>} : vector<16x128xbf16>, vector<128x128xbf16>, vector<16x128xf32> -> vector<16x128xf32>
    %7 = arith.addf %3, %6 : vector<16x128xf32>
    %c0_6 = arith.constant 0 : index
    %c0_7 = arith.constant 0 : index
    %8 = vector.load %arg7[%c0_6, %c0_7] : memref<16x128xf32, #tpu.memory_space<vmem>>, vector<16x128xf32>
    tpu.vector_store %arg7[%c0_6, %c0_7], %7 {strides = array<i32>} : memref<16x128xf32, #tpu.memory_space<vmem>>, vector<16x128xf32>,
    %c0_i32_8 = arith.constant 0 : i32
    %9 = arith.cmpi eq, %arg2, %c0_i32_8 : i32
    %10 = arith.extui %9 : i1 to i32
    %c0_i32_9 = arith.constant 0 : i32
    %11 = arith.cmpi ne, %10, %c0_i32_9 : i32
    scf.if %11 {
      %c0_10 = arith.constant 0 : index
      %c0_11 = arith.constant 0 : index
      %12 = vector.load %arg7[%c0_10, %c0_11] : memref<16x128xf32, #tpu.memory_space<vmem>>, vector<16x128xf32>
      %c0_12 = arith.constant 0 : index
      %c0_13 = arith.constant 0 : index
      %13 = vector.load %arg5[%c0_12, %c0_13] : memref<1x128xf32, #tpu.memory_space<vmem>>, vector<1x128xf32>
      %14 = vector.broadcast %13 : vector<1x128xf32> to vector<16x128xf32>
      %15 = arith.addf %12, %14 : vector<16x128xf32>
      %c0_14 = arith.constant 0 : index
      %c0_15 = arith.constant 0 : index
      %16 = vector.load %arg6[%c0_14, %c0_15] : memref<16x128xf32, #tpu.memory_space<vmem>>, vector<16x128xf32>
      tpu.vector_store %arg6[%c0_14, %c0_15], %15 {strides = array<i32>} : memref<16x128xf32, #tpu.memory_space<vmem>>, vector<16x128xf32>,
    } else {
    }
    return
  }
  func.func @transform_0(%arg0: i32, %arg1: i32, %arg2: i32) -> (i32, i32) {
    %c0_i32 = arith.constant 0 : i32
    return %arg0, %arg2 : i32, i32
  }
  func.func @transform_1(%arg0: i32, %arg1: i32, %arg2: i32) -> (i32, i32) {
    %c0_i32 = arith.constant 0 : i32
    return %arg2, %arg1 : i32, i32
  }
  func.func @transform_2(%arg0: i32, %arg1: i32, %arg2: i32) -> (i32, i32) {
    %c0_i32 = arith.constant 0 : i32
    %c0_i32_0 = arith.constant 0 : i32
    return %c0_i32, %arg1 : i32, i32
  }
  func.func @transform_3(%arg0: i32, %arg1: i32, %arg2: i32) -> (i32, i32) {
    %c0_i32 = arith.constant 0 : i32
    return %arg0, %arg1 : i32, i32
  }
}

</mosaic_0001>

<bundles_post_ra>
// kernel: crnn_forward.17
= control target key start
LH: loop header
LB: loop body
LE: loop exit
PB: predicated region body
PF: predicated region fallthrough
CT: control target
= control target key end

     0   :  { %s607_s6 = smov 0   ;;  %s609_s7 = smov 0   ;;  %s671_s0 = inlined_call_operand.vmem [shape: f32[2,32,32,64], index: 0, kind: input, shape index: {}]   ;;  %s672_s1 = inlined_call_operand.vmem [shape: f32[2,16,16,64], index: 1, kind: output, shape index: {}]  }
   0x1   :  { %s611_s8 = smov 0   ;;  %s613_s9 = smov 0  }
   0x2   :  { %s615_s10 = smov 0  }
   0x3 LB: > { %s20_s11 = sadd.s32 1, %s586_s8  ;;  %s23_s12 = sadd.s32 1, %s590_s9  ;;  %s594_s10 = sphi %s615_s10, %s11_s10   ;;  %s590_s9 = sphi %s613_s9, %s676_s9   ;;  %s586_s8 = sphi %s611_s8, %s675_s8   ;;  %s582_s7 = sphi %s609_s7, %s674_s7   ;;  %s578_s6 = sphi %s607_s6, %s673_s6  }
   0x4   : > { %p21_p0 = scmp.ge.s32.totalorder %s20_s11, 16  ;;  %p459_p1 = scmp.ge.s32.totalorder %s594_s10, 1 }
   0x5   : > { %p109_p2 = scmp.lt.s32.totalorder %s594_s10, 33 }
   0x6   : > { %s678_s11 = smov (%p21_p0, %s20_s11), 0  ;;  %s680_s12 = smov (!%p21_p0, %s23_s12), %s590_s9 }
   0x7   : > { %p110_p3 = pnand %p459_p1, %p109_p2  ;;  %p25_p4 = scmp.ge.s32.totalorder %s680_s12, 2 }
   0x8   : > { %s460_s13 = sshll.u32 (!%p110_p3), %s578_s6, 1  ;;  %p139_p5 = scmp.lt.s32.totalorder (!%p110_p3), %s582_s7, 1 }
   0x9   : > { %s682_s12 = smov (%p25_p4, %s680_s12), 0  ;;  %113 = sbr.rel (%p110_p3) target bundleno = 230 (0xe6), region = 24 }
   0xa   : > { %p141_p6 = scmp.lt.s32.totalorder (!%p110_p3), %s460_s13, 31  ;;  %p151_p7 = scmp.lt.s32.totalorder (!%p110_p3), %s578_s6, 15 }
   0xe   : > { %v171_v0 = vlaneseq  ;;  %s684_s7 = smov (!%p139_p5, %s582_s7), 1  ;;  %s686_s13 = smov (!%p141_p6, %s460_s13), 31  ;;  %vm184_vm0 = vcmask 261120   ;;  %v596_v7 = vmov 0.0   ;;  %vm357_vm5 = vcmask 523264  }
   0xf   : > { %s462_s14 = sshll.u32 %s684_s7, 7  ;;  %s461_s15 = sshll.u32 %s686_s13, 2 }
  0x10   : > { %v172_v1 = vshrl.u32 %v171_v0, 7  ;;  %v175_v2 = vand.u32 127, %v171_v0  ;;  %s145_s16 = sadd.s32 %s462_s14, %s461_s15  ;;  %s688_s6 = smov (!%p151_p7, %s578_s6), 15 }
  0x11   : > { %s463_s17 = sshll.u32 %s145_s16, 3  ;;  %s464_s21 = sshll.u32 %s688_s6, 1 }
  0x12   : > { %v176_v3 = vmul.u32 2, %v172_v1  ;;  %v173_v4 = vadd.s32 8, %v172_v1  ;;  %s147_s20 = scalar_lea.vmem %s671_s0, %s463_s17  ;;  %s465_s22 = sshll.u32 %s684_s7, 5 }
  0x13   : > { %v161_v9 = vld [vmem:[%s147_s20 + $0x18] sm:$0xff]  ;;  %v160_v11 = vld [vmem:[%s147_s20 + $0x10] sm:$0xff]  ;;  %v159_v15 = vld [vmem:[%s147_s20 + $0x8] sm:$0xff]  ;;  %s155_s23 = sadd.s32 %s465_s22, %s464_s21 }
  0x14   : > { %vm178_vm1 = vcmp.eq.s32.totalorder %v175_v2, %v176_v3  ;;  %v266_v5 = vadd.s32 1, %v176_v3  ;;  %v177_v6 = vmul.u32 2, %v173_v4  ;;  %v470_v10 = vld [vmem:[%s147_s20 + $0x38] sm:$0xff]  ;;  %v469_v14 = vld [vmem:[%s147_s20 + $0x30] sm:$0xff]  ;;  %v468_v16 = vld [vmem:[%s147_s20 + $0x28] sm:$0xff]  ;;  %s466_s24 = sshll.u32 %s155_s23, 3 }
  0x15   : > { %v471_v8 = vsel %vm178_vm1, 1.0, %v596_v7  ;;  %v170_v13 = vmax.f32 %v161_v9, %v470_v10  ;;  %v169_v18 = vmax.f32 %v160_v11, %v469_v14  ;;  %v158_v19 = vld [vmem:[%s147_s20] sm:$0xff]  ;;  %v168_v21 = vmax.f32 %v159_v15, %v468_v16  ;;  %s157_s27 = scalar_lea.vmem %s672_s1, %s466_s24 }
  0x16   : > { %501 = vmatprep.mubr.msk.f32.mxu0 %vm184_vm0, %v471_v8  ;;  %vm268_vm2 = vcmp.eq.s32.totalorder %v175_v2, %v266_v5  ;;  %v267_v17 = vadd.s32 1, %v177_v6  ;;  %v467_v20 = vld [vmem:[%s147_s20 + $0x20] sm:$0xff]  ;;  %vm179_vm3 = vcmp.eq.s32.totalorder %v175_v2, %v177_v6 }
  0x17   : > { %v475_v12 = vsel %vm268_vm2, 1.0, %v596_v7  ;;  %493 = vmatprep.subr.mxu0 %v170_v13  ;;  %504 = vmatprep.subr.mxu1 %v170_v13  ;;  %v167_v22 = vmax.f32 %v158_v19, %v467_v20  ;;  %v472_v23 = vsel %vm179_vm3, 1.0, %v596_v7 }
  0x18   : > { %512 = vmatprep.mubr.msk.f32.mxu1 %vm184_vm0, %v475_v12  ;;  %494 = vmatpush3.msra.mxu0 %v170_v13  ;;  %vm269_vm4 = vcmp.eq.s32.totalorder %v175_v2, %v267_v17 }
  0x19   : > { %505 = vmatpush3.msra.mxu1 %v170_v13  ;;  %495 = vmatprep.subr.mxu0 %v169_v18  ;;  %v476_v24 = vsel %vm269_vm4, 1.0, %v596_v7 }
  0x1a   : > { %506 = vmatprep.subr.mxu1 %v169_v18  ;;  %496 = vmatpush3.msra.mxu0 %v169_v18 }
  0x1b   : > { %507 = vmatpush3.msra.mxu1 %v169_v18  ;;  %497 = vmatprep.subr.mxu0 %v168_v21 }
  0x1c   : > { %508 = vmatprep.subr.mxu1 %v168_v21  ;;  %498 = vmatpush3.msra.mxu0 %v168_v21 }
  0x1d   : > { %509 = vmatpush3.msra.mxu1 %v168_v21  ;;  %499 = vmatprep.subr.mxu0 %v167_v22 }
  0x1e   : > { %510 = vmatprep.subr.mxu1 %v167_v22  ;;  %500 = vmatpush3.msra.mxu0 %v167_v22 }
  0x1f   : > { %511 = vmatpush3.msra.mxu1 %v167_v22  ;;  %502 = vmatmul.mubr.msk.f32.vlgmr.msra.gmra.mxu0 %vm184_vm0, %v472_v23 }
  0x20   : > { %513 = vmatmul.mubr.msk.f32.vlgmr.msra.gmra.mxu1 %vm184_vm0, %v476_v24 }
  0xdf   : > { %v503_v25 = vpop.f32.mrf.mxu0 }
  0xe0   : > { %v514_v26 = vpop.f32.mrf.mxu1 }
  0xe1   : > { %v356_v27 = vmax.f32 %v503_v25, %v514_v26  ;;  %v257_v28 = vpop.f32.mrf.mxu0 }
  0xe2   : > { %v346_v29 = vpop.f32.mrf.mxu1 }
  0xe3   : > { %359 = vst.msk [vmem:[%s157_s27 + $0x8] sm:$0xff] %vm357_vm5, %v356_v27  ;;  %v355_v30 = vmax.f32 %v257_v28, %v346_v29 }
  0xe5   : > { %358 = vst.msk [vmem:[%s157_s27] sm:$0xff] %vm357_vm5, %v355_v30 }
  0xe6 PF: > { %s11_s10 = sadd.s32 1, %s594_s10   ;;  %s673_s6 = smov %s586_s8 }
  0xe7   : > { %p8_p8 = scmp.ge.s32.totalorder %s11_s10, 34   ;;  %s674_s7 = smov %s590_s9 }
  0xe8   : > { %s675_s8 = smov %s678_s11  ;;  %s676_s9 = smov %s682_s12 }
  0xe9   :  { %10 = sbr.rel (!%p8_p8) target bundleno = 3 (0x3), region = 55 }

// kernel: crnn_forward.16
= control target key start
LH: loop header
LB: loop body
LE: loop exit
PB: predicated region body
PF: predicated region fallthrough
CT: control target
= control target key end

     0   :  { %s1212_s12 = smov 0   ;;  %s1214_s13 = smov 0   ;;  %s1362_s0 = inlined_call_operand.vmem [shape: bf16[2048,128], index: 0, kind: input, shape index: {}]   ;;  %s1363_s1 = inlined_call_operand.vmem [shape: bf16[128,128], index: 1, kind: input, shape index: {}]   ;;  %s1364_s2 = inlined_call_operand.vmem [shape: f32[1,128], index: 2, kind: input, shape index: {}]   ;;  %s1365_s3 = inlined_call_operand.vmem [shape: f32[2048,128], index: 3, kind: output, shape index: {}]  }
   0x1   :  { %s1216_s14 = smov 0  }
   0x2 LB: > { %s32_s15 = sadd.s32 1, %s1186_s13  ;;  %p1000_p0 = scmp.ge.s32.totalorder %s1190_s14, 1  ;;  %s1190_s14 = sphi %s1216_s14, %s13_s14   ;;  %s1186_s13 = sphi %s1214_s13, %s1367_s13   ;;  %s1182_s12 = sphi %s1212_s12, %s1366_s12  }
   0x3   : > { %p34_p1 = scmp.ge.s32.totalorder %s32_s15, 8  ;;  %p188_p2 = scmp.lt.s32.totalorder %s1190_s14, 9 }
   0x5   : > { %s1369_s15 = smov (%p34_p1, %s32_s15), 0  ;;  %p189_p3 = pnand %p1000_p0, %p188_p2 }
   0x6   : > { %s1001_s18 = sshll.u32 (!%p189_p3), %s1182_s12, 5 }
   0x7   : > { %192 = sbr.rel (%p189_p3) target bundleno = 273 (0x111), region = 32  ;;  %p230_p4 = scmp.lt.s32.totalorder (!%p189_p3), %s1001_s18, 255 }
   0xc   : > { %v1144_v0 = vld [vmem:[%s1363_s1 + $0x38] sm:$0xff]   ;;  %v1145_v1 = vld [vmem:[%s1363_s1 + $0x30] sm:$0xff]   ;;  %s1371_s18 = smov (!%p230_p4, %s1001_s18), 255  ;;  %v1146_v2 = vld [vmem:[%s1363_s1 + $0x28] sm:$0xff]  }
   0xd   : > { %1056 = vmatprep.subr.bf16.mxu0 %v1144_v0  ;;  %1104 = vmatprep.subr.bf16.mxu1 %v1144_v0  ;;  %s1002_s23 = sshll.u32 %s1371_s18, 2  ;;  %v1147_v3 = vld [vmem:[%s1363_s1 + $0x20] sm:$0xff]   ;;  %v1148_v6 = vld [vmem:[%s1363_s1 + $0x18] sm:$0xff]   ;;  %v1149_v7 = vld [vmem:[%s1363_s1 + $0x10] sm:$0xff]   ;;  %s1004_s12 = sshll.u32 %s1371_s18, 3 }
   0xe   : > { %1057 = vmatpush3.bf16.msra.mxu0 %v1144_v0  ;;  %1112 = vmatpush3.bf16.msra.mxu1 %v1144_v0  ;;  %s1245_s26 = scalar_lea.vmem %s1362_s0, %s1002_s23  ;;  %v1150_v8 = vld [vmem:[%s1363_s1 + $0x8] sm:$0xff]   ;;  %v1151_v9 = vld [vmem:[%s1363_s1] sm:$0xff]   ;;  %s1289_s19 = scalar_lea.vmem %s1365_s3, %s1004_s12 }
   0xf   : > { %1058 = vmatprep.subr.bf16.mxu0 %v1145_v1  ;;  %1105 = vmatprep.subr.bf16.mxu1 %v1145_v1  ;;  %v1152_v4 = vld [vmem:[%s1245_s26] sm:$0xff]   ;;  %v1154_v10 = vld [vmem:[%s1245_s26 + $0x8] sm:$0xff]   ;;  %v1156_v12 = vld [vmem:[%s1245_s26 + $0x10] sm:$0xff]  }
  0x10   : > { %v1153_v5 = vld [vmem:[%s1245_s26 + $0x40] sm:$0xff]   ;;  %1072 = vmatprep.mubr.bf16.mxu0 %v1152_v4  ;;  %v1155_v11 = vld [vmem:[%s1245_s26 + $0x48] sm:$0xff]   ;;  %v1157_v13 = vld [vmem:[%s1245_s26 + $0x50] sm:$0xff]  }
  0x11   : > { %1088 = vmatprep.mubr.bf16.mxu1 %v1153_v5  ;;  %v1158_v14 = vld [vmem:[%s1245_s26 + $0x18] sm:$0xff]   ;;  %v1160_v16 = vld [vmem:[%s1245_s26 + $0x20] sm:$0xff]   ;;  %v1162_v18 = vld [vmem:[%s1245_s26 + $0x28] sm:$0xff]  }
  0x12   : > { %1059 = vmatpush3.bf16.msra.mxu0 %v1145_v1  ;;  %1113 = vmatpush3.bf16.msra.mxu1 %v1145_v1  ;;  %v1159_v15 = vld [vmem:[%s1245_s26 + $0x58] sm:$0xff]   ;;  %v1161_v17 = vld [vmem:[%s1245_s26 + $0x60] sm:$0xff]   ;;  %v1163_v19 = vld [vmem:[%s1245_s26 + $0x68] sm:$0xff]  }
  0x13   : > { %1060 = vmatprep.subr.bf16.mxu0 %v1146_v2  ;;  %1106 = vmatprep.subr.bf16.mxu1 %v1146_v2  ;;  %v1164_v20 = vld [vmem:[%s1245_s26 + $0x30] sm:$0xff]   ;;  %v1166_v22 = vld [vmem:[%s1245_s26 + $0x38] sm:$0xff]   ;;  %v1281_v24 = vld [vmem:[%s1364_s2] ss:$0 sm:$0xff] }
  0x14   : > { %v1165_v21 = vld [vmem:[%s1245_s26 + $0x70] sm:$0xff]   ;;  %v1167_v23 = vld [vmem:[%s1245_s26 + $0x78] sm:$0xff]  }
  0x16   : > { %1061 = vmatpush3.bf16.msra.mxu0 %v1146_v2  ;;  %1114 = vmatpush3.bf16.msra.mxu1 %v1146_v2 }
  0x17   : > { %1062 = vmatprep.subr.bf16.mxu0 %v1147_v3  ;;  %1107 = vmatprep.subr.bf16.mxu1 %v1147_v3 }
  0x1a   : > { %1063 = vmatpush3.bf16.msra.mxu0 %v1147_v3  ;;  %1115 = vmatpush3.bf16.msra.mxu1 %v1147_v3 }
  0x1b   : > { %1064 = vmatprep.subr.bf16.mxu0 %v1148_v6  ;;  %1108 = vmatprep.subr.bf16.mxu1 %v1148_v6 }
  0x1e   : > { %1065 = vmatpush3.bf16.msra.mxu0 %v1148_v6  ;;  %1116 = vmatpush3.bf16.msra.mxu1 %v1148_v6 }
  0x1f   : > { %1066 = vmatprep.subr.bf16.mxu0 %v1149_v7  ;;  %1109 = vmatprep.subr.bf16.mxu1 %v1149_v7 }
  0x22   : > { %1067 = vmatpush3.bf16.msra.mxu0 %v1149_v7  ;;  %1117 = vmatpush3.bf16.msra.mxu1 %v1149_v7 }
  0x23   : > { %1068 = vmatprep.subr.bf16.mxu0 %v1150_v8  ;;  %1110 = vmatprep.subr.bf16.mxu1 %v1150_v8 }
  0x26   : > { %1069 = vmatpush3.bf16.msra.mxu0 %v1150_v8  ;;  %1118 = vmatpush3.bf16.msra.mxu1 %v1150_v8 }
  0x27   : > { %1070 = vmatprep.subr.bf16.mxu0 %v1151_v9  ;;  %1111 = vmatprep.subr.bf16.mxu1 %v1151_v9 }
  0x2a   : > { %1071 = vmatpush3.bf16.msra.mxu0 %v1151_v9  ;;  %1119 = vmatpush3.bf16.msra.mxu1 %v1151_v9 }
  0x2d   : > { %1073 = vmatmul.mubr.bf16.vlgmr.msra.gmra.mxu0 %v1154_v10  ;;  %1089 = vmatmul.mubr.bf16.vlgmr.msra.gmra.mxu1 %v1155_v11 }
  0x2e   : > { %1076 = vmatprep.mubr.bf16.mxu0 %v1156_v12  ;;  %1092 = vmatprep.mubr.bf16.mxu1 %v1157_v13 }
  0x35   : > { %1077 = vmatmul.mubr.bf16.gmra.mxu0 %v1158_v14  ;;  %1093 = vmatmul.mubr.bf16.gmra.mxu1 %v1159_v15 }
  0x36   : > { %1080 = vmatprep.mubr.bf16.mxu0 %v1160_v16  ;;  %1096 = vmatprep.mubr.bf16.mxu1 %v1161_v17 }
  0x3d   : > { %1081 = vmatmul.mubr.bf16.gmra.mxu0 %v1162_v18  ;;  %1097 = vmatmul.mubr.bf16.gmra.mxu1 %v1163_v19 }
  0x3e   : > { %1084 = vmatprep.mubr.bf16.mxu0 %v1164_v20  ;;  %1100 = vmatprep.mubr.bf16.mxu1 %v1165_v21 }
  0x45   : > { %1085 = vmatmul.mubr.bf16.gmra.mxu0 %v1166_v22  ;;  %1101 = vmatmul.mubr.bf16.gmra.mxu1 %v1167_v23 }
  0xed   : > { %v1074_v25 = vpop.f32.mrf.mxu0  ;;  %v1090_v26 = vpop.f32.mrf.mxu1 }
  0xee   : > { %v789_v27 = vadd.f32 %v1074_v25, %v1281_v24  ;;  %v805_v28 = vadd.f32 %v1090_v26, %v1281_v24 }
  0xef   : > { %v554_v29 = vpop.f32.mrf.mxu0  ;;  %v618_v30 = vpop.f32.mrf.mxu1 }
  0xf0   : > { %v821_v31 = vmax.f32 %v789_v27, 0.0  ;;  %v837_v32 = vmax.f32 %v805_v28, 0.0  ;;  %v787_v33 = vadd.f32 %v1281_v24, %v554_v29  ;;  %v803_v34 = vadd.f32 %v1281_v24, %v618_v30 }
  0xf1   : > { %v1075_v35 = vpop.f32.mrf.mxu0  ;;  %v1091_v36 = vpop.f32.mrf.mxu1 }
  0xf2   : > { %853 = vst [vmem:[%s1289_s19 + $0x10] sm:$0xff] %v821_v31  ;;  %869 = vst [vmem:[%s1289_s19 + $0x90] sm:$0xff] %v837_v32  ;;  %v819_v37 = vmax.f32 %v787_v33, 0.0  ;;  %v835_v38 = vmax.f32 %v803_v34, 0.0  ;;  %v790_v39 = vadd.f32 %v1075_v35, %v1281_v24  ;;  %v806_v40 = vadd.f32 %v1091_v36, %v1281_v24 }
  0xf3   : > { %v557_v41 = vpop.f32.mrf.mxu0  ;;  %v621_v42 = vpop.f32.mrf.mxu1 }
  0xf4   : > { %851 = vst [vmem:[%s1289_s19] sm:$0xff] %v819_v37  ;;  %867 = vst [vmem:[%s1289_s19 + $0x80] sm:$0xff] %v835_v38  ;;  %v822_v43 = vmax.f32 %v790_v39, 0.0  ;;  %v838_v44 = vmax.f32 %v806_v40, 0.0  ;;  %v788_v45 = vadd.f32 %v1281_v24, %v557_v41  ;;  %v804_v46 = vadd.f32 %v1281_v24, %v621_v42 }
  0xf5   : > { %v1078_v47 = vpop.f32.mrf.mxu0  ;;  %v1094_v48 = vpop.f32.mrf.mxu1 }
  0xf6   : > { %854 = vst [vmem:[%s1289_s19 + $0x18] sm:$0xff] %v822_v43  ;;  %870 = vst [vmem:[%s1289_s19 + $0x98] sm:$0xff] %v838_v44  ;;  %v820_v49 = vmax.f32 %v788_v45, 0.0  ;;  %v836_v50 = vmax.f32 %v804_v46, 0.0  ;;  %v793_v51 = vadd.f32 %v1078_v47, %v1281_v24  ;;  %v809_v52 = vadd.f32 %v1094_v48, %v1281_v24 }
  0xf7   : > { %v570_v53 = vpop.f32.mrf.mxu0  ;;  %v634_v54 = vpop.f32.mrf.mxu1 }
  0xf8   : > { %852 = vst [vmem:[%s1289_s19 + $0x8] sm:$0xff] %v820_v49  ;;  %868 = vst [vmem:[%s1289_s19 + $0x88] sm:$0xff] %v836_v50  ;;  %v825_v55 = vmax.f32 %v793_v51, 0.0  ;;  %v841_v56 = vmax.f32 %v809_v52, 0.0  ;;  %v791_v57 = vadd.f32 %v1281_v24, %v570_v53  ;;  %v807_v58 = vadd.f32 %v1281_v24, %v634_v54 }
  0xf9   : > { %v1079_v59 = vpop.f32.mrf.mxu0  ;;  %v1095_v60 = vpop.f32.mrf.mxu1 }
  0xfa   : > { %857 = vst [vmem:[%s1289_s19 + $0x30] sm:$0xff] %v825_v55  ;;  %873 = vst [vmem:[%s1289_s19 + $0xb0] sm:$0xff] %v841_v56  ;;  %v823_v61 = vmax.f32 %v791_v57, 0.0  ;;  %v839_v62 = vmax.f32 %v807_v58, 0.0  ;;  %v794_v63 = vadd.f32 %v1079_v59, %v1281_v24  ;;  %v810_v0 = vadd.f32 %v1095_v60, %v1281_v24 }
  0xfb   : > { %v573_v1 = vpop.f32.mrf.mxu0  ;;  %v637_v2 = vpop.f32.mrf.mxu1 }
  0xfc   : > { %855 = vst [vmem:[%s1289_s19 + $0x20] sm:$0xff] %v823_v61  ;;  %871 = vst [vmem:[%s1289_s19 + $0xa0] sm:$0xff] %v839_v62  ;;  %v826_v3 = vmax.f32 %v794_v63, 0.0  ;;  %v842_v4 = vmax.f32 %v810_v0, 0.0  ;;  %v792_v5 = vadd.f32 %v1281_v24, %v573_v1  ;;  %v808_v6 = vadd.f32 %v1281_v24, %v637_v2 }
  0xfd   : > { %v1082_v7 = vpop.f32.mrf.mxu0  ;;  %v1098_v8 = vpop.f32.mrf.mxu1 }
  0xfe   : > { %858 = vst [vmem:[%s1289_s19 + $0x38] sm:$0xff] %v826_v3  ;;  %874 = vst [vmem:[%s1289_s19 + $0xb8] sm:$0xff] %v842_v4  ;;  %v824_v9 = vmax.f32 %v792_v5, 0.0  ;;  %v840_v10 = vmax.f32 %v808_v6, 0.0  ;;  %v797_v11 = vadd.f32 %v1082_v7, %v1281_v24  ;;  %v813_v12 = vadd.f32 %v1098_v8, %v1281_v24 }
  0xff   : > { %v586_v13 = vpop.f32.mrf.mxu0  ;;  %v650_v14 = vpop.f32.mrf.mxu1 }
 0x100   : > { %856 = vst [vmem:[%s1289_s19 + $0x28] sm:$0xff] %v824_v9  ;;  %872 = vst [vmem:[%s1289_s19 + $0xa8] sm:$0xff] %v840_v10  ;;  %v829_v15 = vmax.f32 %v797_v11, 0.0  ;;  %v845_v16 = vmax.f32 %v813_v12, 0.0  ;;  %v795_v17 = vadd.f32 %v1281_v24, %v586_v13  ;;  %v811_v18 = vadd.f32 %v1281_v24, %v650_v14 }
 0x101   : > { %v1083_v19 = vpop.f32.mrf.mxu0  ;;  %v1099_v20 = vpop.f32.mrf.mxu1 }
 0x102   : > { %861 = vst [vmem:[%s1289_s19 + $0x50] sm:$0xff] %v829_v15  ;;  %877 = vst [vmem:[%s1289_s19 + $0xd0] sm:$0xff] %v845_v16  ;;  %v827_v21 = vmax.f32 %v795_v17, 0.0  ;;  %v843_v22 = vmax.f32 %v811_v18, 0.0  ;;  %v798_v23 = vadd.f32 %v1083_v19, %v1281_v24  ;;  %v814_v25 = vadd.f32 %v1099_v20, %v1281_v24 }
 0x103   : > { %v589_v26 = vpop.f32.mrf.mxu0  ;;  %v653_v27 = vpop.f32.mrf.mxu1 }
 0x104   : > { %859 = vst [vmem:[%s1289_s19 + $0x40] sm:$0xff] %v827_v21  ;;  %875 = vst [vmem:[%s1289_s19 + $0xc0] sm:$0xff] %v843_v22  ;;  %v830_v28 = vmax.f32 %v798_v23, 0.0  ;;  %v846_v29 = vmax.f32 %v814_v25, 0.0  ;;  %v796_v30 = vadd.f32 %v1281_v24, %v589_v26  ;;  %v812_v31 = vadd.f32 %v1281_v24, %v653_v27 }
 0x105   : > { %v1086_v32 = vpop.f32.mrf.mxu0  ;;  %v1102_v33 = vpop.f32.mrf.mxu1 }
 0x106   : > { %862 = vst [vmem:[%s1289_s19 + $0x58] sm:$0xff] %v830_v28  ;;  %878 = vst [vmem:[%s1289_s19 + $0xd8] sm:$0xff] %v846_v29  ;;  %v828_v34 = vmax.f32 %v796_v30, 0.0  ;;  %v844_v35 = vmax.f32 %v812_v31, 0.0  ;;  %v801_v36 = vadd.f32 %v1086_v32, %v1281_v24  ;;  %v817_v37 = vadd.f32 %v1102_v33, %v1281_v24 }
 0x107   : > { %v602_v38 = vpop.f32.mrf.mxu0  ;;  %v666_v39 = vpop.f32.mrf.mxu1 }
 0x108   : > { %860 = vst [vmem:[%s1289_s19 + $0x48] sm:$0xff] %v828_v34  ;;  %876 = vst [vmem:[%s1289_s19 + $0xc8] sm:$0xff] %v844_v35  ;;  %v833_v40 = vmax.f32 %v801_v36, 0.0  ;;  %v849_v41 = vmax.f32 %v817_v37, 0.0  ;;  %v799_v42 = vadd.f32 %v1281_v24, %v602_v38  ;;  %v815_v43 = vadd.f32 %v1281_v24, %v666_v39 }
 0x109   : > { %v1087_v44 = vpop.f32.mrf.mxu0  ;;  %v1103_v45 = vpop.f32.mrf.mxu1 }
 0x10a   : > { %865 = vst [vmem:[%s1289_s19 + $0x70] sm:$0xff] %v833_v40  ;;  %881 = vst [vmem:[%s1289_s19 + $0xf0] sm:$0xff] %v849_v41  ;;  %v831_v46 = vmax.f32 %v799_v42, 0.0  ;;  %v847_v47 = vmax.f32 %v815_v43, 0.0  ;;  %v802_v48 = vadd.f32 %v1087_v44, %v1281_v24  ;;  %v818_v49 = vadd.f32 %v1103_v45, %v1281_v24 }
 0x10b   : > { %v605_v50 = vpop.f32.mrf.mxu0  ;;  %v669_v51 = vpop.f32.mrf.mxu1 }
 0x10c   : > { %863 = vst [vmem:[%s1289_s19 + $0x60] sm:$0xff] %v831_v46  ;;  %879 = vst [vmem:[%s1289_s19 + $0xe0] sm:$0xff] %v847_v47  ;;  %v834_v52 = vmax.f32 %v802_v48, 0.0  ;;  %v850_v53 = vmax.f32 %v818_v49, 0.0  ;;  %v800_v54 = vadd.f32 %v1281_v24, %v605_v50  ;;  %v816_v55 = vadd.f32 %v1281_v24, %v669_v51 }
 0x10e   : > { %866 = vst [vmem:[%s1289_s19 + $0x78] sm:$0xff] %v834_v52  ;;  %882 = vst [vmem:[%s1289_s19 + $0xf8] sm:$0xff] %v850_v53  ;;  %v832_v56 = vmax.f32 %v800_v54, 0.0  ;;  %v848_v57 = vmax.f32 %v816_v55, 0.0 }
 0x110   : > { %864 = vst [vmem:[%s1289_s19 + $0x68] sm:$0xff] %v832_v56  ;;  %880 = vst [vmem:[%s1289_s19 + $0xe8] sm:$0xff] %v848_v57 }
 0x111 PF: > { %s13_s14 = sadd.s32 1, %s1190_s14   ;;  %s1366_s12 = smov %s1186_s13 }
 0x112   : > { %p10_p5 = scmp.ge.s32.totalorder %s13_s14, 10   ;;  %s1367_s13 = smov %s1369_s15 }
 0x114   :  { %12 = sbr.rel (!%p10_p5) target bundleno = 2 (0x2), region = 76 }

// kernel: crnn_forward.18
= control target key start
LH: loop header
LB: loop body
LE: loop exit
PB: predicated region body
PF: predicated region fallthrough
CT: control target
= control target key end

     0   :  { %s1451_s12 = smov 0   ;;  %s1453_s13 = smov 0   ;;  %s1712_s0 = inlined_call_operand.vmem [shape: bf16[512,640], index: 0, kind: input, shape index: {}]   ;;  %s1713_s1 = inlined_call_operand.vmem [shape: bf16[640,128], index: 1, kind: input, shape index: {}]   ;;  %s1714_s2 = inlined_call_operand.vmem [shape: f32[1,128], index: 2, kind: input, shape index: {}]   ;;  %s1715_s3 = inlined_call_operand.vmem [shape: f32[512,128], index: 3, kind: output, shape index: {}]  }
   0x1   :  { %s1455_s14 = smov 0   ;;  %s1457_s15 = smov 0  }
   0x2   :  { %s1459_s16 = smov 0   ;;  %s1461_s17 = smov 0  }
   0x3   :  { %s1463_s18 = smov 0  }
   0x4 LB: > { %s25_s19 = sadd.s32 1, %s1420_s16  ;;  %s32_s20 = sadd.s32 1, %s1424_s17  ;;  %s1428_s18 = sphi %s1463_s18, %s13_s18   ;;  %s1424_s17 = sphi %s1461_s17, %s1721_s17   ;;  %s1420_s16 = sphi %s1459_s16, %s1720_s16   ;;  %s1416_s15 = sphi %s1457_s15, %s1719_s15   ;;  %s1412_s14 = sphi %s1455_s14, %s1718_s14   ;;  %s1408_s13 = sphi %s1453_s13, %s1717_s13   ;;  %s1404_s12 = sphi %s1451_s12, %s1716_s12  }
   0x5   : > { %p26_p0 = scmp.ge.s32.totalorder %s25_s19, 5  ;;  %p48_p1 = scmp.ne.s32.totalorder %s1408_s13, %s1404_s12 }
   0x6   : > { %p49_p2 = scmp.eq.s32.totalorder %s1428_s18, 0  ;;  %s41_s24 = sadd.s32 1, %s1408_s13 }
   0x7   : > { %s1723_s19 = smov (%p26_p0, %s25_s19), 0  ;;  %s1725_s20 = smov (!%p26_p0, %s32_s20), %s1424_s17 }
   0x8   : > { %p50_p3 = por %p49_p2, %p48_p1  ;;  %p34_p4 = scmp.ge.s32.totalorder %s1725_s20, 2 }
   0x9   : > { %s37_s21 = ssub.s32 %s1420_s16, %s1723_s19  ;;  %p1164_p6 = scmp.ge.s32.totalorder %s1428_s18, 10 }
   0xa   : > { %s1727_s20 = smov (%p34_p4, %s1725_s20), 0 }
   0xb   : > { %s36_s22 = ssub.s32 %s1424_s17, %s1727_s20  ;;  %162 = sbr.rel (%p1164_p6) target bundleno = 44 (0x2c), region = 20 }
   0xc   : > { %s38_s23 = sor.u32 %s37_s21, %s36_s22 }
   0xd   : > { %p39_p5 = scmp.eq.s32.totalorder %s38_s23, 0 }
   0xf   : > { %s1502_s25 = scalar_select %p39_p5, %s1408_s13, %s41_s24  }
  0x10   : > { %165 = sbr.rel (!%p50_p3) target bundleno = 44 (0x2c), region = 24  ;;  %s167_s26 = sand.u32 (%p50_p3), 1, %s1408_s13  }
  0x11   : > { %s1292_s27 = smul.u32 (%p50_p3), 160, %s1424_s17  ;;  %s1165_s28 = sshll.u32 (%p50_p3), %s167_s26, 7 }
  0x12   : > { %s1516_s7 = scalar_lea.vmem (%p50_p3), [#allocation3], %s1165_s28 }
  0x13   : > { %s172_s29 = sadd.s32 (%p50_p3), %s1420_s16, %s1292_s27 }
  0x14   : > { %s1168_s30 = sshll.u32 (%p50_p3), %s172_s29, 2 }
  0x15   : > { %s1511_s6 = scalar_lea.vmem %s1712_s0, %s1168_s30 }
  0x16   : > { %v191_v0 = vld [vmem:[%s1511_s6] sm:$0xf]  ;;  %v193_v1 = vld [vmem:[%s1511_s6 + $0x14] sm:$0xf]  ;;  %v195_v2 = vld [vmem:[%s1511_s6 + $0x28] sm:$0xf] }
  0x17   : > { %192 = vst [vmem:[%s1516_s7] sm:$0xf] %v191_v0  ;;  %194 = vst [vmem:[%s1516_s7 + $0x4] sm:$0xf] %v193_v1  ;;  %v197_v3 = vld [vmem:[%s1511_s6 + $0x3c] sm:$0xf] }
  0x18   : > { %196 = vst [vmem:[%s1516_s7 + $0x8] sm:$0xf] %v195_v2  ;;  %v199_v4 = vld [vmem:[%s1511_s6 + $0x50] sm:$0xf]  ;;  %v201_v5 = vld [vmem:[%s1511_s6 + $0x64] sm:$0xf] }
  0x19   : > { %198 = vst [vmem:[%s1516_s7 + $0xc] sm:$0xf] %v197_v3  ;;  %200 = vst [vmem:[%s1516_s7 + $0x10] sm:$0xf] %v199_v4  ;;  %v203_v6 = vld [vmem:[%s1511_s6 + $0x78] sm:$0xf] }
  0x1a   : > { %202 = vst [vmem:[%s1516_s7 + $0x14] sm:$0xf] %v201_v5  ;;  %v205_v7 = vld [vmem:[%s1511_s6 + $0x8c] sm:$0xf]  ;;  %v207_v8 = vld [vmem:[%s1511_s6 + $0xa0] sm:$0xf] }
  0x1b   : > { %204 = vst [vmem:[%s1516_s7 + $0x18] sm:$0xf] %v203_v6  ;;  %206 = vst [vmem:[%s1516_s7 + $0x1c] sm:$0xf] %v205_v7  ;;  %v209_v9 = vld [vmem:[%s1511_s6 + $0xb4] sm:$0xf] }
  0x1c   : > { %208 = vst [vmem:[%s1516_s7 + $0x20] sm:$0xf] %v207_v8  ;;  %v211_v10 = vld [vmem:[%s1511_s6 + $0xc8] sm:$0xf]  ;;  %v213_v11 = vld [vmem:[%s1511_s6 + $0xdc] sm:$0xf] }
  0x1d   : > { %210 = vst [vmem:[%s1516_s7 + $0x24] sm:$0xf] %v209_v9  ;;  %212 = vst [vmem:[%s1516_s7 + $0x28] sm:$0xf] %v211_v10  ;;  %v215_v12 = vld [vmem:[%s1511_s6 + $0xf0] sm:$0xf] }
  0x1e   : > { %214 = vst [vmem:[%s1516_s7 + $0x2c] sm:$0xf] %v213_v11  ;;  %v217_v13 = vld [vmem:[%s1511_s6 + $0x104] sm:$0xf]  ;;  %v219_v14 = vld [vmem:[%s1511_s6 + $0x118] sm:$0xf] }
  0x1f   : > { %216 = vst [vmem:[%s1516_s7 + $0x30] sm:$0xf] %v215_v12  ;;  %218 = vst [vmem:[%s1516_s7 + $0x34] sm:$0xf] %v217_v13  ;;  %v221_v15 = vld [vmem:[%s1511_s6 + $0x12c] sm:$0xf] }
  0x20   : > { %220 = vst [vmem:[%s1516_s7 + $0x38] sm:$0xf] %v219_v14  ;;  %v223_v16 = vld [vmem:[%s1511_s6 + $0x140] sm:$0xf]  ;;  %v225_v17 = vld [vmem:[%s1511_s6 + $0x154] sm:$0xf] }
  0x21   : > { %222 = vst [vmem:[%s1516_s7 + $0x3c] sm:$0xf] %v221_v15  ;;  %224 = vst [vmem:[%s1516_s7 + $0x40] sm:$0xf] %v223_v16  ;;  %v227_v18 = vld [vmem:[%s1511_s6 + $0x168] sm:$0xf] }
  0x22   : > { %226 = vst [vmem:[%s1516_s7 + $0x44] sm:$0xf] %v225_v17  ;;  %v229_v19 = vld [vmem:[%s1511_s6 + $0x17c] sm:$0xf]  ;;  %v231_v20 = vld [vmem:[%s1511_s6 + $0x190] sm:$0xf] }
  0x23   : > { %228 = vst [vmem:[%s1516_s7 + $0x48] sm:$0xf] %v227_v18  ;;  %230 = vst [vmem:[%s1516_s7 + $0x4c] sm:$0xf] %v229_v19  ;;  %v233_v21 = vld [vmem:[%s1511_s6 + $0x1a4] sm:$0xf] }
  0x24   : > { %232 = vst [vmem:[%s1516_s7 + $0x50] sm:$0xf] %v231_v20  ;;  %v235_v22 = vld [vmem:[%s1511_s6 + $0x1b8] sm:$0xf]  ;;  %v237_v23 = vld [vmem:[%s1511_s6 + $0x1cc] sm:$0xf] }
  0x25   : > { %234 = vst [vmem:[%s1516_s7 + $0x54] sm:$0xf] %v233_v21  ;;  %236 = vst [vmem:[%s1516_s7 + $0x58] sm:$0xf] %v235_v22  ;;  %v239_v24 = vld [vmem:[%s1511_s6 + $0x1e0] sm:$0xf] }
  0x26   : > { %238 = vst [vmem:[%s1516_s7 + $0x5c] sm:$0xf] %v237_v23  ;;  %v241_v25 = vld [vmem:[%s1511_s6 + $0x1f4] sm:$0xf]  ;;  %v243_v26 = vld [vmem:[%s1511_s6 + $0x208] sm:$0xf] }
  0x27   : > { %240 = vst [vmem:[%s1516_s7 + $0x60] sm:$0xf] %v239_v24  ;;  %242 = vst [vmem:[%s1516_s7 + $0x64] sm:$0xf] %v241_v25  ;;  %v245_v27 = vld [vmem:[%s1511_s6 + $0x21c] sm:$0xf] }
  0x28   : > { %244 = vst [vmem:[%s1516_s7 + $0x68] sm:$0xf] %v243_v26  ;;  %v247_v28 = vld [vmem:[%s1511_s6 + $0x230] sm:$0xf]  ;;  %v249_v29 = vld [vmem:[%s1511_s6 + $0x244] sm:$0xf] }
  0x29   : > { %246 = vst [vmem:[%s1516_s7 + $0x6c] sm:$0xf] %v245_v27  ;;  %248 = vst [vmem:[%s1516_s7 + $0x70] sm:$0xf] %v247_v28  ;;  %v251_v30 = vld [vmem:[%s1511_s6 + $0x258] sm:$0xf] }
  0x2a   : > { %250 = vst [vmem:[%s1516_s7 + $0x74] sm:$0xf] %v249_v29  ;;  %v253_v31 = vld [vmem:[%s1511_s6 + $0x26c] sm:$0xf]  ;;  %252 = vst [vmem:[%s1516_s7 + $0x78] sm:$0xf] %v251_v30 }
  0x2b   : > { %254 = vst [vmem:[%s1516_s7 + $0x7c] sm:$0xf] %v253_v31 }
  0x2c PF: > { %p1169_p7 = scmp.ge.s32.totalorder %s1428_s18, 1  ;;  %p353_p8 = scmp.lt.s32.totalorder %s1428_s18, 11 }
  0x2e   : > { %p354_p9 = pnand %p1169_p7, %p353_p8 }
  0x2f   : > { %s360_s8 = sand.u32 (!%p354_p9), 1, %s1404_s12   ;;  %s1171_s9 = sshll.u32 (!%p354_p9), %s1412_s14, 4 }
  0x30   : > { %357 = sbr.rel (%p354_p9) target bundleno = 358 (0x166), region = 69  ;;  %s1170_s10 = sshll.u32 (!%p354_p9), %s360_s8, 7 }
  0x31   : > { %p399_p10 = scmp.lt.s32.totalorder (!%p354_p9), %s1171_s9, 79  ;;  %s1173_s11 = sshll.u32 (!%p354_p9), %s1416_s15, 5 }
  0x32   : > { %p411_p11 = scmp.lt.s32.totalorder (!%p354_p9), %s1173_s11, 63  ;;  %s1594_s12 = scalar_lea.vmem (!%p354_p9), [#allocation3], %s1170_s10 }
  0x33   : > { %p1175_p12 = scmp.ne.s32.totalorder (!%p354_p9), %s1412_s14, 0 }
  0x35   : > { %s1729_s9 = smov (!%p399_p10, %s1171_s9), 79  ;;  %s1731_s11 = smov (!%p411_p11, %s1173_s11), 63 }
  0x36   : > { %s1172_s21 = sshll.u32 %s1729_s9, 2  ;;  %s1174_s26 = sshll.u32 %s1731_s11, 3 }
  0x37   : > { %s1587_s24 = scalar_lea.vmem %s1713_s1, %s1172_s21  ;;  %s1592_s29 = scalar_lea.vmem %s1715_s3, %s1174_s26 }
  0x38   : > { %423 = sbr.rel (%p1175_p12) target bundleno = 78 (0x4e), region = 77 }
  0x3d   : > { %v1430_v32 = vmov 0.0  }
  0x3e   : > { %424 = vst [vmem:[#allocation2 + $0xb0] sm:$0xff] %v1430_v32  ;;  %425 = vst [vmem:[#allocation2] sm:$0xff] %v1430_v32 }
  0x3f   : > { %426 = vst [vmem:[#allocation2 + $0xd8] sm:$0xff] %v1430_v32  ;;  %427 = vst [vmem:[#allocation2 + $0x18] sm:$0xff] %v1430_v32 }
  0x40   : > { %428 = vst [vmem:[#allocation2 + $0x50] sm:$0xff] %v1430_v32  ;;  %429 = vst [vmem:[#allocation2 + $0x68] sm:$0xff] %v1430_v32 }
  0x41   : > { %430 = vst [vmem:[#allocation2 + $0x30] sm:$0xff] %v1430_v32  ;;  %431 = vst [vmem:[#allocation2 + $0x48] sm:$0xff] %v1430_v32 }
  0x42   : > { %432 = vst [vmem:[#allocation2 + $0x80] sm:$0xff] %v1430_v32  ;;  %433 = vst [vmem:[#allocation2 + $0x88] sm:$0xff] %v1430_v32 }
  0x43   : > { %434 = vst [vmem:[#allocation2 + $0xe8] sm:$0xff] %v1430_v32  ;;  %435 = vst [vmem:[#allocation2 + $0xb8] sm:$0xff] %v1430_v32 }
  0x44   : > { %436 = vst [vmem:[#allocation2 + $0x60] sm:$0xff] %v1430_v32  ;;  %437 = vst [vmem:[#allocation2 + $0xf0] sm:$0xff] %v1430_v32 }
  0x45   : > { %438 = vst [vmem:[#allocation2 + $0x8] sm:$0xff] %v1430_v32  ;;  %439 = vst [vmem:[#allocation2 + $0x78] sm:$0xff] %v1430_v32 }
  0x46   : > { %440 = vst [vmem:[#allocation2 + $0x38] sm:$0xff] %v1430_v32  ;;  %441 = vst [vmem:[#allocation2 + $0x58] sm:$0xff] %v1430_v32 }
  0x47   : > { %442 = vst [vmem:[#allocation2 + $0x40] sm:$0xff] %v1430_v32  ;;  %443 = vst [vmem:[#allocation2 + $0xc8] sm:$0xff] %v1430_v32 }
  0x48   : > { %444 = vst [vmem:[#allocation2 + $0xe0] sm:$0xff] %v1430_v32  ;;  %445 = vst [vmem:[#allocation2 + $0x90] sm:$0xff] %v1430_v32 }
  0x49   : > { %446 = vst [vmem:[#allocation2 + $0x70] sm:$0xff] %v1430_v32  ;;  %447 = vst [vmem:[#allocation2 + $0xc0] sm:$0xff] %v1430_v32 }
  0x4a   : > { %448 = vst [vmem:[#allocation2 + $0xa8] sm:$0xff] %v1430_v32  ;;  %449 = vst [vmem:[#allocation2 + $0xd0] sm:$0xff] %v1430_v32 }
  0x4b   : > { %450 = vst [vmem:[#allocation2 + $0x10] sm:$0xff] %v1430_v32  ;;  %451 = vst [vmem:[#allocation2 + $0x28] sm:$0xff] %v1430_v32 }
  0x4c   : > { %452 = vst [vmem:[#allocation2 + $0xa0] sm:$0xff] %v1430_v32  ;;  %453 = vst [vmem:[#allocation2 + $0xf8] sm:$0xff] %v1430_v32 }
  0x4d   : > { %454 = vst [vmem:[#allocation2 + $0x20] sm:$0xff] %v1430_v32  ;;  %455 = vst [vmem:[#allocation2 + $0x98] sm:$0xff] %v1430_v32 }
  0x4e PF: > { %v1350_v33 = vld [vmem:[%s1587_s24 + $0x38] sm:$0xff]   ;;  %v1351_v34 = vld [vmem:[%s1587_s24 + $0x30] sm:$0xff]   ;;  %v1352_v35 = vld [vmem:[%s1587_s24 + $0x28] sm:$0xff]   ;;  %p1200_p13 = scmp.ne.s32.totalorder %s1412_s14, 4 }
  0x4f   : > { %1228 = vmatprep.subr.bf16.mxu0 %v1350_v33  ;;  %1276 = vmatprep.subr.bf16.mxu1 %v1350_v33  ;;  %v1353_v36 = vld [vmem:[%s1587_s24 + $0x20] sm:$0xff]   ;;  %v1354_v39 = vld [vmem:[%s1587_s24 + $0x18] sm:$0xff]   ;;  %v1355_v40 = vld [vmem:[%s1587_s24 + $0x10] sm:$0xff]  }
  0x50   : > { %1229 = vmatpush3.bf16.msra.mxu0 %v1350_v33  ;;  %1284 = vmatpush3.bf16.msra.mxu1 %v1350_v33  ;;  %v1358_v37 = vld [vmem:[%s1594_s12] sm:$0xff]   ;;  %v1356_v41 = vld [vmem:[%s1587_s24 + $0x8] sm:$0xff]   ;;  %v1362_v45 = vld [vmem:[%s1594_s12 + $0x10] sm:$0xff]  }
  0x51   : > { %1230 = vmatprep.subr.bf16.mxu0 %v1351_v34  ;;  %1277 = vmatprep.subr.bf16.mxu1 %v1351_v34  ;;  %v1359_v38 = vld [vmem:[%s1594_s12 + $0x40] sm:$0xff]   ;;  %v1360_v43 = vld [vmem:[%s1594_s12 + $0x8] sm:$0xff]   ;;  %v1363_v46 = vld [vmem:[%s1594_s12 + $0x50] sm:$0xff]  }
  0x52   : > { %1244 = vmatprep.mubr.bf16.mxu0 %v1358_v37  ;;  %1260 = vmatprep.mubr.bf16.mxu1 %v1359_v38  ;;  %v1357_v42 = vld [vmem:[%s1587_s24] sm:$0xff]   ;;  %v1361_v44 = vld [vmem:[%s1594_s12 + $0x48] sm:$0xff]   ;;  %v1364_v47 = vld [vmem:[%s1594_s12 + $0x18] sm:$0xff]  }
  0x53   : > { %v1365_v48 = vld [vmem:[%s1594_s12 + $0x58] sm:$0xff]   ;;  %v1366_v49 = vld [vmem:[%s1594_s12 + $0x20] sm:$0xff]   ;;  %v1368_v51 = vld [vmem:[%s1594_s12 + $0x28] sm:$0xff]  }
  0x54   : > { %1231 = vmatpush3.bf16.msra.mxu0 %v1351_v34  ;;  %1285 = vmatpush3.bf16.msra.mxu1 %v1351_v34  ;;  %v1367_v50 = vld [vmem:[%s1594_s12 + $0x60] sm:$0xff]   ;;  %v1369_v52 = vld [vmem:[%s1594_s12 + $0x68] sm:$0xff]   ;;  %v1370_v53 = vld [vmem:[%s1594_s12 + $0x30] sm:$0xff]  }
  0x55   : > { %1232 = vmatprep.subr.bf16.mxu0 %v1352_v35  ;;  %1278 = vmatprep.subr.bf16.mxu1 %v1352_v35  ;;  %v1371_v54 = vld [vmem:[%s1594_s12 + $0x70] sm:$0xff]   ;;  %v1372_v55 = vld [vmem:[%s1594_s12 + $0x38] sm:$0xff]   ;;  %v474_v58 = vld [vmem:[#allocation2 + $0x40] sm:$0xff] }
  0x56   : > { %v1373_v56 = vld [vmem:[%s1594_s12 + $0x78] sm:$0xff]   ;;  %v456_v61 = vld [vmem:[#allocation2 + $0xb0] sm:$0xff]  ;;  %v475_v4 = vld [vmem:[#allocation2 + $0xc8] sm:$0xff] }
  0x57   : > { %v458_v57 = vld [vmem:[#allocation2 + $0xd8] sm:$0xff]  ;;  %v457_v9 = vld [vmem:[#allocation2] sm:$0xff]  ;;  %v462_v15 = vld [vmem:[#allocation2 + $0x30] sm:$0xff] }
  0x58   : > { %1233 = vmatpush3.bf16.msra.mxu0 %v1352_v35  ;;  %1286 = vmatpush3.bf16.msra.mxu1 %v1352_v35  ;;  %v472_v62 = vld [vmem:[#allocation2 + $0x38] sm:$0xff]  ;;  %v478_v16 = vld [vmem:[#allocation2 + $0x70] sm:$0xff]  ;;  %v476_v22 = vld [vmem:[#allocation2 + $0xe0] sm:$0xff] }
  0x59   : > { %1234 = vmatprep.subr.bf16.mxu0 %v1353_v36  ;;  %1279 = vmatprep.subr.bf16.mxu1 %v1353_v36  ;;  %v459_v3 = vld [vmem:[#allocation2 + $0x18] sm:$0xff]  ;;  %v460_v21 = vld [vmem:[#allocation2 + $0x50] sm:$0xff]  ;;  %v463_v27 = vld [vmem:[#allocation2 + $0x48] sm:$0xff] }
  0x5a   : > { %v473_v10 = vld [vmem:[#allocation2 + $0x58] sm:$0xff]  ;;  %v479_v28 = vld [vmem:[#allocation2 + $0xc0] sm:$0xff]  ;;  %v461_v33 = vld [vmem:[#allocation2 + $0x68] sm:$0xff] }
  0x5b   : > { %v477_v34 = vld [vmem:[#allocation2 + $0x90] sm:$0xff] }
  0x5c   : > { %1235 = vmatpush3.bf16.msra.mxu0 %v1353_v36  ;;  %1287 = vmatpush3.bf16.msra.mxu1 %v1353_v36 }
  0x5d   : > { %1236 = vmatprep.subr.bf16.mxu0 %v1354_v39  ;;  %1280 = vmatprep.subr.bf16.mxu1 %v1354_v39 }
  0x60   : > { %1237 = vmatpush3.bf16.msra.mxu0 %v1354_v39  ;;  %1288 = vmatpush3.bf16.msra.mxu1 %v1354_v39  ;;  %v466_v39 = vld [vmem:[#allocation2 + $0xe8] sm:$0xff] }
  0x61   : > { %1238 = vmatprep.subr.bf16.mxu0 %v1355_v40  ;;  %1281 = vmatprep.subr.bf16.mxu1 %v1355_v40 }
  0x64   : > { %1239 = vmatpush3.bf16.msra.mxu0 %v1355_v40  ;;  %1289 = vmatpush3.bf16.msra.mxu1 %v1355_v40  ;;  %v482_v40 = vld [vmem:[#allocation2 + $0x10] sm:$0xff] }
  0x65   : > { %1240 = vmatprep.subr.bf16.mxu0 %v1356_v41  ;;  %1282 = vmatprep.subr.bf16.mxu1 %v1356_v41 }
  0x68   : > { %1241 = vmatpush3.bf16.msra.mxu0 %v1356_v41  ;;  %1290 = vmatpush3.bf16.msra.mxu1 %v1356_v41 }
  0x69   : > { %1242 = vmatprep.subr.bf16.mxu0 %v1357_v42  ;;  %1283 = vmatprep.subr.bf16.mxu1 %v1357_v42 }
  0x6c   : > { %1243 = vmatpush3.bf16.msra.mxu0 %v1357_v42  ;;  %1291 = vmatpush3.bf16.msra.mxu1 %v1357_v42 }
  0x6f   : > { %1245 = vmatmul.mubr.bf16.vlgmr.msra.gmra.mxu0 %v1360_v43  ;;  %1261 = vmatmul.mubr.bf16.vlgmr.msra.gmra.mxu1 %v1361_v44 }
  0x70   : > { %1248 = vmatprep.mubr.bf16.mxu0 %v1362_v45  ;;  %1264 = vmatprep.mubr.bf16.mxu1 %v1363_v46  ;;  %v464_v45 = vld [vmem:[#allocation2 + $0x80] sm:$0xff]  ;;  %v480_v46 = vld [vmem:[#allocation2 + $0xa8] sm:$0xff] }
  0x77   : > { %1249 = vmatmul.mubr.bf16.gmra.mxu0 %v1364_v47  ;;  %1265 = vmatmul.mubr.bf16.gmra.mxu1 %v1365_v48 }
  0x78   : > { %1252 = vmatprep.mubr.bf16.mxu0 %v1366_v49  ;;  %1268 = vmatprep.mubr.bf16.mxu1 %v1367_v50 }
  0x7f   : > { %1253 = vmatmul.mubr.bf16.gmra.mxu0 %v1368_v51  ;;  %1269 = vmatmul.mubr.bf16.gmra.mxu1 %v1369_v52  ;;  %v467_v51 = vld [vmem:[#allocation2 + $0xb8] sm:$0xff]  ;;  %v483_v52 = vld [vmem:[#allocation2 + $0x28] sm:$0xff] }
  0x80   : > { %1256 = vmatprep.mubr.bf16.mxu0 %v1370_v53  ;;  %1272 = vmatprep.mubr.bf16.mxu1 %v1371_v54 }
  0x87   : > { %1257 = vmatmul.mubr.bf16.gmra.mxu0 %v1372_v55  ;;  %1273 = vmatmul.mubr.bf16.gmra.mxu1 %v1373_v56 }
 0x12f   : > { %v1246_v59 = vpop.f32.mrf.mxu0  ;;  %v1262_v60 = vpop.f32.mrf.mxu1 }
 0x130   : > { %v843_v63 = vadd.f32 %v1246_v59, %v458_v57  ;;  %v859_v0 = vadd.f32 %v1262_v60, %v474_v58  ;;  %v465_v57 = vld [vmem:[#allocation2 + $0x88] sm:$0xff]  ;;  %v481_v58 = vld [vmem:[#allocation2 + $0xd0] sm:$0xff] }
 0x131   : > { %v714_v1 = vpop.f32.mrf.mxu0  ;;  %v778_v2 = vpop.f32.mrf.mxu1 }
 0x132   : > { %875 = vst [vmem:[#allocation2 + $0xd8] sm:$0xff] %v843_v63  ;;  %891 = vst [vmem:[#allocation2 + $0x40] sm:$0xff] %v859_v0  ;;  %v841_v5 = vadd.f32 %v714_v1, %v456_v61  ;;  %v857_v6 = vadd.f32 %v778_v2, %v472_v62  ;;  %v470_v63 = vld [vmem:[#allocation2 + $0x8] sm:$0xff]  ;;  %v486_v0 = vld [vmem:[#allocation2 + $0x20] sm:$0xff] }
 0x133   : > { %v1247_v7 = vpop.f32.mrf.mxu0  ;;  %v1263_v8 = vpop.f32.mrf.mxu1 }
 0x134   : > { %873 = vst [vmem:[#allocation2 + $0xb0] sm:$0xff] %v841_v5  ;;  %889 = vst [vmem:[#allocation2 + $0x38] sm:$0xff] %v857_v6  ;;  %v844_v11 = vadd.f32 %v1247_v7, %v459_v3  ;;  %v860_v12 = vadd.f32 %v1263_v8, %v475_v4  ;;  %v468_v5 = vld [vmem:[#allocation2 + $0x60] sm:$0xff] }
 0x135   : > { %v717_v13 = vpop.f32.mrf.mxu0  ;;  %v781_v14 = vpop.f32.mrf.mxu1  ;;  %v484_v6 = vld [vmem:[#allocation2 + $0xa0] sm:$0xff] }
 0x136   : > { %876 = vst [vmem:[#allocation2 + $0x18] sm:$0xff] %v844_v11  ;;  %892 = vst [vmem:[#allocation2 + $0xc8] sm:$0xff] %v860_v12  ;;  %v842_v17 = vadd.f32 %v717_v13, %v457_v9  ;;  %v858_v18 = vadd.f32 %v781_v14, %v473_v10  ;;  %v471_v11 = vld [vmem:[#allocation2 + $0x78] sm:$0xff] }
 0x137   : > { %v1250_v19 = vpop.f32.mrf.mxu0  ;;  %v1266_v20 = vpop.f32.mrf.mxu1  ;;  %v487_v12 = vld [vmem:[#allocation2 + $0x98] sm:$0xff] }
 0x138   : > { %874 = vst [vmem:[#allocation2] sm:$0xff] %v842_v17  ;;  %890 = vst [vmem:[#allocation2 + $0x58] sm:$0xff] %v858_v18  ;;  %v847_v23 = vadd.f32 %v1250_v19, %v462_v15  ;;  %v863_v24 = vadd.f32 %v1266_v20, %v478_v16  ;;  %v469_v17 = vld [vmem:[#allocation2 + $0xf0] sm:$0xff]  ;;  %v485_v18 = vld [vmem:[#allocation2 + $0xf8] sm:$0xff] }
 0x139   : > { %v730_v25 = vpop.f32.mrf.mxu0  ;;  %v794_v26 = vpop.f32.mrf.mxu1 }
 0x13a   : > { %879 = vst [vmem:[#allocation2 + $0x30] sm:$0xff] %v847_v23  ;;  %895 = vst [vmem:[#allocation2 + $0x70] sm:$0xff] %v863_v24  ;;  %v845_v29 = vadd.f32 %v730_v25, %v460_v21  ;;  %v861_v30 = vadd.f32 %v794_v26, %v476_v22 }
 0x13b   : > { %v1251_v31 = vpop.f32.mrf.mxu0  ;;  %v1267_v32 = vpop.f32.mrf.mxu1 }
 0x13c   : > { %877 = vst [vmem:[#allocation2 + $0x50] sm:$0xff] %v845_v29  ;;  %893 = vst [vmem:[#allocation2 + $0xe0] sm:$0xff] %v861_v30  ;;  %v848_v35 = vadd.f32 %v1251_v31, %v463_v27  ;;  %v864_v36 = vadd.f32 %v1267_v32, %v479_v28 }
 0x13d   : > { %v733_v37 = vpop.f32.mrf.mxu0  ;;  %v797_v38 = vpop.f32.mrf.mxu1 }
 0x13e   : > { %880 = vst [vmem:[#allocation2 + $0x48] sm:$0xff] %v848_v35  ;;  %896 = vst [vmem:[#allocation2 + $0xc0] sm:$0xff] %v864_v36  ;;  %v846_v41 = vadd.f32 %v733_v37, %v461_v33  ;;  %v862_v42 = vadd.f32 %v797_v38, %v477_v34 }
 0x13f   : > { %v1254_v43 = vpop.f32.mrf.mxu0  ;;  %v1270_v44 = vpop.f32.mrf.mxu1 }
 0x140   : > { %878 = vst [vmem:[#allocation2 + $0x68] sm:$0xff] %v846_v41  ;;  %894 = vst [vmem:[#allocation2 + $0x90] sm:$0xff] %v862_v42  ;;  %v851_v47 = vadd.f32 %v1254_v43, %v466_v39  ;;  %v867_v48 = vadd.f32 %v1270_v44, %v482_v40 }
 0x141   : > { %v746_v49 = vpop.f32.mrf.mxu0  ;;  %v810_v50 = vpop.f32.mrf.mxu1 }
 0x142   : > { %883 = vst [vmem:[#allocation2 + $0xe8] sm:$0xff] %v851_v47  ;;  %899 = vst [vmem:[#allocation2 + $0x10] sm:$0xff] %v867_v48  ;;  %v849_v53 = vadd.f32 %v746_v49, %v464_v45  ;;  %v865_v54 = vadd.f32 %v810_v50, %v480_v46 }
 0x143   : > { %v1255_v55 = vpop.f32.mrf.mxu0  ;;  %v1271_v56 = vpop.f32.mrf.mxu1 }
 0x144   : > { %881 = vst [vmem:[#allocation2 + $0x80] sm:$0xff] %v849_v53  ;;  %897 = vst [vmem:[#allocation2 + $0xa8] sm:$0xff] %v865_v54  ;;  %v852_v59 = vadd.f32 %v1255_v55, %v467_v51  ;;  %v868_v60 = vadd.f32 %v1271_v56, %v483_v52 }
 0x145   : > { %v749_v61 = vpop.f32.mrf.mxu0  ;;  %v813_v62 = vpop.f32.mrf.mxu1 }
 0x146   : > { %884 = vst [vmem:[#allocation2 + $0xb8] sm:$0xff] %v852_v59  ;;  %900 = vst [vmem:[#allocation2 + $0x28] sm:$0xff] %v868_v60  ;;  %v850_v1 = vadd.f32 %v749_v61, %v465_v57  ;;  %v866_v2 = vadd.f32 %v813_v62, %v481_v58 }
 0x147   : > { %v1258_v3 = vpop.f32.mrf.mxu0  ;;  %v1274_v4 = vpop.f32.mrf.mxu1 }
 0x148   : > { %882 = vst [vmem:[#allocation2 + $0x88] sm:$0xff] %v850_v1  ;;  %898 = vst [vmem:[#allocation2 + $0xd0] sm:$0xff] %v866_v2  ;;  %v855_v7 = vadd.f32 %v1258_v3, %v470_v63  ;;  %v871_v8 = vadd.f32 %v1274_v4, %v486_v0 }
 0x149   : > { %v762_v9 = vpop.f32.mrf.mxu0  ;;  %v826_v10 = vpop.f32.mrf.mxu1 }
 0x14a   : > { %887 = vst [vmem:[#allocation2 + $0x8] sm:$0xff] %v855_v7  ;;  %903 = vst [vmem:[#allocation2 + $0x20] sm:$0xff] %v871_v8  ;;  %v853_v13 = vadd.f32 %v762_v9, %v468_v5  ;;  %v869_v14 = vadd.f32 %v826_v10, %v484_v6 }
 0x14b   : > { %v1259_v15 = vpop.f32.mrf.mxu0  ;;  %v1275_v16 = vpop.f32.mrf.mxu1 }
 0x14c   : > { %885 = vst [vmem:[#allocation2 + $0x60] sm:$0xff] %v853_v13  ;;  %901 = vst [vmem:[#allocation2 + $0xa0] sm:$0xff] %v869_v14  ;;  %v856_v19 = vadd.f32 %v1259_v15, %v471_v11  ;;  %v872_v20 = vadd.f32 %v1275_v16, %v487_v12  ;;  %908 = sbr.rel (%p1200_p13) target bundleno = 358 (0x166), region = 81 }
 0x14d   : > { %v765_v21 = vpop.f32.mrf.mxu0  ;;  %v829_v22 = vpop.f32.mrf.mxu1 }
 0x14e   : > { %888 = vst [vmem:[#allocation2 + $0x78] sm:$0xff] %v856_v19  ;;  %904 = vst [vmem:[#allocation2 + $0x98] sm:$0xff] %v872_v20  ;;  %v854_v23 = vadd.f32 %v765_v21, %v469_v17  ;;  %v870_v24 = vadd.f32 %v829_v22, %v485_v18 }
 0x150   : > { %886 = vst [vmem:[#allocation2 + $0xf0] sm:$0xff] %v854_v23  ;;  %902 = vst [vmem:[#allocation2 + $0xf8] sm:$0xff] %v870_v24 }
 0x151   : > { %v909_v25 = vld [vmem:[#allocation2 + $0xb0] sm:$0xff]  ;;  %v1625_v26 = vld [vmem:[%s1714_s2] ss:$0 sm:$0xff]  ;;  %v911_v30 = vld [vmem:[#allocation2 + $0xd8] sm:$0xff] }
 0x152   : > { %v910_v27 = vld [vmem:[#allocation2] sm:$0xff]  ;;  %v948_v28 = vadd.f32 %v1625_v26, %v909_v25  ;;  %v912_v31 = vld [vmem:[#allocation2 + $0x18] sm:$0xff]  ;;  %v913_v32 = vld [vmem:[#allocation2 + $0x50] sm:$0xff]  ;;  %v950_v33 = vadd.f32 %v1625_v26, %v911_v30 }
 0x153   : > { %v949_v29 = vadd.f32 %v1625_v26, %v910_v27  ;;  %v951_v34 = vadd.f32 %v1625_v26, %v912_v31  ;;  %v952_v35 = vadd.f32 %v1625_v26, %v913_v32  ;;  %v914_v36 = vld [vmem:[#allocation2 + $0x68] sm:$0xff]  ;;  %v915_v37 = vld [vmem:[#allocation2 + $0x30] sm:$0xff]  ;;  %v917_v43 = vld [vmem:[#allocation2 + $0x80] sm:$0xff] }
 0x154   : > { %v916_v38 = vld [vmem:[#allocation2 + $0x48] sm:$0xff]  ;;  %v980_v39 = vmax.f32 %v948_v28, 0.0  ;;  %v953_v41 = vadd.f32 %v1625_v26, %v914_v36  ;;  %v954_v42 = vadd.f32 %v1625_v26, %v915_v37  ;;  %v982_v46 = vmax.f32 %v950_v33, 0.0  ;;  %v920_v50 = vld [vmem:[#allocation2 + $0xb8] sm:$0xff]  ;;  %v921_v51 = vld [vmem:[#allocation2 + $0x60] sm:$0xff] }
 0x155   : > { %v981_v40 = vmax.f32 %v949_v29, 0.0  ;;  %v918_v44 = vld [vmem:[#allocation2 + $0x88] sm:$0xff]  ;;  %v983_v47 = vmax.f32 %v951_v34, 0.0  ;;  %v984_v48 = vmax.f32 %v952_v35, 0.0  ;;  %v955_v49 = vadd.f32 %v1625_v26, %v916_v38  ;;  %v924_v58 = vld [vmem:[#allocation2 + $0x78] sm:$0xff]  ;;  %v927_v5 = vld [vmem:[#allocation2 + $0x40] sm:$0xff] }
 0x156   : > { %v919_v45 = vld [vmem:[#allocation2 + $0xe8] sm:$0xff]  ;;  %1012 = vst [vmem:[%s1592_s29] sm:$0xff] %v980_v39  ;;  %v985_v53 = vmax.f32 %v953_v41, 0.0  ;;  %v986_v54 = vmax.f32 %v954_v42, 0.0  ;;  %v956_v55 = vadd.f32 %v1625_v26, %v917_v43  ;;  %v957_v56 = vadd.f32 %v1625_v26, %v918_v44  ;;  %1014 = vst [vmem:[%s1592_s29 + $0x10] sm:$0xff] %v982_v46  ;;  %v925_v63 = vld [vmem:[#allocation2 + $0x38] sm:$0xff] }
 0x157   : > { %v922_v52 = vld [vmem:[#allocation2 + $0xf0] sm:$0xff]  ;;  %1013 = vst [vmem:[%s1592_s29 + $0x8] sm:$0xff] %v981_v40  ;;  %v923_v57 = vld [vmem:[#allocation2 + $0x8] sm:$0xff]  ;;  %1015 = vst [vmem:[%s1592_s29 + $0x18] sm:$0xff] %v983_v47  ;;  %v987_v59 = vmax.f32 %v955_v49, 0.0  ;;  %v958_v60 = vadd.f32 %v1625_v26, %v919_v45  ;;  %v959_v61 = vadd.f32 %v1625_v26, %v920_v50  ;;  %v960_v62 = vadd.f32 %v1625_v26, %v921_v51 }
 0x158   : > { %1016 = vst [vmem:[%s1592_s29 + $0x20] sm:$0xff] %v984_v48  ;;  %v926_v0 = vld [vmem:[#allocation2 + $0x58] sm:$0xff]  ;;  %1017 = vst [vmem:[%s1592_s29 + $0x28] sm:$0xff] %v985_v53  ;;  %v988_v1 = vmax.f32 %v956_v55, 0.0  ;;  %v989_v2 = vmax.f32 %v957_v56, 0.0  ;;  %v961_v3 = vadd.f32 %v1625_v26, %v922_v52  ;;  %v962_v4 = vadd.f32 %v1625_v26, %v923_v57  ;;  %v928_v6 = vld [vmem:[#allocation2 + $0xc8] sm:$0xff] }
 0x159   : > { %1018 = vst [vmem:[%s1592_s29 + $0x30] sm:$0xff] %v986_v54  ;;  %v929_v7 = vld [vmem:[#allocation2 + $0xe0] sm:$0xff]  ;;  %1019 = vst [vmem:[%s1592_s29 + $0x38] sm:$0xff] %v987_v59  ;;  %v990_v8 = vmax.f32 %v958_v60, 0.0  ;;  %v991_v9 = vmax.f32 %v959_v61, 0.0  ;;  %v992_v10 = vmax.f32 %v960_v62, 0.0  ;;  %v963_v11 = vadd.f32 %v1625_v26, %v924_v58 }
 0x15a   : > { %v930_v12 = vld [vmem:[#allocation2 + $0x90] sm:$0xff]  ;;  %1020 = vst [vmem:[%s1592_s29 + $0x40] sm:$0xff] %v988_v1  ;;  %1021 = vst [vmem:[%s1592_s29 + $0x48] sm:$0xff] %v989_v2  ;;  %v993_v14 = vmax.f32 %v961_v3, 0.0  ;;  %v994_v15 = vmax.f32 %v962_v4, 0.0  ;;  %v964_v16 = vadd.f32 %v1625_v26, %v925_v63  ;;  %v965_v17 = vadd.f32 %v1625_v26, %v926_v0  ;;  %v932_v18 = vld [vmem:[#allocation2 + $0xc0] sm:$0xff] }
 0x15b   : > { %v931_v13 = vld [vmem:[#allocation2 + $0x70] sm:$0xff]  ;;  %1022 = vst [vmem:[%s1592_s29 + $0x50] sm:$0xff] %v990_v8  ;;  %1023 = vst [vmem:[%s1592_s29 + $0x58] sm:$0xff] %v991_v9  ;;  %v995_v19 = vmax.f32 %v963_v11, 0.0  ;;  %v966_v20 = vadd.f32 %v1625_v26, %v927_v5  ;;  %v967_v21 = vadd.f32 %v1625_v26, %v928_v6  ;;  %v968_v22 = vadd.f32 %v1625_v26, %v929_v7  ;;  %v933_v23 = vld [vmem:[#allocation2 + $0xa8] sm:$0xff] }
 0x15c   : > { %1024 = vst [vmem:[%s1592_s29 + $0x60] sm:$0xff] %v992_v10  ;;  %v934_v24 = vld [vmem:[#allocation2 + $0xd0] sm:$0xff]  ;;  %1025 = vst [vmem:[%s1592_s29 + $0x68] sm:$0xff] %v993_v14  ;;  %v996_v25 = vmax.f32 %v964_v16, 0.0  ;;  %v997_v27 = vmax.f32 %v965_v17, 0.0  ;;  %v969_v28 = vadd.f32 %v1625_v26, %v930_v12  ;;  %v970_v29 = vadd.f32 %v1625_v26, %v931_v13  ;;  %v936_v31 = vld [vmem:[#allocation2 + $0x28] sm:$0xff] }
 0x15d   : > { %1026 = vst [vmem:[%s1592_s29 + $0x70] sm:$0xff] %v994_v15  ;;  %v935_v30 = vld [vmem:[#allocation2 + $0x10] sm:$0xff]  ;;  %v937_v32 = vld [vmem:[#allocation2 + $0xa0] sm:$0xff]  ;;  %1027 = vst [vmem:[%s1592_s29 + $0x78] sm:$0xff] %v995_v19  ;;  %v998_v33 = vmax.f32 %v966_v20, 0.0  ;;  %v999_v34 = vmax.f32 %v967_v21, 0.0  ;;  %v971_v36 = vadd.f32 %v1625_v26, %v932_v18  ;;  %v972_v41 = vadd.f32 %v1625_v26, %v933_v23 }
 0x15e   : > { %v1000_v35 = vmax.f32 %v968_v22, 0.0  ;;  %v938_v37 = vld [vmem:[#allocation2 + $0xf8] sm:$0xff]  ;;  %v939_v38 = vld [vmem:[#allocation2 + $0x20] sm:$0xff]  ;;  %1028 = vst [vmem:[%s1592_s29 + $0x80] sm:$0xff] %v996_v25  ;;  %1029 = vst [vmem:[%s1592_s29 + $0x88] sm:$0xff] %v997_v27  ;;  %v1001_v39 = vmax.f32 %v969_v28, 0.0  ;;  %v973_v42 = vadd.f32 %v1625_v26, %v934_v24  ;;  %v974_v45 = vadd.f32 %v1625_v26, %v935_v30 }
 0x15f   : > { %v1002_v40 = vmax.f32 %v970_v29, 0.0  ;;  %v940_v43 = vld [vmem:[#allocation2 + $0x98] sm:$0xff]  ;;  %1030 = vst [vmem:[%s1592_s29 + $0x90] sm:$0xff] %v998_v33  ;;  %1031 = vst [vmem:[%s1592_s29 + $0x98] sm:$0xff] %v999_v34  ;;  %v1003_v44 = vmax.f32 %v971_v36, 0.0  ;;  %v975_v46 = vadd.f32 %v1625_v26, %v936_v31  ;;  %v976_v47 = vadd.f32 %v1625_v26, %v937_v32 }
 0x160   : > { %1032 = vst [vmem:[%s1592_s29 + $0xa0] sm:$0xff] %v1000_v35  ;;  %1033 = vst [vmem:[%s1592_s29 + $0xa8] sm:$0xff] %v1001_v39  ;;  %v1004_v48 = vmax.f32 %v972_v41, 0.0  ;;  %v1005_v49 = vmax.f32 %v973_v42, 0.0  ;;  %v977_v50 = vadd.f32 %v1625_v26, %v938_v37  ;;  %v978_v51 = vadd.f32 %v1625_v26, %v939_v38 }
 0x161   : > { %1034 = vst [vmem:[%s1592_s29 + $0xb0] sm:$0xff] %v1002_v40  ;;  %1035 = vst [vmem:[%s1592_s29 + $0xb8] sm:$0xff] %v1003_v44  ;;  %v1006_v52 = vmax.f32 %v974_v45, 0.0  ;;  %v1007_v53 = vmax.f32 %v975_v46, 0.0  ;;  %v1008_v54 = vmax.f32 %v976_v47, 0.0  ;;  %v979_v55 = vadd.f32 %v1625_v26, %v940_v43 }
 0x162   : > { %1036 = vst [vmem:[%s1592_s29 + $0xc0] sm:$0xff] %v1004_v48  ;;  %1037 = vst [vmem:[%s1592_s29 + $0xc8] sm:$0xff] %v1005_v49  ;;  %v1009_v56 = vmax.f32 %v977_v50, 0.0  ;;  %v1010_v57 = vmax.f32 %v978_v51, 0.0 }
 0x163   : > { %1038 = vst [vmem:[%s1592_s29 + $0xd0] sm:$0xff] %v1006_v52  ;;  %1039 = vst [vmem:[%s1592_s29 + $0xd8] sm:$0xff] %v1007_v53  ;;  %v1011_v58 = vmax.f32 %v979_v55, 0.0 }
 0x164   : > { %1040 = vst [vmem:[%s1592_s29 + $0xe0] sm:$0xff] %v1008_v54  ;;  %1041 = vst [vmem:[%s1592_s29 + $0xe8] sm:$0xff] %v1009_v56 }
 0x165   : > { %1042 = vst [vmem:[%s1592_s29 + $0xf0] sm:$0xff] %v1010_v57  ;;  %1043 = vst [vmem:[%s1592_s29 + $0xf8] sm:$0xff] %v1011_v58 }
 0x166 PF: > { %s13_s18 = sadd.s32 1, %s1428_s18   ;;  %s1716_s12 = smov %s1408_s13 }
 0x167   : > { %p10_p0 = scmp.ge.s32.totalorder %s13_s18, 12   ;;  %s1717_s13 = smov %s1502_s25 }
 0x168   : > { %s1718_s14 = smov %s1420_s16  ;;  %s1719_s15 = smov %s1424_s17 }
 0x169   : > { %s1720_s16 = smov %s1723_s19  ;;  %s1721_s17 = smov %s1727_s20 }
 0x16a   :  { %12 = sbr.rel (!%p10_p0) target bundleno = 4 (0x4), region = 122 }

// kernel: crnn_forward.19
= control target key start
LH: loop header
LB: loop body
LE: loop exit
PB: predicated region body
PF: predicated region fallthrough
CT: control target
= control target key end

     0   :  { %s546_s6 = smov 0   ;;  %s548_s7 = smov 0   ;;  %s606_s0 = inlined_call_operand.vmem [shape: f32[2,16,16,128], index: 0, kind: input, shape index: {}]   ;;  %s607_s1 = inlined_call_operand.vmem [shape: f32[2,8,8,128], index: 1, kind: output, shape index: {}]  }
   0x1   :  { %s550_s8 = smov 0   ;;  %s552_s9 = smov 0  }
   0x2   :  { %s554_s10 = smov 0  }
   0x3 LB: > { %s20_s11 = sadd.s32 1, %s524_s8  ;;  %s23_s12 = sadd.s32 1, %s528_s9  ;;  %s532_s10 = sphi %s554_s10, %s11_s10   ;;  %s528_s9 = sphi %s552_s9, %s611_s9   ;;  %s524_s8 = sphi %s550_s8, %s610_s8   ;;  %s520_s7 = sphi %s548_s7, %s609_s7   ;;  %s516_s6 = sphi %s546_s6, %s608_s6  }
   0x4   : > { %p21_p0 = scmp.ge.s32.totalorder %s20_s11, 8  ;;  %p417_p1 = scmp.ge.s32.totalorder %s532_s10, 1 }
   0x5   : > { %p109_p2 = scmp.lt.s32.totalorder %s532_s10, 17 }
   0x6   : > { %s613_s11 = smov (%p21_p0, %s20_s11), 0  ;;  %s615_s12 = smov (!%p21_p0, %s23_s12), %s528_s9 }
   0x7   : > { %p110_p3 = pnand %p417_p1, %p109_p2  ;;  %p25_p4 = scmp.ge.s32.totalorder %s615_s12, 2 }
   0x8   : > { %s418_s13 = sshll.u32 (!%p110_p3), %s516_s6, 1  ;;  %p138_p5 = scmp.lt.s32.totalorder (!%p110_p3), %s520_s7, 1 }
   0x9   : > { %s617_s12 = smov (%p25_p4, %s615_s12), 0  ;;  %113 = sbr.rel (%p110_p3) target bundleno = 221 (0xdd), region = 24 }
   0xa   : > { %p140_p6 = scmp.lt.s32.totalorder (!%p110_p3), %s418_s13, 15  ;;  %p150_p7 = scmp.lt.s32.totalorder (!%p110_p3), %s516_s6, 7 }
   0xe   : > { %v163_v0 = vlaneseq  ;;  %v534_v1 = vmov 0.0   ;;  %s619_s7 = smov (!%p138_p5, %s520_s7), 1  ;;  %vm535_vm0 = vmmov 0   ;;  %s621_s13 = smov (!%p140_p6, %s418_s13), 15  ;;  %vm171_vm3 = vcmask 130048  }
   0xf   : > { %438 = vmatprep.subr.mxu0 %v534_v1  ;;  %445 = vmatprep.subr.mxu1 %v534_v1  ;;  %s420_s14 = sshll.u32 %s619_s7, 5  ;;  %s419_s15 = sshll.u32 %s621_s13, 1 }
  0x10   : > { %442 = vmatprep.mubr.msk.f32.mxu0 %vm535_vm0, %v534_v1  ;;  %449 = vmatprep.mubr.msk.f32.mxu1 %vm535_vm0, %v534_v1  ;;  %v164_v2 = vshrl.u32 %v163_v0, 7  ;;  %v166_v4 = vand.u32 127, %v163_v0  ;;  %s144_s16 = sadd.s32 %s420_s14, %s419_s15  ;;  %s623_s6 = smov (!%p150_p7, %s516_s6), 7 }
  0x11   : > { %s421_s17 = sshll.u32 %s144_s16, 3  ;;  %s422_s21 = sshll.u32 %s619_s7, 3 }
  0x12   : > { %v167_v3 = vmul.u32 2, %v164_v2  ;;  %s146_s20 = scalar_lea.vmem %s606_s0, %s421_s17  ;;  %s153_s22 = sadd.s32 %s422_s21, %s623_s6 }
  0x13   : > { %v157_v6 = vld [vmem:[%s146_s20 + $0x8] sm:$0xff]  ;;  %v425_v7 = vld [vmem:[%s146_s20 + $0x18] sm:$0xff]  ;;  %v156_v8 = vld [vmem:[%s146_s20] sm:$0xff]  ;;  %s423_s23 = sshll.u32 %s153_s22, 3 }
  0x14   : > { %v245_v5 = vadd.s32 1, %v167_v3  ;;  %vm168_vm1 = vcmp.eq.s32.totalorder %v166_v4, %v167_v3  ;;  %v162_v9 = vmax.f32 %v157_v6, %v425_v7  ;;  %v424_v10 = vld [vmem:[%s146_s20 + $0x10] sm:$0xff]  ;;  %s155_s26 = scalar_lea.vmem %s607_s1, %s423_s23 }
  0x15   : > { %v161_v11 = vmax.f32 %v156_v8, %v424_v10  ;;  %v426_v12 = vsel %vm168_vm1, 1.0, %v534_v1 }
  0x16   : > { %vm246_vm2 = vcmp.eq.s32.totalorder %v166_v4, %v245_v5  ;;  %439 = vmatpush3.msra.mxu0 %v162_v9  ;;  %446 = vmatpush3.msra.mxu1 %v162_v9 }
  0x17   : > { %v428_v13 = vsel %vm246_vm2, 1.0, %v534_v1  ;;  %440 = vmatprep.subr.mxu0 %v534_v1  ;;  %447 = vmatprep.subr.mxu1 %v534_v1 }
  0x18   : > { %441 = vmatpush3.msra.mxu0 %v161_v11  ;;  %448 = vmatpush3.msra.mxu1 %v161_v11 }
  0x19   : > { %443 = vmatmul.mubr.msk.f32.vlgmr.msra.gmra.mxu0 %vm171_vm3, %v426_v12  ;;  %450 = vmatmul.mubr.msk.f32.vlgmr.msra.gmra.mxu1 %vm171_vm3, %v428_v13 }
  0xd9   : > { %v241_v14 = vpop.f32.mrf.mxu0  ;;  %v318_v15 = vpop.f32.mrf.mxu1 }
  0xda   : > { %v322_v16 = vmax.f32 %v241_v14, %v318_v15 }
  0xdb   : > { %v444_v17 = vpop.f32.mrf.mxu0  ;;  %v451_v18 = vpop.f32.mrf.mxu1 }
  0xdc   : > { %323 = vst [vmem:[%s155_s26] sm:$0xff] %v322_v16 }
  0xdd PF: > { %s11_s10 = sadd.s32 1, %s532_s10   ;;  %s608_s6 = smov %s524_s8 }
  0xde   : > { %p8_p8 = scmp.ge.s32.totalorder %s11_s10, 18   ;;  %s609_s7 = smov %s528_s9 }
  0xdf   : > { %s610_s8 = smov %s613_s11  ;;  %s611_s9 = smov %s617_s12 }
  0xe0   :  { %10 = sbr.rel (!%p8_p8) target bundleno = 3 (0x3), region = 55 }

// kernel: crnn_forward.20
= control target key start
LH: loop header
LB: loop body
LE: loop exit
PB: predicated region body
PF: predicated region fallthrough
CT: control target
= control target key end

     0   :  { %s1347_s15 = smov 0   ;;  %s1349_s16 = smov 0   ;;  %s1642_s0 = inlined_call_operand.vmem [shape: bf16[128,1152], index: 0, kind: input, shape index: {}]   ;;  %s1643_s1 = inlined_call_operand.vmem [shape: bf16[1152,256], index: 1, kind: input, shape index: {}]   ;;  %s1644_s2 = inlined_call_operand.vmem [shape: f32[1,256], index: 2, kind: input, shape index: {}]   ;;  %s1645_s3 = inlined_call_operand.vmem [shape: f32[1,256], index: 3, kind: input, shape index: {}]   ;;  %s1646_s4 = inlined_call_operand.vmem [shape: f32[128,256], index: 4, kind: output, shape index: {}]  }
   0x1   :  { %s1351_s17 = smov 0   ;;  %s1353_s18 = smov 0  }
   0x2   :  { %s1355_s19 = smov 0  }
   0x3 LB: > { %s26_s20 = sadd.s32 1, %s1314_s18  ;;  %p49_p1 = scmp.ne.s32.totalorder %s1306_s16, %s1302_s15  ;;  %s1318_s19 = sphi %s1355_s19, %s14_s19   ;;  %s1314_s18 = sphi %s1353_s18, %s1650_s18   ;;  %s1310_s17 = sphi %s1351_s17, %s1649_s17   ;;  %s1306_s16 = sphi %s1349_s16, %s1648_s16   ;;  %s1302_s15 = sphi %s1347_s15, %s1647_s15  }
   0x4   : > { %p27_p0 = scmp.ge.s32.totalorder %s26_s20, 9  ;;  %p50_p2 = scmp.eq.s32.totalorder %s1318_s19, 0 }
   0x5   : > { %s42_s22 = sadd.s32 1, %s1306_s16  ;;  %p1151_p5 = scmp.ge.s32.totalorder %s1318_s19, 9 }
   0x6   : > { %s1652_s20 = smov (%p27_p0, %s26_s20), 0  ;;  %p51_p3 = por %p50_p2, %p49_p1 }
   0x7   : > { %s38_s21 = ssub.s32 %s1314_s18, %s1652_s20  ;;  %199 = sbr.rel (%p1151_p5) target bundleno = 26 (0x1a), region = 24 }
   0x8   : > { %p40_p4 = scmp.eq.s32.totalorder %s38_s21, 0 }
   0xa   : > { %s1382_s23 = scalar_select %p40_p4, %s1306_s16, %s42_s22  }
   0xc   : > { %202 = sbr.rel (!%p51_p3) target bundleno = 26 (0x1a), region = 28  ;;  %s204_s24 = sand.u32 (%p51_p3), 1, %s1306_s16  }
   0xd   : > { %s1153_s25 = sshll.u32 (%p51_p3), %s1314_s18, 2  ;;  %s1152_s26 = sshll.u32 (%p51_p3), %s204_s24, 6 }
   0xe   : > { %s1390_s29 = scalar_lea.vmem (%p51_p3), %s1642_s0, %s1153_s25  ;;  %s206_s30 = scalar_lea.vmem (%p51_p3), [#allocation3], %s1152_s26 }
   0xf   : > { %v228_v0 = vld [vmem:[%s1390_s29] sm:$0xf] (%p51_p3)  ;;  %v230_v1 = vld [vmem:[%s1390_s29 + $0x24] sm:$0xf] (%p51_p3)  ;;  %v232_v2 = vld [vmem:[%s1390_s29 + $0x48] sm:$0xf] (%p51_p3) }
  0x10   : > { %229 = vst [vmem:[%s206_s30] sm:$0xf] (%p51_p3), %v228_v0  ;;  %231 = vst [vmem:[%s206_s30 + $0x4] sm:$0xf] (%p51_p3), %v230_v1  ;;  %v234_v3 = vld [vmem:[%s1390_s29 + $0x6c] sm:$0xf] (%p51_p3) }
  0x11   : > { %v236_v4 = vld [vmem:[%s1390_s29 + $0x90] sm:$0xf]  ;;  %233 = vst [vmem:[%s206_s30 + $0x8] sm:$0xf] %v232_v2  ;;  %235 = vst [vmem:[%s206_s30 + $0xc] sm:$0xf] %v234_v3 }
  0x12   : > { %237 = vst [vmem:[%s206_s30 + $0x10] sm:$0xf] %v236_v4  ;;  %v238_v5 = vld [vmem:[%s1390_s29 + $0xb4] sm:$0xf]  ;;  %v240_v6 = vld [vmem:[%s1390_s29 + $0xd8] sm:$0xf] }
  0x13   : > { %v242_v7 = vld [vmem:[%s1390_s29 + $0xfc] sm:$0xf]  ;;  %239 = vst [vmem:[%s206_s30 + $0x14] sm:$0xf] %v238_v5  ;;  %241 = vst [vmem:[%s206_s30 + $0x18] sm:$0xf] %v240_v6 }
  0x14   : > { %243 = vst [vmem:[%s206_s30 + $0x1c] sm:$0xf] %v242_v7  ;;  %v244_v8 = vld [vmem:[%s1390_s29 + $0x120] sm:$0xf]  ;;  %v246_v9 = vld [vmem:[%s1390_s29 + $0x144] sm:$0xf] }
  0x15   : > { %v248_v10 = vld [vmem:[%s1390_s29 + $0x168] sm:$0xf]  ;;  %245 = vst [vmem:[%s206_s30 + $0x20] sm:$0xf] %v244_v8  ;;  %247 = vst [vmem:[%s206_s30 + $0x24] sm:$0xf] %v246_v9 }
  0x16   : > { %249 = vst [vmem:[%s206_s30 + $0x28] sm:$0xf] %v248_v10  ;;  %v250_v11 = vld [vmem:[%s1390_s29 + $0x18c] sm:$0xf]  ;;  %v252_v12 = vld [vmem:[%s1390_s29 + $0x1b0] sm:$0xf] }
  0x17   : > { %v254_v13 = vld [vmem:[%s1390_s29 + $0x1d4] sm:$0xf]  ;;  %251 = vst [vmem:[%s206_s30 + $0x2c] sm:$0xf] %v250_v11  ;;  %253 = vst [vmem:[%s206_s30 + $0x30] sm:$0xf] %v252_v12 }
  0x18   : > { %255 = vst [vmem:[%s206_s30 + $0x34] sm:$0xf] %v254_v13  ;;  %v256_v14 = vld [vmem:[%s1390_s29 + $0x1f8] sm:$0xf]  ;;  %v258_v15 = vld [vmem:[%s1390_s29 + $0x21c] sm:$0xf] }
  0x19   : > { %257 = vst [vmem:[%s206_s30 + $0x38] sm:$0xf] %v256_v14  ;;  %259 = vst [vmem:[%s206_s30 + $0x3c] sm:$0xf] %v258_v15 }
  0x1a PF: > { %p1154_p6 = scmp.ge.s32.totalorder %s1318_s19, 1  ;;  %p329_p7 = scmp.lt.s32.totalorder %s1318_s19, 10 }
  0x1c   : > { %p330_p8 = pnand %p1154_p6, %p329_p7 }
  0x1d   : > { %s336_s5 = sand.u32 (!%p330_p8), 1, %s1302_s15   ;;  %s1156_s6 = sshll.u32 (!%p330_p8), %s1310_s17, 4 }
  0x1e   : > { %333 = sbr.rel (%p330_p8) target bundleno = 356 (0x164), region = 73  ;;  %s1155_s7 = sshll.u32 (!%p330_p8), %s336_s5, 6 }
  0x1f   : > { %p387_p9 = scmp.lt.s32.totalorder (!%p330_p8), %s1156_s6, 143  ;;  %s1417_s12 = scalar_lea.vmem (!%p330_p8), [#allocation3], %s1155_s7 }
  0x20   : > { %p1159_p10 = scmp.ne.s32.totalorder (!%p330_p8), %s1310_s17, 0 }
  0x23   : > { %s1654_s6 = smov (!%p387_p9, %s1156_s6), 143  ;;  %423 = sbr.rel (%p1159_p10) target bundleno = 57 (0x39), region = 81 }
  0x24   : > { %s1189_s8 = sshll.u32 %s1654_s6, 3 }
  0x25   : > { %s1415_s11 = scalar_lea.vmem %s1643_s1, %s1189_s8 }
  0x28   : > { %v1320_v16 = vmov 0.0  }
  0x29   : > { %424 = vst [vmem:[#allocation2 + $0xb0] sm:$0xff] %v1320_v16  ;;  %425 = vst [vmem:[#allocation2] sm:$0xff] %v1320_v16 }
  0x2a   : > { %426 = vst [vmem:[#allocation2 + $0xd8] sm:$0xff] %v1320_v16  ;;  %427 = vst [vmem:[#allocation2 + $0x18] sm:$0xff] %v1320_v16 }
  0x2b   : > { %428 = vst [vmem:[#allocation2 + $0x50] sm:$0xff] %v1320_v16  ;;  %429 = vst [vmem:[#allocation2 + $0x68] sm:$0xff] %v1320_v16 }
  0x2c   : > { %430 = vst [vmem:[#allocation2 + $0x30] sm:$0xff] %v1320_v16  ;;  %431 = vst [vmem:[#allocation2 + $0x48] sm:$0xff] %v1320_v16 }
  0x2d   : > { %432 = vst [vmem:[#allocation2 + $0x80] sm:$0xff] %v1320_v16  ;;  %433 = vst [vmem:[#allocation2 + $0x88] sm:$0xff] %v1320_v16 }
  0x2e   : > { %434 = vst [vmem:[#allocation2 + $0xe8] sm:$0xff] %v1320_v16  ;;  %435 = vst [vmem:[#allocation2 + $0xb8] sm:$0xff] %v1320_v16 }
  0x2f   : > { %436 = vst [vmem:[#allocation2 + $0x60] sm:$0xff] %v1320_v16  ;;  %437 = vst [vmem:[#allocation2 + $0xf0] sm:$0xff] %v1320_v16 }
  0x30   : > { %438 = vst [vmem:[#allocation2 + $0x8] sm:$0xff] %v1320_v16  ;;  %439 = vst [vmem:[#allocation2 + $0x78] sm:$0xff] %v1320_v16 }
  0x31   : > { %440 = vst [vmem:[#allocation2 + $0x38] sm:$0xff] %v1320_v16  ;;  %441 = vst [vmem:[#allocation2 + $0x58] sm:$0xff] %v1320_v16 }
  0x32   : > { %442 = vst [vmem:[#allocation2 + $0x40] sm:$0xff] %v1320_v16  ;;  %443 = vst [vmem:[#allocation2 + $0xc8] sm:$0xff] %v1320_v16 }
  0x33   : > { %444 = vst [vmem:[#allocation2 + $0xe0] sm:$0xff] %v1320_v16  ;;  %445 = vst [vmem:[#allocation2 + $0x90] sm:$0xff] %v1320_v16 }
  0x34   : > { %446 = vst [vmem:[#allocation2 + $0x70] sm:$0xff] %v1320_v16  ;;  %447 = vst [vmem:[#allocation2 + $0xc0] sm:$0xff] %v1320_v16 }
  0x35   : > { %448 = vst [vmem:[#allocation2 + $0xa8] sm:$0xff] %v1320_v16  ;;  %449 = vst [vmem:[#allocation2 + $0xd0] sm:$0xff] %v1320_v16 }
  0x36   : > { %450 = vst [vmem:[#allocation2 + $0x10] sm:$0xff] %v1320_v16  ;;  %451 = vst [vmem:[#allocation2 + $0x28] sm:$0xff] %v1320_v16 }
  0x37   : > { %452 = vst [vmem:[#allocation2 + $0xa0] sm:$0xff] %v1320_v16  ;;  %453 = vst [vmem:[#allocation2 + $0xf8] sm:$0xff] %v1320_v16 }
  0x38   : > { %454 = vst [vmem:[#allocation2 + $0x20] sm:$0xff] %v1320_v16  ;;  %455 = vst [vmem:[#allocation2 + $0x98] sm:$0xff] %v1320_v16 }
  0x39 PF: > { %v1248_v17 = vld [vmem:[%s1415_s11 + $0x74] ss:$8 sps:$4 sm:$0xff]   ;;  %v1250_v18 = vld [vmem:[%s1415_s11 + $0x70] ss:$8 sps:$4 sm:$0xff]   ;;  %v1321_v19 = vmov 0   ;;  %v1272_v34 = vld [vmem:[%s1417_s12] sm:$0xff]  }
  0x3a   : > { %680 = vmatprep.mubr.bf16.mxu0 %v1321_v19  ;;  %720 = vmatprep.mubr.bf16.mxu1 %v1321_v19  ;;  %v1251_v20 = vld [vmem:[%s1415_s11 + $0x64] ss:$8 sps:$4 sm:$0xff]   ;;  %v1253_v21 = vld [vmem:[%s1415_s11 + $0x60] ss:$8 sps:$4 sm:$0xff]   ;;  %v1254_v22 = vld [vmem:[%s1415_s11 + $0x54] ss:$8 sps:$4 sm:$0xff]  }
  0x3b   : > { %648 = vmatprep.subr.bf16.mxu0 %v1248_v17  ;;  %1190 = vmatprep.subr.bf16.mxu1 %v1248_v17  ;;  %v1256_v23 = vld [vmem:[%s1415_s11 + $0x50] ss:$8 sps:$4 sm:$0xff]   ;;  %v1257_v24 = vld [vmem:[%s1415_s11 + $0x44] ss:$8 sps:$4 sm:$0xff]   ;;  %v1259_v25 = vld [vmem:[%s1415_s11 + $0x40] ss:$8 sps:$4 sm:$0xff]  }
  0x3c   : > { %649 = vmatpush1.bf16.msra.mxu0 %v1250_v18  ;;  %1198 = vmatpush1.bf16.msra.mxu1 %v1250_v18  ;;  %v1260_v26 = vld [vmem:[%s1415_s11 + $0x34] ss:$8 sps:$4 sm:$0xff]   ;;  %v1262_v27 = vld [vmem:[%s1415_s11 + $0x30] ss:$8 sps:$4 sm:$0xff]   ;;  %v1263_v28 = vld [vmem:[%s1415_s11 + $0x24] ss:$8 sps:$4 sm:$0xff]  }
  0x3d   : > { %650 = vmatprep.subr.bf16.mxu0 %v1251_v20  ;;  %1191 = vmatprep.subr.bf16.mxu1 %v1251_v20  ;;  %v1265_v29 = vld [vmem:[%s1415_s11 + $0x20] ss:$8 sps:$4 sm:$0xff]   ;;  %v1266_v30 = vld [vmem:[%s1415_s11 + $0x14] ss:$8 sps:$4 sm:$0xff]   ;;  %v1268_v31 = vld [vmem:[%s1415_s11 + $0x10] ss:$8 sps:$4 sm:$0xff]  }
  0x3e   : > { %v1269_v32 = vld [vmem:[%s1415_s11 + $0x4] ss:$8 sps:$4 sm:$0xff]   ;;  %v1271_v33 = vld [vmem:[%s1415_s11] ss:$8 sps:$4 sm:$0xff]   ;;  %v1276_v38 = vld [vmem:[%s1417_s12 + $0x10] sm:$0xff]   ;;  %p1184_p11 = scmp.ne.s32.totalorder %s1310_s17, 8 }
  0x3f   : > { %v1273_v35 = vld [vmem:[%s1417_s12 + $0x20] sm:$0xff]   ;;  %v1274_v36 = vld [vmem:[%s1417_s12 + $0x8] sm:$0xff]   ;;  %v1277_v39 = vld [vmem:[%s1417_s12 + $0x30] sm:$0xff]  }
  0x40   : > { %651 = vmatpush1.bf16.msra.mxu0 %v1253_v21  ;;  %1199 = vmatpush1.bf16.msra.mxu1 %v1253_v21  ;;  %v1275_v37 = vld [vmem:[%s1417_s12 + $0x28] sm:$0xff]   ;;  %v1278_v40 = vld [vmem:[%s1417_s12 + $0x18] sm:$0xff]   ;;  %v456_v42 = vld [vmem:[#allocation2 + $0xb0] sm:$0xff] }
  0x41   : > { %652 = vmatprep.subr.bf16.mxu0 %v1254_v22  ;;  %1192 = vmatprep.subr.bf16.mxu1 %v1254_v22  ;;  %v1279_v41 = vld [vmem:[%s1417_s12 + $0x38] sm:$0xff]   ;;  %v457_v46 = vld [vmem:[#allocation2] sm:$0xff]  ;;  %v475_v59 = vld [vmem:[#allocation2 + $0xc8] sm:$0xff] }
  0x42   : > { %v472_v43 = vld [vmem:[#allocation2 + $0x38] sm:$0xff]  ;;  %v474_v53 = vld [vmem:[#allocation2 + $0x40] sm:$0xff]  ;;  %v460_v0 = vld [vmem:[#allocation2 + $0x50] sm:$0xff] }
  0x43   : > { %v473_v47 = vld [vmem:[#allocation2 + $0x58] sm:$0xff]  ;;  %v476_v1 = vld [vmem:[#allocation2 + $0xe0] sm:$0xff]  ;;  %v461_v6 = vld [vmem:[#allocation2 + $0x68] sm:$0xff] }
  0x44   : > { %653 = vmatpush1.bf16.msra.mxu0 %v1256_v23  ;;  %1200 = vmatpush1.bf16.msra.mxu1 %v1256_v23  ;;  %v458_v52 = vld [vmem:[#allocation2 + $0xd8] sm:$0xff]  ;;  %v477_v7 = vld [vmem:[#allocation2 + $0x90] sm:$0xff]  ;;  %v463_v18 = vld [vmem:[#allocation2 + $0x48] sm:$0xff] }
  0x45   : > { %654 = vmatprep.subr.bf16.mxu0 %v1257_v24  ;;  %1193 = vmatprep.subr.bf16.mxu1 %v1257_v24  ;;  %v459_v58 = vld [vmem:[#allocation2 + $0x18] sm:$0xff]  ;;  %v462_v12 = vld [vmem:[#allocation2 + $0x30] sm:$0xff]  ;;  %v464_v24 = vld [vmem:[#allocation2 + $0x80] sm:$0xff] }
  0x46   : > { %v478_v13 = vld [vmem:[#allocation2 + $0x70] sm:$0xff] }
  0x48   : > { %655 = vmatpush1.bf16.msra.mxu0 %v1259_v25  ;;  %1201 = vmatpush1.bf16.msra.mxu1 %v1259_v25  ;;  %v480_v25 = vld [vmem:[#allocation2 + $0xa8] sm:$0xff] }
  0x49   : > { %656 = vmatprep.subr.bf16.mxu0 %v1260_v26  ;;  %1194 = vmatprep.subr.bf16.mxu1 %v1260_v26 }
  0x4c   : > { %657 = vmatpush1.bf16.msra.mxu0 %v1262_v27  ;;  %1202 = vmatpush1.bf16.msra.mxu1 %v1262_v27 }
  0x4d   : > { %658 = vmatprep.subr.bf16.mxu0 %v1263_v28  ;;  %1195 = vmatprep.subr.bf16.mxu1 %v1263_v28 }
  0x50   : > { %659 = vmatpush1.bf16.msra.mxu0 %v1265_v29  ;;  %1203 = vmatpush1.bf16.msra.mxu1 %v1265_v29 }
  0x51   : > { %660 = vmatprep.subr.bf16.mxu0 %v1266_v30  ;;  %1196 = vmatprep.subr.bf16.mxu1 %v1266_v30  ;;  %v465_v30 = vld [vmem:[#allocation2 + $0x88] sm:$0xff] }
  0x54   : > { %661 = vmatpush1.bf16.msra.mxu0 %v1268_v31  ;;  %1204 = vmatpush1.bf16.msra.mxu1 %v1268_v31  ;;  %v481_v31 = vld [vmem:[#allocation2 + $0xd0] sm:$0xff] }
  0x55   : > { %662 = vmatprep.subr.bf16.mxu0 %v1269_v32  ;;  %1197 = vmatprep.subr.bf16.mxu1 %v1269_v32 }
  0x58   : > { %663 = vmatpush1.bf16.msra.mxu0 %v1271_v33  ;;  %1205 = vmatpush1.bf16.msra.mxu1 %v1271_v33 }
  0x5b   : > { %681 = vmatmul.mubr.bf16.vlgmr.msra.gmra.mxu0 %v1272_v34  ;;  %721 = vmatmul.mubr.bf16.vlgmr.msra.gmra.mxu1 %v1273_v35 }
  0x5c   : > { %690 = vmatprep.mubr.bf16.mxu0 %v1321_v19  ;;  %730 = vmatprep.mubr.bf16.mxu1 %v1321_v19 }
  0x63   : > { %691 = vmatmul.mubr.bf16.gmra.mxu0 %v1274_v36  ;;  %731 = vmatmul.mubr.bf16.gmra.mxu1 %v1275_v37  ;;  %v466_v36 = vld [vmem:[#allocation2 + $0xe8] sm:$0xff]  ;;  %v482_v37 = vld [vmem:[#allocation2 + $0x10] sm:$0xff] }
  0x64   : > { %700 = vmatprep.mubr.bf16.mxu0 %v1321_v19  ;;  %740 = vmatprep.mubr.bf16.mxu1 %v1321_v19 }
  0x6b   : > { %701 = vmatmul.mubr.bf16.gmra.mxu0 %v1276_v38  ;;  %741 = vmatmul.mubr.bf16.gmra.mxu1 %v1277_v39 }
  0x6c   : > { %710 = vmatprep.mubr.bf16.mxu0 %v1321_v19  ;;  %750 = vmatprep.mubr.bf16.mxu1 %v1321_v19  ;;  %v479_v19 = vld [vmem:[#allocation2 + $0xc0] sm:$0xff] }
  0x73   : > { %711 = vmatmul.mubr.bf16.gmra.mxu0 %v1278_v40  ;;  %751 = vmatmul.mubr.bf16.gmra.mxu1 %v1279_v41 }
 0x11b   : > { %v682_v44 = vpop.f32.mrf.mxu0  ;;  %v722_v45 = vpop.f32.mrf.mxu1 }
 0x11c   : > { %v761_v48 = vadd.f32 %v682_v44, %v456_v42  ;;  %v777_v49 = vadd.f32 %v722_v45, %v472_v43  ;;  %v467_v42 = vld [vmem:[#allocation2 + $0xb8] sm:$0xff]  ;;  %v483_v43 = vld [vmem:[#allocation2 + $0x28] sm:$0xff] }
 0x11d   : > { %v684_v50 = vpop.f32.mrf.mxu0  ;;  %v724_v51 = vpop.f32.mrf.mxu1 }
 0x11e   : > { %793 = vst [vmem:[#allocation2 + $0xb0] sm:$0xff] %v761_v48  ;;  %809 = vst [vmem:[#allocation2 + $0x38] sm:$0xff] %v777_v49  ;;  %v762_v54 = vadd.f32 %v684_v50, %v457_v46  ;;  %v778_v55 = vadd.f32 %v724_v51, %v473_v47  ;;  %v468_v48 = vld [vmem:[#allocation2 + $0x60] sm:$0xff] }
 0x11f   : > { %v686_v56 = vpop.f32.mrf.mxu0  ;;  %v726_v57 = vpop.f32.mrf.mxu1  ;;  %v484_v49 = vld [vmem:[#allocation2 + $0xa0] sm:$0xff] }
 0x120   : > { %794 = vst [vmem:[#allocation2] sm:$0xff] %v762_v54  ;;  %810 = vst [vmem:[#allocation2 + $0x58] sm:$0xff] %v778_v55  ;;  %v763_v60 = vadd.f32 %v686_v56, %v458_v52  ;;  %v779_v61 = vadd.f32 %v726_v57, %v474_v53  ;;  %v469_v54 = vld [vmem:[#allocation2 + $0xf0] sm:$0xff]  ;;  %v485_v55 = vld [vmem:[#allocation2 + $0xf8] sm:$0xff] }
 0x121   : > { %v688_v62 = vpop.f32.mrf.mxu0  ;;  %v728_v63 = vpop.f32.mrf.mxu1 }
 0x122   : > { %795 = vst [vmem:[#allocation2 + $0xd8] sm:$0xff] %v763_v60  ;;  %811 = vst [vmem:[#allocation2 + $0x40] sm:$0xff] %v779_v61  ;;  %v764_v2 = vadd.f32 %v688_v62, %v459_v58  ;;  %v780_v3 = vadd.f32 %v728_v63, %v475_v59  ;;  %v470_v60 = vld [vmem:[#allocation2 + $0x8] sm:$0xff]  ;;  %v486_v61 = vld [vmem:[#allocation2 + $0x20] sm:$0xff] }
 0x123   : > { %v692_v4 = vpop.f32.mrf.mxu0  ;;  %v732_v5 = vpop.f32.mrf.mxu1 }
 0x124   : > { %796 = vst [vmem:[#allocation2 + $0x18] sm:$0xff] %v764_v2  ;;  %812 = vst [vmem:[#allocation2 + $0xc8] sm:$0xff] %v780_v3  ;;  %v765_v8 = vadd.f32 %v692_v4, %v460_v0  ;;  %v781_v9 = vadd.f32 %v732_v5, %v476_v1  ;;  %v471_v2 = vld [vmem:[#allocation2 + $0x78] sm:$0xff] }
 0x125   : > { %v694_v10 = vpop.f32.mrf.mxu0  ;;  %v734_v11 = vpop.f32.mrf.mxu1  ;;  %v487_v3 = vld [vmem:[#allocation2 + $0x98] sm:$0xff] }
 0x126   : > { %797 = vst [vmem:[#allocation2 + $0x50] sm:$0xff] %v765_v8  ;;  %813 = vst [vmem:[#allocation2 + $0xe0] sm:$0xff] %v781_v9  ;;  %v766_v14 = vadd.f32 %v694_v10, %v461_v6  ;;  %v782_v15 = vadd.f32 %v734_v11, %v477_v7 }
 0x127   : > { %v696_v16 = vpop.f32.mrf.mxu0  ;;  %v736_v17 = vpop.f32.mrf.mxu1 }
 0x128   : > { %798 = vst [vmem:[#allocation2 + $0x68] sm:$0xff] %v766_v14  ;;  %814 = vst [vmem:[#allocation2 + $0x90] sm:$0xff] %v782_v15  ;;  %v767_v20 = vadd.f32 %v696_v16, %v462_v12  ;;  %v783_v21 = vadd.f32 %v736_v17, %v478_v13 }
 0x129   : > { %v698_v22 = vpop.f32.mrf.mxu0  ;;  %v738_v23 = vpop.f32.mrf.mxu1 }
 0x12a   : > { %799 = vst [vmem:[#allocation2 + $0x30] sm:$0xff] %v767_v20  ;;  %815 = vst [vmem:[#allocation2 + $0x70] sm:$0xff] %v783_v21  ;;  %v768_v26 = vadd.f32 %v698_v22, %v463_v18  ;;  %v784_v27 = vadd.f32 %v738_v23, %v479_v19 }
 0x12b   : > { %v702_v28 = vpop.f32.mrf.mxu0  ;;  %v742_v29 = vpop.f32.mrf.mxu1 }
 0x12c   : > { %800 = vst [vmem:[#allocation2 + $0x48] sm:$0xff] %v768_v26  ;;  %816 = vst [vmem:[#allocation2 + $0xc0] sm:$0xff] %v784_v27  ;;  %v769_v32 = vadd.f32 %v702_v28, %v464_v24  ;;  %v785_v33 = vadd.f32 %v742_v29, %v480_v25 }
 0x12d   : > { %v704_v34 = vpop.f32.mrf.mxu0  ;;  %v744_v35 = vpop.f32.mrf.mxu1 }
 0x12e   : > { %801 = vst [vmem:[#allocation2 + $0x80] sm:$0xff] %v769_v32  ;;  %817 = vst [vmem:[#allocation2 + $0xa8] sm:$0xff] %v785_v33  ;;  %v770_v38 = vadd.f32 %v704_v34, %v465_v30  ;;  %v786_v39 = vadd.f32 %v744_v35, %v481_v31 }
 0x12f   : > { %v706_v40 = vpop.f32.mrf.mxu0  ;;  %v746_v41 = vpop.f32.mrf.mxu1 }
 0x130   : > { %802 = vst [vmem:[#allocation2 + $0x88] sm:$0xff] %v770_v38  ;;  %818 = vst [vmem:[#allocation2 + $0xd0] sm:$0xff] %v786_v39  ;;  %v771_v44 = vadd.f32 %v706_v40, %v466_v36  ;;  %v787_v45 = vadd.f32 %v746_v41, %v482_v37 }
 0x131   : > { %v708_v46 = vpop.f32.mrf.mxu0  ;;  %v748_v47 = vpop.f32.mrf.mxu1 }
 0x132   : > { %803 = vst [vmem:[#allocation2 + $0xe8] sm:$0xff] %v771_v44  ;;  %819 = vst [vmem:[#allocation2 + $0x10] sm:$0xff] %v787_v45  ;;  %v772_v50 = vadd.f32 %v708_v46, %v467_v42  ;;  %v788_v51 = vadd.f32 %v748_v47, %v483_v43 }
 0x133   : > { %v712_v52 = vpop.f32.mrf.mxu0  ;;  %v752_v53 = vpop.f32.mrf.mxu1 }
 0x134   : > { %804 = vst [vmem:[#allocation2 + $0xb8] sm:$0xff] %v772_v50  ;;  %820 = vst [vmem:[#allocation2 + $0x28] sm:$0xff] %v788_v51  ;;  %v773_v56 = vadd.f32 %v712_v52, %v468_v48  ;;  %v789_v57 = vadd.f32 %v752_v53, %v484_v49 }
 0x135   : > { %v714_v58 = vpop.f32.mrf.mxu0  ;;  %v754_v59 = vpop.f32.mrf.mxu1 }
 0x136   : > { %805 = vst [vmem:[#allocation2 + $0x60] sm:$0xff] %v773_v56  ;;  %821 = vst [vmem:[#allocation2 + $0xa0] sm:$0xff] %v789_v57  ;;  %v774_v62 = vadd.f32 %v714_v58, %v469_v54  ;;  %v790_v63 = vadd.f32 %v754_v59, %v485_v55 }
 0x137   : > { %v716_v0 = vpop.f32.mrf.mxu0  ;;  %v756_v1 = vpop.f32.mrf.mxu1 }
 0x138   : > { %806 = vst [vmem:[#allocation2 + $0xf0] sm:$0xff] %v774_v62  ;;  %822 = vst [vmem:[#allocation2 + $0xf8] sm:$0xff] %v790_v63  ;;  %v775_v4 = vadd.f32 %v716_v0, %v470_v60  ;;  %v791_v5 = vadd.f32 %v756_v1, %v486_v61  ;;  %828 = sbr.rel (%p1184_p11) target bundleno = 356 (0x164), region = 85 }
 0x139   : > { %v718_v6 = vpop.f32.mrf.mxu0  ;;  %v758_v7 = vpop.f32.mrf.mxu1 }
 0x13a   : > { %807 = vst [vmem:[#allocation2 + $0x8] sm:$0xff] %v775_v4  ;;  %823 = vst [vmem:[#allocation2 + $0x20] sm:$0xff] %v791_v5  ;;  %v776_v8 = vadd.f32 %v718_v6, %v471_v2  ;;  %v792_v9 = vadd.f32 %v758_v7, %v487_v3 }
 0x13c   : > { %808 = vst [vmem:[#allocation2 + $0x78] sm:$0xff] %v776_v8  ;;  %824 = vst [vmem:[#allocation2 + $0x98] sm:$0xff] %v792_v9 }
 0x13d   : > { %v863_v10 = vlaneseq  ;;  %v861_v12 = vld [vmem:[%s1644_s2] sm:$0x3]  ;;  %v829_v14 = vld [vmem:[#allocation2 + $0xb0] sm:$0xff]  ;;  %v831_v18 = vld [vmem:[#allocation2 + $0xd8] sm:$0xff] }
 0x13e   : > { %v905_v13 = vld [vmem:[%s1645_s3] sm:$0x3]  ;;  %v832_v19 = vld [vmem:[#allocation2 + $0x18] sm:$0xff]  ;;  %v833_v20 = vld [vmem:[#allocation2 + $0x50] sm:$0xff] }
 0x13f   : > { %v864_v11 = vshrl.u32 %v863_v10, 7  ;;  %v830_v16 = vld [vmem:[#allocation2] sm:$0xff]  ;;  %v834_v25 = vld [vmem:[#allocation2 + $0x68] sm:$0xff]  ;;  %v835_v26 = vld [vmem:[#allocation2 + $0x30] sm:$0xff] }
 0x140   : > { %v836_v27 = vld [vmem:[#allocation2 + $0x48] sm:$0xff]  ;;  %v837_v40 = vld [vmem:[#allocation2 + $0x80] sm:$0xff]  ;;  %v840_v47 = vld [vmem:[#allocation2 + $0xb8] sm:$0xff] }
 0x141   : > { %v865_v15 = vsub.s32 0, %v864_v11  ;;  %v869_v17 = vsub.s32 1, %v864_v11  ;;  %v838_v41 = vld [vmem:[#allocation2 + $0x88] sm:$0xff]  ;;  %v841_v48 = vld [vmem:[#allocation2 + $0x60] sm:$0xff]  ;;  %v842_v49 = vld [vmem:[#allocation2 + $0xf0] sm:$0xff] }
 0x142   : > { %v839_v42 = vld [vmem:[#allocation2 + $0xe8] sm:$0xff]  ;;  %v845_v8 = vld [vmem:[#allocation2 + $0x38] sm:$0xff]  ;;  %v847_v10 = vld [vmem:[#allocation2 + $0x40] sm:$0xff] }
 0x143   : > { %v1459_v21 = vrot.slane %v861_v12, %v865_v15  ;;  %v1461_v22 = vrot.slane %v905_v13, %v865_v15  ;;  %v1463_v23 = vrot.slane %v861_v12, %v869_v17  ;;  %v1465_v24 = vrot.slane %v905_v13, %v869_v17  ;;  %v843_v54 = vld [vmem:[#allocation2 + $0x8] sm:$0xff]  ;;  %v844_v55 = vld [vmem:[#allocation2 + $0x78] sm:$0xff]  ;;  %v850_v17 = vld [vmem:[#allocation2 + $0x90] sm:$0xff] }
 0x144   : > { %v846_v9 = vld [vmem:[#allocation2 + $0x58] sm:$0xff]  ;;  %v848_v15 = vld [vmem:[#allocation2 + $0xc8] sm:$0xff] }
 0x145   : > { %v873_v28 = vmul.f32 %v1459_v21, %v829_v14  ;;  %v874_v29 = vmul.f32 %v1463_v23, %v830_v16  ;;  %v875_v30 = vmul.f32 %v1459_v21, %v831_v18  ;;  %v876_v31 = vmul.f32 %v1463_v23, %v832_v19  ;;  %v849_v16 = vld [vmem:[#allocation2 + $0xe0] sm:$0xff] }
 0x146   : > { %v877_v32 = vmul.f32 %v1459_v21, %v833_v20  ;;  %v878_v33 = vmul.f32 %v1463_v23, %v834_v25  ;;  %v879_v34 = vmul.f32 %v1459_v21, %v835_v26  ;;  %v880_v35 = vmul.f32 %v1463_v23, %v836_v27  ;;  %v851_v26 = vld [vmem:[#allocation2 + $0x70] sm:$0xff]  ;;  %v852_v27 = vld [vmem:[#allocation2 + $0xc0] sm:$0xff] }
 0x147   : > { %v917_v36 = vadd.f32 %v1461_v22, %v873_v28  ;;  %v918_v37 = vadd.f32 %v1465_v24, %v874_v29  ;;  %v919_v38 = vadd.f32 %v1461_v22, %v875_v30  ;;  %v920_v39 = vadd.f32 %v1465_v24, %v876_v31 }
 0x148   : > { %v921_v43 = vadd.f32 %v1461_v22, %v877_v32  ;;  %v922_v44 = vadd.f32 %v1465_v24, %v878_v33  ;;  %v923_v45 = vadd.f32 %v1461_v22, %v879_v34  ;;  %v924_v46 = vadd.f32 %v1465_v24, %v880_v35 }
 0x149   : > { %v949_v50 = vmax.f32 %v917_v36, 0.0  ;;  %v950_v51 = vmax.f32 %v918_v37, 0.0  ;;  %v951_v52 = vmax.f32 %v919_v38, 0.0  ;;  %v952_v53 = vmax.f32 %v920_v39, 0.0 }
 0x14a   : > { %v953_v56 = vmax.f32 %v921_v43, 0.0  ;;  %v954_v57 = vmax.f32 %v922_v44, 0.0  ;;  %v955_v58 = vmax.f32 %v923_v45, 0.0  ;;  %v956_v59 = vmax.f32 %v924_v46, 0.0  ;;  %v853_v44 = vld [vmem:[#allocation2 + $0xa8] sm:$0xff]  ;;  %v854_v45 = vld [vmem:[#allocation2 + $0xd0] sm:$0xff] }
 0x14b   : > { %981 = vst [vmem:[%s1646_s4] sm:$0xff] %v949_v50  ;;  %982 = vst [vmem:[%s1646_s4 + $0x8] sm:$0xff] %v950_v51  ;;  %v881_v60 = vmul.f32 %v1459_v21, %v837_v40  ;;  %v882_v61 = vmul.f32 %v1463_v23, %v838_v41  ;;  %v883_v62 = vmul.f32 %v1459_v21, %v839_v42  ;;  %v855_v46 = vld [vmem:[#allocation2 + $0x10] sm:$0xff]  ;;  %v856_v51 = vld [vmem:[#allocation2 + $0x28] sm:$0xff] }
 0x14c   : > { %983 = vst [vmem:[%s1646_s4 + $0x10] sm:$0xff] %v951_v52  ;;  %984 = vst [vmem:[%s1646_s4 + $0x18] sm:$0xff] %v952_v53  ;;  %v884_v63 = vmul.f32 %v1463_v23, %v840_v47  ;;  %v885_v0 = vmul.f32 %v1459_v21, %v841_v48  ;;  %v886_v1 = vmul.f32 %v1463_v23, %v842_v49  ;;  %v857_v52 = vld [vmem:[#allocation2 + $0xa0] sm:$0xff]  ;;  %v858_v53 = vld [vmem:[#allocation2 + $0xf8] sm:$0xff] }
 0x14d   : > { %985 = vst [vmem:[%s1646_s4 + $0x20] sm:$0xff] %v953_v56  ;;  %986 = vst [vmem:[%s1646_s4 + $0x28] sm:$0xff] %v954_v57  ;;  %v887_v2 = vmul.f32 %v1459_v21, %v843_v54  ;;  %v888_v3 = vmul.f32 %v1463_v23, %v844_v55  ;;  %v925_v4 = vadd.f32 %v1461_v22, %v881_v60 }
 0x14e   : > { %987 = vst [vmem:[%s1646_s4 + $0x30] sm:$0xff] %v955_v58  ;;  %988 = vst [vmem:[%s1646_s4 + $0x38] sm:$0xff] %v956_v59  ;;  %v926_v5 = vadd.f32 %v1465_v24, %v882_v61  ;;  %v927_v6 = vadd.f32 %v1461_v22, %v883_v62  ;;  %v928_v7 = vadd.f32 %v1465_v24, %v884_v63  ;;  %v859_v58 = vld [vmem:[#allocation2 + $0x20] sm:$0xff]  ;;  %v860_v59 = vld [vmem:[#allocation2 + $0x98] sm:$0xff] }
 0x14f   : > { %v929_v11 = vadd.f32 %v1461_v22, %v885_v0  ;;  %v930_v12 = vadd.f32 %v1465_v24, %v886_v1  ;;  %v931_v13 = vadd.f32 %v1461_v22, %v887_v2  ;;  %v932_v14 = vadd.f32 %v1465_v24, %v888_v3 }
 0x150   : > { %v957_v18 = vmax.f32 %v925_v4, 0.0  ;;  %v958_v19 = vmax.f32 %v926_v5, 0.0  ;;  %v959_v20 = vmax.f32 %v927_v6, 0.0  ;;  %v960_v25 = vmax.f32 %v928_v7, 0.0 }
 0x151   : > { %v961_v28 = vmax.f32 %v929_v11, 0.0  ;;  %v962_v29 = vmax.f32 %v930_v12, 0.0  ;;  %v963_v30 = vmax.f32 %v931_v13, 0.0  ;;  %v964_v31 = vmax.f32 %v932_v14, 0.0 }
 0x152   : > { %989 = vst [vmem:[%s1646_s4 + $0x40] sm:$0xff] %v957_v18  ;;  %990 = vst [vmem:[%s1646_s4 + $0x48] sm:$0xff] %v958_v19  ;;  %v889_v32 = vmul.f32 %v1459_v21, %v845_v8  ;;  %v890_v33 = vmul.f32 %v1463_v23, %v846_v9  ;;  %v891_v34 = vmul.f32 %v1459_v21, %v847_v10 }
 0x153   : > { %991 = vst [vmem:[%s1646_s4 + $0x50] sm:$0xff] %v959_v20  ;;  %992 = vst [vmem:[%s1646_s4 + $0x58] sm:$0xff] %v960_v25  ;;  %v892_v35 = vmul.f32 %v1463_v23, %v848_v15  ;;  %v893_v36 = vmul.f32 %v1459_v21, %v849_v16  ;;  %v894_v37 = vmul.f32 %v1463_v23, %v850_v17 }
 0x154   : > { %993 = vst [vmem:[%s1646_s4 + $0x60] sm:$0xff] %v961_v28  ;;  %994 = vst [vmem:[%s1646_s4 + $0x68] sm:$0xff] %v962_v29  ;;  %v895_v38 = vmul.f32 %v1459_v21, %v851_v26  ;;  %v896_v39 = vmul.f32 %v1463_v23, %v852_v27  ;;  %v933_v40 = vadd.f32 %v1461_v22, %v889_v32 }
 0x155   : > { %995 = vst [vmem:[%s1646_s4 + $0x70] sm:$0xff] %v963_v30  ;;  %996 = vst [vmem:[%s1646_s4 + $0x78] sm:$0xff] %v964_v31  ;;  %v934_v41 = vadd.f32 %v1465_v24, %v890_v33  ;;  %v935_v42 = vadd.f32 %v1461_v22, %v891_v34  ;;  %v936_v43 = vadd.f32 %v1465_v24, %v892_v35 }
 0x156   : > { %v937_v47 = vadd.f32 %v1461_v22, %v893_v36  ;;  %v938_v48 = vadd.f32 %v1465_v24, %v894_v37  ;;  %v939_v49 = vadd.f32 %v1461_v22, %v895_v38  ;;  %v940_v50 = vadd.f32 %v1465_v24, %v896_v39 }
 0x157   : > { %v965_v54 = vmax.f32 %v933_v40, 0.0  ;;  %v966_v55 = vmax.f32 %v934_v41, 0.0  ;;  %v967_v56 = vmax.f32 %v935_v42, 0.0  ;;  %v968_v57 = vmax.f32 %v936_v43, 0.0 }
 0x158   : > { %v969_v60 = vmax.f32 %v937_v47, 0.0  ;;  %v970_v61 = vmax.f32 %v938_v48, 0.0  ;;  %v971_v62 = vmax.f32 %v939_v49, 0.0  ;;  %v972_v63 = vmax.f32 %v940_v50, 0.0 }
 0x159   : > { %997 = vst [vmem:[%s1646_s4 + $0x80] sm:$0xff] %v965_v54  ;;  %998 = vst [vmem:[%s1646_s4 + $0x88] sm:$0xff] %v966_v55  ;;  %v897_v0 = vmul.f32 %v1459_v21, %v853_v44  ;;  %v898_v1 = vmul.f32 %v1463_v23, %v854_v45  ;;  %v899_v2 = vmul.f32 %v1459_v21, %v855_v46 }
 0x15a   : > { %999 = vst [vmem:[%s1646_s4 + $0x90] sm:$0xff] %v967_v56  ;;  %1000 = vst [vmem:[%s1646_s4 + $0x98] sm:$0xff] %v968_v57  ;;  %v900_v3 = vmul.f32 %v1463_v23, %v856_v51  ;;  %v901_v4 = vmul.f32 %v1459_v21, %v857_v52  ;;  %v902_v5 = vmul.f32 %v1463_v23, %v858_v53 }
 0x15b   : > { %1001 = vst [vmem:[%s1646_s4 + $0xa0] sm:$0xff] %v969_v60  ;;  %1002 = vst [vmem:[%s1646_s4 + $0xa8] sm:$0xff] %v970_v61  ;;  %v903_v6 = vmul.f32 %v1459_v21, %v859_v58  ;;  %v904_v7 = vmul.f32 %v1463_v23, %v860_v59  ;;  %v941_v8 = vadd.f32 %v1461_v22, %v897_v0 }
 0x15c   : > { %1003 = vst [vmem:[%s1646_s4 + $0xb0] sm:$0xff] %v971_v62  ;;  %1004 = vst [vmem:[%s1646_s4 + $0xb8] sm:$0xff] %v972_v63  ;;  %v942_v9 = vadd.f32 %v1465_v24, %v898_v1  ;;  %v943_v10 = vadd.f32 %v1461_v22, %v899_v2  ;;  %v944_v11 = vadd.f32 %v1465_v24, %v900_v3 }
 0x15d   : > { %v945_v12 = vadd.f32 %v1461_v22, %v901_v4  ;;  %v946_v13 = vadd.f32 %v1465_v24, %v902_v5  ;;  %v947_v14 = vadd.f32 %v1461_v22, %v903_v6  ;;  %v948_v15 = vadd.f32 %v1465_v24, %v904_v7 }
 0x15e   : > { %v973_v16 = vmax.f32 %v941_v8, 0.0  ;;  %v974_v21 = vmax.f32 %v942_v9, 0.0  ;;  %v975_v17 = vmax.f32 %v943_v10, 0.0  ;;  %v976_v23 = vmax.f32 %v944_v11, 0.0 }
 0x15f   : > { %v977_v18 = vmax.f32 %v945_v12, 0.0  ;;  %v978_v19 = vmax.f32 %v946_v13, 0.0  ;;  %v979_v20 = vmax.f32 %v947_v14, 0.0  ;;  %v980_v25 = vmax.f32 %v948_v15, 0.0 }
 0x160   : > { %1005 = vst [vmem:[%s1646_s4 + $0xc0] sm:$0xff] %v973_v16  ;;  %1006 = vst [vmem:[%s1646_s4 + $0xc8] sm:$0xff] %v974_v21 }
 0x161   : > { %1007 = vst [vmem:[%s1646_s4 + $0xd0] sm:$0xff] %v975_v17  ;;  %1008 = vst [vmem:[%s1646_s4 + $0xd8] sm:$0xff] %v976_v23 }
 0x162   : > { %1009 = vst [vmem:[%s1646_s4 + $0xe0] sm:$0xff] %v977_v18  ;;  %1010 = vst [vmem:[%s1646_s4 + $0xe8] sm:$0xff] %v978_v19 }
 0x163   : > { %1011 = vst [vmem:[%s1646_s4 + $0xf0] sm:$0xff] %v979_v20  ;;  %1012 = vst [vmem:[%s1646_s4 + $0xf8] sm:$0xff] %v980_v25 }
 0x164 PF: > { %s14_s19 = sadd.s32 1, %s1318_s19   ;;  %s1647_s15 = smov %s1306_s16 }
 0x165   : > { %p11_p12 = scmp.ge.s32.totalorder %s14_s19, 11   ;;  %s1648_s16 = smov %s1382_s23 }
 0x166   : > { %s1649_s17 = smov %s1314_s18  ;;  %s1650_s18 = smov %s1652_s20 }
 0x167   :  { %13 = sbr.rel (!%p11_p12) target bundleno = 3 (0x3), region = 129 }

// kernel: crnn_forward.22
= control target key start
LH: loop header
LB: loop body
LE: loop exit
PB: predicated region body
PF: predicated region fallthrough
CT: control target
= control target key end

     0   :  { %s368_s6 = smov 0   ;;  %s370_s7 = smov 0   ;;  %s419_s0 = inlined_call_operand.vmem [shape: f32[2,8,8,256], index: 0, kind: input, shape index: {}]   ;;  %s420_s1 = inlined_call_operand.vmem [shape: f32[2,4,8,256], index: 1, kind: output, shape index: {}]  }
   0x1   :  { %s372_s8 = smov 0   ;;  %s374_s9 = smov 0  }
   0x2   :  { %s376_s10 = smov 0  }
   0x3 LB: > { %s20_s11 = sadd.s32 1, %s348_s8  ;;  %s23_s12 = sadd.s32 1, %s352_s9  ;;  %s356_s10 = sphi %s376_s10, %s11_s10   ;;  %s352_s9 = sphi %s374_s9, %s424_s9   ;;  %s348_s8 = sphi %s372_s8, %s423_s8   ;;  %s344_s7 = sphi %s370_s7, %s422_s7   ;;  %s340_s6 = sphi %s368_s6, %s421_s6  }
   0x4   : > { %p21_p0 = scmp.ge.s32.totalorder %s20_s11, 4  ;;  %p266_p1 = scmp.ge.s32.totalorder %s356_s10, 1 }
   0x5   : > { %p109_p2 = scmp.lt.s32.totalorder %s356_s10, 9 }
   0x6   : > { %s426_s11 = smov (%p21_p0, %s20_s11), 0  ;;  %s428_s12 = smov (!%p21_p0, %s23_s12), %s352_s9 }
   0x7   : > { %p110_p3 = pnand %p266_p1, %p109_p2  ;;  %p25_p4 = scmp.ge.s32.totalorder %s428_s12, 2 }
   0x8   : > { %s267_s13 = sshll.u32 (!%p110_p3), %s340_s6, 1  ;;  %p139_p5 = scmp.lt.s32.totalorder (!%p110_p3), %s344_s7, 1 }
   0x9   : > { %s430_s12 = smov (%p25_p4, %s428_s12), 0  ;;  %113 = sbr.rel (%p110_p3) target bundleno = 24 (0x18), region = 24 }
   0xa   : > { %p141_p6 = scmp.lt.s32.totalorder (!%p110_p3), %s267_s13, 7  ;;  %p151_p7 = scmp.lt.s32.totalorder (!%p110_p3), %s340_s6, 3 }
   0xe   : > { %s432_s7 = smov (!%p139_p5, %s344_s7), 1  ;;  %s434_s13 = smov (!%p141_p6, %s267_s13), 7 }
   0xf   : > { %s269_s14 = sshll.u32 %s432_s7, 4  ;;  %s268_s15 = sshll.u32 %s434_s13, 1 }
  0x10   : > { %s145_s16 = sadd.s32 %s269_s14, %s268_s15  ;;  %s272_s21 = sshll.u32 %s432_s7, 3 }
  0x11   : > { %s270_s17 = sshll.u32 %s145_s16, 3  ;;  %s436_s6 = smov (!%p151_p7, %s340_s6), 3 }
  0x12   : > { %s147_s20 = scalar_lea.vmem %s419_s0, %s270_s17  ;;  %s271_s22 = sshll.u32 %s436_s6, 1 }
  0x13   : > { %v158_v0 = vld [vmem:[%s147_s20] sm:$0xff]  ;;  %v274_v1 = vld [vmem:[%s147_s20 + $0x10] sm:$0xff]  ;;  %v159_v2 = vld [vmem:[%s147_s20 + $0x8] sm:$0xff]  ;;  %s155_s23 = sadd.s32 %s272_s21, %s271_s22 }
  0x14   : > { %v275_v3 = vld [vmem:[%s147_s20 + $0x18] sm:$0xff]  ;;  %v163_v4 = vmax.f32 %v158_v0, %v274_v1  ;;  %s273_s24 = sshll.u32 %s155_s23, 3 }
  0x15   : > { %v164_v5 = vmax.f32 %v159_v2, %v275_v3  ;;  %s157_s27 = scalar_lea.vmem %s420_s1, %s273_s24 }
  0x16   : > { %165 = vst [vmem:[%s157_s27] sm:$0xff] %v163_v4 }
  0x17   : > { %166 = vst [vmem:[%s157_s27 + $0x8] sm:$0xff] %v164_v5 }
  0x18 PF: > { %s11_s10 = sadd.s32 1, %s356_s10   ;;  %s421_s6 = smov %s348_s8 }
  0x19   : > { %p8_p8 = scmp.ge.s32.totalorder %s11_s10, 10   ;;  %s422_s7 = smov %s352_s9 }
  0x1a   : > { %s423_s8 = smov %s426_s11  ;;  %s424_s9 = smov %s430_s12 }
  0x1b   :  { %10 = sbr.rel (!%p8_p8) target bundleno = 3 (0x3), region = 55 }

// kernel: crnn_forward.21
= control target key start
LH: loop header
LB: loop body
LE: loop exit
PB: predicated region body
PF: predicated region fallthrough
CT: control target
= control target key end

     0   :  { %s1441_s12 = smov 0   ;;  %s1443_s13 = smov 0   ;;  %s1713_s0 = inlined_call_operand.vmem [shape: bf16[128,2304], index: 0, kind: input, shape index: {}]   ;;  %s1714_s1 = inlined_call_operand.vmem [shape: bf16[2304,256], index: 1, kind: input, shape index: {}]   ;;  %s1715_s2 = inlined_call_operand.vmem [shape: f32[1,256], index: 2, kind: input, shape index: {}]   ;;  %s1716_s3 = inlined_call_operand.vmem [shape: f32[128,256], index: 3, kind: output, shape index: {}]  }
   0x1   :  { %s1445_s14 = smov 0   ;;  %s1447_s15 = smov 0  }
   0x2   :  { %s1449_s16 = smov 0  }
   0x3 LB: > { %s25_s17 = sadd.s32 1, %s1414_s15  ;;  %p48_p1 = scmp.ne.s32.totalorder %s1406_s13, %s1402_s12  ;;  %s1418_s16 = sphi %s1449_s16, %s13_s16   ;;  %s1414_s15 = sphi %s1447_s15, %s1720_s15   ;;  %s1410_s14 = sphi %s1445_s14, %s1719_s14   ;;  %s1406_s13 = sphi %s1443_s13, %s1718_s13   ;;  %s1402_s12 = sphi %s1441_s12, %s1717_s12  }
   0x4   : > { %p26_p0 = scmp.ge.s32.totalorder %s25_s17, 9  ;;  %p49_p2 = scmp.eq.s32.totalorder %s1418_s16, 0 }
   0x5   : > { %s41_s19 = sadd.s32 1, %s1406_s13  ;;  %p1170_p5 = scmp.ge.s32.totalorder %s1418_s16, 9 }
   0x6   : > { %s1722_s17 = smov (%p26_p0, %s25_s17), 0  ;;  %p50_p3 = por %p49_p2, %p48_p1 }
   0x7   : > { %s37_s18 = ssub.s32 %s1414_s15, %s1722_s17  ;;  %164 = sbr.rel (%p1170_p5) target bundleno = 24 (0x18), region = 20 }
   0x8   : > { %p39_p4 = scmp.eq.s32.totalorder %s37_s18, 0 }
   0xa   : > { %s1476_s20 = scalar_select %p39_p4, %s1406_s13, %s41_s19  }
   0xc   : > { %167 = sbr.rel (!%p50_p3) target bundleno = 24 (0x18), region = 24  ;;  %s169_s21 = sand.u32 (%p50_p3), 1, %s1406_s13  }
   0xd   : > { %s1233_s22 = sshll.u32 (%p50_p3), %s1414_s15, 3  ;;  %s1171_s23 = sshll.u32 (%p50_p3), %s169_s21, 7 }
   0xe   : > { %s1484_s26 = scalar_lea.vmem (%p50_p3), %s1713_s0, %s1233_s22  ;;  %s171_s27 = scalar_lea.vmem (%p50_p3), [#allocation3], %s1171_s23 }
   0xf   : > { %v236_v0 = vld [vmem:[%s1484_s26] sm:$0xff] (%p50_p3)  ;;  %v238_v1 = vld [vmem:[%s1484_s26 + $0x48] sm:$0xff] (%p50_p3)  ;;  %v240_v2 = vld [vmem:[%s1484_s26 + $0x90] sm:$0xff] (%p50_p3) }
  0x10   : > { %237 = vst [vmem:[%s171_s27] sm:$0xff] (%p50_p3), %v236_v0  ;;  %239 = vst [vmem:[%s171_s27 + $0x8] sm:$0xff] (%p50_p3), %v238_v1  ;;  %v242_v3 = vld [vmem:[%s1484_s26 + $0xd8] sm:$0xff] (%p50_p3)  ;;  %v244_v4 = vld [vmem:[%s1484_s26 + $0x120] sm:$0xff] (%p50_p3) }
  0x11   : > { %241 = vst [vmem:[%s171_s27 + $0x10] sm:$0xff] %v240_v2  ;;  %v246_v5 = vld [vmem:[%s1484_s26 + $0x168] sm:$0xff]  ;;  %243 = vst [vmem:[%s171_s27 + $0x18] sm:$0xff] %v242_v3  ;;  %v248_v6 = vld [vmem:[%s1484_s26 + $0x1b0] sm:$0xff] }
  0x12   : > { %245 = vst [vmem:[%s171_s27 + $0x20] sm:$0xff] %v244_v4  ;;  %247 = vst [vmem:[%s171_s27 + $0x28] sm:$0xff] %v246_v5  ;;  %v250_v7 = vld [vmem:[%s1484_s26 + $0x1f8] sm:$0xff]  ;;  %v252_v8 = vld [vmem:[%s1484_s26 + $0x240] sm:$0xff] }
  0x13   : > { %249 = vst [vmem:[%s171_s27 + $0x30] sm:$0xff] %v248_v6  ;;  %251 = vst [vmem:[%s171_s27 + $0x38] sm:$0xff] %v250_v7  ;;  %v254_v9 = vld [vmem:[%s1484_s26 + $0x288] sm:$0xff]  ;;  %v256_v10 = vld [vmem:[%s1484_s26 + $0x2d0] sm:$0xff] }
  0x14   : > { %253 = vst [vmem:[%s171_s27 + $0x40] sm:$0xff] %v252_v8  ;;  %v258_v11 = vld [vmem:[%s1484_s26 + $0x318] sm:$0xff]  ;;  %255 = vst [vmem:[%s171_s27 + $0x48] sm:$0xff] %v254_v9  ;;  %v260_v12 = vld [vmem:[%s1484_s26 + $0x360] sm:$0xff] }
  0x15   : > { %257 = vst [vmem:[%s171_s27 + $0x50] sm:$0xff] %v256_v10  ;;  %259 = vst [vmem:[%s171_s27 + $0x58] sm:$0xff] %v258_v11  ;;  %v262_v13 = vld [vmem:[%s1484_s26 + $0x3a8] sm:$0xff]  ;;  %v264_v14 = vld [vmem:[%s1484_s26 + $0x3f0] sm:$0xff] }
  0x16   : > { %261 = vst [vmem:[%s171_s27 + $0x60] sm:$0xff] %v260_v12  ;;  %263 = vst [vmem:[%s171_s27 + $0x68] sm:$0xff] %v262_v13  ;;  %v266_v15 = vld [vmem:[%s1484_s26 + $0x438] sm:$0xff] }
  0x17   : > { %265 = vst [vmem:[%s171_s27 + $0x70] sm:$0xff] %v264_v14  ;;  %267 = vst [vmem:[%s171_s27 + $0x78] sm:$0xff] %v266_v15 }
  0x18 PF: > { %p1174_p6 = scmp.ge.s32.totalorder %s1418_s16, 1  ;;  %p287_p7 = scmp.lt.s32.totalorder %s1418_s16, 10 }
  0x1a   : > { %p288_p8 = pnand %p1174_p6, %p287_p7 }
  0x1b   : > { %s294_s28 = sand.u32 (!%p288_p8), 1, %s1402_s12   ;;  %s1176_s29 = sshll.u32 (!%p288_p8), %s1410_s14, 5 }
  0x1c   : > { %291 = sbr.rel (%p288_p8) target bundleno = 375 (0x177), region = 66  ;;  %s1175_s30 = sshll.u32 (!%p288_p8), %s294_s28, 7 }
  0x1d   : > { %p340_p9 = scmp.lt.s32.totalorder (!%p288_p8), %s1176_s29, 287  ;;  %s1511_s8 = scalar_lea.vmem (!%p288_p8), [#allocation3], %s1175_s30 }
  0x1e   : > { %p1179_p10 = scmp.ne.s32.totalorder (!%p288_p8), %s1410_s14, 0 }
  0x21   : > { %s1724_s29 = smov (!%p340_p9, %s1176_s29), 287  ;;  %370 = sbr.rel (%p1179_p10) target bundleno = 55 (0x37), region = 74 }
  0x22   : > { %s1234_s4 = sshll.u32 %s1724_s29, 3 }
  0x23   : > { %s1509_s7 = scalar_lea.vmem %s1714_s1, %s1234_s4 }
  0x26   : > { %v1420_v16 = vmov 0.0  }
  0x27   : > { %371 = vst [vmem:[#allocation2 + $0xb0] sm:$0xff] %v1420_v16  ;;  %372 = vst [vmem:[#allocation2] sm:$0xff] %v1420_v16 }
  0x28   : > { %373 = vst [vmem:[#allocation2 + $0xd8] sm:$0xff] %v1420_v16  ;;  %374 = vst [vmem:[#allocation2 + $0x18] sm:$0xff] %v1420_v16 }
  0x29   : > { %375 = vst [vmem:[#allocation2 + $0x50] sm:$0xff] %v1420_v16  ;;  %376 = vst [vmem:[#allocation2 + $0x68] sm:$0xff] %v1420_v16 }
  0x2a   : > { %377 = vst [vmem:[#allocation2 + $0x30] sm:$0xff] %v1420_v16  ;;  %378 = vst [vmem:[#allocation2 + $0x48] sm:$0xff] %v1420_v16 }
  0x2b   : > { %379 = vst [vmem:[#allocation2 + $0x80] sm:$0xff] %v1420_v16  ;;  %380 = vst [vmem:[#allocation2 + $0x88] sm:$0xff] %v1420_v16 }
  0x2c   : > { %381 = vst [vmem:[#allocation2 + $0xe8] sm:$0xff] %v1420_v16  ;;  %382 = vst [vmem:[#allocation2 + $0xb8] sm:$0xff] %v1420_v16 }
  0x2d   : > { %383 = vst [vmem:[#allocation2 + $0x60] sm:$0xff] %v1420_v16  ;;  %384 = vst [vmem:[#allocation2 + $0xf0] sm:$0xff] %v1420_v16 }
  0x2e   : > { %385 = vst [vmem:[#allocation2 + $0x8] sm:$0xff] %v1420_v16  ;;  %386 = vst [vmem:[#allocation2 + $0x78] sm:$0xff] %v1420_v16 }
  0x2f   : > { %387 = vst [vmem:[#allocation2 + $0x38] sm:$0xff] %v1420_v16  ;;  %388 = vst [vmem:[#allocation2 + $0x58] sm:$0xff] %v1420_v16 }
  0x30   : > { %389 = vst [vmem:[#allocation2 + $0x40] sm:$0xff] %v1420_v16  ;;  %390 = vst [vmem:[#allocation2 + $0xc8] sm:$0xff] %v1420_v16 }
  0x31   : > { %391 = vst [vmem:[#allocation2 + $0xe0] sm:$0xff] %v1420_v16  ;;  %392 = vst [vmem:[#allocation2 + $0x90] sm:$0xff] %v1420_v16 }
  0x32   : > { %393 = vst [vmem:[#allocation2 + $0x70] sm:$0xff] %v1420_v16  ;;  %394 = vst [vmem:[#allocation2 + $0xc0] sm:$0xff] %v1420_v16 }
  0x33   : > { %395 = vst [vmem:[#allocation2 + $0xa8] sm:$0xff] %v1420_v16  ;;  %396 = vst [vmem:[#allocation2 + $0xd0] sm:$0xff] %v1420_v16 }
  0x34   : > { %397 = vst [vmem:[#allocation2 + $0x10] sm:$0xff] %v1420_v16  ;;  %398 = vst [vmem:[#allocation2 + $0x28] sm:$0xff] %v1420_v16 }
  0x35   : > { %399 = vst [vmem:[#allocation2 + $0xa0] sm:$0xff] %v1420_v16  ;;  %400 = vst [vmem:[#allocation2 + $0xf8] sm:$0xff] %v1420_v16 }
  0x36   : > { %401 = vst [vmem:[#allocation2 + $0x20] sm:$0xff] %v1420_v16  ;;  %402 = vst [vmem:[#allocation2 + $0x98] sm:$0xff] %v1420_v16 }
  0x37 PF: > { %v1308_v17 = vld [vmem:[%s1509_s7 + $0x74] ss:$8 sps:$4 sm:$0xff]   ;;  %v1310_v18 = vld [vmem:[%s1509_s7 + $0x70] ss:$8 sps:$4 sm:$0xff]   ;;  %v1311_v19 = vld [vmem:[%s1509_s7 + $0x64] ss:$8 sps:$4 sm:$0xff]  }
  0x38   : > { %723 = vmatprep.subr.bf16.mxu0 %v1308_v17  ;;  %1235 = vmatprep.subr.bf16.mxu1 %v1308_v17  ;;  %v1313_v20 = vld [vmem:[%s1509_s7 + $0x60] ss:$8 sps:$4 sm:$0xff]   ;;  %v1314_v21 = vld [vmem:[%s1509_s7 + $0x54] ss:$8 sps:$4 sm:$0xff]   ;;  %v1316_v22 = vld [vmem:[%s1509_s7 + $0x50] ss:$8 sps:$4 sm:$0xff]  }
  0x39   : > { %724 = vmatpush1.bf16.msra.mxu0 %v1310_v18  ;;  %1251 = vmatpush1.bf16.msra.mxu1 %v1310_v18  ;;  %v1317_v23 = vld [vmem:[%s1509_s7 + $0x44] ss:$8 sps:$4 sm:$0xff]   ;;  %v1319_v24 = vld [vmem:[%s1509_s7 + $0x40] ss:$8 sps:$4 sm:$0xff]   ;;  %v1320_v25 = vld [vmem:[%s1509_s7 + $0x34] ss:$8 sps:$4 sm:$0xff]  }
  0x3a   : > { %725 = vmatprep.subr.bf16.mxu0 %v1311_v19  ;;  %1236 = vmatprep.subr.bf16.mxu1 %v1311_v19  ;;  %v1322_v26 = vld [vmem:[%s1509_s7 + $0x30] ss:$8 sps:$4 sm:$0xff]   ;;  %v1323_v27 = vld [vmem:[%s1509_s7 + $0x24] ss:$8 sps:$4 sm:$0xff]   ;;  %v1325_v28 = vld [vmem:[%s1509_s7 + $0x20] ss:$8 sps:$4 sm:$0xff]  }
  0x3b   : > { %v1326_v29 = vld [vmem:[%s1509_s7 + $0x14] ss:$8 sps:$4 sm:$0xff]   ;;  %v1358_v30 = vld [vmem:[%s1511_s8 + $0x4] ss:$8 sps:$4 sm:$0xff]   ;;  %v1328_v31 = vld [vmem:[%s1509_s7 + $0x10] ss:$8 sps:$4 sm:$0xff]  }
  0x3c   : > { %v1361_v32 = vld [vmem:[%s1511_s8 + $0x44] ss:$8 sps:$4 sm:$0xff]   ;;  %755 = vmatprep.mubr.bf16.mxu0 %v1358_v30  ;;  %v1331_v34 = vld [vmem:[%s1509_s7] ss:$8 sps:$4 sm:$0xff]   ;;  %v1332_v35 = vld [vmem:[%s1509_s7 + $0xf4] ss:$8 sps:$4 sm:$0xff]  }
  0x3d   : > { %726 = vmatpush1.bf16.msra.mxu0 %v1313_v20  ;;  %1252 = vmatpush1.bf16.msra.mxu1 %v1313_v20  ;;  %v1329_v33 = vld [vmem:[%s1509_s7 + $0x4] ss:$8 sps:$4 sm:$0xff]   ;;  %v1334_v36 = vld [vmem:[%s1509_s7 + $0xf0] ss:$8 sps:$4 sm:$0xff]   ;;  %v1337_v38 = vld [vmem:[%s1509_s7 + $0xe0] ss:$8 sps:$4 sm:$0xff]  }
  0x3e   : > { %727 = vmatprep.subr.bf16.mxu0 %v1314_v21  ;;  %1237 = vmatprep.subr.bf16.mxu1 %v1314_v21  ;;  %v1335_v37 = vld [vmem:[%s1509_s7 + $0xe4] ss:$8 sps:$4 sm:$0xff]   ;;  %v1338_v39 = vld [vmem:[%s1509_s7 + $0xd4] ss:$8 sps:$4 sm:$0xff]   ;;  %v1340_v40 = vld [vmem:[%s1509_s7 + $0xd0] ss:$8 sps:$4 sm:$0xff]  }
  0x3f   : > { %795 = vmatprep.mubr.bf16.mxu1 %v1361_v32  ;;  %v1341_v41 = vld [vmem:[%s1509_s7 + $0xc4] ss:$8 sps:$4 sm:$0xff]   ;;  %v1343_v42 = vld [vmem:[%s1509_s7 + $0xc0] ss:$8 sps:$4 sm:$0xff]   ;;  %v1344_v43 = vld [vmem:[%s1509_s7 + $0xb4] ss:$8 sps:$4 sm:$0xff]  }
  0x40   : > { %v1346_v44 = vld [vmem:[%s1509_s7 + $0xb0] ss:$8 sps:$4 sm:$0xff]   ;;  %v1347_v45 = vld [vmem:[%s1509_s7 + $0xa4] ss:$8 sps:$4 sm:$0xff]   ;;  %v1349_v46 = vld [vmem:[%s1509_s7 + $0xa0] ss:$8 sps:$4 sm:$0xff]  }
  0x41   : > { %728 = vmatpush1.bf16.msra.mxu0 %v1316_v22  ;;  %1253 = vmatpush1.bf16.msra.mxu1 %v1316_v22  ;;  %v1350_v47 = vld [vmem:[%s1509_s7 + $0x94] ss:$8 sps:$4 sm:$0xff]   ;;  %v1352_v48 = vld [vmem:[%s1509_s7 + $0x90] ss:$8 sps:$4 sm:$0xff]   ;;  %v1353_v49 = vld [vmem:[%s1509_s7 + $0x84] ss:$8 sps:$4 sm:$0xff]  }
  0x42   : > { %729 = vmatprep.subr.bf16.mxu0 %v1317_v23  ;;  %1238 = vmatprep.subr.bf16.mxu1 %v1317_v23  ;;  %v1355_v50 = vld [vmem:[%s1509_s7 + $0x80] ss:$8 sps:$4 sm:$0xff]   ;;  %v1362_v53 = vld [vmem:[%s1511_s8 + $0x14] ss:$8 sps:$4 sm:$0xff]   ;;  %v1366_v55 = vld [vmem:[%s1511_s8 + $0x10] ss:$8 sps:$4 sm:$0xff]  }
  0x43   : > { %v1356_v51 = vld [vmem:[%s1511_s8] ss:$8 sps:$4 sm:$0xff]   ;;  %v1364_v54 = vld [vmem:[%s1511_s8 + $0x54] ss:$8 sps:$4 sm:$0xff]   ;;  %v1367_v56 = vld [vmem:[%s1511_s8 + $0x50] ss:$8 sps:$4 sm:$0xff]  }
  0x44   : > { %v1359_v52 = vld [vmem:[%s1511_s8 + $0x40] ss:$8 sps:$4 sm:$0xff]   ;;  %v1368_v57 = vld [vmem:[%s1511_s8 + $0x24] ss:$8 sps:$4 sm:$0xff]   ;;  %v1374_v61 = vld [vmem:[%s1511_s8 + $0x34] ss:$8 sps:$4 sm:$0xff]  }
  0x45   : > { %730 = vmatpush1.bf16.msra.mxu0 %v1319_v24  ;;  %1254 = vmatpush1.bf16.msra.mxu1 %v1319_v24  ;;  %v1370_v58 = vld [vmem:[%s1511_s8 + $0x64] ss:$8 sps:$4 sm:$0xff]   ;;  %v1372_v59 = vld [vmem:[%s1511_s8 + $0x20] ss:$8 sps:$4 sm:$0xff]   ;;  %v1376_v62 = vld [vmem:[%s1511_s8 + $0x74] ss:$8 sps:$4 sm:$0xff]  }
  0x46   : > { %731 = vmatprep.subr.bf16.mxu0 %v1320_v25  ;;  %1239 = vmatprep.subr.bf16.mxu1 %v1320_v25  ;;  %v1373_v60 = vld [vmem:[%s1511_s8 + $0x60] ss:$8 sps:$4 sm:$0xff]   ;;  %v1378_v63 = vld [vmem:[%s1511_s8 + $0x30] ss:$8 sps:$4 sm:$0xff]   ;;  %p1228_p11 = scmp.ne.s32.totalorder %s1410_s14, 8 }
  0x47   : > { %v1379_v0 = vld [vmem:[%s1511_s8 + $0x70] ss:$8 sps:$4 sm:$0xff]   ;;  %v404_v5 = vld [vmem:[#allocation2] sm:$0xff]  ;;  %v422_v18 = vld [vmem:[#allocation2 + $0xc8] sm:$0xff] }
  0x48   : > { %v403_v1 = vld [vmem:[#allocation2 + $0xb0] sm:$0xff]  ;;  %v419_v2 = vld [vmem:[#allocation2 + $0x38] sm:$0xff]  ;;  %v421_v12 = vld [vmem:[#allocation2 + $0x40] sm:$0xff] }
  0x49   : > { %732 = vmatpush1.bf16.msra.mxu0 %v1322_v26  ;;  %1255 = vmatpush1.bf16.msra.mxu1 %v1322_v26  ;;  %v420_v6 = vld [vmem:[#allocation2 + $0x58] sm:$0xff]  ;;  %v407_v23 = vld [vmem:[#allocation2 + $0x50] sm:$0xff]  ;;  %v423_v24 = vld [vmem:[#allocation2 + $0xe0] sm:$0xff] }
  0x4a   : > { %733 = vmatprep.subr.bf16.mxu0 %v1323_v27  ;;  %1240 = vmatprep.subr.bf16.mxu1 %v1323_v27  ;;  %v405_v11 = vld [vmem:[#allocation2 + $0xd8] sm:$0xff]  ;;  %v424_v30 = vld [vmem:[#allocation2 + $0x90] sm:$0xff] }
  0x4b   : > { %v406_v17 = vld [vmem:[#allocation2 + $0x18] sm:$0xff] }
  0x4d   : > { %734 = vmatpush1.bf16.msra.mxu0 %v1325_v28  ;;  %1256 = vmatpush1.bf16.msra.mxu1 %v1325_v28 }
  0x4e   : > { %735 = vmatprep.subr.bf16.mxu0 %v1326_v29  ;;  %1241 = vmatprep.subr.bf16.mxu1 %v1326_v29  ;;  %v408_v29 = vld [vmem:[#allocation2 + $0x68] sm:$0xff] }
  0x51   : > { %736 = vmatpush1.bf16.msra.mxu0 %v1328_v31  ;;  %1257 = vmatpush1.bf16.msra.mxu1 %v1328_v31 }
  0x52   : > { %737 = vmatprep.subr.bf16.mxu0 %v1329_v33  ;;  %1242 = vmatprep.subr.bf16.mxu1 %v1329_v33 }
  0x55   : > { %738 = vmatpush1.bf16.msra.mxu0 %v1331_v34  ;;  %1258 = vmatpush1.bf16.msra.mxu1 %v1331_v34 }
  0x56   : > { %739 = vmatprep.subr.bf16.mxu0 %v1332_v35  ;;  %1243 = vmatprep.subr.bf16.mxu1 %v1332_v35  ;;  %v409_v35 = vld [vmem:[#allocation2 + $0x30] sm:$0xff] }
  0x59   : > { %740 = vmatpush2.bf16.msra.mxu0 %v1334_v36  ;;  %1259 = vmatpush2.bf16.msra.mxu1 %v1334_v36  ;;  %v425_v36 = vld [vmem:[#allocation2 + $0x70] sm:$0xff] }
  0x5a   : > { %741 = vmatprep.subr.bf16.mxu0 %v1335_v37  ;;  %1244 = vmatprep.subr.bf16.mxu1 %v1335_v37 }
  0x5d   : > { %742 = vmatpush2.bf16.msra.mxu0 %v1337_v38  ;;  %1260 = vmatpush2.bf16.msra.mxu1 %v1337_v38 }
  0x5e   : > { %743 = vmatprep.subr.bf16.mxu0 %v1338_v39  ;;  %1245 = vmatprep.subr.bf16.mxu1 %v1338_v39 }
  0x61   : > { %744 = vmatpush2.bf16.msra.mxu0 %v1340_v40  ;;  %1261 = vmatpush2.bf16.msra.mxu1 %v1340_v40 }
  0x62   : > { %745 = vmatprep.subr.bf16.mxu0 %v1341_v41  ;;  %1246 = vmatprep.subr.bf16.mxu1 %v1341_v41  ;;  %v410_v41 = vld [vmem:[#allocation2 + $0x48] sm:$0xff] }
  0x65   : > { %746 = vmatpush2.bf16.msra.mxu0 %v1343_v42  ;;  %1262 = vmatpush2.bf16.msra.mxu1 %v1343_v42  ;;  %v426_v42 = vld [vmem:[#allocation2 + $0xc0] sm:$0xff] }
  0x66   : > { %747 = vmatprep.subr.bf16.mxu0 %v1344_v43  ;;  %1247 = vmatprep.subr.bf16.mxu1 %v1344_v43 }
  0x69   : > { %748 = vmatpush2.bf16.msra.mxu0 %v1346_v44  ;;  %1263 = vmatpush2.bf16.msra.mxu1 %v1346_v44 }
  0x6a   : > { %749 = vmatprep.subr.bf16.mxu0 %v1347_v45  ;;  %1248 = vmatprep.subr.bf16.mxu1 %v1347_v45 }
  0x6d   : > { %750 = vmatpush2.bf16.msra.mxu0 %v1349_v46  ;;  %1264 = vmatpush2.bf16.msra.mxu1 %v1349_v46 }
  0x6e   : > { %751 = vmatprep.subr.bf16.mxu0 %v1350_v47  ;;  %1249 = vmatprep.subr.bf16.mxu1 %v1350_v47  ;;  %v411_v47 = vld [vmem:[#allocation2 + $0x80] sm:$0xff] }
  0x71   : > { %752 = vmatpush2.bf16.msra.mxu0 %v1352_v48  ;;  %1265 = vmatpush2.bf16.msra.mxu1 %v1352_v48  ;;  %v427_v48 = vld [vmem:[#allocation2 + $0xa8] sm:$0xff] }
  0x72   : > { %753 = vmatprep.subr.bf16.mxu0 %v1353_v49  ;;  %1250 = vmatprep.subr.bf16.mxu1 %v1353_v49 }
  0x75   : > { %754 = vmatpush2.bf16.msra.mxu0 %v1355_v50  ;;  %1266 = vmatpush2.bf16.msra.mxu1 %v1355_v50 }
  0x78   : > { %756 = vmatmul.mubr.bf16.vlgmr.msra.gmra.mxu0 %v1356_v51  ;;  %796 = vmatmul.mubr.bf16.vlgmr.msra.gmra.mxu1 %v1359_v52 }
  0x79   : > { %765 = vmatprep.mubr.bf16.mxu0 %v1362_v53  ;;  %805 = vmatprep.mubr.bf16.mxu1 %v1364_v54  ;;  %v412_v53 = vld [vmem:[#allocation2 + $0x88] sm:$0xff]  ;;  %v428_v54 = vld [vmem:[#allocation2 + $0xd0] sm:$0xff] }
  0x80   : > { %766 = vmatmul.mubr.bf16.gmra.mxu0 %v1366_v55  ;;  %806 = vmatmul.mubr.bf16.gmra.mxu1 %v1367_v56 }
  0x81   : > { %775 = vmatprep.mubr.bf16.mxu0 %v1368_v57  ;;  %815 = vmatprep.mubr.bf16.mxu1 %v1370_v58 }
  0x88   : > { %776 = vmatmul.mubr.bf16.gmra.mxu0 %v1372_v59  ;;  %816 = vmatmul.mubr.bf16.gmra.mxu1 %v1373_v60  ;;  %v413_v59 = vld [vmem:[#allocation2 + $0xe8] sm:$0xff]  ;;  %v429_v60 = vld [vmem:[#allocation2 + $0x10] sm:$0xff] }
  0x89   : > { %785 = vmatprep.mubr.bf16.mxu0 %v1374_v61  ;;  %825 = vmatprep.mubr.bf16.mxu1 %v1376_v62 }
  0x90   : > { %786 = vmatmul.mubr.bf16.gmra.mxu0 %v1378_v63  ;;  %826 = vmatmul.mubr.bf16.gmra.mxu1 %v1379_v0 }
 0x138   : > { %v757_v3 = vpop.f32.mrf.mxu0  ;;  %v797_v4 = vpop.f32.mrf.mxu1 }
 0x139   : > { %v836_v7 = vadd.f32 %v757_v3, %v403_v1  ;;  %v852_v8 = vadd.f32 %v797_v4, %v419_v2  ;;  %v414_v1 = vld [vmem:[#allocation2 + $0xb8] sm:$0xff]  ;;  %v430_v2 = vld [vmem:[#allocation2 + $0x28] sm:$0xff] }
 0x13a   : > { %v759_v9 = vpop.f32.mrf.mxu0  ;;  %v799_v10 = vpop.f32.mrf.mxu1 }
 0x13b   : > { %868 = vst [vmem:[#allocation2 + $0xb0] sm:$0xff] %v836_v7  ;;  %884 = vst [vmem:[#allocation2 + $0x38] sm:$0xff] %v852_v8  ;;  %v837_v13 = vadd.f32 %v759_v9, %v404_v5  ;;  %v853_v14 = vadd.f32 %v799_v10, %v420_v6  ;;  %v415_v7 = vld [vmem:[#allocation2 + $0x60] sm:$0xff] }
 0x13c   : > { %v761_v15 = vpop.f32.mrf.mxu0  ;;  %v801_v16 = vpop.f32.mrf.mxu1  ;;  %v431_v8 = vld [vmem:[#allocation2 + $0xa0] sm:$0xff] }
 0x13d   : > { %869 = vst [vmem:[#allocation2] sm:$0xff] %v837_v13  ;;  %885 = vst [vmem:[#allocation2 + $0x58] sm:$0xff] %v853_v14  ;;  %v838_v19 = vadd.f32 %v761_v15, %v405_v11  ;;  %v854_v20 = vadd.f32 %v801_v16, %v421_v12  ;;  %v416_v13 = vld [vmem:[#allocation2 + $0xf0] sm:$0xff]  ;;  %v432_v14 = vld [vmem:[#allocation2 + $0xf8] sm:$0xff] }
 0x13e   : > { %v763_v21 = vpop.f32.mrf.mxu0  ;;  %v803_v22 = vpop.f32.mrf.mxu1 }
 0x13f   : > { %870 = vst [vmem:[#allocation2 + $0xd8] sm:$0xff] %v838_v19  ;;  %886 = vst [vmem:[#allocation2 + $0x40] sm:$0xff] %v854_v20  ;;  %v839_v25 = vadd.f32 %v763_v21, %v406_v17  ;;  %v855_v26 = vadd.f32 %v803_v22, %v422_v18  ;;  %v417_v19 = vld [vmem:[#allocation2 + $0x8] sm:$0xff]  ;;  %v433_v20 = vld [vmem:[#allocation2 + $0x20] sm:$0xff] }
 0x140   : > { %v767_v27 = vpop.f32.mrf.mxu0  ;;  %v807_v28 = vpop.f32.mrf.mxu1 }
 0x141   : > { %871 = vst [vmem:[#allocation2 + $0x18] sm:$0xff] %v839_v25  ;;  %887 = vst [vmem:[#allocation2 + $0xc8] sm:$0xff] %v855_v26  ;;  %v840_v31 = vadd.f32 %v767_v27, %v407_v23  ;;  %v856_v32 = vadd.f32 %v807_v28, %v423_v24  ;;  %v418_v25 = vld [vmem:[#allocation2 + $0x78] sm:$0xff] }
 0x142   : > { %v769_v33 = vpop.f32.mrf.mxu0  ;;  %v809_v34 = vpop.f32.mrf.mxu1  ;;  %v434_v26 = vld [vmem:[#allocation2 + $0x98] sm:$0xff] }
 0x143   : > { %872 = vst [vmem:[#allocation2 + $0x50] sm:$0xff] %v840_v31  ;;  %888 = vst [vmem:[#allocation2 + $0xe0] sm:$0xff] %v856_v32  ;;  %v841_v37 = vadd.f32 %v769_v33, %v408_v29  ;;  %v857_v38 = vadd.f32 %v809_v34, %v424_v30 }
 0x144   : > { %v771_v39 = vpop.f32.mrf.mxu0  ;;  %v811_v40 = vpop.f32.mrf.mxu1 }
 0x145   : > { %873 = vst [vmem:[#allocation2 + $0x68] sm:$0xff] %v841_v37  ;;  %889 = vst [vmem:[#allocation2 + $0x90] sm:$0xff] %v857_v38  ;;  %v842_v43 = vadd.f32 %v771_v39, %v409_v35  ;;  %v858_v44 = vadd.f32 %v811_v40, %v425_v36 }
 0x146   : > { %v773_v45 = vpop.f32.mrf.mxu0  ;;  %v813_v46 = vpop.f32.mrf.mxu1 }
 0x147   : > { %874 = vst [vmem:[#allocation2 + $0x30] sm:$0xff] %v842_v43  ;;  %890 = vst [vmem:[#allocation2 + $0x70] sm:$0xff] %v858_v44  ;;  %v843_v49 = vadd.f32 %v773_v45, %v410_v41  ;;  %v859_v50 = vadd.f32 %v813_v46, %v426_v42 }
 0x148   : > { %v777_v51 = vpop.f32.mrf.mxu0  ;;  %v817_v52 = vpop.f32.mrf.mxu1 }
 0x149   : > { %875 = vst [vmem:[#allocation2 + $0x48] sm:$0xff] %v843_v49  ;;  %891 = vst [vmem:[#allocation2 + $0xc0] sm:$0xff] %v859_v50  ;;  %v844_v55 = vadd.f32 %v777_v51, %v411_v47  ;;  %v860_v56 = vadd.f32 %v817_v52, %v427_v48 }
 0x14a   : > { %v779_v57 = vpop.f32.mrf.mxu0  ;;  %v819_v58 = vpop.f32.mrf.mxu1 }
 0x14b   : > { %876 = vst [vmem:[#allocation2 + $0x80] sm:$0xff] %v844_v55  ;;  %892 = vst [vmem:[#allocation2 + $0xa8] sm:$0xff] %v860_v56  ;;  %v845_v61 = vadd.f32 %v779_v57, %v412_v53  ;;  %v861_v62 = vadd.f32 %v819_v58, %v428_v54 }
 0x14c   : > { %v781_v63 = vpop.f32.mrf.mxu0  ;;  %v821_v0 = vpop.f32.mrf.mxu1 }
 0x14d   : > { %877 = vst [vmem:[#allocation2 + $0x88] sm:$0xff] %v845_v61  ;;  %893 = vst [vmem:[#allocation2 + $0xd0] sm:$0xff] %v861_v62  ;;  %v846_v3 = vadd.f32 %v781_v63, %v413_v59  ;;  %v862_v4 = vadd.f32 %v821_v0, %v429_v60 }
 0x14e   : > { %v783_v5 = vpop.f32.mrf.mxu0  ;;  %v823_v6 = vpop.f32.mrf.mxu1 }
 0x14f   : > { %878 = vst [vmem:[#allocation2 + $0xe8] sm:$0xff] %v846_v3  ;;  %894 = vst [vmem:[#allocation2 + $0x10] sm:$0xff] %v862_v4  ;;  %v847_v9 = vadd.f32 %v783_v5, %v414_v1  ;;  %v863_v10 = vadd.f32 %v823_v6, %v430_v2 }
 0x150   : > { %v787_v11 = vpop.f32.mrf.mxu0  ;;  %v827_v12 = vpop.f32.mrf.mxu1 }
 0x151   : > { %879 = vst [vmem:[#allocation2 + $0xb8] sm:$0xff] %v847_v9  ;;  %895 = vst [vmem:[#allocation2 + $0x28] sm:$0xff] %v863_v10  ;;  %v848_v15 = vadd.f32 %v787_v11, %v415_v7  ;;  %v864_v16 = vadd.f32 %v827_v12, %v431_v8 }
 0x152   : > { %v789_v17 = vpop.f32.mrf.mxu0  ;;  %v829_v18 = vpop.f32.mrf.mxu1 }
 0x153   : > { %880 = vst [vmem:[#allocation2 + $0x60] sm:$0xff] %v848_v15  ;;  %896 = vst [vmem:[#allocation2 + $0xa0] sm:$0xff] %v864_v16  ;;  %v849_v21 = vadd.f32 %v789_v17, %v416_v13  ;;  %v865_v22 = vadd.f32 %v829_v18, %v432_v14 }
 0x154   : > { %v791_v23 = vpop.f32.mrf.mxu0  ;;  %v831_v24 = vpop.f32.mrf.mxu1 }
 0x155   : > { %881 = vst [vmem:[#allocation2 + $0xf0] sm:$0xff] %v849_v21  ;;  %897 = vst [vmem:[#allocation2 + $0xf8] sm:$0xff] %v865_v22  ;;  %v850_v27 = vadd.f32 %v791_v23, %v417_v19  ;;  %v866_v28 = vadd.f32 %v831_v24, %v433_v20  ;;  %903 = sbr.rel (%p1228_p11) target bundleno = 375 (0x177), region = 78 }
 0x156   : > { %v793_v29 = vpop.f32.mrf.mxu0  ;;  %v833_v30 = vpop.f32.mrf.mxu1 }
 0x157   : > { %882 = vst [vmem:[#allocation2 + $0x8] sm:$0xff] %v850_v27  ;;  %898 = vst [vmem:[#allocation2 + $0x20] sm:$0xff] %v866_v28  ;;  %v851_v31 = vadd.f32 %v793_v29, %v418_v25  ;;  %v867_v32 = vadd.f32 %v833_v30, %v434_v26 }
 0x159   : > { %883 = vst [vmem:[#allocation2 + $0x78] sm:$0xff] %v851_v31  ;;  %899 = vst [vmem:[#allocation2 + $0x98] sm:$0xff] %v867_v32 }
 0x15a   : > { %v938_v33 = vlaneseq  ;;  %v936_v35 = vld [vmem:[%s1715_s2] sm:$0x3]  ;;  %v904_v36 = vld [vmem:[#allocation2 + $0xb0] sm:$0xff]  ;;  %v906_v40 = vld [vmem:[#allocation2 + $0xd8] sm:$0xff] }
 0x15b   : > { %v905_v38 = vld [vmem:[#allocation2] sm:$0xff]  ;;  %v907_v41 = vld [vmem:[#allocation2 + $0x18] sm:$0xff]  ;;  %v908_v42 = vld [vmem:[#allocation2 + $0x50] sm:$0xff] }
 0x15c   : > { %v939_v34 = vshrl.u32 %v938_v33, 7  ;;  %v909_v45 = vld [vmem:[#allocation2 + $0x68] sm:$0xff]  ;;  %v910_v46 = vld [vmem:[#allocation2 + $0x30] sm:$0xff]  ;;  %v912_v52 = vld [vmem:[#allocation2 + $0x80] sm:$0xff] }
 0x15d   : > { %v911_v47 = vld [vmem:[#allocation2 + $0x48] sm:$0xff]  ;;  %v915_v59 = vld [vmem:[#allocation2 + $0xb8] sm:$0xff]  ;;  %v916_v60 = vld [vmem:[#allocation2 + $0x60] sm:$0xff] }
 0x15e   : > { %v940_v37 = vsub.s32 0, %v939_v34  ;;  %v944_v39 = vsub.s32 1, %v939_v34  ;;  %v913_v53 = vld [vmem:[#allocation2 + $0x88] sm:$0xff]  ;;  %v917_v61 = vld [vmem:[#allocation2 + $0xf0] sm:$0xff]  ;;  %v920_v12 = vld [vmem:[#allocation2 + $0x38] sm:$0xff] }
 0x15f   : > { %v914_v54 = vld [vmem:[#allocation2 + $0xe8] sm:$0xff]  ;;  %v921_v13 = vld [vmem:[#allocation2 + $0x58] sm:$0xff]  ;;  %v922_v14 = vld [vmem:[#allocation2 + $0x40] sm:$0xff] }
 0x160   : > { %v1566_v43 = vrot.slane %v936_v35, %v940_v37  ;;  %v1568_v44 = vrot.slane %v936_v35, %v944_v39  ;;  %v918_v2 = vld [vmem:[#allocation2 + $0x8] sm:$0xff]  ;;  %v919_v3 = vld [vmem:[#allocation2 + $0x78] sm:$0xff]  ;;  %v924_v20 = vld [vmem:[#allocation2 + $0xe0] sm:$0xff] }
 0x161   : > { %v923_v19 = vld [vmem:[#allocation2 + $0xc8] sm:$0xff]  ;;  %v925_v21 = vld [vmem:[#allocation2 + $0x90] sm:$0xff]  ;;  %v927_v27 = vld [vmem:[#allocation2 + $0xc0] sm:$0xff] }
 0x162   : > { %v948_v48 = vadd.f32 %v1566_v43, %v904_v36  ;;  %v949_v49 = vadd.f32 %v1568_v44, %v905_v38  ;;  %v950_v50 = vadd.f32 %v1566_v43, %v906_v40  ;;  %v951_v51 = vadd.f32 %v1568_v44, %v907_v41  ;;  %v926_v26 = vld [vmem:[#allocation2 + $0x70] sm:$0xff]  ;;  %v928_v36 = vld [vmem:[#allocation2 + $0xa8] sm:$0xff] }
 0x163   : > { %v952_v55 = vadd.f32 %v1566_v43, %v908_v42  ;;  %v953_v56 = vadd.f32 %v1568_v44, %v909_v45  ;;  %v954_v57 = vadd.f32 %v1566_v43, %v910_v46  ;;  %v955_v58 = vadd.f32 %v1568_v44, %v911_v47  ;;  %v929_v37 = vld [vmem:[#allocation2 + $0xd0] sm:$0xff]  ;;  %v931_v45 = vld [vmem:[#allocation2 + $0x28] sm:$0xff]  ;;  %v932_v46 = vld [vmem:[#allocation2 + $0xa0] sm:$0xff] }
 0x164   : > { %v980_v62 = vmax.f32 %v948_v48, 0.0  ;;  %v981_v63 = vmax.f32 %v949_v49, 0.0  ;;  %v982_v0 = vmax.f32 %v950_v50, 0.0  ;;  %v983_v1 = vmax.f32 %v951_v51, 0.0  ;;  %v930_v38 = vld [vmem:[#allocation2 + $0x10] sm:$0xff]  ;;  %v933_v47 = vld [vmem:[#allocation2 + $0xf8] sm:$0xff] }
 0x165   : > { %v984_v4 = vmax.f32 %v952_v55, 0.0  ;;  %v985_v5 = vmax.f32 %v953_v56, 0.0  ;;  %v986_v6 = vmax.f32 %v954_v57, 0.0  ;;  %v987_v7 = vmax.f32 %v955_v58, 0.0 }
 0x166   : > { %1012 = vst [vmem:[%s1716_s3] sm:$0xff] %v980_v62  ;;  %1013 = vst [vmem:[%s1716_s3 + $0x8] sm:$0xff] %v981_v63  ;;  %v956_v8 = vadd.f32 %v1566_v43, %v912_v52  ;;  %v957_v9 = vadd.f32 %v1568_v44, %v913_v53  ;;  %v958_v10 = vadd.f32 %v1566_v43, %v914_v54  ;;  %v934_v52 = vld [vmem:[#allocation2 + $0x20] sm:$0xff]  ;;  %v935_v53 = vld [vmem:[#allocation2 + $0x98] sm:$0xff] }
 0x167   : > { %1014 = vst [vmem:[%s1716_s3 + $0x10] sm:$0xff] %v982_v0  ;;  %1015 = vst [vmem:[%s1716_s3 + $0x18] sm:$0xff] %v983_v1  ;;  %v959_v11 = vadd.f32 %v1568_v44, %v915_v59  ;;  %v960_v15 = vadd.f32 %v1566_v43, %v916_v60  ;;  %v961_v16 = vadd.f32 %v1568_v44, %v917_v61 }
 0x168   : > { %1016 = vst [vmem:[%s1716_s3 + $0x20] sm:$0xff] %v984_v4  ;;  %1017 = vst [vmem:[%s1716_s3 + $0x28] sm:$0xff] %v985_v5  ;;  %v962_v17 = vadd.f32 %v1566_v43, %v918_v2  ;;  %v963_v18 = vadd.f32 %v1568_v44, %v919_v3  ;;  %v988_v22 = vmax.f32 %v956_v8, 0.0  ;;  %v989_v23 = vmax.f32 %v957_v9, 0.0 }
 0x169   : > { %1018 = vst [vmem:[%s1716_s3 + $0x30] sm:$0xff] %v986_v6  ;;  %1019 = vst [vmem:[%s1716_s3 + $0x38] sm:$0xff] %v987_v7  ;;  %v990_v24 = vmax.f32 %v958_v10, 0.0  ;;  %v991_v25 = vmax.f32 %v959_v11, 0.0  ;;  %v992_v28 = vmax.f32 %v960_v15, 0.0  ;;  %v993_v29 = vmax.f32 %v961_v16, 0.0 }
 0x16a   : > { %v994_v30 = vmax.f32 %v962_v17, 0.0  ;;  %v995_v31 = vmax.f32 %v963_v18, 0.0  ;;  %1020 = vst [vmem:[%s1716_s3 + $0x40] sm:$0xff] %v988_v22  ;;  %1021 = vst [vmem:[%s1716_s3 + $0x48] sm:$0xff] %v989_v23  ;;  %v964_v32 = vadd.f32 %v1566_v43, %v920_v12  ;;  %v965_v33 = vadd.f32 %v1568_v44, %v921_v13 }
 0x16b   : > { %1022 = vst [vmem:[%s1716_s3 + $0x50] sm:$0xff] %v990_v24  ;;  %1023 = vst [vmem:[%s1716_s3 + $0x58] sm:$0xff] %v991_v25  ;;  %v966_v34 = vadd.f32 %v1566_v43, %v922_v14  ;;  %v967_v35 = vadd.f32 %v1568_v44, %v923_v19  ;;  %v968_v39 = vadd.f32 %v1566_v43, %v924_v20 }
 0x16c   : > { %1024 = vst [vmem:[%s1716_s3 + $0x60] sm:$0xff] %v992_v28  ;;  %1025 = vst [vmem:[%s1716_s3 + $0x68] sm:$0xff] %v993_v29  ;;  %v969_v40 = vadd.f32 %v1568_v44, %v925_v21  ;;  %v970_v41 = vadd.f32 %v1566_v43, %v926_v26  ;;  %v971_v42 = vadd.f32 %v1568_v44, %v927_v27  ;;  %v996_v48 = vmax.f32 %v964_v32, 0.0 }
 0x16d   : > { %1026 = vst [vmem:[%s1716_s3 + $0x70] sm:$0xff] %v994_v30  ;;  %1027 = vst [vmem:[%s1716_s3 + $0x78] sm:$0xff] %v995_v31  ;;  %v997_v49 = vmax.f32 %v965_v33, 0.0  ;;  %v998_v50 = vmax.f32 %v966_v34, 0.0  ;;  %v999_v51 = vmax.f32 %v967_v35, 0.0  ;;  %v1000_v54 = vmax.f32 %v968_v39, 0.0 }
 0x16e   : > { %v1001_v55 = vmax.f32 %v969_v40, 0.0  ;;  %v1002_v56 = vmax.f32 %v970_v41, 0.0  ;;  %v1003_v57 = vmax.f32 %v971_v42, 0.0  ;;  %1028 = vst [vmem:[%s1716_s3 + $0x80] sm:$0xff] %v996_v48  ;;  %v972_v58 = vadd.f32 %v1566_v43, %v928_v36 }
 0x16f   : > { %1029 = vst [vmem:[%s1716_s3 + $0x88] sm:$0xff] %v997_v49  ;;  %1030 = vst [vmem:[%s1716_s3 + $0x90] sm:$0xff] %v998_v50  ;;  %v973_v59 = vadd.f32 %v1568_v44, %v929_v37  ;;  %v974_v60 = vadd.f32 %v1566_v43, %v930_v38  ;;  %v975_v61 = vadd.f32 %v1568_v44, %v931_v45 }
 0x170   : > { %1031 = vst [vmem:[%s1716_s3 + $0x98] sm:$0xff] %v999_v51  ;;  %1032 = vst [vmem:[%s1716_s3 + $0xa0] sm:$0xff] %v1000_v54  ;;  %v976_v62 = vadd.f32 %v1566_v43, %v932_v46  ;;  %v977_v63 = vadd.f32 %v1568_v44, %v933_v47  ;;  %v978_v0 = vadd.f32 %v1566_v43, %v934_v52  ;;  %v1004_v2 = vmax.f32 %v972_v58, 0.0 }
 0x171   : > { %1033 = vst [vmem:[%s1716_s3 + $0xa8] sm:$0xff] %v1001_v55  ;;  %1034 = vst [vmem:[%s1716_s3 + $0xb0] sm:$0xff] %v1002_v56  ;;  %v979_v1 = vadd.f32 %v1568_v44, %v935_v53  ;;  %v1005_v3 = vmax.f32 %v973_v59, 0.0  ;;  %v1006_v4 = vmax.f32 %v974_v60, 0.0  ;;  %v1007_v5 = vmax.f32 %v975_v61, 0.0 }
 0x172   : > { %1035 = vst [vmem:[%s1716_s3 + $0xb8] sm:$0xff] %v1003_v57  ;;  %v1008_v6 = vmax.f32 %v976_v62, 0.0  ;;  %v1009_v7 = vmax.f32 %v977_v63, 0.0  ;;  %v1010_v8 = vmax.f32 %v978_v0, 0.0  ;;  %1036 = vst [vmem:[%s1716_s3 + $0xc0] sm:$0xff] %v1004_v2 }
 0x173   : > { %v1011_v9 = vmax.f32 %v979_v1, 0.0  ;;  %1037 = vst [vmem:[%s1716_s3 + $0xc8] sm:$0xff] %v1005_v3  ;;  %1038 = vst [vmem:[%s1716_s3 + $0xd0] sm:$0xff] %v1006_v4 }
 0x174   : > { %1039 = vst [vmem:[%s1716_s3 + $0xd8] sm:$0xff] %v1007_v5  ;;  %1040 = vst [vmem:[%s1716_s3 + $0xe0] sm:$0xff] %v1008_v6 }
 0x175   : > { %1041 = vst [vmem:[%s1716_s3 + $0xe8] sm:$0xff] %v1009_v7  ;;  %1042 = vst [vmem:[%s1716_s3 + $0xf0] sm:$0xff] %v1010_v8 }
 0x176   : > { %1043 = vst [vmem:[%s1716_s3 + $0xf8] sm:$0xff] %v1011_v9 }
 0x177 PF: > { %s13_s16 = sadd.s32 1, %s1418_s16   ;;  %s1717_s12 = smov %s1406_s13 }
 0x178   : > { %p10_p12 = scmp.ge.s32.totalorder %s13_s16, 11   ;;  %s1718_s13 = smov %s1476_s20 }
 0x179   : > { %s1719_s14 = smov %s1414_s15  ;;  %s1720_s15 = smov %s1722_s17 }
 0x17a   :  { %12 = sbr.rel (!%p10_p12) target bundleno = 3 (0x3), region = 119 }

// kernel: crnn_forward.23
= control target key start
LH: loop header
LB: loop body
LE: loop exit
PB: predicated region body
PF: predicated region fallthrough
CT: control target
= control target key end

     0   :  { %s1866_s0 = inlined_call_operand.vmem [shape: bf16[64,2304], index: 0, kind: input, shape index: {}]   ;;  %s1867_s1 = inlined_call_operand.vmem [shape: bf16[2304,512], index: 1, kind: input, shape index: {}]   ;;  %s1868_s2 = inlined_call_operand.vmem [shape: f32[1,512], index: 2, kind: input, shape index: {}]   ;;  %s1869_s3 = inlined_call_operand.vmem [shape: f32[1,512], index: 3, kind: input, shape index: {}]   ;;  %s1870_s4 = inlined_call_operand.vmem [shape: f32[64,512], index: 4, kind: output, shape index: {}]  }
   0x1   :  { %1873 = sst [smem:[#allocation8_spill]] %s1866_s0 }
   0x2   :  { %1874 = sst [smem:[#allocation9_spill]] %s1867_s1 }
   0x3   :  { %s1539_s15 = smov 0   ;;  %s1541_s16 = smov 0  }
   0x4   :  { %s1543_s17 = smov 0   ;;  %s1545_s18 = smov 0  }
   0x5   :  { %s1547_s19 = smov 0   ;;  %s1549_s20 = smov 0  }
   0x6   :  { %s1551_s21 = smov 0   ;;  %s1553_s22 = smov 0  }
   0x7   :  { %s1555_s23 = smov 0   ;;  %s1557_s24 = smov 0  }
   0x8   :  { %s1559_s25 = smov 0  }
   0x9 LB: > { %s1176_s26 = sadd.s32 4294967295, %s1511_s25   ;;  %s26_s27 = sadd.s32 1, %s1503_s23  ;;  %s1511_s25 = sphi %s1559_s25, %s14_s25   ;;  %s1507_s24 = sphi %s1557_s24, %s1893_s24   ;;  %s1503_s23 = sphi %s1555_s23, %s1892_s23   ;;  %s1499_s22 = sphi %s1553_s22, %s1891_s22   ;;  %s1495_s21 = sphi %s1551_s21, %s1890_s21   ;;  %s1491_s20 = sphi %s1549_s20, %s1889_s20   ;;  %s1487_s19 = sphi %s1547_s19, %s1888_s19   ;;  %s1483_s18 = sphi %s1545_s18, %s1887_s18   ;;  %s1479_s17 = sphi %s1543_s17, %s1886_s17   ;;  %s1475_s16 = sphi %s1541_s16, %s1885_s16   ;;  %s1471_s15 = sphi %s1539_s15, %s1884_s15  }
   0xa   : > { %p27_p0 = scmp.ge.s32.totalorder %s26_s27, 9  ;;  %s29_s28 = sadd.s32 1, %s1507_s24 }
   0xb   : > { %s42_s29 = sadd.s32 1, %s1491_s20  ;;  %p49_p1 = scmp.ne.s32.totalorder %s1491_s20, %s1487_s19 }
   0xc   : > { %s1895_s27 = smov (%p27_p0, %s26_s27), 0  ;;  %s1897_s28 = smov (!%p27_p0, %s29_s28), %s1507_s24 }
   0xd   : > { %1875 = sst [smem:[#allocation6_spill]] %s1895_s27  ;;  %s38_s30 = ssub.s32 %s1503_s23, %s1895_s27 }
   0xe   : > { %p50_p2 = scmp.eq.s32.totalorder %s1511_s25, 0  ;;  %p31_p3 = scmp.ge.s32.totalorder %s1897_s28, 2 }
   0xf   : > { %p40_p4 = scmp.eq.s32.totalorder %s38_s30, 0  ;;  %s70_s6 = sadd.s32 1, %s1483_s18 }
  0x10   : > { %p1606_p5 = por %p50_p2, %p49_p1  ;;  %s1899_s28 = smov (%p31_p3, %s1897_s28), 0 }
  0x11   : > { %1877 = sst [smem:[#allocation7_spill]] %s1899_s28  ;;  %s66_s8 = ssub.s32 %s1507_s24, %s1899_s28 }
  0x12   : > { %s1614_s7 = scalar_select %p40_p4, %s1491_s20, %s42_s29  }
  0x13   : > { %p77_p6 = scmp.ne.s32.totalorder %s1483_s18, %s1479_s17  ;;  %s67_s9 = sor.u32 %s66_s8, %s38_s30 }
  0x14   : > { %p148_p7 = scmp.eq.s32.totalorder %s66_s8, 0  ;;  %p68_p8 = scmp.eq.s32.totalorder %s67_s9, 0 }
  0x15   : > { %p1620_p9 = por %p77_p6, %p50_p2  ;;  %s150_s11 = sadd.s32 1, %s1475_s16 }
  0x16   : > { %p160_p10 = scmp.ne.s32.totalorder %s1475_s16, %s1471_s15  ;;  %p161_p11 = scmp.eq.s32.totalorder %s1176_s26, 17 }
  0x17   : > { %s1628_s12 = scalar_select %p68_p8, %s1483_s18, %s70_s6  }
  0x18   : > { %s1631_s13 = scalar_select %p148_p7, %s1475_s16, %s150_s11  }
  0x19   : > { %p1633_p12 = por %p161_p11, %p160_p10  ;;  %p1179_p13 = scmp.ge.s32.totalorder %s1511_s25, 18 }
  0x1b   : > { %183 = sbr.rel (%p1179_p13) target bundleno = 72 (0x48), region = 16 }
  0x20   : > { %186 = sbr.rel (!%p1606_p5) target bundleno = 46 (0x2e), region = 20  ;;  %s188_s29 = sand.u32 (%p1606_p5), 1, %s1491_s20  }
  0x21   : > { %s1241_s30 = sshll.u32 (%p1606_p5), %s1503_s23, 3  ;;  %s1180_s8 = sshll.u32 (%p1606_p5), %s188_s29, 6 }
  0x22   : > { %s1880_s0 = sld [smem:[#allocation8_spill]] (%p1606_p5)  ;;  %s190_s26 = scalar_lea.vmem (%p1606_p5), [#allocation3], %s1180_s8 }
  0x28   : > { %s196_s11 = scalar_lea.vmem %s1880_s0, %s1241_s30 }
  0x29   : > { %v239_v0 = vld [vmem:[%s196_s11] sm:$0xff]  ;;  %v241_v1 = vld [vmem:[%s196_s11 + $0x48] sm:$0xff]  ;;  %v243_v2 = vld [vmem:[%s196_s11 + $0x90] sm:$0xff] }
  0x2a   : > { %240 = vst [vmem:[%s190_s26] sm:$0xff] %v239_v0  ;;  %242 = vst [vmem:[%s190_s26 + $0x8] sm:$0xff] %v241_v1  ;;  %v245_v3 = vld [vmem:[%s196_s11 + $0xd8] sm:$0xff]  ;;  %v247_v4 = vld [vmem:[%s196_s11 + $0x120] sm:$0xff] }
  0x2b   : > { %244 = vst [vmem:[%s190_s26 + $0x10] sm:$0xff] %v243_v2  ;;  %v249_v5 = vld [vmem:[%s196_s11 + $0x168] sm:$0xff]  ;;  %246 = vst [vmem:[%s190_s26 + $0x18] sm:$0xff] %v245_v3  ;;  %v251_v6 = vld [vmem:[%s196_s11 + $0x1b0] sm:$0xff] }
  0x2c   : > { %248 = vst [vmem:[%s190_s26 + $0x20] sm:$0xff] %v247_v4  ;;  %250 = vst [vmem:[%s190_s26 + $0x28] sm:$0xff] %v249_v5  ;;  %v253_v7 = vld [vmem:[%s196_s11 + $0x1f8] sm:$0xff] }
  0x2d   : > { %252 = vst [vmem:[%s190_s26 + $0x30] sm:$0xff] %v251_v6  ;;  %254 = vst [vmem:[%s190_s26 + $0x38] sm:$0xff] %v253_v7 }
  0x2e PF: > { %260 = sbr.rel (!%p1620_p9) target bundleno = 72 (0x48), region = 58  ;;  %s262_s5 = sand.u32 (%p1620_p9), 1, %s1483_s18  }
  0x2f   : > { %s1185_s29 = sshll.u32 (%p1620_p9), %s1507_s24, 1  ;;  %s1183_s30 = sshll.u32 (%p1620_p9), %s262_s5, 8 }
  0x30   : > { %s1242_s8 = sshll.u32 (%p1620_p9), %s1503_s23, 7  ;;  %s1881_s1 = sld [smem:[#allocation9_spill]] (%p1620_p9) }
  0x31   : > { %s268_s6 = sadd.s32 (%p1620_p9), %s1242_s8, %s1185_s29  ;;  %s1658_s10 = scalar_lea.vmem (%p1620_p9), [#allocation4], %s1183_s30 }
  0x32   : > { %s1187_s9 = sshll.u32 (%p1620_p9), %s268_s6, 2 }
  0x36   : > { %s1653_s27 = scalar_lea.vmem %s1881_s1, %s1187_s9 }
  0x37   : > { %v361_v8 = vld [vmem:[%s1653_s27] sm:$0xff]  ;;  %v363_v9 = vld [vmem:[%s1653_s27 + $0x10] sm:$0xff] }
  0x38   : > { %v365_v10 = vld [vmem:[%s1653_s27 + $0x20] sm:$0xff]  ;;  %362 = vst [vmem:[%s1658_s10] sm:$0xff] %v361_v8  ;;  %364 = vst [vmem:[%s1658_s10 + $0x8] sm:$0xff] %v363_v9  ;;  %v367_v11 = vld [vmem:[%s1653_s27 + $0x30] sm:$0xff] }
  0x39   : > { %366 = vst [vmem:[%s1658_s10 + $0x10] sm:$0xff] %v365_v10  ;;  %v369_v12 = vld [vmem:[%s1653_s27 + $0x40] sm:$0xff]  ;;  %v371_v13 = vld [vmem:[%s1653_s27 + $0x50] sm:$0xff]  ;;  %368 = vst [vmem:[%s1658_s10 + $0x18] sm:$0xff] %v367_v11 }
  0x3a   : > { %370 = vst [vmem:[%s1658_s10 + $0x20] sm:$0xff] %v369_v12  ;;  %372 = vst [vmem:[%s1658_s10 + $0x28] sm:$0xff] %v371_v13  ;;  %v373_v14 = vld [vmem:[%s1653_s27 + $0x60] sm:$0xff]  ;;  %v375_v15 = vld [vmem:[%s1653_s27 + $0x70] sm:$0xff] }
  0x3b   : > { %v377_v16 = vld [vmem:[%s1653_s27 + $0x80] sm:$0xff]  ;;  %374 = vst [vmem:[%s1658_s10 + $0x30] sm:$0xff] %v373_v14  ;;  %376 = vst [vmem:[%s1658_s10 + $0x38] sm:$0xff] %v375_v15  ;;  %v379_v17 = vld [vmem:[%s1653_s27 + $0x90] sm:$0xff] }
  0x3c   : > { %378 = vst [vmem:[%s1658_s10 + $0x40] sm:$0xff] %v377_v16  ;;  %v381_v18 = vld [vmem:[%s1653_s27 + $0xa0] sm:$0xff]  ;;  %v383_v19 = vld [vmem:[%s1653_s27 + $0xb0] sm:$0xff]  ;;  %380 = vst [vmem:[%s1658_s10 + $0x48] sm:$0xff] %v379_v17 }
  0x3d   : > { %382 = vst [vmem:[%s1658_s10 + $0x50] sm:$0xff] %v381_v18  ;;  %384 = vst [vmem:[%s1658_s10 + $0x58] sm:$0xff] %v383_v19  ;;  %v385_v20 = vld [vmem:[%s1653_s27 + $0xc0] sm:$0xff]  ;;  %v387_v21 = vld [vmem:[%s1653_s27 + $0xd0] sm:$0xff] }
  0x3e   : > { %v389_v22 = vld [vmem:[%s1653_s27 + $0xe0] sm:$0xff]  ;;  %386 = vst [vmem:[%s1658_s10 + $0x60] sm:$0xff] %v385_v20  ;;  %388 = vst [vmem:[%s1658_s10 + $0x68] sm:$0xff] %v387_v21  ;;  %v391_v23 = vld [vmem:[%s1653_s27 + $0xf0] sm:$0xff] }
  0x3f   : > { %390 = vst [vmem:[%s1658_s10 + $0x70] sm:$0xff] %v389_v22  ;;  %v393_v24 = vld [vmem:[%s1653_s27 + $0x100] sm:$0xff]  ;;  %v395_v25 = vld [vmem:[%s1653_s27 + $0x110] sm:$0xff]  ;;  %392 = vst [vmem:[%s1658_s10 + $0x78] sm:$0xff] %v391_v23 }
  0x40   : > { %394 = vst [vmem:[%s1658_s10 + $0x80] sm:$0xff] %v393_v24  ;;  %396 = vst [vmem:[%s1658_s10 + $0x88] sm:$0xff] %v395_v25  ;;  %v397_v26 = vld [vmem:[%s1653_s27 + $0x120] sm:$0xff]  ;;  %v399_v27 = vld [vmem:[%s1653_s27 + $0x130] sm:$0xff] }
  0x41   : > { %v401_v28 = vld [vmem:[%s1653_s27 + $0x140] sm:$0xff]  ;;  %398 = vst [vmem:[%s1658_s10 + $0x90] sm:$0xff] %v397_v26  ;;  %400 = vst [vmem:[%s1658_s10 + $0x98] sm:$0xff] %v399_v27  ;;  %v403_v29 = vld [vmem:[%s1653_s27 + $0x150] sm:$0xff] }
  0x42   : > { %402 = vst [vmem:[%s1658_s10 + $0xa0] sm:$0xff] %v401_v28  ;;  %v405_v30 = vld [vmem:[%s1653_s27 + $0x160] sm:$0xff]  ;;  %v407_v31 = vld [vmem:[%s1653_s27 + $0x170] sm:$0xff]  ;;  %404 = vst [vmem:[%s1658_s10 + $0xa8] sm:$0xff] %v403_v29 }
  0x43   : > { %406 = vst [vmem:[%s1658_s10 + $0xb0] sm:$0xff] %v405_v30  ;;  %408 = vst [vmem:[%s1658_s10 + $0xb8] sm:$0xff] %v407_v31  ;;  %v409_v32 = vld [vmem:[%s1653_s27 + $0x180] sm:$0xff]  ;;  %v411_v33 = vld [vmem:[%s1653_s27 + $0x190] sm:$0xff] }
  0x44   : > { %v413_v34 = vld [vmem:[%s1653_s27 + $0x1a0] sm:$0xff]  ;;  %410 = vst [vmem:[%s1658_s10 + $0xc0] sm:$0xff] %v409_v32  ;;  %412 = vst [vmem:[%s1658_s10 + $0xc8] sm:$0xff] %v411_v33  ;;  %v415_v35 = vld [vmem:[%s1653_s27 + $0x1b0] sm:$0xff] }
  0x45   : > { %414 = vst [vmem:[%s1658_s10 + $0xd0] sm:$0xff] %v413_v34  ;;  %v417_v36 = vld [vmem:[%s1653_s27 + $0x1c0] sm:$0xff]  ;;  %v419_v37 = vld [vmem:[%s1653_s27 + $0x1d0] sm:$0xff]  ;;  %416 = vst [vmem:[%s1658_s10 + $0xd8] sm:$0xff] %v415_v35 }
  0x46   : > { %418 = vst [vmem:[%s1658_s10 + $0xe0] sm:$0xff] %v417_v36  ;;  %420 = vst [vmem:[%s1658_s10 + $0xe8] sm:$0xff] %v419_v37  ;;  %v421_v38 = vld [vmem:[%s1653_s27 + $0x1e0] sm:$0xff]  ;;  %v423_v39 = vld [vmem:[%s1653_s27 + $0x1f0] sm:$0xff] }
  0x47   : > { %422 = vst [vmem:[%s1658_s10 + $0xf0] sm:$0xff] %v421_v38  ;;  %424 = vst [vmem:[%s1658_s10 + $0xf8] sm:$0xff] %v423_v39 }
  0x48 PF: > { %p1188_p0 = scmp.ge.s32.totalorder %s1511_s25, 1  ;;  %p445_p1 = scmp.lt.s32.totalorder %s1511_s25, 19 }
  0x4a   : > { %p446_p2 = pnand %p1188_p0, %p445_p1 }
  0x4b   : > { %s452_s0 = sand.u32 (!%p446_p2), 1, %s1487_s19   ;;  %s459_s28 = sand.u32 (!%p446_p2), 1, %s1479_s17  }
  0x4c   : > { %449 = sbr.rel (%p446_p2) target bundleno = 407 (0x197), region = 104  ;;  %s1189_s11 = sshll.u32 (!%p446_p2), %s452_s0, 6 }
  0x4d   : > { %s1190_s26 = sshll.u32 (!%p446_p2), %s459_s28, 8  ;;  %s492_s5 = sand.u32 (!%p446_p2), 1, %s1471_s15  }
  0x4e   : > { %s1192_s27 = sshll.u32 (!%p446_p2), %s1499_s22, 1  ;;  %s1191_s29 = sshll.u32 (!%p446_p2), %s492_s5, 7 }
  0x4f   : > { %p500_p3 = scmp.lt.s32.totalorder (!%p446_p2), %s1192_s27, 3  ;;  %s1737_s19 = scalar_lea.vmem (!%p446_p2), [#allocation3], %s1189_s11 }
  0x50   : > { %s1739_s17 = scalar_lea.vmem (!%p446_p2), [#allocation4], %s1190_s26  ;;  %s1741_s15 = scalar_lea.vmem (!%p446_p2), [#allocation5], %s1191_s29 }
  0x51   : > { %s1901_s27 = smov (!%p500_p3, %s1192_s27), 3  ;;  %p1194_p4 = scmp.ne.s32.totalorder %s1495_s21, 0 }
  0x52   : > { %s502_s6 = scalar_lea.vmem %s1868_s2, %s1901_s27  ;;  %s507_s1 = scalar_lea.vmem %s1869_s3, %s1901_s27 }
  0x53   : > { %514 = sbr.rel (%p1194_p4) target bundleno = 97 (0x61), region = 116 }
  0x58   : > { %v1513_v40 = vmov 0.0  }
  0x59   : > { %515 = vst [vmem:[#allocation2 + $0x30] sm:$0xff] %v1513_v40  ;;  %516 = vst [vmem:[#allocation2] sm:$0xff] %v1513_v40 }
  0x5a   : > { %517 = vst [vmem:[#allocation2 + $0x58] sm:$0xff] %v1513_v40  ;;  %518 = vst [vmem:[#allocation2 + $0x18] sm:$0xff] %v1513_v40 }
  0x5b   : > { %519 = vst [vmem:[#allocation2 + $0x50] sm:$0xff] %v1513_v40  ;;  %520 = vst [vmem:[#allocation2 + $0x68] sm:$0xff] %v1513_v40 }
  0x5c   : > { %521 = vst [vmem:[#allocation2 + $0x8] sm:$0xff] %v1513_v40  ;;  %522 = vst [vmem:[#allocation2 + $0x48] sm:$0xff] %v1513_v40 }
  0x5d   : > { %523 = vst [vmem:[#allocation2 + $0x40] sm:$0xff] %v1513_v40  ;;  %524 = vst [vmem:[#allocation2 + $0x20] sm:$0xff] %v1513_v40 }
  0x5e   : > { %525 = vst [vmem:[#allocation2 + $0x10] sm:$0xff] %v1513_v40  ;;  %526 = vst [vmem:[#allocation2 + $0x38] sm:$0xff] %v1513_v40 }
  0x5f   : > { %527 = vst [vmem:[#allocation2 + $0x60] sm:$0xff] %v1513_v40  ;;  %528 = vst [vmem:[#allocation2 + $0x70] sm:$0xff] %v1513_v40 }
  0x60   : > { %529 = vst [vmem:[#allocation2 + $0x78] sm:$0xff] %v1513_v40  ;;  %530 = vst [vmem:[#allocation2 + $0x28] sm:$0xff] %v1513_v40 }
  0x61 PF: > { %v1365_v41 = vld [vmem:[%s1739_s17 + $0x74] ss:$8 sps:$4 sm:$0xff]   ;;  %v1367_v42 = vld [vmem:[%s1739_s17 + $0x70] ss:$8 sps:$4 sm:$0xff]   ;;  %v1368_v43 = vld [vmem:[%s1739_s17 + $0x64] ss:$8 sps:$4 sm:$0xff]  }
  0x62   : > { %787 = vmatprep.subr.bf16.mxu0 %v1365_v41  ;;  %1244 = vmatprep.subr.bf16.mxu1 %v1365_v41  ;;  %v1370_v44 = vld [vmem:[%s1739_s17 + $0x60] ss:$8 sps:$4 sm:$0xff]   ;;  %v1371_v45 = vld [vmem:[%s1739_s17 + $0x54] ss:$8 sps:$4 sm:$0xff]   ;;  %v1373_v46 = vld [vmem:[%s1739_s17 + $0x50] ss:$8 sps:$4 sm:$0xff]  }
  0x63   : > { %788 = vmatpush1.bf16.msra.mxu0 %v1367_v42  ;;  %1260 = vmatpush1.bf16.msra.mxu1 %v1367_v42  ;;  %v1374_v47 = vld [vmem:[%s1739_s17 + $0x44] ss:$8 sps:$4 sm:$0xff]   ;;  %v1376_v48 = vld [vmem:[%s1739_s17 + $0x40] ss:$8 sps:$4 sm:$0xff]   ;;  %v1377_v49 = vld [vmem:[%s1739_s17 + $0x34] ss:$8 sps:$4 sm:$0xff]  }
  0x64   : > { %789 = vmatprep.subr.bf16.mxu0 %v1368_v43  ;;  %1245 = vmatprep.subr.bf16.mxu1 %v1368_v43  ;;  %v1379_v50 = vld [vmem:[%s1739_s17 + $0x30] ss:$8 sps:$4 sm:$0xff]   ;;  %v1380_v51 = vld [vmem:[%s1739_s17 + $0x24] ss:$8 sps:$4 sm:$0xff]   ;;  %v1382_v52 = vld [vmem:[%s1739_s17 + $0x20] ss:$8 sps:$4 sm:$0xff]  }
  0x65   : > { %v1383_v53 = vld [vmem:[%s1739_s17 + $0x14] ss:$8 sps:$4 sm:$0xff]   ;;  %v1415_v54 = vld [vmem:[%s1737_s19 + $0x4] ss:$8 sps:$4 sm:$0xff]   ;;  %v1385_v55 = vld [vmem:[%s1739_s17 + $0x10] ss:$8 sps:$4 sm:$0xff]  }
  0x66   : > { %v1418_v56 = vld [vmem:[%s1737_s19 + $0x24] ss:$8 sps:$4 sm:$0xff]   ;;  %819 = vmatprep.mubr.bf16.mxu0 %v1415_v54  ;;  %v1388_v58 = vld [vmem:[%s1739_s17] ss:$8 sps:$4 sm:$0xff]   ;;  %v1389_v59 = vld [vmem:[%s1739_s17 + $0xf4] ss:$8 sps:$4 sm:$0xff]  }
  0x67   : > { %790 = vmatpush1.bf16.msra.mxu0 %v1370_v44  ;;  %1261 = vmatpush1.bf16.msra.mxu1 %v1370_v44  ;;  %v1386_v57 = vld [vmem:[%s1739_s17 + $0x4] ss:$8 sps:$4 sm:$0xff]   ;;  %v1391_v60 = vld [vmem:[%s1739_s17 + $0xf0] ss:$8 sps:$4 sm:$0xff]   ;;  %v1394_v62 = vld [vmem:[%s1739_s17 + $0xe0] ss:$8 sps:$4 sm:$0xff]  }
  0x68   : > { %791 = vmatprep.subr.bf16.mxu0 %v1371_v45  ;;  %1246 = vmatprep.subr.bf16.mxu1 %v1371_v45  ;;  %v1392_v61 = vld [vmem:[%s1739_s17 + $0xe4] ss:$8 sps:$4 sm:$0xff]   ;;  %v1395_v63 = vld [vmem:[%s1739_s17 + $0xd4] ss:$8 sps:$4 sm:$0xff]   ;;  %v1397_v0 = vld [vmem:[%s1739_s17 + $0xd0] ss:$8 sps:$4 sm:$0xff]  }
  0x69   : > { %839 = vmatprep.mubr.bf16.mxu1 %v1418_v56  ;;  %v1398_v1 = vld [vmem:[%s1739_s17 + $0xc4] ss:$8 sps:$4 sm:$0xff]   ;;  %v1400_v2 = vld [vmem:[%s1739_s17 + $0xc0] ss:$8 sps:$4 sm:$0xff]   ;;  %v1401_v3 = vld [vmem:[%s1739_s17 + $0xb4] ss:$8 sps:$4 sm:$0xff]  }
  0x6a   : > { %v1403_v4 = vld [vmem:[%s1739_s17 + $0xb0] ss:$8 sps:$4 sm:$0xff]   ;;  %v1404_v5 = vld [vmem:[%s1739_s17 + $0xa4] ss:$8 sps:$4 sm:$0xff]   ;;  %v1406_v6 = vld [vmem:[%s1739_s17 + $0xa0] ss:$8 sps:$4 sm:$0xff]  }
  0x6b   : > { %792 = vmatpush1.bf16.msra.mxu0 %v1373_v46  ;;  %1262 = vmatpush1.bf16.msra.mxu1 %v1373_v46  ;;  %v1407_v7 = vld [vmem:[%s1739_s17 + $0x94] ss:$8 sps:$4 sm:$0xff]   ;;  %v1409_v8 = vld [vmem:[%s1739_s17 + $0x90] ss:$8 sps:$4 sm:$0xff]   ;;  %v1410_v9 = vld [vmem:[%s1739_s17 + $0x84] ss:$8 sps:$4 sm:$0xff]  }
  0x6c   : > { %793 = vmatprep.subr.bf16.mxu0 %v1374_v47  ;;  %1247 = vmatprep.subr.bf16.mxu1 %v1374_v47  ;;  %v1412_v10 = vld [vmem:[%s1739_s17 + $0x80] ss:$8 sps:$4 sm:$0xff]   ;;  %v1419_v13 = vld [vmem:[%s1737_s19 + $0x14] ss:$8 sps:$4 sm:$0xff]   ;;  %v1423_v15 = vld [vmem:[%s1737_s19 + $0x10] ss:$8 sps:$4 sm:$0xff]  }
  0x6d   : > { %v1413_v11 = vld [vmem:[%s1737_s19] ss:$8 sps:$4 sm:$0xff]   ;;  %v1421_v14 = vld [vmem:[%s1737_s19 + $0x34] ss:$8 sps:$4 sm:$0xff]   ;;  %v1424_v16 = vld [vmem:[%s1737_s19 + $0x30] ss:$8 sps:$4 sm:$0xff]  }
  0x6e   : > { %v1416_v12 = vld [vmem:[%s1737_s19 + $0x20] ss:$8 sps:$4 sm:$0xff]   ;;  %v531_v17 = vld [vmem:[#allocation2 + $0x30] sm:$0xff]  ;;  %v533_v27 = vld [vmem:[#allocation2 + $0x58] sm:$0xff]  ;;  %p1235_p5 = scmp.ne.s32.totalorder %s1495_s21, 8 }
  0x6f   : > { %794 = vmatpush1.bf16.msra.mxu0 %v1376_v48  ;;  %1263 = vmatpush1.bf16.msra.mxu1 %v1376_v48  ;;  %v539_v18 = vld [vmem:[#allocation2 + $0x40] sm:$0xff]  ;;  %v541_v28 = vld [vmem:[#allocation2 + $0x10] sm:$0xff]  ;;  %v534_v33 = vld [vmem:[#allocation2 + $0x18] sm:$0xff] }
  0x70   : > { %795 = vmatprep.subr.bf16.mxu0 %v1377_v49  ;;  %1248 = vmatprep.subr.bf16.mxu1 %v1377_v49  ;;  %v532_v21 = vld [vmem:[#allocation2] sm:$0xff]  ;;  %v542_v34 = vld [vmem:[#allocation2 + $0x38] sm:$0xff]  ;;  %v535_v39 = vld [vmem:[#allocation2 + $0x50] sm:$0xff] }
  0x71   : > { %v540_v22 = vld [vmem:[#allocation2 + $0x20] sm:$0xff]  ;;  %v536_v45 = vld [vmem:[#allocation2 + $0x68] sm:$0xff]  ;;  %v544_v46 = vld [vmem:[#allocation2 + $0x70] sm:$0xff] }
  0x72   : > { %v543_v40 = vld [vmem:[#allocation2 + $0x60] sm:$0xff] }
  0x73   : > { %796 = vmatpush1.bf16.msra.mxu0 %v1379_v50  ;;  %1264 = vmatpush1.bf16.msra.mxu1 %v1379_v50 }
  0x74   : > { %797 = vmatprep.subr.bf16.mxu0 %v1380_v51  ;;  %1249 = vmatprep.subr.bf16.mxu1 %v1380_v51  ;;  %v537_v51 = vld [vmem:[#allocation2 + $0x8] sm:$0xff] }
  0x77   : > { %798 = vmatpush1.bf16.msra.mxu0 %v1382_v52  ;;  %1265 = vmatpush1.bf16.msra.mxu1 %v1382_v52  ;;  %v545_v52 = vld [vmem:[#allocation2 + $0x78] sm:$0xff] }
  0x78   : > { %799 = vmatprep.subr.bf16.mxu0 %v1383_v53  ;;  %1250 = vmatprep.subr.bf16.mxu1 %v1383_v53 }
  0x7b   : > { %800 = vmatpush1.bf16.msra.mxu0 %v1385_v55  ;;  %1266 = vmatpush1.bf16.msra.mxu1 %v1385_v55 }
  0x7c   : > { %801 = vmatprep.subr.bf16.mxu0 %v1386_v57  ;;  %1251 = vmatprep.subr.bf16.mxu1 %v1386_v57  ;;  %v538_v57 = vld [vmem:[#allocation2 + $0x48] sm:$0xff] }
  0x7f   : > { %802 = vmatpush1.bf16.msra.mxu0 %v1388_v58  ;;  %1267 = vmatpush1.bf16.msra.mxu1 %v1388_v58  ;;  %v546_v58 = vld [vmem:[#allocation2 + $0x28] sm:$0xff] }
  0x80   : > { %803 = vmatprep.subr.bf16.mxu0 %v1389_v59  ;;  %1252 = vmatprep.subr.bf16.mxu1 %v1389_v59 }
  0x83   : > { %804 = vmatpush2.bf16.msra.mxu0 %v1391_v60  ;;  %1268 = vmatpush2.bf16.msra.mxu1 %v1391_v60 }
  0x84   : > { %805 = vmatprep.subr.bf16.mxu0 %v1392_v61  ;;  %1253 = vmatprep.subr.bf16.mxu1 %v1392_v61 }
  0x87   : > { %806 = vmatpush2.bf16.msra.mxu0 %v1394_v62  ;;  %1269 = vmatpush2.bf16.msra.mxu1 %v1394_v62 }
  0x88   : > { %807 = vmatprep.subr.bf16.mxu0 %v1395_v63  ;;  %1254 = vmatprep.subr.bf16.mxu1 %v1395_v63 }
  0x8b   : > { %808 = vmatpush2.bf16.msra.mxu0 %v1397_v0  ;;  %1270 = vmatpush2.bf16.msra.mxu1 %v1397_v0 }
  0x8c   : > { %809 = vmatprep.subr.bf16.mxu0 %v1398_v1  ;;  %1255 = vmatprep.subr.bf16.mxu1 %v1398_v1 }
  0x8f   : > { %810 = vmatpush2.bf16.msra.mxu0 %v1400_v2  ;;  %1271 = vmatpush2.bf16.msra.mxu1 %v1400_v2 }
  0x90   : > { %811 = vmatprep.subr.bf16.mxu0 %v1401_v3  ;;  %1256 = vmatprep.subr.bf16.mxu1 %v1401_v3 }
  0x93   : > { %812 = vmatpush2.bf16.msra.mxu0 %v1403_v4  ;;  %1272 = vmatpush2.bf16.msra.mxu1 %v1403_v4 }
  0x94   : > { %813 = vmatprep.subr.bf16.mxu0 %v1404_v5  ;;  %1257 = vmatprep.subr.bf16.mxu1 %v1404_v5 }
  0x97   : > { %814 = vmatpush2.bf16.msra.mxu0 %v1406_v6  ;;  %1273 = vmatpush2.bf16.msra.mxu1 %v1406_v6 }
  0x98   : > { %815 = vmatprep.subr.bf16.mxu0 %v1407_v7  ;;  %1258 = vmatprep.subr.bf16.mxu1 %v1407_v7 }
  0x9b   : > { %816 = vmatpush2.bf16.msra.mxu0 %v1409_v8  ;;  %1274 = vmatpush2.bf16.msra.mxu1 %v1409_v8 }
  0x9c   : > { %817 = vmatprep.subr.bf16.mxu0 %v1410_v9  ;;  %1259 = vmatprep.subr.bf16.mxu1 %v1410_v9 }
  0x9f   : > { %818 = vmatpush2.bf16.msra.mxu0 %v1412_v10  ;;  %1275 = vmatpush2.bf16.msra.mxu1 %v1412_v10 }
  0xa2   : > { %820 = vmatmul.mubr.bf16.vlgmr.msra.gmra.mxu0 %v1413_v11  ;;  %840 = vmatmul.mubr.bf16.vlgmr.msra.gmra.mxu1 %v1416_v12 }
  0xa3   : > { %829 = vmatprep.mubr.bf16.mxu0 %v1419_v13  ;;  %849 = vmatprep.mubr.bf16.mxu1 %v1421_v14 }
  0xaa   : > { %830 = vmatmul.mubr.bf16.gmra.mxu0 %v1423_v15  ;;  %850 = vmatmul.mubr.bf16.gmra.mxu1 %v1424_v16 }
 0x162   : > { %v821_v19 = vpop.f32.mrf.mxu0  ;;  %v841_v20 = vpop.f32.mrf.mxu1 }
 0x163   : > { %v860_v23 = vadd.f32 %v821_v19, %v531_v17  ;;  %v868_v24 = vadd.f32 %v841_v20, %v539_v18 }
 0x164   : > { %v823_v25 = vpop.f32.mrf.mxu0  ;;  %v843_v26 = vpop.f32.mrf.mxu1 }
 0x165   : > { %876 = vst [vmem:[#allocation2 + $0x30] sm:$0xff] %v860_v23  ;;  %884 = vst [vmem:[#allocation2 + $0x40] sm:$0xff] %v868_v24  ;;  %v861_v29 = vadd.f32 %v823_v25, %v532_v21  ;;  %v869_v30 = vadd.f32 %v843_v26, %v540_v22 }
 0x166   : > { %v825_v31 = vpop.f32.mrf.mxu0  ;;  %v845_v32 = vpop.f32.mrf.mxu1 }
 0x167   : > { %877 = vst [vmem:[#allocation2] sm:$0xff] %v861_v29  ;;  %885 = vst [vmem:[#allocation2 + $0x20] sm:$0xff] %v869_v30  ;;  %v862_v35 = vadd.f32 %v825_v31, %v533_v27  ;;  %v870_v36 = vadd.f32 %v845_v32, %v541_v28 }
 0x168   : > { %v827_v37 = vpop.f32.mrf.mxu0  ;;  %v847_v38 = vpop.f32.mrf.mxu1 }
 0x169   : > { %878 = vst [vmem:[#allocation2 + $0x58] sm:$0xff] %v862_v35  ;;  %886 = vst [vmem:[#allocation2 + $0x10] sm:$0xff] %v870_v36  ;;  %v863_v41 = vadd.f32 %v827_v37, %v534_v33  ;;  %v871_v42 = vadd.f32 %v847_v38, %v542_v34 }
 0x16a   : > { %v831_v43 = vpop.f32.mrf.mxu0  ;;  %v851_v44 = vpop.f32.mrf.mxu1 }
 0x16b   : > { %879 = vst [vmem:[#allocation2 + $0x18] sm:$0xff] %v863_v41  ;;  %887 = vst [vmem:[#allocation2 + $0x38] sm:$0xff] %v871_v42  ;;  %v864_v47 = vadd.f32 %v831_v43, %v535_v39  ;;  %v872_v48 = vadd.f32 %v851_v44, %v543_v40 }
 0x16c   : > { %v833_v49 = vpop.f32.mrf.mxu0  ;;  %v853_v50 = vpop.f32.mrf.mxu1 }
 0x16d   : > { %880 = vst [vmem:[#allocation2 + $0x50] sm:$0xff] %v864_v47  ;;  %888 = vst [vmem:[#allocation2 + $0x60] sm:$0xff] %v872_v48  ;;  %v865_v53 = vadd.f32 %v833_v49, %v536_v45  ;;  %v873_v54 = vadd.f32 %v853_v50, %v544_v46 }
 0x16e   : > { %v835_v55 = vpop.f32.mrf.mxu0  ;;  %v855_v56 = vpop.f32.mrf.mxu1 }
 0x16f   : > { %881 = vst [vmem:[#allocation2 + $0x68] sm:$0xff] %v865_v53  ;;  %889 = vst [vmem:[#allocation2 + $0x70] sm:$0xff] %v873_v54  ;;  %v866_v59 = vadd.f32 %v835_v55, %v537_v51  ;;  %v874_v60 = vadd.f32 %v855_v56, %v545_v52  ;;  %895 = sbr.rel (%p1235_p5) target bundleno = 397 (0x18d), region = 120 }
 0x170   : > { %v837_v61 = vpop.f32.mrf.mxu0  ;;  %v857_v62 = vpop.f32.mrf.mxu1 }
 0x171   : > { %882 = vst [vmem:[#allocation2 + $0x8] sm:$0xff] %v866_v59  ;;  %890 = vst [vmem:[#allocation2 + $0x78] sm:$0xff] %v874_v60  ;;  %v867_v63 = vadd.f32 %v837_v61, %v538_v57  ;;  %v875_v0 = vadd.f32 %v857_v62, %v546_v58 }
 0x173   : > { %883 = vst [vmem:[#allocation2 + $0x48] sm:$0xff] %v867_v63  ;;  %891 = vst [vmem:[#allocation2 + $0x28] sm:$0xff] %v875_v0 }
 0x174   : > { %v914_v1 = vlaneseq  ;;  %v912_v3 = vld [vmem:[%s502_s6] sm:$0x3]  ;;  %v896_v5 = vld [vmem:[#allocation2 + $0x30] sm:$0xff]  ;;  %v898_v9 = vld [vmem:[#allocation2 + $0x58] sm:$0xff] }
 0x175   : > { %v940_v4 = vld [vmem:[%s507_s1] sm:$0x3]  ;;  %v899_v10 = vld [vmem:[#allocation2 + $0x18] sm:$0xff]  ;;  %v900_v11 = vld [vmem:[#allocation2 + $0x50] sm:$0xff] }
 0x176   : > { %v915_v2 = vshrl.u32 %v914_v1, 7  ;;  %v897_v7 = vld [vmem:[#allocation2] sm:$0xff]  ;;  %v901_v16 = vld [vmem:[#allocation2 + $0x68] sm:$0xff]  ;;  %v906_v33 = vld [vmem:[#allocation2 + $0x10] sm:$0xff] }
 0x177   : > { %v904_v31 = vld [vmem:[#allocation2 + $0x40] sm:$0xff]  ;;  %v907_v38 = vld [vmem:[#allocation2 + $0x38] sm:$0xff]  ;;  %v909_v40 = vld [vmem:[#allocation2 + $0x70] sm:$0xff] }
 0x178   : > { %v916_v6 = vsub.s32 0, %v915_v2  ;;  %v920_v8 = vsub.s32 1, %v915_v2  ;;  %v902_v17 = vld [vmem:[#allocation2 + $0x8] sm:$0xff]  ;;  %v905_v32 = vld [vmem:[#allocation2 + $0x20] sm:$0xff]  ;;  %v910_v45 = vld [vmem:[#allocation2 + $0x78] sm:$0xff] }
 0x179   : > { %v908_v39 = vld [vmem:[#allocation2 + $0x60] sm:$0xff] }
 0x17a   : > { %v917_v12 = vrot.slane %v912_v3, %v916_v6  ;;  %v945_v13 = vrot.slane %v940_v4, %v916_v6  ;;  %v921_v14 = vrot.slane %v912_v3, %v920_v8  ;;  %v949_v15 = vrot.slane %v940_v4, %v920_v8  ;;  %v903_v18 = vld [vmem:[#allocation2 + $0x48] sm:$0xff] }
 0x17b   : > { %v911_v46 = vld [vmem:[#allocation2 + $0x28] sm:$0xff] }
 0x17c   : > { %v924_v19 = vmul.f32 %v917_v12, %v896_v5  ;;  %v925_v20 = vmul.f32 %v921_v14, %v897_v7  ;;  %v926_v21 = vmul.f32 %v917_v12, %v898_v9  ;;  %v927_v22 = vmul.f32 %v921_v14, %v899_v10 }
 0x17d   : > { %v928_v23 = vmul.f32 %v917_v12, %v900_v11  ;;  %v929_v24 = vmul.f32 %v921_v14, %v901_v16  ;;  %v930_v25 = vmul.f32 %v917_v12, %v902_v17  ;;  %v931_v26 = vmul.f32 %v921_v14, %v903_v18 }
 0x17e   : > { %v952_v27 = vadd.f32 %v945_v13, %v924_v19  ;;  %v953_v28 = vadd.f32 %v949_v15, %v925_v20  ;;  %v954_v29 = vadd.f32 %v945_v13, %v926_v21  ;;  %v955_v30 = vadd.f32 %v949_v15, %v927_v22 }
 0x17f   : > { %v956_v34 = vadd.f32 %v945_v13, %v928_v23  ;;  %v957_v35 = vadd.f32 %v949_v15, %v929_v24  ;;  %v958_v36 = vadd.f32 %v945_v13, %v930_v25  ;;  %v959_v37 = vadd.f32 %v949_v15, %v931_v26 }
 0x180   : > { %v968_v41 = vmax.f32 %v952_v27, 0.0  ;;  %v969_v42 = vmax.f32 %v953_v28, 0.0  ;;  %v970_v43 = vmax.f32 %v954_v29, 0.0  ;;  %v971_v44 = vmax.f32 %v955_v30, 0.0 }
 0x181   : > { %v972_v47 = vmax.f32 %v956_v34, 0.0  ;;  %v973_v48 = vmax.f32 %v957_v35, 0.0  ;;  %v974_v49 = vmax.f32 %v958_v36, 0.0  ;;  %v975_v50 = vmax.f32 %v959_v37, 0.0 }
 0x182   : > { %984 = vst [vmem:[%s1741_s15] sm:$0xff] %v968_v41  ;;  %985 = vst [vmem:[%s1741_s15 + $0x8] sm:$0xff] %v969_v42  ;;  %v932_v51 = vmul.f32 %v917_v12, %v904_v31  ;;  %v933_v52 = vmul.f32 %v921_v14, %v905_v32  ;;  %v934_v53 = vmul.f32 %v917_v12, %v906_v33 }
 0x183   : > { %986 = vst [vmem:[%s1741_s15 + $0x10] sm:$0xff] %v970_v43  ;;  %987 = vst [vmem:[%s1741_s15 + $0x18] sm:$0xff] %v971_v44  ;;  %v935_v54 = vmul.f32 %v921_v14, %v907_v38  ;;  %v936_v55 = vmul.f32 %v917_v12, %v908_v39  ;;  %v937_v56 = vmul.f32 %v921_v14, %v909_v40 }
 0x184   : > { %988 = vst [vmem:[%s1741_s15 + $0x20] sm:$0xff] %v972_v47  ;;  %989 = vst [vmem:[%s1741_s15 + $0x28] sm:$0xff] %v973_v48  ;;  %v938_v57 = vmul.f32 %v917_v12, %v910_v45  ;;  %v939_v58 = vmul.f32 %v921_v14, %v911_v46  ;;  %v960_v59 = vadd.f32 %v945_v13, %v932_v51 }
 0x185   : > { %990 = vst [vmem:[%s1741_s15 + $0x30] sm:$0xff] %v974_v49  ;;  %991 = vst [vmem:[%s1741_s15 + $0x38] sm:$0xff] %v975_v50  ;;  %v961_v60 = vadd.f32 %v949_v15, %v933_v52  ;;  %v962_v61 = vadd.f32 %v945_v13, %v934_v53  ;;  %v963_v62 = vadd.f32 %v949_v15, %v935_v54 }
 0x186   : > { %v964_v63 = vadd.f32 %v945_v13, %v936_v55  ;;  %v965_v0 = vadd.f32 %v949_v15, %v937_v56  ;;  %v966_v1 = vadd.f32 %v945_v13, %v938_v57  ;;  %v967_v2 = vadd.f32 %v949_v15, %v939_v58 }
 0x187   : > { %v976_v3 = vmax.f32 %v960_v59, 0.0  ;;  %v977_v4 = vmax.f32 %v961_v60, 0.0  ;;  %v978_v5 = vmax.f32 %v962_v61, 0.0  ;;  %v979_v6 = vmax.f32 %v963_v62, 0.0 }
 0x188   : > { %v980_v7 = vmax.f32 %v964_v63, 0.0  ;;  %v981_v8 = vmax.f32 %v965_v0, 0.0  ;;  %v982_v9 = vmax.f32 %v966_v1, 0.0  ;;  %v983_v10 = vmax.f32 %v967_v2, 0.0 }
 0x189   : > { %992 = vst [vmem:[%s1741_s15 + $0x40] sm:$0xff] %v976_v3  ;;  %993 = vst [vmem:[%s1741_s15 + $0x48] sm:$0xff] %v977_v4 }
 0x18a   : > { %994 = vst [vmem:[%s1741_s15 + $0x50] sm:$0xff] %v978_v5  ;;  %995 = vst [vmem:[%s1741_s15 + $0x58] sm:$0xff] %v979_v6 }
 0x18b   : > { %996 = vst [vmem:[%s1741_s15 + $0x60] sm:$0xff] %v980_v7  ;;  %997 = vst [vmem:[%s1741_s15 + $0x68] sm:$0xff] %v981_v8 }
 0x18c   : > { %998 = vst [vmem:[%s1741_s15 + $0x70] sm:$0xff] %v982_v9  ;;  %999 = vst [vmem:[%s1741_s15 + $0x78] sm:$0xff] %v983_v10 }
 0x18d PF: > { %1006 = sbr.rel (!%p1633_p12) target bundleno = 407 (0x197), region = 124  ;;  %s1243_s1 = sshll.u32 (%p1633_p12), %s1499_s22, 4  ;;  %v1025_v11 = vld [vmem:[%s1741_s15] sm:$0xff] (%p1633_p12)  ;;  %v1027_v12 = vld [vmem:[%s1741_s15 + $0x8] sm:$0xff] (%p1633_p12)  ;;  %v1029_v13 = vld [vmem:[%s1741_s15 + $0x10] sm:$0xff] (%p1633_p12) }
 0x18e   : > { %s1012_s27 = scalar_lea.vmem (%p1633_p12), %s1870_s4, %s1243_s1  ;;  %v1031_v14 = vld [vmem:[%s1741_s15 + $0x18] sm:$0xff] (%p1633_p12)  ;;  %v1033_v15 = vld [vmem:[%s1741_s15 + $0x20] sm:$0xff] (%p1633_p12)  ;;  %v1035_v16 = vld [vmem:[%s1741_s15 + $0x28] sm:$0xff] (%p1633_p12) }
 0x18f   : > { %1026 = vst [vmem:[%s1012_s27] sm:$0xff] (%p1633_p12), %v1025_v11  ;;  %1028 = vst [vmem:[%s1012_s27 + $0x8] sm:$0xff] (%p1633_p12), %v1027_v12  ;;  %v1037_v17 = vld [vmem:[%s1741_s15 + $0x30] sm:$0xff] (%p1633_p12)  ;;  %v1039_v18 = vld [vmem:[%s1741_s15 + $0x38] sm:$0xff] (%p1633_p12) }
 0x190   : > { %1030 = vst [vmem:[%s1012_s27 + $0x20] sm:$0xff] (%p1633_p12), %v1029_v13  ;;  %1032 = vst [vmem:[%s1012_s27 + $0x28] sm:$0xff] (%p1633_p12), %v1031_v14  ;;  %v1041_v19 = vld [vmem:[%s1741_s15 + $0x40] sm:$0xff] (%p1633_p12)  ;;  %v1043_v20 = vld [vmem:[%s1741_s15 + $0x48] sm:$0xff] (%p1633_p12) }
 0x191   : > { %1034 = vst [vmem:[%s1012_s27 + $0x40] sm:$0xff] (%p1633_p12), %v1033_v15  ;;  %1036 = vst [vmem:[%s1012_s27 + $0x48] sm:$0xff] (%p1633_p12), %v1035_v16  ;;  %v1045_v21 = vld [vmem:[%s1741_s15 + $0x50] sm:$0xff] (%p1633_p12)  ;;  %v1047_v22 = vld [vmem:[%s1741_s15 + $0x58] sm:$0xff] (%p1633_p12) }
 0x192   : > { %1038 = vst [vmem:[%s1012_s27 + $0x60] sm:$0xff] %v1037_v17  ;;  %1040 = vst [vmem:[%s1012_s27 + $0x68] sm:$0xff] %v1039_v18  ;;  %v1049_v23 = vld [vmem:[%s1741_s15 + $0x60] sm:$0xff]  ;;  %v1051_v24 = vld [vmem:[%s1741_s15 + $0x68] sm:$0xff] }
 0x193   : > { %1042 = vst [vmem:[%s1012_s27 + $0x80] sm:$0xff] %v1041_v19  ;;  %1044 = vst [vmem:[%s1012_s27 + $0x88] sm:$0xff] %v1043_v20  ;;  %v1053_v25 = vld [vmem:[%s1741_s15 + $0x70] sm:$0xff]  ;;  %v1055_v26 = vld [vmem:[%s1741_s15 + $0x78] sm:$0xff] }
 0x194   : > { %1046 = vst [vmem:[%s1012_s27 + $0xa0] sm:$0xff] %v1045_v21  ;;  %1048 = vst [vmem:[%s1012_s27 + $0xa8] sm:$0xff] %v1047_v22 }
 0x195   : > { %1050 = vst [vmem:[%s1012_s27 + $0xc0] sm:$0xff] %v1049_v23  ;;  %1052 = vst [vmem:[%s1012_s27 + $0xc8] sm:$0xff] %v1051_v24 }
 0x196   : > { %1054 = vst [vmem:[%s1012_s27 + $0xe0] sm:$0xff] %v1053_v25  ;;  %1056 = vst [vmem:[%s1012_s27 + $0xe8] sm:$0xff] %v1055_v26 }
 0x197 PF: > { %s14_s25 = sadd.s32 1, %s1511_s25   ;;  %s1882_s14 = sld [smem:[#allocation6_spill]] }
 0x198   : > { %p11_p6 = scmp.ge.s32.totalorder %s14_s25, 20   ;;  %s1883_s29 = sld [smem:[#allocation7_spill]] }
 0x199   : > { %s1884_s15 = smov %s1475_s16  ;;  %s1885_s16 = smov %s1631_s13 }
 0x19a   : > { %s1886_s17 = smov %s1483_s18  ;;  %s1887_s18 = smov %s1628_s12 }
 0x19b   : > { %s1888_s19 = smov %s1491_s20  ;;  %s1889_s20 = smov %s1614_s7 }
 0x19c   : > { %s1890_s21 = smov %s1503_s23  ;;  %s1891_s22 = smov %s1507_s24 }
 0x19d   : > { %s1892_s23 = smov %s1882_s14  ;;  %13 = sbr.rel (!%p11_p6) target bundleno = 9 (0x9), region = 192 }
 0x19e   : > { %s1893_s24 = smov %s1883_s29 }

// kernel: crnn_forward.25
= control target key start
LH: loop header
LB: loop body
LE: loop exit
PB: predicated region body
PF: predicated region fallthrough
CT: control target
= control target key end

     0   :  { %s378_s6 = smov 0   ;;  %s380_s7 = smov 0   ;;  %s429_s0 = inlined_call_operand.vmem [shape: f32[2,4,8,512], index: 0, kind: input, shape index: {}]   ;;  %s430_s1 = inlined_call_operand.vmem [shape: f32[2,2,8,512], index: 1, kind: output, shape index: {}]  }
   0x1   :  { %s382_s8 = smov 0   ;;  %s384_s9 = smov 0  }
   0x2   :  { %s386_s10 = smov 0  }
   0x3 LB: > { %s20_s11 = sadd.s32 1, %s358_s8  ;;  %s23_s12 = sadd.s32 1, %s362_s9  ;;  %s366_s10 = sphi %s386_s10, %s11_s10   ;;  %s362_s9 = sphi %s384_s9, %s434_s9   ;;  %s358_s8 = sphi %s382_s8, %s433_s8   ;;  %s354_s7 = sphi %s380_s7, %s432_s7   ;;  %s350_s6 = sphi %s378_s6, %s431_s6  }
   0x4   : > { %p21_p0 = scmp.ge.s32.totalorder %s20_s11, 2  ;;  %p274_p1 = scmp.ge.s32.totalorder %s366_s10, 1 }
   0x5   : > { %p109_p2 = scmp.lt.s32.totalorder %s366_s10, 5 }
   0x6   : > { %s436_s11 = smov (%p21_p0, %s20_s11), 0  ;;  %s438_s12 = smov (!%p21_p0, %s23_s12), %s362_s9 }
   0x7   : > { %p110_p3 = pnand %p274_p1, %p109_p2  ;;  %p25_p4 = scmp.ge.s32.totalorder %s438_s12, 2 }
   0x8   : > { %s275_s13 = sshll.u32 (!%p110_p3), %s350_s6, 1  ;;  %p139_p5 = scmp.lt.s32.totalorder (!%p110_p3), %s354_s7, 1 }
   0x9   : > { %s440_s12 = smov (%p25_p4, %s438_s12), 0  ;;  %113 = sbr.rel (%p110_p3) target bundleno = 26 (0x1a), region = 24 }
   0xa   : > { %p141_p6 = scmp.lt.s32.totalorder (!%p110_p3), %s275_s13, 3  ;;  %p151_p7 = scmp.lt.s32.totalorder (!%p110_p3), %s350_s6, 1 }
   0xe   : > { %s442_s7 = smov (!%p139_p5, %s354_s7), 1  ;;  %s444_s13 = smov (!%p141_p6, %s275_s13), 3 }
   0xf   : > { %s277_s14 = sshll.u32 %s442_s7, 4  ;;  %s276_s15 = sshll.u32 %s444_s13, 2 }
  0x10   : > { %s145_s16 = sadd.s32 %s277_s14, %s276_s15  ;;  %s280_s21 = sshll.u32 %s442_s7, 3 }
  0x11   : > { %s278_s17 = sshll.u32 %s145_s16, 3  ;;  %s446_s6 = smov (!%p151_p7, %s350_s6), 1 }
  0x12   : > { %s147_s20 = scalar_lea.vmem %s429_s0, %s278_s17  ;;  %s279_s22 = sshll.u32 %s446_s6, 2 }
  0x13   : > { %v158_v0 = vld [vmem:[%s147_s20] sm:$0xff]  ;;  %v159_v2 = vld [vmem:[%s147_s20 + $0x8] sm:$0xff]  ;;  %v160_v4 = vld [vmem:[%s147_s20 + $0x10] sm:$0xff]  ;;  %s155_s23 = sadd.s32 %s280_s21, %s279_s22 }
  0x14   : > { %v282_v1 = vld [vmem:[%s147_s20 + $0x20] sm:$0xff]  ;;  %v283_v3 = vld [vmem:[%s147_s20 + $0x28] sm:$0xff]  ;;  %v284_v5 = vld [vmem:[%s147_s20 + $0x30] sm:$0xff]  ;;  %s281_s24 = sshll.u32 %s155_s23, 3 }
  0x15   : > { %v167_v6 = vmax.f32 %v158_v0, %v282_v1  ;;  %v168_v7 = vmax.f32 %v159_v2, %v283_v3  ;;  %v169_v8 = vmax.f32 %v160_v4, %v284_v5  ;;  %v161_v9 = vld [vmem:[%s147_s20 + $0x18] sm:$0xff]  ;;  %s157_s27 = scalar_lea.vmem %s430_s1, %s281_s24 }
  0x16   : > { %v285_v10 = vld [vmem:[%s147_s20 + $0x38] sm:$0xff] }
  0x17   : > { %v170_v11 = vmax.f32 %v161_v9, %v285_v10  ;;  %171 = vst [vmem:[%s157_s27] sm:$0xff] %v167_v6  ;;  %172 = vst [vmem:[%s157_s27 + $0x8] sm:$0xff] %v168_v7 }
  0x18   : > { %173 = vst [vmem:[%s157_s27 + $0x10] sm:$0xff] %v169_v8 }
  0x19   : > { %174 = vst [vmem:[%s157_s27 + $0x18] sm:$0xff] %v170_v11 }
  0x1a PF: > { %s11_s10 = sadd.s32 1, %s366_s10   ;;  %s431_s6 = smov %s358_s8 }
  0x1b   : > { %p8_p8 = scmp.ge.s32.totalorder %s11_s10, 6   ;;  %s432_s7 = smov %s362_s9 }
  0x1c   : > { %s433_s8 = smov %s436_s11  ;;  %s434_s9 = smov %s440_s12 }
  0x1d   :  { %10 = sbr.rel (!%p8_p8) target bundleno = 3 (0x3), region = 55 }

// kernel: crnn_forward.24
= control target key start
LH: loop header
LB: loop body
LE: loop exit
PB: predicated region body
PF: predicated region fallthrough
CT: control target
= control target key end

     0   :  { %s2385_s0 = inlined_call_operand.vmem [shape: bf16[64,4608], index: 0, kind: input, shape index: {}]   ;;  %s2386_s1 = inlined_call_operand.vmem [shape: bf16[4608,512], index: 1, kind: input, shape index: {}]   ;;  %s2387_s2 = inlined_call_operand.vmem [shape: f32[1,512], index: 2, kind: input, shape index: {}]   ;;  %s2388_s3 = inlined_call_operand.vmem [shape: f32[64,512], index: 3, kind: output, shape index: {}]  }
   0x1   :  { %2390 = sst [smem:[#allocation7_spill]] %s2385_s0 }
   0x2   :  { %2391 = sst [smem:[#allocation8_spill]] %s2386_s1 }
   0x3   :  { %s1945_s12 = smov 0   ;;  %s1947_s13 = smov 0  }
   0x4   :  { %s1949_s14 = smov 0   ;;  %s1951_s15 = smov 0  }
   0x5   :  { %s1953_s16 = smov 0   ;;  %s1955_s17 = smov 0  }
   0x6   :  { %s1957_s18 = smov 0   ;;  %s1959_s19 = smov 0  }
   0x7   :  { %s1961_s20 = smov 0   ;;  %s1963_s21 = smov 0  }
   0x8   :  { %s1965_s22 = smov 0  }
   0x9 LB: > { %s1520_s23 = sadd.s32 4294967295, %s1922_s22   ;;  %s25_s24 = sadd.s32 1, %s1914_s20  ;;  %s1922_s22 = sphi %s1965_s22, %s13_s22   ;;  %s1918_s21 = sphi %s1963_s21, %s2408_s21   ;;  %s1914_s20 = sphi %s1961_s20, %s2407_s20   ;;  %s1910_s19 = sphi %s1959_s19, %s2406_s19   ;;  %s1906_s18 = sphi %s1957_s18, %s2405_s18   ;;  %s1902_s17 = sphi %s1955_s17, %s2404_s17   ;;  %s1898_s16 = sphi %s1953_s16, %s2403_s16   ;;  %s1894_s15 = sphi %s1951_s15, %s2402_s15   ;;  %s1890_s14 = sphi %s1949_s14, %s2401_s14   ;;  %s1886_s13 = sphi %s1947_s13, %s2400_s13   ;;  %s1882_s12 = sphi %s1945_s12, %s2399_s12  }
   0xa   : > { %p26_p0 = scmp.ge.s32.totalorder %s25_s24, 9  ;;  %s28_s25 = sadd.s32 1, %s1918_s21 }
   0xb   : > { %s41_s26 = sadd.s32 1, %s1902_s17  ;;  %p48_p1 = scmp.ne.s32.totalorder %s1902_s17, %s1898_s16 }
   0xc   : > { %s2410_s24 = smov (%p26_p0, %s25_s24), 0  ;;  %s2412_s25 = smov (!%p26_p0, %s28_s25), %s1918_s21 }
   0xd   : > { %s37_s27 = ssub.s32 %s1914_s20, %s2410_s24  ;;  %p49_p2 = scmp.eq.s32.totalorder %s1922_s22, 0 }
   0xe   : > { %p30_p3 = scmp.ge.s32.totalorder %s2412_s25, 2  ;;  %p39_p4 = scmp.eq.s32.totalorder %s37_s27, 0 }
   0xf   : > { %p2012_p5 = por %p49_p2, %p48_p1  ;;  %s69_s29 = sadd.s32 1, %s1894_s15 }
  0x10   : > { %s2414_s25 = smov (%p30_p3, %s2412_s25), 0  ;;  %p76_p6 = scmp.ne.s32.totalorder %s1894_s15, %s1890_s14 }
  0x11   : > { %2393 = sst [smem:[#allocation6_spill]] %s2414_s25  ;;  %s65_s4 = ssub.s32 %s1918_s21, %s2414_s25 }
  0x12   : > { %s2020_s30 = scalar_select %p39_p4, %s1902_s17, %s41_s26  }
  0x13   : > { %s66_s5 = sor.u32 %s65_s4, %s37_s27  ;;  %p121_p7 = scmp.eq.s32.totalorder %s65_s4, 0 }
  0x14   : > { %p67_p8 = scmp.eq.s32.totalorder %s66_s5, 0  ;;  %p2026_p9 = por %p76_p6, %p49_p2 }
  0x15   : > { %s123_s7 = sadd.s32 1, %s1886_s13  ;;  %p133_p10 = scmp.ne.s32.totalorder %s1886_s13, %s1882_s12 }
  0x16   : > { %s2034_s8 = scalar_select %p67_p8, %s1894_s15, %s69_s29  }
  0x17   : > { %s2037_s9 = scalar_select %p121_p7, %s1886_s13, %s123_s7  }
  0x18   : > { %p134_p11 = scmp.eq.s32.totalorder %s1520_s23, 17  ;;  %p1523_p13 = scmp.ge.s32.totalorder %s1922_s22, 18 }
  0x1a   : > { %p2039_p12 = por %p134_p11, %p133_p10  ;;  %156 = sbr.rel (%p1523_p13) target bundleno = 91 (0x5b), region = 16 }
  0x1f   : > { %159 = sbr.rel (!%p2012_p5) target bundleno = 49 (0x31), region = 20  ;;  %s161_s11 = sand.u32 (%p2012_p5), 1, %s1902_s17  }
  0x20   : > { %s1624_s26 = sshll.u32 (%p2012_p5), %s1914_s20, 4  ;;  %s1524_s27 = sshll.u32 (%p2012_p5), %s161_s11, 7 }
  0x21   : > { %s2396_s0 = sld [smem:[#allocation7_spill]] (%p2012_p5)  ;;  %s163_s23 = scalar_lea.vmem (%p2012_p5), [#allocation3], %s1524_s27 }
  0x27   : > { %s2051_s5 = scalar_lea.vmem %s2396_s0, %s1624_s26 }
  0x28   : > { %v182_v0 = vld [vmem:[%s2051_s5] sm:$0xff]  ;;  %v184_v1 = vld [vmem:[%s2051_s5 + $0x8] sm:$0xff]  ;;  %v186_v2 = vld [vmem:[%s2051_s5 + $0x90] sm:$0xff] }
  0x29   : > { %183 = vst [vmem:[%s163_s23] sm:$0xff] %v182_v0  ;;  %185 = vst [vmem:[%s163_s23 + $0x8] sm:$0xff] %v184_v1  ;;  %v188_v3 = vld [vmem:[%s2051_s5 + $0x98] sm:$0xff]  ;;  %v190_v4 = vld [vmem:[%s2051_s5 + $0x120] sm:$0xff] }
  0x2a   : > { %187 = vst [vmem:[%s163_s23 + $0x10] sm:$0xff] %v186_v2  ;;  %v192_v5 = vld [vmem:[%s2051_s5 + $0x128] sm:$0xff]  ;;  %189 = vst [vmem:[%s163_s23 + $0x18] sm:$0xff] %v188_v3  ;;  %v194_v6 = vld [vmem:[%s2051_s5 + $0x1b0] sm:$0xff] }
  0x2b   : > { %191 = vst [vmem:[%s163_s23 + $0x20] sm:$0xff] %v190_v4  ;;  %193 = vst [vmem:[%s163_s23 + $0x28] sm:$0xff] %v192_v5  ;;  %v196_v7 = vld [vmem:[%s2051_s5 + $0x1b8] sm:$0xff]  ;;  %v198_v8 = vld [vmem:[%s2051_s5 + $0x240] sm:$0xff] }
  0x2c   : > { %195 = vst [vmem:[%s163_s23 + $0x30] sm:$0xff] %v194_v6  ;;  %197 = vst [vmem:[%s163_s23 + $0x38] sm:$0xff] %v196_v7  ;;  %v200_v9 = vld [vmem:[%s2051_s5 + $0x248] sm:$0xff]  ;;  %v202_v10 = vld [vmem:[%s2051_s5 + $0x2d0] sm:$0xff] }
  0x2d   : > { %199 = vst [vmem:[%s163_s23 + $0x40] sm:$0xff] %v198_v8  ;;  %v204_v11 = vld [vmem:[%s2051_s5 + $0x2d8] sm:$0xff]  ;;  %201 = vst [vmem:[%s163_s23 + $0x48] sm:$0xff] %v200_v9  ;;  %v206_v12 = vld [vmem:[%s2051_s5 + $0x360] sm:$0xff] }
  0x2e   : > { %203 = vst [vmem:[%s163_s23 + $0x50] sm:$0xff] %v202_v10  ;;  %205 = vst [vmem:[%s163_s23 + $0x58] sm:$0xff] %v204_v11  ;;  %v208_v13 = vld [vmem:[%s2051_s5 + $0x368] sm:$0xff]  ;;  %v210_v14 = vld [vmem:[%s2051_s5 + $0x3f0] sm:$0xff] }
  0x2f   : > { %207 = vst [vmem:[%s163_s23 + $0x60] sm:$0xff] %v206_v12  ;;  %209 = vst [vmem:[%s163_s23 + $0x68] sm:$0xff] %v208_v13  ;;  %v212_v15 = vld [vmem:[%s2051_s5 + $0x3f8] sm:$0xff] }
  0x30   : > { %211 = vst [vmem:[%s163_s23 + $0x70] sm:$0xff] %v210_v14  ;;  %213 = vst [vmem:[%s163_s23 + $0x78] sm:$0xff] %v212_v15 }
  0x31 PF: > { %219 = sbr.rel (!%p2026_p9) target bundleno = 91 (0x5b), region = 43  ;;  %s221_s28 = sand.u32 (%p2026_p9), 1, %s1894_s15  }
  0x32   : > { %s1529_s7 = sshll.u32 (%p2026_p9), %s1918_s21, 1  ;;  %s1527_s11 = sshll.u32 (%p2026_p9), %s221_s28, 9 }
  0x33   : > { %s1625_s26 = sshll.u32 (%p2026_p9), %s1914_s20, 8  ;;  %s2397_s1 = sld [smem:[#allocation8_spill]] (%p2026_p9) }
  0x34   : > { %s227_s27 = sadd.s32 (%p2026_p9), %s1625_s26, %s1529_s7  ;;  %s2082_s6 = scalar_lea.vmem (%p2026_p9), [#allocation4], %s1527_s11 }
  0x35   : > { %s1531_s29 = sshll.u32 (%p2026_p9), %s227_s27, 2 }
  0x39   : > { %s2077_s25 = scalar_lea.vmem %s2397_s1, %s1531_s29 }
  0x3a   : > { %v384_v16 = vld [vmem:[%s2077_s25] sm:$0xff]  ;;  %v386_v17 = vld [vmem:[%s2077_s25 + $0x10] sm:$0xff] }
  0x3b   : > { %v388_v18 = vld [vmem:[%s2077_s25 + $0x20] sm:$0xff]  ;;  %385 = vst [vmem:[%s2082_s6] sm:$0xff] %v384_v16  ;;  %387 = vst [vmem:[%s2082_s6 + $0x8] sm:$0xff] %v386_v17  ;;  %v390_v19 = vld [vmem:[%s2077_s25 + $0x30] sm:$0xff] }
  0x3c   : > { %389 = vst [vmem:[%s2082_s6 + $0x10] sm:$0xff] %v388_v18  ;;  %v392_v20 = vld [vmem:[%s2077_s25 + $0x40] sm:$0xff]  ;;  %v394_v21 = vld [vmem:[%s2077_s25 + $0x50] sm:$0xff]  ;;  %391 = vst [vmem:[%s2082_s6 + $0x18] sm:$0xff] %v390_v19 }
  0x3d   : > { %393 = vst [vmem:[%s2082_s6 + $0x20] sm:$0xff] %v392_v20  ;;  %395 = vst [vmem:[%s2082_s6 + $0x28] sm:$0xff] %v394_v21  ;;  %v396_v22 = vld [vmem:[%s2077_s25 + $0x60] sm:$0xff]  ;;  %v398_v23 = vld [vmem:[%s2077_s25 + $0x70] sm:$0xff] }
  0x3e   : > { %v400_v24 = vld [vmem:[%s2077_s25 + $0x80] sm:$0xff]  ;;  %397 = vst [vmem:[%s2082_s6 + $0x30] sm:$0xff] %v396_v22  ;;  %399 = vst [vmem:[%s2082_s6 + $0x38] sm:$0xff] %v398_v23  ;;  %v402_v25 = vld [vmem:[%s2077_s25 + $0x90] sm:$0xff] }
  0x3f   : > { %401 = vst [vmem:[%s2082_s6 + $0x40] sm:$0xff] %v400_v24  ;;  %v404_v26 = vld [vmem:[%s2077_s25 + $0xa0] sm:$0xff]  ;;  %v406_v27 = vld [vmem:[%s2077_s25 + $0xb0] sm:$0xff]  ;;  %403 = vst [vmem:[%s2082_s6 + $0x48] sm:$0xff] %v402_v25 }
  0x40   : > { %405 = vst [vmem:[%s2082_s6 + $0x50] sm:$0xff] %v404_v26  ;;  %407 = vst [vmem:[%s2082_s6 + $0x58] sm:$0xff] %v406_v27  ;;  %v408_v28 = vld [vmem:[%s2077_s25 + $0xc0] sm:$0xff]  ;;  %v410_v29 = vld [vmem:[%s2077_s25 + $0xd0] sm:$0xff] }
  0x41   : > { %v412_v30 = vld [vmem:[%s2077_s25 + $0xe0] sm:$0xff]  ;;  %409 = vst [vmem:[%s2082_s6 + $0x60] sm:$0xff] %v408_v28  ;;  %411 = vst [vmem:[%s2082_s6 + $0x68] sm:$0xff] %v410_v29  ;;  %v414_v31 = vld [vmem:[%s2077_s25 + $0xf0] sm:$0xff] }
  0x42   : > { %413 = vst [vmem:[%s2082_s6 + $0x70] sm:$0xff] %v412_v30  ;;  %v416_v32 = vld [vmem:[%s2077_s25 + $0x100] sm:$0xff]  ;;  %v418_v33 = vld [vmem:[%s2077_s25 + $0x110] sm:$0xff]  ;;  %415 = vst [vmem:[%s2082_s6 + $0x78] sm:$0xff] %v414_v31 }
  0x43   : > { %417 = vst [vmem:[%s2082_s6 + $0x80] sm:$0xff] %v416_v32  ;;  %419 = vst [vmem:[%s2082_s6 + $0x88] sm:$0xff] %v418_v33  ;;  %v420_v34 = vld [vmem:[%s2077_s25 + $0x120] sm:$0xff]  ;;  %v422_v35 = vld [vmem:[%s2077_s25 + $0x130] sm:$0xff] }
  0x44   : > { %v424_v36 = vld [vmem:[%s2077_s25 + $0x140] sm:$0xff]  ;;  %421 = vst [vmem:[%s2082_s6 + $0x90] sm:$0xff] %v420_v34  ;;  %423 = vst [vmem:[%s2082_s6 + $0x98] sm:$0xff] %v422_v35  ;;  %v426_v37 = vld [vmem:[%s2077_s25 + $0x150] sm:$0xff] }
  0x45   : > { %425 = vst [vmem:[%s2082_s6 + $0xa0] sm:$0xff] %v424_v36  ;;  %v428_v38 = vld [vmem:[%s2077_s25 + $0x160] sm:$0xff]  ;;  %v430_v39 = vld [vmem:[%s2077_s25 + $0x170] sm:$0xff]  ;;  %427 = vst [vmem:[%s2082_s6 + $0xa8] sm:$0xff] %v426_v37 }
  0x46   : > { %429 = vst [vmem:[%s2082_s6 + $0xb0] sm:$0xff] %v428_v38  ;;  %431 = vst [vmem:[%s2082_s6 + $0xb8] sm:$0xff] %v430_v39  ;;  %v432_v40 = vld [vmem:[%s2077_s25 + $0x180] sm:$0xff]  ;;  %v434_v41 = vld [vmem:[%s2077_s25 + $0x190] sm:$0xff] }
  0x47   : > { %v436_v42 = vld [vmem:[%s2077_s25 + $0x1a0] sm:$0xff]  ;;  %433 = vst [vmem:[%s2082_s6 + $0xc0] sm:$0xff] %v432_v40  ;;  %435 = vst [vmem:[%s2082_s6 + $0xc8] sm:$0xff] %v434_v41  ;;  %v438_v43 = vld [vmem:[%s2077_s25 + $0x1b0] sm:$0xff] }
  0x48   : > { %437 = vst [vmem:[%s2082_s6 + $0xd0] sm:$0xff] %v436_v42  ;;  %v440_v44 = vld [vmem:[%s2077_s25 + $0x1c0] sm:$0xff]  ;;  %v442_v45 = vld [vmem:[%s2077_s25 + $0x1d0] sm:$0xff]  ;;  %439 = vst [vmem:[%s2082_s6 + $0xd8] sm:$0xff] %v438_v43 }
  0x49   : > { %441 = vst [vmem:[%s2082_s6 + $0xe0] sm:$0xff] %v440_v44  ;;  %443 = vst [vmem:[%s2082_s6 + $0xe8] sm:$0xff] %v442_v45  ;;  %v444_v46 = vld [vmem:[%s2077_s25 + $0x1e0] sm:$0xff]  ;;  %v446_v47 = vld [vmem:[%s2077_s25 + $0x1f0] sm:$0xff] }
  0x4a   : > { %v448_v48 = vld [vmem:[%s2077_s25 + $0x200] sm:$0xff]  ;;  %445 = vst [vmem:[%s2082_s6 + $0xf0] sm:$0xff] %v444_v46  ;;  %447 = vst [vmem:[%s2082_s6 + $0xf8] sm:$0xff] %v446_v47  ;;  %v450_v49 = vld [vmem:[%s2077_s25 + $0x210] sm:$0xff] }
  0x4b   : > { %449 = vst [vmem:[%s2082_s6 + $0x100] sm:$0xff] %v448_v48  ;;  %v452_v50 = vld [vmem:[%s2077_s25 + $0x220] sm:$0xff]  ;;  %v454_v51 = vld [vmem:[%s2077_s25 + $0x230] sm:$0xff]  ;;  %451 = vst [vmem:[%s2082_s6 + $0x108] sm:$0xff] %v450_v49 }
  0x4c   : > { %453 = vst [vmem:[%s2082_s6 + $0x110] sm:$0xff] %v452_v50  ;;  %455 = vst [vmem:[%s2082_s6 + $0x118] sm:$0xff] %v454_v51  ;;  %v456_v52 = vld [vmem:[%s2077_s25 + $0x240] sm:$0xff]  ;;  %v458_v53 = vld [vmem:[%s2077_s25 + $0x250] sm:$0xff] }
  0x4d   : > { %v460_v54 = vld [vmem:[%s2077_s25 + $0x260] sm:$0xff]  ;;  %457 = vst [vmem:[%s2082_s6 + $0x120] sm:$0xff] %v456_v52  ;;  %459 = vst [vmem:[%s2082_s6 + $0x128] sm:$0xff] %v458_v53  ;;  %v462_v55 = vld [vmem:[%s2077_s25 + $0x270] sm:$0xff] }
  0x4e   : > { %461 = vst [vmem:[%s2082_s6 + $0x130] sm:$0xff] %v460_v54  ;;  %v464_v56 = vld [vmem:[%s2077_s25 + $0x280] sm:$0xff]  ;;  %v466_v57 = vld [vmem:[%s2077_s25 + $0x290] sm:$0xff]  ;;  %463 = vst [vmem:[%s2082_s6 + $0x138] sm:$0xff] %v462_v55 }
  0x4f   : > { %465 = vst [vmem:[%s2082_s6 + $0x140] sm:$0xff] %v464_v56  ;;  %467 = vst [vmem:[%s2082_s6 + $0x148] sm:$0xff] %v466_v57  ;;  %v468_v58 = vld [vmem:[%s2077_s25 + $0x2a0] sm:$0xff]  ;;  %v470_v59 = vld [vmem:[%s2077_s25 + $0x2b0] sm:$0xff] }
  0x50   : > { %v472_v60 = vld [vmem:[%s2077_s25 + $0x2c0] sm:$0xff]  ;;  %469 = vst [vmem:[%s2082_s6 + $0x150] sm:$0xff] %v468_v58  ;;  %471 = vst [vmem:[%s2082_s6 + $0x158] sm:$0xff] %v470_v59  ;;  %v474_v61 = vld [vmem:[%s2077_s25 + $0x2d0] sm:$0xff] }
  0x51   : > { %473 = vst [vmem:[%s2082_s6 + $0x160] sm:$0xff] %v472_v60  ;;  %v476_v62 = vld [vmem:[%s2077_s25 + $0x2e0] sm:$0xff]  ;;  %v478_v63 = vld [vmem:[%s2077_s25 + $0x2f0] sm:$0xff]  ;;  %475 = vst [vmem:[%s2082_s6 + $0x168] sm:$0xff] %v474_v61 }
  0x52   : > { %477 = vst [vmem:[%s2082_s6 + $0x170] sm:$0xff] %v476_v62  ;;  %479 = vst [vmem:[%s2082_s6 + $0x178] sm:$0xff] %v478_v63  ;;  %v480_v0 = vld [vmem:[%s2077_s25 + $0x300] sm:$0xff]  ;;  %v482_v1 = vld [vmem:[%s2077_s25 + $0x310] sm:$0xff] }
  0x53   : > { %v484_v2 = vld [vmem:[%s2077_s25 + $0x320] sm:$0xff]  ;;  %481 = vst [vmem:[%s2082_s6 + $0x180] sm:$0xff] %v480_v0  ;;  %483 = vst [vmem:[%s2082_s6 + $0x188] sm:$0xff] %v482_v1  ;;  %v486_v3 = vld [vmem:[%s2077_s25 + $0x330] sm:$0xff] }
  0x54   : > { %485 = vst [vmem:[%s2082_s6 + $0x190] sm:$0xff] %v484_v2  ;;  %v488_v4 = vld [vmem:[%s2077_s25 + $0x340] sm:$0xff]  ;;  %v490_v5 = vld [vmem:[%s2077_s25 + $0x350] sm:$0xff]  ;;  %487 = vst [vmem:[%s2082_s6 + $0x198] sm:$0xff] %v486_v3 }
  0x55   : > { %489 = vst [vmem:[%s2082_s6 + $0x1a0] sm:$0xff] %v488_v4  ;;  %491 = vst [vmem:[%s2082_s6 + $0x1a8] sm:$0xff] %v490_v5  ;;  %v492_v6 = vld [vmem:[%s2077_s25 + $0x360] sm:$0xff]  ;;  %v494_v7 = vld [vmem:[%s2077_s25 + $0x370] sm:$0xff] }
  0x56   : > { %v496_v8 = vld [vmem:[%s2077_s25 + $0x380] sm:$0xff]  ;;  %493 = vst [vmem:[%s2082_s6 + $0x1b0] sm:$0xff] %v492_v6  ;;  %495 = vst [vmem:[%s2082_s6 + $0x1b8] sm:$0xff] %v494_v7  ;;  %v498_v9 = vld [vmem:[%s2077_s25 + $0x390] sm:$0xff] }
  0x57   : > { %497 = vst [vmem:[%s2082_s6 + $0x1c0] sm:$0xff] %v496_v8  ;;  %v500_v10 = vld [vmem:[%s2077_s25 + $0x3a0] sm:$0xff]  ;;  %v502_v11 = vld [vmem:[%s2077_s25 + $0x3b0] sm:$0xff]  ;;  %499 = vst [vmem:[%s2082_s6 + $0x1c8] sm:$0xff] %v498_v9 }
  0x58   : > { %501 = vst [vmem:[%s2082_s6 + $0x1d0] sm:$0xff] %v500_v10  ;;  %503 = vst [vmem:[%s2082_s6 + $0x1d8] sm:$0xff] %v502_v11  ;;  %v504_v12 = vld [vmem:[%s2077_s25 + $0x3c0] sm:$0xff]  ;;  %v506_v13 = vld [vmem:[%s2077_s25 + $0x3d0] sm:$0xff] }
  0x59   : > { %v508_v14 = vld [vmem:[%s2077_s25 + $0x3e0] sm:$0xff]  ;;  %505 = vst [vmem:[%s2082_s6 + $0x1e0] sm:$0xff] %v504_v12  ;;  %507 = vst [vmem:[%s2082_s6 + $0x1e8] sm:$0xff] %v506_v13  ;;  %v510_v15 = vld [vmem:[%s2077_s25 + $0x3f0] sm:$0xff] }
  0x5a   : > { %509 = vst [vmem:[%s2082_s6 + $0x1f0] sm:$0xff] %v508_v14  ;;  %511 = vst [vmem:[%s2082_s6 + $0x1f8] sm:$0xff] %v510_v15 }
  0x5b PF: > { %p1532_p0 = scmp.ge.s32.totalorder %s1922_s22, 1  ;;  %p524_p1 = scmp.lt.s32.totalorder %s1922_s22, 19 }
  0x5d   : > { %p525_p2 = pnand %p1532_p0, %p524_p1 }
  0x5e   : > { %s531_s0 = sand.u32 (!%p525_p2), 1, %s1898_s16   ;;  %s538_s5 = sand.u32 (!%p525_p2), 1, %s1890_s14  }
  0x5f   : > { %528 = sbr.rel (%p525_p2) target bundleno = 440 (0x1b8), region = 85  ;;  %s1533_s23 = sshll.u32 (!%p525_p2), %s531_s0, 7 }
  0x60   : > { %s1534_s28 = sshll.u32 (!%p525_p2), %s538_s5, 9  ;;  %s565_s7 = sand.u32 (!%p525_p2), 1, %s1882_s12  }
  0x61   : > { %s1536_s11 = sshll.u32 (!%p525_p2), %s1910_s19, 1  ;;  %s1535_s25 = sshll.u32 (!%p525_p2), %s565_s7, 7 }
  0x62   : > { %p573_p3 = scmp.lt.s32.totalorder (!%p525_p2), %s1536_s11, 3  ;;  %s2221_s4 = scalar_lea.vmem (!%p525_p2), [#allocation3], %s1533_s23 }
  0x63   : > { %s2223_s6 = scalar_lea.vmem (!%p525_p2), [#allocation4], %s1534_s28  ;;  %s2225_s1 = scalar_lea.vmem (!%p525_p2), [#allocation5], %s1535_s25 }
  0x64   : > { %s2416_s11 = smov (!%p573_p3, %s1536_s11), 3  ;;  %p1537_p4 = scmp.ne.s32.totalorder %s1906_s18, 0 }
  0x65   : > { %s575_s29 = scalar_lea.vmem %s2387_s2, %s2416_s11 }
  0x66   : > { %582 = sbr.rel (%p1537_p4) target bundleno = 116 (0x74), region = 97 }
  0x6b   : > { %v1924_v16 = vmov 0.0  }
  0x6c   : > { %583 = vst [vmem:[#allocation2 + $0x30] sm:$0xff] %v1924_v16  ;;  %584 = vst [vmem:[#allocation2] sm:$0xff] %v1924_v16 }
  0x6d   : > { %585 = vst [vmem:[#allocation2 + $0x58] sm:$0xff] %v1924_v16  ;;  %586 = vst [vmem:[#allocation2 + $0x18] sm:$0xff] %v1924_v16 }
  0x6e   : > { %587 = vst [vmem:[#allocation2 + $0x50] sm:$0xff] %v1924_v16  ;;  %588 = vst [vmem:[#allocation2 + $0x68] sm:$0xff] %v1924_v16 }
  0x6f   : > { %589 = vst [vmem:[#allocation2 + $0x8] sm:$0xff] %v1924_v16  ;;  %590 = vst [vmem:[#allocation2 + $0x48] sm:$0xff] %v1924_v16 }
  0x70   : > { %591 = vst [vmem:[#allocation2 + $0x40] sm:$0xff] %v1924_v16  ;;  %592 = vst [vmem:[#allocation2 + $0x20] sm:$0xff] %v1924_v16 }
  0x71   : > { %593 = vst [vmem:[#allocation2 + $0x10] sm:$0xff] %v1924_v16  ;;  %594 = vst [vmem:[#allocation2 + $0x38] sm:$0xff] %v1924_v16 }
  0x72   : > { %595 = vst [vmem:[#allocation2 + $0x60] sm:$0xff] %v1924_v16  ;;  %596 = vst [vmem:[#allocation2 + $0x70] sm:$0xff] %v1924_v16 }
  0x73   : > { %597 = vst [vmem:[#allocation2 + $0x78] sm:$0xff] %v1924_v16  ;;  %598 = vst [vmem:[#allocation2 + $0x28] sm:$0xff] %v1924_v16 }
  0x74 PF: > { %v1716_v17 = vld [vmem:[%s2223_s6 + $0x74] ss:$8 sps:$4 sm:$0xff]   ;;  %v1720_v19 = vld [vmem:[%s2223_s6 + $0x70] ss:$8 sps:$4 sm:$0xff]   ;;  %v1722_v21 = vld [vmem:[%s2223_s6 + $0x64] ss:$8 sps:$4 sm:$0xff]  }
  0x75   : > { %v1718_v18 = vld [vmem:[%s2223_s6 + $0x174] ss:$8 sps:$4 sm:$0xff]   ;;  %1095 = vmatprep.subr.bf16.mxu0 %v1716_v17  ;;  %v1721_v20 = vld [vmem:[%s2223_s6 + $0x170] ss:$8 sps:$4 sm:$0xff]   ;;  %v1724_v22 = vld [vmem:[%s2223_s6 + $0x164] ss:$8 sps:$4 sm:$0xff]  }
  0x76   : > { %1168 = vmatprep.subr.bf16.mxu1 %v1718_v18  ;;  %1096 = vmatpush1.bf16.msra.mxu0 %v1720_v19  ;;  %v1726_v23 = vld [vmem:[%s2223_s6 + $0x60] ss:$8 sps:$4 sm:$0xff]   ;;  %v1728_v25 = vld [vmem:[%s2223_s6 + $0x54] ss:$8 sps:$4 sm:$0xff]   ;;  %v1732_v27 = vld [vmem:[%s2223_s6 + $0x50] ss:$8 sps:$4 sm:$0xff]  }
  0x77   : > { %1169 = vmatpush1.bf16.msra.mxu1 %v1721_v20  ;;  %1097 = vmatprep.subr.bf16.mxu0 %v1722_v21  ;;  %v1727_v24 = vld [vmem:[%s2223_s6 + $0x160] ss:$8 sps:$4 sm:$0xff]   ;;  %v1730_v26 = vld [vmem:[%s2223_s6 + $0x154] ss:$8 sps:$4 sm:$0xff]   ;;  %v1733_v28 = vld [vmem:[%s2223_s6 + $0x150] ss:$8 sps:$4 sm:$0xff]  }
  0x78   : > { %1170 = vmatprep.subr.bf16.mxu1 %v1724_v22  ;;  %v1734_v29 = vld [vmem:[%s2223_s6 + $0x44] ss:$8 sps:$4 sm:$0xff]   ;;  %v1738_v31 = vld [vmem:[%s2223_s6 + $0x40] ss:$8 sps:$4 sm:$0xff]   ;;  %v1740_v33 = vld [vmem:[%s2223_s6 + $0x34] ss:$8 sps:$4 sm:$0xff]  }
  0x79   : > { %v1736_v30 = vld [vmem:[%s2223_s6 + $0x144] ss:$8 sps:$4 sm:$0xff]   ;;  %v1739_v32 = vld [vmem:[%s2223_s6 + $0x140] ss:$8 sps:$4 sm:$0xff]   ;;  %v1742_v34 = vld [vmem:[%s2223_s6 + $0x134] ss:$8 sps:$4 sm:$0xff]  }
  0x7a   : > { %1098 = vmatpush1.bf16.msra.mxu0 %v1726_v23  ;;  %v1744_v35 = vld [vmem:[%s2223_s6 + $0x30] ss:$8 sps:$4 sm:$0xff]   ;;  %v1746_v37 = vld [vmem:[%s2223_s6 + $0x24] ss:$8 sps:$4 sm:$0xff]   ;;  %v1750_v39 = vld [vmem:[%s2223_s6 + $0x20] ss:$8 sps:$4 sm:$0xff]  }
  0x7b   : > { %1171 = vmatpush1.bf16.msra.mxu1 %v1727_v24  ;;  %1099 = vmatprep.subr.bf16.mxu0 %v1728_v25  ;;  %v1745_v36 = vld [vmem:[%s2223_s6 + $0x130] ss:$8 sps:$4 sm:$0xff]   ;;  %v1748_v38 = vld [vmem:[%s2223_s6 + $0x124] ss:$8 sps:$4 sm:$0xff]   ;;  %v1751_v40 = vld [vmem:[%s2223_s6 + $0x120] ss:$8 sps:$4 sm:$0xff]  }
  0x7c   : > { %1172 = vmatprep.subr.bf16.mxu1 %v1730_v26  ;;  %v1752_v41 = vld [vmem:[%s2223_s6 + $0x14] ss:$8 sps:$4 sm:$0xff]   ;;  %v1756_v43 = vld [vmem:[%s2223_s6 + $0x10] ss:$8 sps:$4 sm:$0xff]   ;;  %v1758_v45 = vld [vmem:[%s2223_s6 + $0x4] ss:$8 sps:$4 sm:$0xff]  }
  0x7d   : > { %v1754_v42 = vld [vmem:[%s2223_s6 + $0x114] ss:$8 sps:$4 sm:$0xff]   ;;  %v1757_v44 = vld [vmem:[%s2223_s6 + $0x110] ss:$8 sps:$4 sm:$0xff]   ;;  %v1760_v46 = vld [vmem:[%s2223_s6 + $0x104] ss:$8 sps:$4 sm:$0xff]  }
  0x7e   : > { %1100 = vmatpush1.bf16.msra.mxu0 %v1732_v27  ;;  %v1762_v47 = vld [vmem:[%s2223_s6] ss:$8 sps:$4 sm:$0xff]   ;;  %v1764_v49 = vld [vmem:[%s2223_s6 + $0xf4] ss:$8 sps:$4 sm:$0xff]   ;;  %v1768_v51 = vld [vmem:[%s2223_s6 + $0xf0] ss:$8 sps:$4 sm:$0xff]  }
  0x7f   : > { %1173 = vmatpush1.bf16.msra.mxu1 %v1733_v28  ;;  %1101 = vmatprep.subr.bf16.mxu0 %v1734_v29  ;;  %v1763_v48 = vld [vmem:[%s2223_s6 + $0x100] ss:$8 sps:$4 sm:$0xff]   ;;  %v1766_v50 = vld [vmem:[%s2223_s6 + $0x1f4] ss:$8 sps:$4 sm:$0xff]   ;;  %v1769_v52 = vld [vmem:[%s2223_s6 + $0x1f0] ss:$8 sps:$4 sm:$0xff]  }
  0x80   : > { %1174 = vmatprep.subr.bf16.mxu1 %v1736_v30  ;;  %v1770_v53 = vld [vmem:[%s2223_s6 + $0xe4] ss:$8 sps:$4 sm:$0xff]   ;;  %v1774_v55 = vld [vmem:[%s2223_s6 + $0xe0] ss:$8 sps:$4 sm:$0xff]   ;;  %v1776_v57 = vld [vmem:[%s2223_s6 + $0xd4] ss:$8 sps:$4 sm:$0xff]  }
  0x81   : > { %v1772_v54 = vld [vmem:[%s2223_s6 + $0x1e4] ss:$8 sps:$4 sm:$0xff]   ;;  %v1775_v56 = vld [vmem:[%s2223_s6 + $0x1e0] ss:$8 sps:$4 sm:$0xff]   ;;  %v1778_v58 = vld [vmem:[%s2223_s6 + $0x1d4] ss:$8 sps:$4 sm:$0xff]  }
  0x82   : > { %1102 = vmatpush1.bf16.msra.mxu0 %v1738_v31  ;;  %v1780_v59 = vld [vmem:[%s2223_s6 + $0xd0] ss:$8 sps:$4 sm:$0xff]   ;;  %v1782_v61 = vld [vmem:[%s2223_s6 + $0xc4] ss:$8 sps:$4 sm:$0xff]   ;;  %v1786_v63 = vld [vmem:[%s2223_s6 + $0xc0] ss:$8 sps:$4 sm:$0xff]  }
  0x83   : > { %1175 = vmatpush1.bf16.msra.mxu1 %v1739_v32  ;;  %1103 = vmatprep.subr.bf16.mxu0 %v1740_v33  ;;  %v1781_v60 = vld [vmem:[%s2223_s6 + $0x1d0] ss:$8 sps:$4 sm:$0xff]   ;;  %v1784_v62 = vld [vmem:[%s2223_s6 + $0x1c4] ss:$8 sps:$4 sm:$0xff]   ;;  %v1787_v0 = vld [vmem:[%s2223_s6 + $0x1c0] ss:$8 sps:$4 sm:$0xff]  }
  0x84   : > { %1176 = vmatprep.subr.bf16.mxu1 %v1742_v34  ;;  %v1788_v1 = vld [vmem:[%s2223_s6 + $0xb4] ss:$8 sps:$4 sm:$0xff]   ;;  %v1792_v5 = vld [vmem:[%s2223_s6 + $0xb0] ss:$8 sps:$4 sm:$0xff]   ;;  %v1794_v7 = vld [vmem:[%s2223_s6 + $0xa4] ss:$8 sps:$4 sm:$0xff]  }
  0x85   : > { %v1814_v2 = vld [vmem:[%s2221_s4 + $0x4] ss:$16 sps:$4 sm:$0xff]   ;;  %v1817_v4 = vld [vmem:[%s2221_s4 + $0xc] ss:$16 sps:$4 sm:$0xff]   ;;  %v1793_v6 = vld [vmem:[%s2223_s6 + $0x1b0] ss:$8 sps:$4 sm:$0xff]  }
  0x86   : > { %1104 = vmatpush1.bf16.msra.mxu0 %v1744_v35  ;;  %v1790_v3 = vld [vmem:[%s2223_s6 + $0x1b4] ss:$8 sps:$4 sm:$0xff]   ;;  %1127 = vmatprep.mubr.bf16.mxu0 %v1814_v2  ;;  %v1796_v8 = vld [vmem:[%s2223_s6 + $0x1a4] ss:$8 sps:$4 sm:$0xff]   ;;  %v1798_v9 = vld [vmem:[%s2223_s6 + $0xa0] ss:$8 sps:$4 sm:$0xff]  }
  0x87   : > { %1177 = vmatpush1.bf16.msra.mxu1 %v1745_v36  ;;  %1105 = vmatprep.subr.bf16.mxu0 %v1746_v37  ;;  %v1799_v10 = vld [vmem:[%s2223_s6 + $0x1a0] ss:$8 sps:$4 sm:$0xff]   ;;  %v1800_v11 = vld [vmem:[%s2223_s6 + $0x94] ss:$8 sps:$4 sm:$0xff]   ;;  %v1804_v13 = vld [vmem:[%s2223_s6 + $0x90] ss:$8 sps:$4 sm:$0xff]  }
  0x88   : > { %1178 = vmatprep.subr.bf16.mxu1 %v1748_v38  ;;  %1200 = vmatprep.mubr.bf16.mxu1 %v1817_v4  ;;  %v1802_v12 = vld [vmem:[%s2223_s6 + $0x194] ss:$8 sps:$4 sm:$0xff]   ;;  %v1805_v14 = vld [vmem:[%s2223_s6 + $0x190] ss:$8 sps:$4 sm:$0xff]   ;;  %v1806_v15 = vld [vmem:[%s2223_s6 + $0x84] ss:$8 sps:$4 sm:$0xff]  }
  0x89   : > { %v1808_v16 = vld [vmem:[%s2223_s6 + $0x184] ss:$8 sps:$4 sm:$0xff]   ;;  %v1810_v17 = vld [vmem:[%s2223_s6 + $0x80] ss:$8 sps:$4 sm:$0xff]   ;;  %v599_v34 = vld [vmem:[#allocation2 + $0x30] sm:$0xff]  ;;  %p1618_p5 = scmp.ne.s32.totalorder %s1906_s18, 8 }
  0x8a   : > { %1106 = vmatpush1.bf16.msra.mxu0 %v1750_v39  ;;  %v1811_v18 = vld [vmem:[%s2223_s6 + $0x180] ss:$8 sps:$4 sm:$0xff]   ;;  %v1818_v21 = vld [vmem:[%s2221_s4 + $0x24] ss:$16 sps:$4 sm:$0xff]   ;;  %v1820_v22 = vld [vmem:[%s2221_s4 + $0x2c] ss:$16 sps:$4 sm:$0xff]  }
  0x8b   : > { %1179 = vmatpush1.bf16.msra.mxu1 %v1751_v40  ;;  %1107 = vmatprep.subr.bf16.mxu0 %v1752_v41  ;;  %v1812_v19 = vld [vmem:[%s2221_s4] ss:$16 sps:$4 sm:$0xff]   ;;  %v1815_v20 = vld [vmem:[%s2221_s4 + $0x8] ss:$16 sps:$4 sm:$0xff]   ;;  %v1824_v25 = vld [vmem:[%s2221_s4 + $0x44] ss:$16 sps:$4 sm:$0xff]  }
  0x8c   : > { %1180 = vmatprep.subr.bf16.mxu1 %v1754_v42  ;;  %v1822_v23 = vld [vmem:[%s2221_s4 + $0x20] ss:$16 sps:$4 sm:$0xff]   ;;  %v1823_v24 = vld [vmem:[%s2221_s4 + $0x28] ss:$16 sps:$4 sm:$0xff]   ;;  %v1826_v26 = vld [vmem:[%s2221_s4 + $0x4c] ss:$16 sps:$4 sm:$0xff]  }
  0x8d   : > { %v1828_v27 = vld [vmem:[%s2221_s4 + $0x40] ss:$16 sps:$4 sm:$0xff]   ;;  %v1829_v28 = vld [vmem:[%s2221_s4 + $0x48] ss:$16 sps:$4 sm:$0xff]   ;;  %v1830_v29 = vld [vmem:[%s2221_s4 + $0x64] ss:$16 sps:$4 sm:$0xff]  }
  0x8e   : > { %1108 = vmatpush1.bf16.msra.mxu0 %v1756_v43  ;;  %v1832_v30 = vld [vmem:[%s2221_s4 + $0x6c] ss:$16 sps:$4 sm:$0xff]   ;;  %v1834_v31 = vld [vmem:[%s2221_s4 + $0x60] ss:$16 sps:$4 sm:$0xff]   ;;  %v1835_v32 = vld [vmem:[%s2221_s4 + $0x68] ss:$16 sps:$4 sm:$0xff]  }
  0x8f   : > { %1181 = vmatpush1.bf16.msra.mxu1 %v1757_v44  ;;  %1109 = vmatprep.subr.bf16.mxu0 %v1758_v45  ;;  %v600_v38 = vld [vmem:[#allocation2] sm:$0xff]  ;;  %v601_v43 = vld [vmem:[#allocation2 + $0x58] sm:$0xff]  ;;  %v606_v4 = vld [vmem:[#allocation2 + $0x48] sm:$0xff] }
  0x90   : > { %1182 = vmatprep.subr.bf16.mxu1 %v1760_v46 }
  0x92   : > { %1110 = vmatpush1.bf16.msra.mxu0 %v1762_v47 }
  0x93   : > { %1183 = vmatpush1.bf16.msra.mxu1 %v1763_v48  ;;  %1111 = vmatprep.subr.bf16.mxu0 %v1764_v49  ;;  %v602_v48 = vld [vmem:[#allocation2 + $0x18] sm:$0xff] }
  0x94   : > { %1184 = vmatprep.subr.bf16.mxu1 %v1766_v50 }
  0x96   : > { %1112 = vmatpush2.bf16.msra.mxu0 %v1768_v51 }
  0x97   : > { %1185 = vmatpush2.bf16.msra.mxu1 %v1769_v52  ;;  %1113 = vmatprep.subr.bf16.mxu0 %v1770_v53  ;;  %v603_v53 = vld [vmem:[#allocation2 + $0x50] sm:$0xff] }
  0x98   : > { %1186 = vmatprep.subr.bf16.mxu1 %v1772_v54 }
  0x9a   : > { %1114 = vmatpush2.bf16.msra.mxu0 %v1774_v55 }
  0x9b   : > { %1187 = vmatpush2.bf16.msra.mxu1 %v1775_v56  ;;  %1115 = vmatprep.subr.bf16.mxu0 %v1776_v57 }
  0x9c   : > { %1188 = vmatprep.subr.bf16.mxu1 %v1778_v58  ;;  %v604_v58 = vld [vmem:[#allocation2 + $0x68] sm:$0xff] }
  0x9e   : > { %1116 = vmatpush2.bf16.msra.mxu0 %v1780_v59 }
  0x9f   : > { %1189 = vmatpush2.bf16.msra.mxu1 %v1781_v60  ;;  %1117 = vmatprep.subr.bf16.mxu0 %v1782_v61 }
  0xa0   : > { %1190 = vmatprep.subr.bf16.mxu1 %v1784_v62 }
  0xa2   : > { %1118 = vmatpush2.bf16.msra.mxu0 %v1786_v63  ;;  %v605_v63 = vld [vmem:[#allocation2 + $0x8] sm:$0xff] }
  0xa3   : > { %1191 = vmatpush2.bf16.msra.mxu1 %v1787_v0  ;;  %1119 = vmatprep.subr.bf16.mxu0 %v1788_v1 }
  0xa4   : > { %1192 = vmatprep.subr.bf16.mxu1 %v1790_v3 }
  0xa6   : > { %1120 = vmatpush2.bf16.msra.mxu0 %v1792_v5 }
  0xa7   : > { %1193 = vmatpush2.bf16.msra.mxu1 %v1793_v6  ;;  %1121 = vmatprep.subr.bf16.mxu0 %v1794_v7 }
  0xa8   : > { %1194 = vmatprep.subr.bf16.mxu1 %v1796_v8 }
  0xaa   : > { %1122 = vmatpush2.bf16.msra.mxu0 %v1798_v9  ;;  %v607_v9 = vld [vmem:[#allocation2 + $0x40] sm:$0xff] }
  0xab   : > { %1195 = vmatpush2.bf16.msra.mxu1 %v1799_v10  ;;  %1123 = vmatprep.subr.bf16.mxu0 %v1800_v11 }
  0xac   : > { %1196 = vmatprep.subr.bf16.mxu1 %v1802_v12 }
  0xae   : > { %1124 = vmatpush2.bf16.msra.mxu0 %v1804_v13 }
  0xaf   : > { %1197 = vmatpush2.bf16.msra.mxu1 %v1805_v14  ;;  %1125 = vmatprep.subr.bf16.mxu0 %v1806_v15  ;;  %v608_v14 = vld [vmem:[#allocation2 + $0x20] sm:$0xff] }
  0xb0   : > { %1198 = vmatprep.subr.bf16.mxu1 %v1808_v16 }
  0xb2   : > { %1126 = vmatpush2.bf16.msra.mxu0 %v1810_v17 }
  0xb3   : > { %1199 = vmatpush2.bf16.msra.mxu1 %v1811_v18 }
  0xb5   : > { %1128 = vmatmul.mubr.bf16.vlgmr.msra.gmra.mxu0 %v1812_v19  ;;  %v609_v19 = vld [vmem:[#allocation2 + $0x10] sm:$0xff] }
  0xb6   : > { %1201 = vmatmul.mubr.bf16.vlgmr.msra.gmra.mxu1 %v1815_v20  ;;  %1137 = vmatprep.mubr.bf16.mxu0 %v1818_v21 }
  0xb7   : > { %1210 = vmatprep.mubr.bf16.mxu1 %v1820_v22 }
  0xbd   : > { %1138 = vmatmul.mubr.bf16.gmra.mxu0 %v1822_v23 }
  0xbe   : > { %1211 = vmatmul.mubr.bf16.gmra.mxu1 %v1823_v24  ;;  %1147 = vmatprep.mubr.bf16.mxu0 %v1824_v25  ;;  %v610_v24 = vld [vmem:[#allocation2 + $0x38] sm:$0xff] }
  0xbf   : > { %1220 = vmatprep.mubr.bf16.mxu1 %v1826_v26 }
  0xc5   : > { %1148 = vmatmul.mubr.bf16.gmra.mxu0 %v1828_v27 }
  0xc6   : > { %1221 = vmatmul.mubr.bf16.gmra.mxu1 %v1829_v28  ;;  %1157 = vmatprep.mubr.bf16.mxu0 %v1830_v29  ;;  %v611_v29 = vld [vmem:[#allocation2 + $0x60] sm:$0xff] }
  0xc7   : > { %1230 = vmatprep.mubr.bf16.mxu1 %v1832_v30 }
  0xcd   : > { %1158 = vmatmul.mubr.bf16.gmra.mxu0 %v1834_v31 }
  0xce   : > { %1231 = vmatmul.mubr.bf16.gmra.mxu1 %v1835_v32 }
 0x175   : > { %v1129_v33 = vpop.f32.mrf.mxu0 }
 0x176   : > { %v1202_v35 = vpop.f32.mrf.mxu1 }
 0x177   : > { %v1203_v36 = vadd.f32 %v1202_v35, %v1129_v33  ;;  %v1131_v37 = vpop.f32.mrf.mxu0 }
 0x178   : > { %v1204_v39 = vpop.f32.mrf.mxu1 }
 0x179   : > { %v1241_v40 = vadd.f32 %v1203_v36, %v599_v34  ;;  %v1205_v41 = vadd.f32 %v1204_v39, %v1131_v37  ;;  %v1133_v42 = vpop.f32.mrf.mxu0  ;;  %v612_v34 = vld [vmem:[#allocation2 + $0x70] sm:$0xff]  ;;  %v613_v39 = vld [vmem:[#allocation2 + $0x78] sm:$0xff] }
 0x17a   : > { %v1206_v44 = vpop.f32.mrf.mxu1 }
 0x17b   : > { %1257 = vst [vmem:[#allocation2 + $0x30] sm:$0xff] %v1241_v40  ;;  %v1242_v45 = vadd.f32 %v1205_v41, %v600_v38  ;;  %v1207_v46 = vadd.f32 %v1206_v44, %v1133_v42  ;;  %v1135_v47 = vpop.f32.mrf.mxu0  ;;  %v614_v44 = vld [vmem:[#allocation2 + $0x28] sm:$0xff] }
 0x17c   : > { %v1208_v49 = vpop.f32.mrf.mxu1 }
 0x17d   : > { %1258 = vst [vmem:[#allocation2] sm:$0xff] %v1242_v45  ;;  %v1243_v50 = vadd.f32 %v1207_v46, %v601_v43  ;;  %v1209_v51 = vadd.f32 %v1208_v49, %v1135_v47  ;;  %v1139_v52 = vpop.f32.mrf.mxu0 }
 0x17e   : > { %v1212_v54 = vpop.f32.mrf.mxu1 }
 0x17f   : > { %1259 = vst [vmem:[#allocation2 + $0x58] sm:$0xff] %v1243_v50  ;;  %v1244_v55 = vadd.f32 %v1209_v51, %v602_v48  ;;  %v1213_v56 = vadd.f32 %v1212_v54, %v1139_v52  ;;  %v1141_v57 = vpop.f32.mrf.mxu0 }
 0x180   : > { %v1214_v59 = vpop.f32.mrf.mxu1 }
 0x181   : > { %1260 = vst [vmem:[#allocation2 + $0x18] sm:$0xff] %v1244_v55  ;;  %v1245_v60 = vadd.f32 %v1213_v56, %v603_v53  ;;  %v1215_v61 = vadd.f32 %v1214_v59, %v1141_v57  ;;  %v1143_v62 = vpop.f32.mrf.mxu0 }
 0x182   : > { %v1216_v0 = vpop.f32.mrf.mxu1 }
 0x183   : > { %1261 = vst [vmem:[#allocation2 + $0x50] sm:$0xff] %v1245_v60  ;;  %v1246_v1 = vadd.f32 %v1215_v61, %v604_v58  ;;  %v1217_v2 = vadd.f32 %v1216_v0, %v1143_v62  ;;  %v1145_v3 = vpop.f32.mrf.mxu0 }
 0x184   : > { %v1218_v5 = vpop.f32.mrf.mxu1 }
 0x185   : > { %1262 = vst [vmem:[#allocation2 + $0x68] sm:$0xff] %v1246_v1  ;;  %v1247_v6 = vadd.f32 %v1217_v2, %v605_v63  ;;  %v1219_v7 = vadd.f32 %v1218_v5, %v1145_v3  ;;  %v1149_v8 = vpop.f32.mrf.mxu0 }
 0x186   : > { %v1222_v10 = vpop.f32.mrf.mxu1 }
 0x187   : > { %1263 = vst [vmem:[#allocation2 + $0x8] sm:$0xff] %v1247_v6  ;;  %v1248_v11 = vadd.f32 %v1219_v7, %v606_v4  ;;  %v1223_v12 = vadd.f32 %v1222_v10, %v1149_v8  ;;  %v1151_v13 = vpop.f32.mrf.mxu0 }
 0x188   : > { %v1224_v15 = vpop.f32.mrf.mxu1 }
 0x189   : > { %1264 = vst [vmem:[#allocation2 + $0x48] sm:$0xff] %v1248_v11  ;;  %v1249_v16 = vadd.f32 %v1223_v12, %v607_v9  ;;  %v1225_v17 = vadd.f32 %v1224_v15, %v1151_v13  ;;  %v1153_v18 = vpop.f32.mrf.mxu0 }
 0x18a   : > { %v1226_v20 = vpop.f32.mrf.mxu1 }
 0x18b   : > { %1265 = vst [vmem:[#allocation2 + $0x40] sm:$0xff] %v1249_v16  ;;  %v1250_v21 = vadd.f32 %v1225_v17, %v608_v14  ;;  %v1227_v22 = vadd.f32 %v1226_v20, %v1153_v18  ;;  %v1155_v23 = vpop.f32.mrf.mxu0 }
 0x18c   : > { %v1228_v25 = vpop.f32.mrf.mxu1 }
 0x18d   : > { %1266 = vst [vmem:[#allocation2 + $0x20] sm:$0xff] %v1250_v21  ;;  %v1251_v26 = vadd.f32 %v1227_v22, %v609_v19  ;;  %v1229_v27 = vadd.f32 %v1228_v25, %v1155_v23  ;;  %v1159_v28 = vpop.f32.mrf.mxu0 }
 0x18e   : > { %v1232_v30 = vpop.f32.mrf.mxu1 }
 0x18f   : > { %1267 = vst [vmem:[#allocation2 + $0x10] sm:$0xff] %v1251_v26  ;;  %v1252_v31 = vadd.f32 %v1229_v27, %v610_v24  ;;  %v1233_v32 = vadd.f32 %v1232_v30, %v1159_v28  ;;  %v1161_v33 = vpop.f32.mrf.mxu0 }
 0x190   : > { %v1234_v35 = vpop.f32.mrf.mxu1 }
 0x191   : > { %1268 = vst [vmem:[#allocation2 + $0x38] sm:$0xff] %v1252_v31  ;;  %v1253_v36 = vadd.f32 %v1233_v32, %v611_v29  ;;  %v1235_v37 = vadd.f32 %v1234_v35, %v1161_v33  ;;  %v1163_v38 = vpop.f32.mrf.mxu0 }
 0x192   : > { %v1236_v40 = vpop.f32.mrf.mxu1 }
 0x193   : > { %1269 = vst [vmem:[#allocation2 + $0x60] sm:$0xff] %v1253_v36  ;;  %v1254_v41 = vadd.f32 %v1235_v37, %v612_v34  ;;  %v1237_v42 = vadd.f32 %v1236_v40, %v1163_v38  ;;  %v1165_v43 = vpop.f32.mrf.mxu0 }
 0x194   : > { %v1238_v45 = vpop.f32.mrf.mxu1 }
 0x195   : > { %1270 = vst [vmem:[#allocation2 + $0x70] sm:$0xff] %v1254_v41  ;;  %v1255_v46 = vadd.f32 %v1237_v42, %v613_v39  ;;  %v1239_v47 = vadd.f32 %v1238_v45, %v1165_v43  ;;  %1276 = sbr.rel (%p1618_p5) target bundleno = 430 (0x1ae), region = 101 }
 0x197   : > { %1271 = vst [vmem:[#allocation2 + $0x78] sm:$0xff] %v1255_v46  ;;  %v1256_v48 = vadd.f32 %v1239_v47, %v614_v44 }
 0x199   : > { %1272 = vst [vmem:[#allocation2 + $0x28] sm:$0xff] %v1256_v48 }
 0x19a   : > { %v1295_v49 = vlaneseq  ;;  %v1293_v51 = vld [vmem:[%s575_s29] sm:$0x3]  ;;  %v1277_v52 = vld [vmem:[#allocation2 + $0x30] sm:$0xff]  ;;  %v1279_v56 = vld [vmem:[#allocation2 + $0x58] sm:$0xff] }
 0x19b   : > { %v1278_v54 = vld [vmem:[#allocation2] sm:$0xff]  ;;  %v1280_v57 = vld [vmem:[#allocation2 + $0x18] sm:$0xff]  ;;  %v1281_v58 = vld [vmem:[#allocation2 + $0x50] sm:$0xff] }
 0x19c   : > { %v1296_v50 = vshrl.u32 %v1295_v49, 7  ;;  %v1282_v61 = vld [vmem:[#allocation2 + $0x68] sm:$0xff]  ;;  %v1285_v4 = vld [vmem:[#allocation2 + $0x40] sm:$0xff]  ;;  %v1287_v6 = vld [vmem:[#allocation2 + $0x10] sm:$0xff] }
 0x19d   : > { %v1283_v62 = vld [vmem:[#allocation2 + $0x8] sm:$0xff]  ;;  %v1286_v5 = vld [vmem:[#allocation2 + $0x20] sm:$0xff]  ;;  %v1288_v11 = vld [vmem:[#allocation2 + $0x38] sm:$0xff] }
 0x19e   : > { %v1297_v53 = vsub.s32 0, %v1296_v50  ;;  %v1301_v55 = vsub.s32 1, %v1296_v50  ;;  %v1284_v63 = vld [vmem:[#allocation2 + $0x48] sm:$0xff]  ;;  %v1289_v12 = vld [vmem:[#allocation2 + $0x60] sm:$0xff]  ;;  %v1290_v13 = vld [vmem:[#allocation2 + $0x70] sm:$0xff] }
 0x19f   : > { %v1291_v18 = vld [vmem:[#allocation2 + $0x78] sm:$0xff] }
 0x1a0   : > { %v1298_v59 = vrot.slane %v1293_v51, %v1297_v53  ;;  %v1302_v60 = vrot.slane %v1293_v51, %v1301_v55  ;;  %v1292_v19 = vld [vmem:[#allocation2 + $0x28] sm:$0xff] }
 0x1a2   : > { %v1305_v0 = vadd.f32 %v1298_v59, %v1277_v52  ;;  %v1306_v1 = vadd.f32 %v1302_v60, %v1278_v54  ;;  %v1307_v2 = vadd.f32 %v1298_v59, %v1279_v56  ;;  %v1308_v3 = vadd.f32 %v1302_v60, %v1280_v57 }
 0x1a3   : > { %v1309_v7 = vadd.f32 %v1298_v59, %v1281_v58  ;;  %v1310_v8 = vadd.f32 %v1302_v60, %v1282_v61  ;;  %v1311_v9 = vadd.f32 %v1298_v59, %v1283_v62  ;;  %v1312_v10 = vadd.f32 %v1302_v60, %v1284_v63 }
 0x1a4   : > { %v1321_v14 = vmax.f32 %v1305_v0, 0.0  ;;  %v1322_v15 = vmax.f32 %v1306_v1, 0.0  ;;  %v1323_v16 = vmax.f32 %v1307_v2, 0.0  ;;  %v1324_v17 = vmax.f32 %v1308_v3, 0.0 }
 0x1a5   : > { %v1325_v20 = vmax.f32 %v1309_v7, 0.0  ;;  %v1326_v21 = vmax.f32 %v1310_v8, 0.0  ;;  %v1327_v22 = vmax.f32 %v1311_v9, 0.0  ;;  %v1328_v23 = vmax.f32 %v1312_v10, 0.0 }
 0x1a6   : > { %1337 = vst [vmem:[%s2225_s1] sm:$0xff] %v1321_v14  ;;  %1338 = vst [vmem:[%s2225_s1 + $0x8] sm:$0xff] %v1322_v15  ;;  %v1313_v24 = vadd.f32 %v1298_v59, %v1285_v4  ;;  %v1314_v25 = vadd.f32 %v1302_v60, %v1286_v5  ;;  %v1315_v26 = vadd.f32 %v1298_v59, %v1287_v6 }
 0x1a7   : > { %1339 = vst [vmem:[%s2225_s1 + $0x10] sm:$0xff] %v1323_v16  ;;  %1340 = vst [vmem:[%s2225_s1 + $0x18] sm:$0xff] %v1324_v17  ;;  %v1316_v27 = vadd.f32 %v1302_v60, %v1288_v11  ;;  %v1317_v28 = vadd.f32 %v1298_v59, %v1289_v12  ;;  %v1318_v29 = vadd.f32 %v1302_v60, %v1290_v13 }
 0x1a8   : > { %1341 = vst [vmem:[%s2225_s1 + $0x20] sm:$0xff] %v1325_v20  ;;  %1342 = vst [vmem:[%s2225_s1 + $0x28] sm:$0xff] %v1326_v21  ;;  %v1319_v30 = vadd.f32 %v1298_v59, %v1291_v18  ;;  %v1320_v31 = vadd.f32 %v1302_v60, %v1292_v19  ;;  %v1329_v32 = vmax.f32 %v1313_v24, 0.0  ;;  %v1330_v33 = vmax.f32 %v1314_v25, 0.0 }
 0x1a9   : > { %1343 = vst [vmem:[%s2225_s1 + $0x30] sm:$0xff] %v1327_v22  ;;  %1344 = vst [vmem:[%s2225_s1 + $0x38] sm:$0xff] %v1328_v23  ;;  %v1331_v34 = vmax.f32 %v1315_v26, 0.0  ;;  %v1332_v35 = vmax.f32 %v1316_v27, 0.0  ;;  %v1333_v36 = vmax.f32 %v1317_v28, 0.0  ;;  %v1334_v37 = vmax.f32 %v1318_v29, 0.0 }
 0x1aa   : > { %v1335_v38 = vmax.f32 %v1319_v30, 0.0  ;;  %v1336_v39 = vmax.f32 %v1320_v31, 0.0  ;;  %1345 = vst [vmem:[%s2225_s1 + $0x40] sm:$0xff] %v1329_v32  ;;  %1346 = vst [vmem:[%s2225_s1 + $0x48] sm:$0xff] %v1330_v33 }
 0x1ab   : > { %1347 = vst [vmem:[%s2225_s1 + $0x50] sm:$0xff] %v1331_v34  ;;  %1348 = vst [vmem:[%s2225_s1 + $0x58] sm:$0xff] %v1332_v35 }
 0x1ac   : > { %1349 = vst [vmem:[%s2225_s1 + $0x60] sm:$0xff] %v1333_v36  ;;  %1350 = vst [vmem:[%s2225_s1 + $0x68] sm:$0xff] %v1334_v37 }
 0x1ad   : > { %1351 = vst [vmem:[%s2225_s1 + $0x70] sm:$0xff] %v1335_v38  ;;  %1352 = vst [vmem:[%s2225_s1 + $0x78] sm:$0xff] %v1336_v39 }
 0x1ae PF: > { %1359 = sbr.rel (!%p2039_p12) target bundleno = 440 (0x1b8), region = 105  ;;  %s1626_s16 = sshll.u32 (%p2039_p12), %s1910_s19, 4  ;;  %v1378_v40 = vld [vmem:[%s2225_s1] sm:$0xff] (%p2039_p12)  ;;  %v1380_v41 = vld [vmem:[%s2225_s1 + $0x8] sm:$0xff] (%p2039_p12)  ;;  %v1382_v42 = vld [vmem:[%s2225_s1 + $0x10] sm:$0xff] (%p2039_p12) }
 0x1af   : > { %s1365_s5 = scalar_lea.vmem (%p2039_p12), %s2388_s3, %s1626_s16  ;;  %v1384_v43 = vld [vmem:[%s2225_s1 + $0x18] sm:$0xff] (%p2039_p12)  ;;  %v1386_v44 = vld [vmem:[%s2225_s1 + $0x20] sm:$0xff] (%p2039_p12)  ;;  %v1388_v45 = vld [vmem:[%s2225_s1 + $0x28] sm:$0xff] (%p2039_p12) }
 0x1b0   : > { %1379 = vst [vmem:[%s1365_s5] sm:$0xff] (%p2039_p12), %v1378_v40  ;;  %1381 = vst [vmem:[%s1365_s5 + $0x8] sm:$0xff] (%p2039_p12), %v1380_v41  ;;  %v1390_v46 = vld [vmem:[%s2225_s1 + $0x30] sm:$0xff] (%p2039_p12)  ;;  %v1392_v47 = vld [vmem:[%s2225_s1 + $0x38] sm:$0xff] (%p2039_p12) }
 0x1b1   : > { %1383 = vst [vmem:[%s1365_s5 + $0x20] sm:$0xff] (%p2039_p12), %v1382_v42  ;;  %1385 = vst [vmem:[%s1365_s5 + $0x28] sm:$0xff] (%p2039_p12), %v1384_v43  ;;  %v1394_v48 = vld [vmem:[%s2225_s1 + $0x40] sm:$0xff] (%p2039_p12)  ;;  %v1396_v49 = vld [vmem:[%s2225_s1 + $0x48] sm:$0xff] (%p2039_p12) }
 0x1b2   : > { %1387 = vst [vmem:[%s1365_s5 + $0x40] sm:$0xff] (%p2039_p12), %v1386_v44  ;;  %1389 = vst [vmem:[%s1365_s5 + $0x48] sm:$0xff] (%p2039_p12), %v1388_v45  ;;  %v1398_v50 = vld [vmem:[%s2225_s1 + $0x50] sm:$0xff] (%p2039_p12)  ;;  %v1400_v51 = vld [vmem:[%s2225_s1 + $0x58] sm:$0xff] (%p2039_p12) }
 0x1b3   : > { %1391 = vst [vmem:[%s1365_s5 + $0x60] sm:$0xff] %v1390_v46  ;;  %1393 = vst [vmem:[%s1365_s5 + $0x68] sm:$0xff] %v1392_v47  ;;  %v1402_v52 = vld [vmem:[%s2225_s1 + $0x60] sm:$0xff]  ;;  %v1404_v53 = vld [vmem:[%s2225_s1 + $0x68] sm:$0xff] }
 0x1b4   : > { %1395 = vst [vmem:[%s1365_s5 + $0x80] sm:$0xff] %v1394_v48  ;;  %1397 = vst [vmem:[%s1365_s5 + $0x88] sm:$0xff] %v1396_v49  ;;  %v1406_v54 = vld [vmem:[%s2225_s1 + $0x70] sm:$0xff]  ;;  %v1408_v55 = vld [vmem:[%s2225_s1 + $0x78] sm:$0xff] }
 0x1b5   : > { %1399 = vst [vmem:[%s1365_s5 + $0xa0] sm:$0xff] %v1398_v50  ;;  %1401 = vst [vmem:[%s1365_s5 + $0xa8] sm:$0xff] %v1400_v51 }
 0x1b6   : > { %1403 = vst [vmem:[%s1365_s5 + $0xc0] sm:$0xff] %v1402_v52  ;;  %1405 = vst [vmem:[%s1365_s5 + $0xc8] sm:$0xff] %v1404_v53 }
 0x1b7   : > { %1407 = vst [vmem:[%s1365_s5 + $0xe0] sm:$0xff] %v1406_v54  ;;  %1409 = vst [vmem:[%s1365_s5 + $0xe8] sm:$0xff] %v1408_v55 }
 0x1b8 PF: > { %s13_s22 = sadd.s32 1, %s1922_s22   ;;  %s2398_s10 = sld [smem:[#allocation6_spill]] }
 0x1b9   : > { %p10_p6 = scmp.ge.s32.totalorder %s13_s22, 20   ;;  %s2399_s12 = smov %s1886_s13 }
 0x1ba   : > { %s2400_s13 = smov %s2037_s9  ;;  %s2401_s14 = smov %s1894_s15 }
 0x1bb   : > { %s2402_s15 = smov %s2034_s8  ;;  %s2403_s16 = smov %s1902_s17 }
 0x1bc   : > { %s2404_s17 = smov %s2020_s30  ;;  %s2405_s18 = smov %s1914_s20 }
 0x1bd   : > { %s2406_s19 = smov %s1918_s21  ;;  %s2407_s20 = smov %s2410_s24 }
 0x1be   : > { %s2408_s21 = smov %s2398_s10  ;;  %12 = sbr.rel (!%p10_p6) target bundleno = 9 (0x9), region = 170 }

// kernel: crnn_forward.26
= control target key start
LH: loop header
LB: loop body
LE: loop exit
PB: predicated region body
PF: predicated region fallthrough
CT: control target
= control target key end

     0   :  { %s2111_s0 = inlined_call_operand.vmem [shape: bf16[16,2048], index: 0, kind: input, shape index: {}]   ;;  %s2112_s1 = inlined_call_operand.vmem [shape: bf16[2048,512], index: 1, kind: input, shape index: {}]   ;;  %s2113_s2 = inlined_call_operand.vmem [shape: f32[1,512], index: 2, kind: input, shape index: {}]   ;;  %s2114_s3 = inlined_call_operand.vmem [shape: f32[1,512], index: 3, kind: input, shape index: {}]   ;;  %s2115_s4 = inlined_call_operand.vmem [shape: f32[16,512], index: 4, kind: output, shape index: {}]  }
   0x1   :  { %2118 = sst [smem:[#allocation8_spill]] %s2111_s0 }
   0x2   :  { %2119 = sst [smem:[#allocation9_spill]] %s2112_s1 }
   0x3   :  { %s1716_s15 = smov 0   ;;  %s1718_s16 = smov 0  }
   0x4   :  { %s1720_s17 = smov 0   ;;  %s1722_s18 = smov 0  }
   0x5   :  { %s1724_s19 = smov 0   ;;  %s1726_s20 = smov 0  }
   0x6   :  { %s1728_s21 = smov 0   ;;  %s1730_s22 = smov 0  }
   0x7   :  { %s1732_s23 = smov 0   ;;  %s1734_s24 = smov 0  }
   0x8   :  { %s1736_s25 = smov 0  }
   0x9 LB: > { %s1315_s26 = sadd.s32 4294967295, %s1688_s25   ;;  %s26_s27 = sadd.s32 1, %s1680_s23  ;;  %s1688_s25 = sphi %s1736_s25, %s14_s25   ;;  %s1684_s24 = sphi %s1734_s24, %s2138_s24   ;;  %s1680_s23 = sphi %s1732_s23, %s2137_s23   ;;  %s1676_s22 = sphi %s1730_s22, %s2136_s22   ;;  %s1672_s21 = sphi %s1728_s21, %s2135_s21   ;;  %s1668_s20 = sphi %s1726_s20, %s2134_s20   ;;  %s1664_s19 = sphi %s1724_s19, %s2133_s19   ;;  %s1660_s18 = sphi %s1722_s18, %s2132_s18   ;;  %s1656_s17 = sphi %s1720_s17, %s2131_s17   ;;  %s1652_s16 = sphi %s1718_s16, %s2130_s16   ;;  %s1648_s15 = sphi %s1716_s15, %s2129_s15  }
   0xa   : > { %p27_p0 = scmp.ge.s32.totalorder %s26_s27, 4  ;;  %s29_s28 = sadd.s32 1, %s1684_s24 }
   0xb   : > { %s42_s29 = sadd.s32 1, %s1668_s20  ;;  %p49_p1 = scmp.ne.s32.totalorder %s1668_s20, %s1664_s19 }
   0xc   : > { %s2140_s27 = smov (%p27_p0, %s26_s27), 0  ;;  %s2142_s28 = smov (!%p27_p0, %s29_s28), %s1684_s24 }
   0xd   : > { %2120 = sst [smem:[#allocation6_spill]] %s2140_s27  ;;  %s38_s30 = ssub.s32 %s1680_s23, %s2140_s27 }
   0xe   : > { %p50_p2 = scmp.eq.s32.totalorder %s1688_s25, 0  ;;  %p31_p3 = scmp.ge.s32.totalorder %s2142_s28, 2 }
   0xf   : > { %p40_p4 = scmp.eq.s32.totalorder %s38_s30, 0  ;;  %s70_s6 = sadd.s32 1, %s1660_s18 }
  0x10   : > { %p1783_p5 = por %p50_p2, %p49_p1  ;;  %s2144_s28 = smov (%p31_p3, %s2142_s28), 0 }
  0x11   : > { %2122 = sst [smem:[#allocation7_spill]] %s2144_s28  ;;  %s66_s8 = ssub.s32 %s1684_s24, %s2144_s28 }
  0x12   : > { %s1791_s7 = scalar_select %p40_p4, %s1668_s20, %s42_s29  }
  0x13   : > { %p77_p6 = scmp.ne.s32.totalorder %s1660_s18, %s1656_s17  ;;  %s67_s9 = sor.u32 %s66_s8, %s38_s30 }
  0x14   : > { %p148_p7 = scmp.eq.s32.totalorder %s66_s8, 0  ;;  %p68_p8 = scmp.eq.s32.totalorder %s67_s9, 0 }
  0x15   : > { %p1797_p9 = por %p77_p6, %p50_p2  ;;  %s150_s11 = sadd.s32 1, %s1652_s16 }
  0x16   : > { %p160_p10 = scmp.ne.s32.totalorder %s1652_s16, %s1648_s15  ;;  %p161_p11 = scmp.eq.s32.totalorder %s1315_s26, 7 }
  0x17   : > { %s1805_s12 = scalar_select %p68_p8, %s1660_s18, %s70_s6  }
  0x18   : > { %s1808_s13 = scalar_select %p148_p7, %s1652_s16, %s150_s11  }
  0x19   : > { %p1810_p12 = por %p161_p11, %p160_p10  ;;  %p1318_p13 = scmp.ge.s32.totalorder %s1688_s25, 8 }
  0x1b   : > { %183 = sbr.rel (%p1318_p13) target bundleno = 86 (0x56), region = 16 }
  0x20   : > { %186 = sbr.rel (!%p1783_p5) target bundleno = 44 (0x2c), region = 20  ;;  %s188_s29 = sand.u32 (%p1783_p5), 1, %s1668_s20  }
  0x21   : > { %s1408_s30 = sshll.u32 (%p1783_p5), %s1680_s23, 4  ;;  %s1319_s8 = sshll.u32 (%p1783_p5), %s188_s29, 5 }
  0x22   : > { %s2125_s0 = sld [smem:[#allocation8_spill]] (%p1783_p5)  ;;  %s190_s26 = scalar_lea.vmem (%p1783_p5), [#allocation3], %s1319_s8 }
  0x28   : > { %s196_s11 = scalar_lea.vmem %s2125_s0, %s1408_s30 }
  0x29   : > { %v209_v0 = vld [vmem:[%s196_s11] sm:$0xff]  ;;  %v211_v1 = vld [vmem:[%s196_s11 + $0x8] sm:$0xff] }
  0x2a   : > { %v213_v2 = vld [vmem:[%s196_s11 + $0x40] sm:$0xff]  ;;  %210 = vst [vmem:[%s190_s26] sm:$0xff] %v209_v0  ;;  %212 = vst [vmem:[%s190_s26 + $0x8] sm:$0xff] %v211_v1  ;;  %v215_v3 = vld [vmem:[%s196_s11 + $0x48] sm:$0xff] }
  0x2b   : > { %214 = vst [vmem:[%s190_s26 + $0x10] sm:$0xff] %v213_v2  ;;  %216 = vst [vmem:[%s190_s26 + $0x18] sm:$0xff] %v215_v3 }
  0x2c PF: > { %222 = sbr.rel (!%p1797_p9) target bundleno = 86 (0x56), region = 43  ;;  %s224_s5 = sand.u32 (%p1797_p9), 1, %s1660_s18  }
  0x2d   : > { %s1324_s29 = sshll.u32 (%p1797_p9), %s1684_s24, 1  ;;  %s1322_s6 = sshll.u32 (%p1797_p9), %s224_s5, 9 }
  0x2e   : > { %s1409_s30 = sshll.u32 (%p1797_p9), %s1680_s23, 8  ;;  %s2126_s1 = sld [smem:[#allocation9_spill]] (%p1797_p9) }
  0x2f   : > { %s230_s9 = sadd.s32 (%p1797_p9), %s1409_s30, %s1324_s29  ;;  %s1835_s10 = scalar_lea.vmem (%p1797_p9), [#allocation4], %s1322_s6 }
  0x30   : > { %s1326_s0 = sshll.u32 (%p1797_p9), %s230_s9, 2 }
  0x34   : > { %s1830_s27 = scalar_lea.vmem %s2126_s1, %s1326_s0 }
  0x35   : > { %v387_v4 = vld [vmem:[%s1830_s27] sm:$0xff]  ;;  %v389_v5 = vld [vmem:[%s1830_s27 + $0x10] sm:$0xff] }
  0x36   : > { %v391_v6 = vld [vmem:[%s1830_s27 + $0x20] sm:$0xff]  ;;  %388 = vst [vmem:[%s1835_s10] sm:$0xff] %v387_v4  ;;  %390 = vst [vmem:[%s1835_s10 + $0x8] sm:$0xff] %v389_v5  ;;  %v393_v7 = vld [vmem:[%s1830_s27 + $0x30] sm:$0xff] }
  0x37   : > { %392 = vst [vmem:[%s1835_s10 + $0x10] sm:$0xff] %v391_v6  ;;  %v395_v8 = vld [vmem:[%s1830_s27 + $0x40] sm:$0xff]  ;;  %v397_v9 = vld [vmem:[%s1830_s27 + $0x50] sm:$0xff]  ;;  %394 = vst [vmem:[%s1835_s10 + $0x18] sm:$0xff] %v393_v7 }
  0x38   : > { %396 = vst [vmem:[%s1835_s10 + $0x20] sm:$0xff] %v395_v8  ;;  %398 = vst [vmem:[%s1835_s10 + $0x28] sm:$0xff] %v397_v9  ;;  %v399_v10 = vld [vmem:[%s1830_s27 + $0x60] sm:$0xff]  ;;  %v401_v11 = vld [vmem:[%s1830_s27 + $0x70] sm:$0xff] }
  0x39   : > { %v403_v12 = vld [vmem:[%s1830_s27 + $0x80] sm:$0xff]  ;;  %400 = vst [vmem:[%s1835_s10 + $0x30] sm:$0xff] %v399_v10  ;;  %402 = vst [vmem:[%s1835_s10 + $0x38] sm:$0xff] %v401_v11  ;;  %v405_v13 = vld [vmem:[%s1830_s27 + $0x90] sm:$0xff] }
  0x3a   : > { %404 = vst [vmem:[%s1835_s10 + $0x40] sm:$0xff] %v403_v12  ;;  %v407_v14 = vld [vmem:[%s1830_s27 + $0xa0] sm:$0xff]  ;;  %v409_v15 = vld [vmem:[%s1830_s27 + $0xb0] sm:$0xff]  ;;  %406 = vst [vmem:[%s1835_s10 + $0x48] sm:$0xff] %v405_v13 }
  0x3b   : > { %408 = vst [vmem:[%s1835_s10 + $0x50] sm:$0xff] %v407_v14  ;;  %410 = vst [vmem:[%s1835_s10 + $0x58] sm:$0xff] %v409_v15  ;;  %v411_v16 = vld [vmem:[%s1830_s27 + $0xc0] sm:$0xff]  ;;  %v413_v17 = vld [vmem:[%s1830_s27 + $0xd0] sm:$0xff] }
  0x3c   : > { %v415_v18 = vld [vmem:[%s1830_s27 + $0xe0] sm:$0xff]  ;;  %412 = vst [vmem:[%s1835_s10 + $0x60] sm:$0xff] %v411_v16  ;;  %414 = vst [vmem:[%s1835_s10 + $0x68] sm:$0xff] %v413_v17  ;;  %v417_v19 = vld [vmem:[%s1830_s27 + $0xf0] sm:$0xff] }
  0x3d   : > { %416 = vst [vmem:[%s1835_s10 + $0x70] sm:$0xff] %v415_v18  ;;  %v419_v20 = vld [vmem:[%s1830_s27 + $0x100] sm:$0xff]  ;;  %v421_v21 = vld [vmem:[%s1830_s27 + $0x110] sm:$0xff]  ;;  %418 = vst [vmem:[%s1835_s10 + $0x78] sm:$0xff] %v417_v19 }
  0x3e   : > { %420 = vst [vmem:[%s1835_s10 + $0x80] sm:$0xff] %v419_v20  ;;  %422 = vst [vmem:[%s1835_s10 + $0x88] sm:$0xff] %v421_v21  ;;  %v423_v22 = vld [vmem:[%s1830_s27 + $0x120] sm:$0xff]  ;;  %v425_v23 = vld [vmem:[%s1830_s27 + $0x130] sm:$0xff] }
  0x3f   : > { %v427_v24 = vld [vmem:[%s1830_s27 + $0x140] sm:$0xff]  ;;  %424 = vst [vmem:[%s1835_s10 + $0x90] sm:$0xff] %v423_v22  ;;  %426 = vst [vmem:[%s1835_s10 + $0x98] sm:$0xff] %v425_v23  ;;  %v429_v25 = vld [vmem:[%s1830_s27 + $0x150] sm:$0xff] }
  0x40   : > { %428 = vst [vmem:[%s1835_s10 + $0xa0] sm:$0xff] %v427_v24  ;;  %v431_v26 = vld [vmem:[%s1830_s27 + $0x160] sm:$0xff]  ;;  %v433_v27 = vld [vmem:[%s1830_s27 + $0x170] sm:$0xff]  ;;  %430 = vst [vmem:[%s1835_s10 + $0xa8] sm:$0xff] %v429_v25 }
  0x41   : > { %432 = vst [vmem:[%s1835_s10 + $0xb0] sm:$0xff] %v431_v26  ;;  %434 = vst [vmem:[%s1835_s10 + $0xb8] sm:$0xff] %v433_v27  ;;  %v435_v28 = vld [vmem:[%s1830_s27 + $0x180] sm:$0xff]  ;;  %v437_v29 = vld [vmem:[%s1830_s27 + $0x190] sm:$0xff] }
  0x42   : > { %v439_v30 = vld [vmem:[%s1830_s27 + $0x1a0] sm:$0xff]  ;;  %436 = vst [vmem:[%s1835_s10 + $0xc0] sm:$0xff] %v435_v28  ;;  %438 = vst [vmem:[%s1835_s10 + $0xc8] sm:$0xff] %v437_v29  ;;  %v441_v31 = vld [vmem:[%s1830_s27 + $0x1b0] sm:$0xff] }
  0x43   : > { %440 = vst [vmem:[%s1835_s10 + $0xd0] sm:$0xff] %v439_v30  ;;  %v443_v32 = vld [vmem:[%s1830_s27 + $0x1c0] sm:$0xff]  ;;  %v445_v33 = vld [vmem:[%s1830_s27 + $0x1d0] sm:$0xff]  ;;  %442 = vst [vmem:[%s1835_s10 + $0xd8] sm:$0xff] %v441_v31 }
  0x44   : > { %444 = vst [vmem:[%s1835_s10 + $0xe0] sm:$0xff] %v443_v32  ;;  %446 = vst [vmem:[%s1835_s10 + $0xe8] sm:$0xff] %v445_v33  ;;  %v447_v34 = vld [vmem:[%s1830_s27 + $0x1e0] sm:$0xff]  ;;  %v449_v35 = vld [vmem:[%s1830_s27 + $0x1f0] sm:$0xff] }
  0x45   : > { %v451_v36 = vld [vmem:[%s1830_s27 + $0x200] sm:$0xff]  ;;  %448 = vst [vmem:[%s1835_s10 + $0xf0] sm:$0xff] %v447_v34  ;;  %450 = vst [vmem:[%s1835_s10 + $0xf8] sm:$0xff] %v449_v35  ;;  %v453_v37 = vld [vmem:[%s1830_s27 + $0x210] sm:$0xff] }
  0x46   : > { %452 = vst [vmem:[%s1835_s10 + $0x100] sm:$0xff] %v451_v36  ;;  %v455_v38 = vld [vmem:[%s1830_s27 + $0x220] sm:$0xff]  ;;  %v457_v39 = vld [vmem:[%s1830_s27 + $0x230] sm:$0xff]  ;;  %454 = vst [vmem:[%s1835_s10 + $0x108] sm:$0xff] %v453_v37 }
  0x47   : > { %456 = vst [vmem:[%s1835_s10 + $0x110] sm:$0xff] %v455_v38  ;;  %458 = vst [vmem:[%s1835_s10 + $0x118] sm:$0xff] %v457_v39  ;;  %v459_v40 = vld [vmem:[%s1830_s27 + $0x240] sm:$0xff]  ;;  %v461_v41 = vld [vmem:[%s1830_s27 + $0x250] sm:$0xff] }
  0x48   : > { %v463_v42 = vld [vmem:[%s1830_s27 + $0x260] sm:$0xff]  ;;  %460 = vst [vmem:[%s1835_s10 + $0x120] sm:$0xff] %v459_v40  ;;  %462 = vst [vmem:[%s1835_s10 + $0x128] sm:$0xff] %v461_v41  ;;  %v465_v43 = vld [vmem:[%s1830_s27 + $0x270] sm:$0xff] }
  0x49   : > { %464 = vst [vmem:[%s1835_s10 + $0x130] sm:$0xff] %v463_v42  ;;  %v467_v44 = vld [vmem:[%s1830_s27 + $0x280] sm:$0xff]  ;;  %v469_v45 = vld [vmem:[%s1830_s27 + $0x290] sm:$0xff]  ;;  %466 = vst [vmem:[%s1835_s10 + $0x138] sm:$0xff] %v465_v43 }
  0x4a   : > { %468 = vst [vmem:[%s1835_s10 + $0x140] sm:$0xff] %v467_v44  ;;  %470 = vst [vmem:[%s1835_s10 + $0x148] sm:$0xff] %v469_v45  ;;  %v471_v46 = vld [vmem:[%s1830_s27 + $0x2a0] sm:$0xff]  ;;  %v473_v47 = vld [vmem:[%s1830_s27 + $0x2b0] sm:$0xff] }
  0x4b   : > { %v475_v48 = vld [vmem:[%s1830_s27 + $0x2c0] sm:$0xff]  ;;  %472 = vst [vmem:[%s1835_s10 + $0x150] sm:$0xff] %v471_v46  ;;  %474 = vst [vmem:[%s1835_s10 + $0x158] sm:$0xff] %v473_v47  ;;  %v477_v49 = vld [vmem:[%s1830_s27 + $0x2d0] sm:$0xff] }
  0x4c   : > { %476 = vst [vmem:[%s1835_s10 + $0x160] sm:$0xff] %v475_v48  ;;  %v479_v50 = vld [vmem:[%s1830_s27 + $0x2e0] sm:$0xff]  ;;  %v481_v51 = vld [vmem:[%s1830_s27 + $0x2f0] sm:$0xff]  ;;  %478 = vst [vmem:[%s1835_s10 + $0x168] sm:$0xff] %v477_v49 }
  0x4d   : > { %480 = vst [vmem:[%s1835_s10 + $0x170] sm:$0xff] %v479_v50  ;;  %482 = vst [vmem:[%s1835_s10 + $0x178] sm:$0xff] %v481_v51  ;;  %v483_v52 = vld [vmem:[%s1830_s27 + $0x300] sm:$0xff]  ;;  %v485_v53 = vld [vmem:[%s1830_s27 + $0x310] sm:$0xff] }
  0x4e   : > { %v487_v54 = vld [vmem:[%s1830_s27 + $0x320] sm:$0xff]  ;;  %484 = vst [vmem:[%s1835_s10 + $0x180] sm:$0xff] %v483_v52  ;;  %486 = vst [vmem:[%s1835_s10 + $0x188] sm:$0xff] %v485_v53  ;;  %v489_v55 = vld [vmem:[%s1830_s27 + $0x330] sm:$0xff] }
  0x4f   : > { %488 = vst [vmem:[%s1835_s10 + $0x190] sm:$0xff] %v487_v54  ;;  %v491_v56 = vld [vmem:[%s1830_s27 + $0x340] sm:$0xff]  ;;  %v493_v57 = vld [vmem:[%s1830_s27 + $0x350] sm:$0xff]  ;;  %490 = vst [vmem:[%s1835_s10 + $0x198] sm:$0xff] %v489_v55 }
  0x50   : > { %492 = vst [vmem:[%s1835_s10 + $0x1a0] sm:$0xff] %v491_v56  ;;  %494 = vst [vmem:[%s1835_s10 + $0x1a8] sm:$0xff] %v493_v57  ;;  %v495_v58 = vld [vmem:[%s1830_s27 + $0x360] sm:$0xff]  ;;  %v497_v59 = vld [vmem:[%s1830_s27 + $0x370] sm:$0xff] }
  0x51   : > { %v499_v60 = vld [vmem:[%s1830_s27 + $0x380] sm:$0xff]  ;;  %496 = vst [vmem:[%s1835_s10 + $0x1b0] sm:$0xff] %v495_v58  ;;  %498 = vst [vmem:[%s1835_s10 + $0x1b8] sm:$0xff] %v497_v59  ;;  %v501_v61 = vld [vmem:[%s1830_s27 + $0x390] sm:$0xff] }
  0x52   : > { %500 = vst [vmem:[%s1835_s10 + $0x1c0] sm:$0xff] %v499_v60  ;;  %v503_v62 = vld [vmem:[%s1830_s27 + $0x3a0] sm:$0xff]  ;;  %v505_v63 = vld [vmem:[%s1830_s27 + $0x3b0] sm:$0xff]  ;;  %502 = vst [vmem:[%s1835_s10 + $0x1c8] sm:$0xff] %v501_v61 }
  0x53   : > { %504 = vst [vmem:[%s1835_s10 + $0x1d0] sm:$0xff] %v503_v62  ;;  %506 = vst [vmem:[%s1835_s10 + $0x1d8] sm:$0xff] %v505_v63  ;;  %v507_v0 = vld [vmem:[%s1830_s27 + $0x3c0] sm:$0xff]  ;;  %v509_v1 = vld [vmem:[%s1830_s27 + $0x3d0] sm:$0xff] }
  0x54   : > { %v511_v2 = vld [vmem:[%s1830_s27 + $0x3e0] sm:$0xff]  ;;  %508 = vst [vmem:[%s1835_s10 + $0x1e0] sm:$0xff] %v507_v0  ;;  %510 = vst [vmem:[%s1835_s10 + $0x1e8] sm:$0xff] %v509_v1  ;;  %v513_v3 = vld [vmem:[%s1830_s27 + $0x3f0] sm:$0xff] }
  0x55   : > { %512 = vst [vmem:[%s1835_s10 + $0x1f0] sm:$0xff] %v511_v2  ;;  %514 = vst [vmem:[%s1835_s10 + $0x1f8] sm:$0xff] %v513_v3 }
  0x56 PF: > { %p1327_p0 = scmp.ge.s32.totalorder %s1688_s25, 1  ;;  %p535_p1 = scmp.lt.s32.totalorder %s1688_s25, 9 }
  0x58   : > { %p536_p2 = pnand %p1327_p0, %p535_p1 }
  0x59   : > { %s542_s0 = sand.u32 (!%p536_p2), 1, %s1664_s19   ;;  %s549_s28 = sand.u32 (!%p536_p2), 1, %s1656_s17  }
  0x5a   : > { %539 = sbr.rel (%p536_p2) target bundleno = 399 (0x18f), region = 89  ;;  %s1328_s11 = sshll.u32 (!%p536_p2), %s542_s0, 5 }
  0x5b   : > { %s1329_s26 = sshll.u32 (!%p536_p2), %s549_s28, 9  ;;  %s582_s5 = sand.u32 (!%p536_p2), 1, %s1648_s15  }
  0x5c   : > { %s1331_s29 = sshll.u32 (!%p536_p2), %s1676_s22, 1  ;;  %s1330_s27 = sshll.u32 (!%p536_p2), %s582_s5, 5 }
  0x5d   : > { %p590_p3 = scmp.lt.s32.totalorder (!%p536_p2), %s1331_s29, 3  ;;  %s1978_s19 = scalar_lea.vmem (!%p536_p2), [#allocation3], %s1328_s11 }
  0x5e   : > { %s1980_s17 = scalar_lea.vmem (!%p536_p2), [#allocation4], %s1329_s26  ;;  %s1982_s15 = scalar_lea.vmem (!%p536_p2), [#allocation5], %s1330_s27 }
  0x5f   : > { %s2146_s29 = smov (!%p590_p3, %s1331_s29), 3  ;;  %p1333_p4 = scmp.ne.s32.totalorder %s1672_s21, 0 }
  0x60   : > { %s592_s9 = scalar_lea.vmem %s2113_s2, %s2146_s29  ;;  %s597_s1 = scalar_lea.vmem %s2114_s3, %s2146_s29 }
  0x61   : > { %604 = sbr.rel (%p1333_p4) target bundleno = 105 (0x69), region = 101 }
  0x66   : > { %v1690_v4 = vmov 0.0  }
  0x67   : > { %605 = vst [vmem:[#allocation2 + $0x10] sm:$0xff] %v1690_v4  ;;  %606 = vst [vmem:[#allocation2] sm:$0xff] %v1690_v4 }
  0x68   : > { %607 = vst [vmem:[#allocation2 + $0x18] sm:$0xff] %v1690_v4  ;;  %608 = vst [vmem:[#allocation2 + $0x8] sm:$0xff] %v1690_v4 }
  0x69 PF: > { %v1500_v5 = vld [vmem:[%s1980_s17 + $0x74] ss:$8 sps:$4 sm:$0xff]   ;;  %v1504_v7 = vld [vmem:[%s1980_s17 + $0x70] ss:$8 sps:$4 sm:$0xff]   ;;  %v1506_v9 = vld [vmem:[%s1980_s17 + $0x64] ss:$8 sps:$4 sm:$0xff]  }
  0x6a   : > { %v1502_v6 = vld [vmem:[%s1980_s17 + $0x174] ss:$8 sps:$4 sm:$0xff]   ;;  %1021 = vmatprep.subr.bf16.mxu0 %v1500_v5  ;;  %v1505_v8 = vld [vmem:[%s1980_s17 + $0x170] ss:$8 sps:$4 sm:$0xff]   ;;  %v1508_v10 = vld [vmem:[%s1980_s17 + $0x164] ss:$8 sps:$4 sm:$0xff]  }
  0x6b   : > { %1064 = vmatprep.subr.bf16.mxu1 %v1502_v6  ;;  %1022 = vmatpush1.bf16.msra.mxu0 %v1504_v7  ;;  %v1510_v11 = vld [vmem:[%s1980_s17 + $0x60] ss:$8 sps:$4 sm:$0xff]   ;;  %v1512_v13 = vld [vmem:[%s1980_s17 + $0x54] ss:$8 sps:$4 sm:$0xff]   ;;  %v1516_v15 = vld [vmem:[%s1980_s17 + $0x50] ss:$8 sps:$4 sm:$0xff]  }
  0x6c   : > { %1065 = vmatpush1.bf16.msra.mxu1 %v1505_v8  ;;  %1023 = vmatprep.subr.bf16.mxu0 %v1506_v9  ;;  %v1511_v12 = vld [vmem:[%s1980_s17 + $0x160] ss:$8 sps:$4 sm:$0xff]   ;;  %v1514_v14 = vld [vmem:[%s1980_s17 + $0x154] ss:$8 sps:$4 sm:$0xff]   ;;  %v1517_v16 = vld [vmem:[%s1980_s17 + $0x150] ss:$8 sps:$4 sm:$0xff]  }
  0x6d   : > { %1066 = vmatprep.subr.bf16.mxu1 %v1508_v10  ;;  %v1518_v17 = vld [vmem:[%s1980_s17 + $0x44] ss:$8 sps:$4 sm:$0xff]   ;;  %v1522_v19 = vld [vmem:[%s1980_s17 + $0x40] ss:$8 sps:$4 sm:$0xff]   ;;  %v1524_v21 = vld [vmem:[%s1980_s17 + $0x34] ss:$8 sps:$4 sm:$0xff]  }
  0x6e   : > { %v1520_v18 = vld [vmem:[%s1980_s17 + $0x144] ss:$8 sps:$4 sm:$0xff]   ;;  %v1523_v20 = vld [vmem:[%s1980_s17 + $0x140] ss:$8 sps:$4 sm:$0xff]   ;;  %v1526_v22 = vld [vmem:[%s1980_s17 + $0x134] ss:$8 sps:$4 sm:$0xff]  }
  0x6f   : > { %1024 = vmatpush1.bf16.msra.mxu0 %v1510_v11  ;;  %v1528_v23 = vld [vmem:[%s1980_s17 + $0x30] ss:$8 sps:$4 sm:$0xff]   ;;  %v1530_v25 = vld [vmem:[%s1980_s17 + $0x24] ss:$8 sps:$4 sm:$0xff]   ;;  %v1534_v27 = vld [vmem:[%s1980_s17 + $0x20] ss:$8 sps:$4 sm:$0xff]  }
  0x70   : > { %1067 = vmatpush1.bf16.msra.mxu1 %v1511_v12  ;;  %1025 = vmatprep.subr.bf16.mxu0 %v1512_v13  ;;  %v1529_v24 = vld [vmem:[%s1980_s17 + $0x130] ss:$8 sps:$4 sm:$0xff]   ;;  %v1532_v26 = vld [vmem:[%s1980_s17 + $0x124] ss:$8 sps:$4 sm:$0xff]   ;;  %v1535_v28 = vld [vmem:[%s1980_s17 + $0x120] ss:$8 sps:$4 sm:$0xff]  }
  0x71   : > { %1068 = vmatprep.subr.bf16.mxu1 %v1514_v14  ;;  %v1536_v29 = vld [vmem:[%s1980_s17 + $0x14] ss:$8 sps:$4 sm:$0xff]   ;;  %v1540_v31 = vld [vmem:[%s1980_s17 + $0x10] ss:$8 sps:$4 sm:$0xff]   ;;  %v1542_v33 = vld [vmem:[%s1980_s17 + $0x4] ss:$8 sps:$4 sm:$0xff]  }
  0x72   : > { %v1538_v30 = vld [vmem:[%s1980_s17 + $0x114] ss:$8 sps:$4 sm:$0xff]   ;;  %v1541_v32 = vld [vmem:[%s1980_s17 + $0x110] ss:$8 sps:$4 sm:$0xff]   ;;  %v1544_v34 = vld [vmem:[%s1980_s17 + $0x104] ss:$8 sps:$4 sm:$0xff]  }
  0x73   : > { %1026 = vmatpush1.bf16.msra.mxu0 %v1516_v15  ;;  %v1546_v35 = vld [vmem:[%s1980_s17] ss:$8 sps:$4 sm:$0xff]   ;;  %v1548_v37 = vld [vmem:[%s1980_s17 + $0xf4] ss:$8 sps:$4 sm:$0xff]   ;;  %v1552_v39 = vld [vmem:[%s1980_s17 + $0xf0] ss:$8 sps:$4 sm:$0xff]  }
  0x74   : > { %1069 = vmatpush1.bf16.msra.mxu1 %v1517_v16  ;;  %1027 = vmatprep.subr.bf16.mxu0 %v1518_v17  ;;  %v1547_v36 = vld [vmem:[%s1980_s17 + $0x100] ss:$8 sps:$4 sm:$0xff]   ;;  %v1550_v38 = vld [vmem:[%s1980_s17 + $0x1f4] ss:$8 sps:$4 sm:$0xff]   ;;  %v1553_v40 = vld [vmem:[%s1980_s17 + $0x1f0] ss:$8 sps:$4 sm:$0xff]  }
  0x75   : > { %1070 = vmatprep.subr.bf16.mxu1 %v1520_v18  ;;  %v1554_v41 = vld [vmem:[%s1980_s17 + $0xe4] ss:$8 sps:$4 sm:$0xff]   ;;  %v1558_v43 = vld [vmem:[%s1980_s17 + $0xe0] ss:$8 sps:$4 sm:$0xff]   ;;  %v1560_v45 = vld [vmem:[%s1980_s17 + $0xd4] ss:$8 sps:$4 sm:$0xff]  }
  0x76   : > { %v1556_v42 = vld [vmem:[%s1980_s17 + $0x1e4] ss:$8 sps:$4 sm:$0xff]   ;;  %v1559_v44 = vld [vmem:[%s1980_s17 + $0x1e0] ss:$8 sps:$4 sm:$0xff]   ;;  %v1562_v46 = vld [vmem:[%s1980_s17 + $0x1d4] ss:$8 sps:$4 sm:$0xff]  }
  0x77   : > { %1028 = vmatpush1.bf16.msra.mxu0 %v1522_v19  ;;  %v1564_v47 = vld [vmem:[%s1980_s17 + $0xd0] ss:$8 sps:$4 sm:$0xff]   ;;  %v1566_v49 = vld [vmem:[%s1980_s17 + $0xc4] ss:$8 sps:$4 sm:$0xff]   ;;  %v1570_v51 = vld [vmem:[%s1980_s17 + $0xc0] ss:$8 sps:$4 sm:$0xff]  }
  0x78   : > { %1071 = vmatpush1.bf16.msra.mxu1 %v1523_v20  ;;  %1029 = vmatprep.subr.bf16.mxu0 %v1524_v21  ;;  %v1565_v48 = vld [vmem:[%s1980_s17 + $0x1d0] ss:$8 sps:$4 sm:$0xff]   ;;  %v1568_v50 = vld [vmem:[%s1980_s17 + $0x1c4] ss:$8 sps:$4 sm:$0xff]   ;;  %v1571_v53 = vld [vmem:[%s1980_s17 + $0x1c0] ss:$8 sps:$4 sm:$0xff]  }
  0x79   : > { %1072 = vmatprep.subr.bf16.mxu1 %v1526_v22  ;;  %v1598_v52 = vld [vmem:[%s1978_s19 + $0x4] ss:$16 sps:$4 sm:$0xff]   ;;  %v1601_v56 = vld [vmem:[%s1978_s19 + $0xc] ss:$16 sps:$4 sm:$0xff]   ;;  %v1576_v57 = vld [vmem:[%s1980_s17 + $0xb0] ss:$8 sps:$4 sm:$0xff]  }
  0x7a   : > { %v1572_v54 = vld [vmem:[%s1980_s17 + $0xb4] ss:$8 sps:$4 sm:$0xff]   ;;  %1053 = vmatprep.mubr.bf16.mxu0 %v1598_v52  ;;  %1096 = vmatprep.mubr.bf16.mxu1 %v1601_v56  ;;  %v1577_v58 = vld [vmem:[%s1980_s17 + $0x1b0] ss:$8 sps:$4 sm:$0xff]   ;;  %v1578_v59 = vld [vmem:[%s1980_s17 + $0xa4] ss:$8 sps:$4 sm:$0xff]  }
  0x7b   : > { %1030 = vmatpush1.bf16.msra.mxu0 %v1528_v23  ;;  %v1574_v55 = vld [vmem:[%s1980_s17 + $0x1b4] ss:$8 sps:$4 sm:$0xff]   ;;  %v1580_v60 = vld [vmem:[%s1980_s17 + $0x1a4] ss:$8 sps:$4 sm:$0xff]   ;;  %v1582_v61 = vld [vmem:[%s1980_s17 + $0xa0] ss:$8 sps:$4 sm:$0xff]  }
  0x7c   : > { %1073 = vmatpush1.bf16.msra.mxu1 %v1529_v24  ;;  %1031 = vmatprep.subr.bf16.mxu0 %v1530_v25  ;;  %v1583_v62 = vld [vmem:[%s1980_s17 + $0x1a0] ss:$8 sps:$4 sm:$0xff]   ;;  %v1584_v63 = vld [vmem:[%s1980_s17 + $0x94] ss:$8 sps:$4 sm:$0xff]   ;;  %v1588_v1 = vld [vmem:[%s1980_s17 + $0x90] ss:$8 sps:$4 sm:$0xff]  }
  0x7d   : > { %1074 = vmatprep.subr.bf16.mxu1 %v1532_v26  ;;  %v1586_v0 = vld [vmem:[%s1980_s17 + $0x194] ss:$8 sps:$4 sm:$0xff]   ;;  %v1589_v2 = vld [vmem:[%s1980_s17 + $0x190] ss:$8 sps:$4 sm:$0xff]   ;;  %v1590_v3 = vld [vmem:[%s1980_s17 + $0x84] ss:$8 sps:$4 sm:$0xff]  }
  0x7e   : > { %v1592_v4 = vld [vmem:[%s1980_s17 + $0x184] ss:$8 sps:$4 sm:$0xff]   ;;  %v1594_v5 = vld [vmem:[%s1980_s17 + $0x80] ss:$8 sps:$4 sm:$0xff]   ;;  %v609_v10 = vld [vmem:[#allocation2 + $0x10] sm:$0xff]  ;;  %p1402_p5 = scmp.ne.s32.totalorder %s1672_s21, 3 }
  0x7f   : > { %1032 = vmatpush1.bf16.msra.mxu0 %v1534_v27  ;;  %v1595_v6 = vld [vmem:[%s1980_s17 + $0x180] ss:$8 sps:$4 sm:$0xff]   ;;  %v611_v19 = vld [vmem:[#allocation2 + $0x18] sm:$0xff] }
  0x80   : > { %1075 = vmatpush1.bf16.msra.mxu1 %v1535_v28  ;;  %1033 = vmatprep.subr.bf16.mxu0 %v1536_v29  ;;  %v1596_v7 = vld [vmem:[%s1978_s19] ss:$16 sps:$4 sm:$0xff]   ;;  %v1599_v8 = vld [vmem:[%s1978_s19 + $0x8] ss:$16 sps:$4 sm:$0xff]  }
  0x81   : > { %1076 = vmatprep.subr.bf16.mxu1 %v1538_v30  ;;  %v610_v14 = vld [vmem:[#allocation2] sm:$0xff]  ;;  %v612_v24 = vld [vmem:[#allocation2 + $0x8] sm:$0xff] }
  0x83   : > { %1034 = vmatpush1.bf16.msra.mxu0 %v1540_v31 }
  0x84   : > { %1077 = vmatpush1.bf16.msra.mxu1 %v1541_v32  ;;  %1035 = vmatprep.subr.bf16.mxu0 %v1542_v33 }
  0x85   : > { %1078 = vmatprep.subr.bf16.mxu1 %v1544_v34 }
  0x87   : > { %1036 = vmatpush1.bf16.msra.mxu0 %v1546_v35 }
  0x88   : > { %1079 = vmatpush1.bf16.msra.mxu1 %v1547_v36  ;;  %1037 = vmatprep.subr.bf16.mxu0 %v1548_v37 }
  0x89   : > { %1080 = vmatprep.subr.bf16.mxu1 %v1550_v38 }
  0x8b   : > { %1038 = vmatpush2.bf16.msra.mxu0 %v1552_v39 }
  0x8c   : > { %1081 = vmatpush2.bf16.msra.mxu1 %v1553_v40  ;;  %1039 = vmatprep.subr.bf16.mxu0 %v1554_v41 }
  0x8d   : > { %1082 = vmatprep.subr.bf16.mxu1 %v1556_v42 }
  0x8f   : > { %1040 = vmatpush2.bf16.msra.mxu0 %v1558_v43 }
  0x90   : > { %1083 = vmatpush2.bf16.msra.mxu1 %v1559_v44  ;;  %1041 = vmatprep.subr.bf16.mxu0 %v1560_v45 }
  0x91   : > { %1084 = vmatprep.subr.bf16.mxu1 %v1562_v46 }
  0x93   : > { %1042 = vmatpush2.bf16.msra.mxu0 %v1564_v47 }
  0x94   : > { %1085 = vmatpush2.bf16.msra.mxu1 %v1565_v48  ;;  %1043 = vmatprep.subr.bf16.mxu0 %v1566_v49 }
  0x95   : > { %1086 = vmatprep.subr.bf16.mxu1 %v1568_v50 }
  0x97   : > { %1044 = vmatpush2.bf16.msra.mxu0 %v1570_v51 }
  0x98   : > { %1087 = vmatpush2.bf16.msra.mxu1 %v1571_v53  ;;  %1045 = vmatprep.subr.bf16.mxu0 %v1572_v54 }
  0x99   : > { %1088 = vmatprep.subr.bf16.mxu1 %v1574_v55 }
  0x9b   : > { %1046 = vmatpush2.bf16.msra.mxu0 %v1576_v57 }
  0x9c   : > { %1089 = vmatpush2.bf16.msra.mxu1 %v1577_v58  ;;  %1047 = vmatprep.subr.bf16.mxu0 %v1578_v59 }
  0x9d   : > { %1090 = vmatprep.subr.bf16.mxu1 %v1580_v60 }
  0x9f   : > { %1048 = vmatpush2.bf16.msra.mxu0 %v1582_v61 }
  0xa0   : > { %1091 = vmatpush2.bf16.msra.mxu1 %v1583_v62  ;;  %1049 = vmatprep.subr.bf16.mxu0 %v1584_v63 }
  0xa1   : > { %1092 = vmatprep.subr.bf16.mxu1 %v1586_v0 }
  0xa3   : > { %1050 = vmatpush2.bf16.msra.mxu0 %v1588_v1 }
  0xa4   : > { %1093 = vmatpush2.bf16.msra.mxu1 %v1589_v2  ;;  %1051 = vmatprep.subr.bf16.mxu0 %v1590_v3 }
  0xa5   : > { %1094 = vmatprep.subr.bf16.mxu1 %v1592_v4 }
  0xa7   : > { %1052 = vmatpush2.bf16.msra.mxu0 %v1594_v5 }
  0xa8   : > { %1095 = vmatpush2.bf16.msra.mxu1 %v1595_v6 }
  0xaa   : > { %1054 = vmatmul.mubr.bf16.vlgmr.msra.gmra.mxu0 %v1596_v7 }
  0xab   : > { %1097 = vmatmul.mubr.bf16.vlgmr.msra.gmra.mxu1 %v1599_v8 }
 0x16a   : > { %v1055_v9 = vpop.f32.mrf.mxu0 }
 0x16b   : > { %v1098_v11 = vpop.f32.mrf.mxu1 }
 0x16c   : > { %v1099_v12 = vadd.f32 %v1098_v11, %v1055_v9  ;;  %v1057_v13 = vpop.f32.mrf.mxu0 }
 0x16d   : > { %v1100_v15 = vpop.f32.mrf.mxu1 }
 0x16e   : > { %v1107_v16 = vadd.f32 %v1099_v12, %v609_v10  ;;  %v1101_v17 = vadd.f32 %v1100_v15, %v1057_v13  ;;  %v1059_v18 = vpop.f32.mrf.mxu0 }
 0x16f   : > { %v1102_v20 = vpop.f32.mrf.mxu1 }
 0x170   : > { %1111 = vst [vmem:[#allocation2 + $0x10] sm:$0xff] %v1107_v16  ;;  %v1108_v21 = vadd.f32 %v1101_v17, %v610_v14  ;;  %v1103_v22 = vadd.f32 %v1102_v20, %v1059_v18  ;;  %v1061_v23 = vpop.f32.mrf.mxu0 }
 0x171   : > { %v1104_v25 = vpop.f32.mrf.mxu1 }
 0x172   : > { %1112 = vst [vmem:[#allocation2] sm:$0xff] %v1108_v21  ;;  %v1109_v26 = vadd.f32 %v1103_v22, %v611_v19  ;;  %v1105_v27 = vadd.f32 %v1104_v25, %v1061_v23  ;;  %1118 = sbr.rel (%p1402_p5) target bundleno = 391 (0x187), region = 105 }
 0x174   : > { %1113 = vst [vmem:[#allocation2 + $0x18] sm:$0xff] %v1109_v26  ;;  %v1110_v28 = vadd.f32 %v1105_v27, %v612_v24 }
 0x176   : > { %1114 = vst [vmem:[#allocation2 + $0x8] sm:$0xff] %v1110_v28 }
 0x177   : > { %v1125_v29 = vlaneseq  ;;  %v1123_v31 = vld [vmem:[%s592_s9] sm:$0x3]  ;;  %v1119_v33 = vld [vmem:[#allocation2 + $0x10] sm:$0xff] }
 0x178   : > { %v1139_v32 = vld [vmem:[%s597_s1] sm:$0x3] }
 0x179   : > { %v1126_v30 = vshrl.u32 %v1125_v29, 7  ;;  %v1120_v36 = vld [vmem:[#allocation2] sm:$0xff] }
 0x17b   : > { %v1127_v34 = vsub.s32 0, %v1126_v30  ;;  %v1131_v35 = vsub.s32 1, %v1126_v30  ;;  %v1121_v37 = vld [vmem:[#allocation2 + $0x18] sm:$0xff] }
 0x17d   : > { %v1122_v38 = vld [vmem:[#allocation2 + $0x8] sm:$0xff]  ;;  %v1128_v39 = vrot.slane %v1123_v31, %v1127_v34  ;;  %v1144_v40 = vrot.slane %v1139_v32, %v1127_v34  ;;  %v1132_v41 = vrot.slane %v1123_v31, %v1131_v35  ;;  %v1148_v42 = vrot.slane %v1139_v32, %v1131_v35 }
 0x17f   : > { %v1135_v43 = vmul.f32 %v1128_v39, %v1119_v33  ;;  %v1136_v44 = vmul.f32 %v1132_v41, %v1120_v36  ;;  %v1137_v45 = vmul.f32 %v1128_v39, %v1121_v37  ;;  %v1138_v46 = vmul.f32 %v1132_v41, %v1122_v38 }
 0x181   : > { %v1151_v47 = vadd.f32 %v1144_v40, %v1135_v43  ;;  %v1152_v48 = vadd.f32 %v1148_v42, %v1136_v44  ;;  %v1153_v49 = vadd.f32 %v1144_v40, %v1137_v45  ;;  %v1154_v50 = vadd.f32 %v1148_v42, %v1138_v46 }
 0x183   : > { %v1155_v51 = vmax.f32 %v1151_v47, 0.0  ;;  %v1156_v52 = vmax.f32 %v1152_v48, 0.0  ;;  %v1157_v53 = vmax.f32 %v1153_v49, 0.0  ;;  %v1158_v54 = vmax.f32 %v1154_v50, 0.0 }
 0x185   : > { %1159 = vst [vmem:[%s1982_s15] sm:$0xff] %v1155_v51  ;;  %1160 = vst [vmem:[%s1982_s15 + $0x8] sm:$0xff] %v1156_v52 }
 0x186   : > { %1161 = vst [vmem:[%s1982_s15 + $0x10] sm:$0xff] %v1157_v53  ;;  %1162 = vst [vmem:[%s1982_s15 + $0x18] sm:$0xff] %v1158_v54 }
 0x187 PF: > { %1169 = sbr.rel (!%p1810_p12) target bundleno = 399 (0x18f), region = 109  ;;  %s1410_s1 = sshll.u32 (%p1810_p12), %s1676_s22, 4 }
 0x188   : > { %s1175_s29 = scalar_lea.vmem (%p1810_p12), %s2115_s4, %s1410_s1 }
 0x18c   : > { %v1188_v55 = vld [vmem:[%s1982_s15] sm:$0xff]  ;;  %v1190_v56 = vld [vmem:[%s1982_s15 + $0x8] sm:$0xff] }
 0x18d   : > { %v1192_v57 = vld [vmem:[%s1982_s15 + $0x10] sm:$0xff]  ;;  %v1194_v58 = vld [vmem:[%s1982_s15 + $0x18] sm:$0xff]  ;;  %1189 = vst [vmem:[%s1175_s29] sm:$0xff] %v1188_v55  ;;  %1191 = vst [vmem:[%s1175_s29 + $0x8] sm:$0xff] %v1190_v56 }
 0x18e   : > { %1193 = vst [vmem:[%s1175_s29 + $0x20] sm:$0xff] %v1192_v57  ;;  %1195 = vst [vmem:[%s1175_s29 + $0x28] sm:$0xff] %v1194_v58 }
 0x18f PF: > { %s14_s25 = sadd.s32 1, %s1688_s25   ;;  %s2127_s14 = sld [smem:[#allocation6_spill]] }
 0x190   : > { %p11_p6 = scmp.ge.s32.totalorder %s14_s25, 10   ;;  %s2128_s27 = sld [smem:[#allocation7_spill]] }
 0x191   : > { %s2129_s15 = smov %s1652_s16  ;;  %s2130_s16 = smov %s1808_s13 }
 0x192   : > { %s2131_s17 = smov %s1660_s18  ;;  %s2132_s18 = smov %s1805_s12 }
 0x193   : > { %s2133_s19 = smov %s1668_s20  ;;  %s2134_s20 = smov %s1791_s7 }
 0x194   : > { %s2135_s21 = smov %s1680_s23  ;;  %s2136_s22 = smov %s1684_s24 }
 0x195   : > { %s2137_s23 = smov %s2127_s14  ;;  %13 = sbr.rel (!%p11_p6) target bundleno = 9 (0x9), region = 177 }
 0x196   : > { %s2138_s24 = smov %s2128_s27 }

// kernel: crnn_forward.27
= control target key start
LH: loop header
LB: loop body
LE: loop exit
PB: predicated region body
PF: predicated region fallthrough
CT: control target
= control target key end

     0   :  { %s968_s1 = inlined_call_operand.vmem [shape: bf16[512,256], index: 1, kind: input, shape index: {}]   ;;  %s969_s0 = inlined_call_operand.vmem [shape: bf16[16,512], index: 0, kind: input, shape index: {}]   ;;  %s970_s2 = inlined_call_operand.vmem [shape: f32[1,256], index: 2, kind: input, shape index: {}]   ;;  %s971_s3 = inlined_call_operand.vmem [shape: f32[16,256], index: 3, kind: output, shape index: {}]  }
   0x1   :  { %v627_v0 = vld [vmem:[%s968_s1 + $0x74] ss:$8 sps:$4 sm:$0xff]   ;;  %v631_v2 = vld [vmem:[%s968_s1 + $0x70] ss:$8 sps:$4 sm:$0xff]   ;;  %v633_v4 = vld [vmem:[%s968_s1 + $0x64] ss:$8 sps:$4 sm:$0xff]  }
   0x2   :  { %v629_v1 = vld [vmem:[%s968_s1 + $0x174] ss:$8 sps:$4 sm:$0xff]   ;;  %434 = vmatprep.subr.bf16.mxu0 %v627_v0  ;;  %v632_v3 = vld [vmem:[%s968_s1 + $0x170] ss:$8 sps:$4 sm:$0xff]   ;;  %v635_v5 = vld [vmem:[%s968_s1 + $0x164] ss:$8 sps:$4 sm:$0xff]  }
   0x3   :  { %477 = vmatprep.subr.bf16.mxu1 %v629_v1  ;;  %435 = vmatpush1.bf16.msra.mxu0 %v631_v2  ;;  %v637_v6 = vld [vmem:[%s968_s1 + $0x60] ss:$8 sps:$4 sm:$0xff]   ;;  %v639_v8 = vld [vmem:[%s968_s1 + $0x54] ss:$8 sps:$4 sm:$0xff]   ;;  %v643_v10 = vld [vmem:[%s968_s1 + $0x50] ss:$8 sps:$4 sm:$0xff]  }
   0x4   :  { %478 = vmatpush1.bf16.msra.mxu1 %v632_v3  ;;  %436 = vmatprep.subr.bf16.mxu0 %v633_v4  ;;  %v638_v7 = vld [vmem:[%s968_s1 + $0x160] ss:$8 sps:$4 sm:$0xff]   ;;  %v641_v9 = vld [vmem:[%s968_s1 + $0x154] ss:$8 sps:$4 sm:$0xff]   ;;  %v644_v11 = vld [vmem:[%s968_s1 + $0x150] ss:$8 sps:$4 sm:$0xff]   ;;  %v537_v4 = vlaneseq }
   0x5   :  { %479 = vmatprep.subr.bf16.mxu1 %v635_v5  ;;  %v645_v12 = vld [vmem:[%s968_s1 + $0x44] ss:$8 sps:$4 sm:$0xff]   ;;  %v649_v14 = vld [vmem:[%s968_s1 + $0x40] ss:$8 sps:$4 sm:$0xff]   ;;  %v651_v16 = vld [vmem:[%s968_s1 + $0x34] ss:$8 sps:$4 sm:$0xff]  }
   0x6   :  { %v647_v13 = vld [vmem:[%s968_s1 + $0x144] ss:$8 sps:$4 sm:$0xff]   ;;  %v650_v15 = vld [vmem:[%s968_s1 + $0x140] ss:$8 sps:$4 sm:$0xff]   ;;  %v653_v17 = vld [vmem:[%s968_s1 + $0x134] ss:$8 sps:$4 sm:$0xff]  }
   0x7   :  { %437 = vmatpush1.bf16.msra.mxu0 %v637_v6  ;;  %v655_v18 = vld [vmem:[%s968_s1 + $0x30] ss:$8 sps:$4 sm:$0xff]   ;;  %v657_v20 = vld [vmem:[%s968_s1 + $0x24] ss:$8 sps:$4 sm:$0xff]   ;;  %v661_v22 = vld [vmem:[%s968_s1 + $0x20] ss:$8 sps:$4 sm:$0xff]  }
   0x8   :  { %480 = vmatpush1.bf16.msra.mxu1 %v638_v7  ;;  %438 = vmatprep.subr.bf16.mxu0 %v639_v8  ;;  %v656_v19 = vld [vmem:[%s968_s1 + $0x130] ss:$8 sps:$4 sm:$0xff]   ;;  %v659_v21 = vld [vmem:[%s968_s1 + $0x124] ss:$8 sps:$4 sm:$0xff]   ;;  %v662_v23 = vld [vmem:[%s968_s1 + $0x120] ss:$8 sps:$4 sm:$0xff]  }
   0x9   :  { %481 = vmatprep.subr.bf16.mxu1 %v641_v9  ;;  %v663_v24 = vld [vmem:[%s968_s1 + $0x14] ss:$8 sps:$4 sm:$0xff]   ;;  %v667_v26 = vld [vmem:[%s968_s1 + $0x10] ss:$8 sps:$4 sm:$0xff]   ;;  %v669_v28 = vld [vmem:[%s968_s1 + $0x4] ss:$8 sps:$4 sm:$0xff]  }
   0xa   :  { %v665_v25 = vld [vmem:[%s968_s1 + $0x114] ss:$8 sps:$4 sm:$0xff]   ;;  %v668_v27 = vld [vmem:[%s968_s1 + $0x110] ss:$8 sps:$4 sm:$0xff]   ;;  %v671_v29 = vld [vmem:[%s968_s1 + $0x104] ss:$8 sps:$4 sm:$0xff]  }
   0xb   :  { %439 = vmatpush1.bf16.msra.mxu0 %v643_v10  ;;  %v673_v30 = vld [vmem:[%s968_s1] ss:$8 sps:$4 sm:$0xff]   ;;  %v675_v32 = vld [vmem:[%s968_s1 + $0xf4] ss:$8 sps:$4 sm:$0xff]   ;;  %v679_v34 = vld [vmem:[%s968_s1 + $0xf0] ss:$8 sps:$4 sm:$0xff]  }
   0xc   :  { %482 = vmatpush1.bf16.msra.mxu1 %v644_v11  ;;  %440 = vmatprep.subr.bf16.mxu0 %v645_v12  ;;  %v674_v31 = vld [vmem:[%s968_s1 + $0x100] ss:$8 sps:$4 sm:$0xff]   ;;  %v677_v33 = vld [vmem:[%s968_s1 + $0x1f4] ss:$8 sps:$4 sm:$0xff]   ;;  %v680_v35 = vld [vmem:[%s968_s1 + $0x1f0] ss:$8 sps:$4 sm:$0xff]  }
   0xd   :  { %483 = vmatprep.subr.bf16.mxu1 %v647_v13  ;;  %v681_v36 = vld [vmem:[%s968_s1 + $0xe4] ss:$8 sps:$4 sm:$0xff]   ;;  %v685_v38 = vld [vmem:[%s968_s1 + $0xe0] ss:$8 sps:$4 sm:$0xff]   ;;  %v687_v40 = vld [vmem:[%s968_s1 + $0xd4] ss:$8 sps:$4 sm:$0xff]  }
   0xe   :  { %v683_v37 = vld [vmem:[%s968_s1 + $0x1e4] ss:$8 sps:$4 sm:$0xff]   ;;  %v686_v39 = vld [vmem:[%s968_s1 + $0x1e0] ss:$8 sps:$4 sm:$0xff]   ;;  %v689_v41 = vld [vmem:[%s968_s1 + $0x1d4] ss:$8 sps:$4 sm:$0xff]  }
   0xf   :  { %441 = vmatpush1.bf16.msra.mxu0 %v649_v14  ;;  %v691_v42 = vld [vmem:[%s968_s1 + $0xd0] ss:$8 sps:$4 sm:$0xff]   ;;  %v693_v44 = vld [vmem:[%s968_s1 + $0xc4] ss:$8 sps:$4 sm:$0xff]   ;;  %v697_v46 = vld [vmem:[%s968_s1 + $0xc0] ss:$8 sps:$4 sm:$0xff]  }
  0x10   :  { %484 = vmatpush1.bf16.msra.mxu1 %v650_v15  ;;  %442 = vmatprep.subr.bf16.mxu0 %v651_v16  ;;  %v692_v43 = vld [vmem:[%s968_s1 + $0x1d0] ss:$8 sps:$4 sm:$0xff]   ;;  %v695_v45 = vld [vmem:[%s968_s1 + $0x1c4] ss:$8 sps:$4 sm:$0xff]   ;;  %v698_v48 = vld [vmem:[%s968_s1 + $0x1c0] ss:$8 sps:$4 sm:$0xff]  }
  0x11   :  { %485 = vmatprep.subr.bf16.mxu1 %v653_v17  ;;  %v725_v47 = vld [vmem:[%s969_s0 + $0x4] ss:$16 sps:$4 sm:$0xff]   ;;  %v728_v51 = vld [vmem:[%s969_s0 + $0xc] ss:$16 sps:$4 sm:$0xff]   ;;  %v703_v52 = vld [vmem:[%s968_s1 + $0xb0] ss:$8 sps:$4 sm:$0xff]  }
  0x12   :  { %v699_v49 = vld [vmem:[%s968_s1 + $0xb4] ss:$8 sps:$4 sm:$0xff]   ;;  %466 = vmatprep.mubr.bf16.mxu0 %v725_v47  ;;  %509 = vmatprep.mubr.bf16.mxu1 %v728_v51  ;;  %v704_v53 = vld [vmem:[%s968_s1 + $0x1b0] ss:$8 sps:$4 sm:$0xff]   ;;  %v705_v54 = vld [vmem:[%s968_s1 + $0xa4] ss:$8 sps:$4 sm:$0xff]  }
  0x13   :  { %443 = vmatpush1.bf16.msra.mxu0 %v655_v18  ;;  %v701_v50 = vld [vmem:[%s968_s1 + $0x1b4] ss:$8 sps:$4 sm:$0xff]   ;;  %v707_v55 = vld [vmem:[%s968_s1 + $0x1a4] ss:$8 sps:$4 sm:$0xff]   ;;  %v709_v56 = vld [vmem:[%s968_s1 + $0xa0] ss:$8 sps:$4 sm:$0xff]  }
  0x14   :  { %486 = vmatpush1.bf16.msra.mxu1 %v656_v19  ;;  %444 = vmatprep.subr.bf16.mxu0 %v657_v20  ;;  %v710_v57 = vld [vmem:[%s968_s1 + $0x1a0] ss:$8 sps:$4 sm:$0xff]   ;;  %v711_v58 = vld [vmem:[%s968_s1 + $0x94] ss:$8 sps:$4 sm:$0xff]   ;;  %v715_v60 = vld [vmem:[%s968_s1 + $0x90] ss:$8 sps:$4 sm:$0xff]  }
  0x15   :  { %487 = vmatprep.subr.bf16.mxu1 %v659_v21  ;;  %v713_v59 = vld [vmem:[%s968_s1 + $0x194] ss:$8 sps:$4 sm:$0xff]   ;;  %v716_v61 = vld [vmem:[%s968_s1 + $0x190] ss:$8 sps:$4 sm:$0xff]   ;;  %v717_v62 = vld [vmem:[%s968_s1 + $0x84] ss:$8 sps:$4 sm:$0xff]  }
  0x16   :  { %v719_v63 = vld [vmem:[%s968_s1 + $0x184] ss:$8 sps:$4 sm:$0xff]   ;;  %v721_v0 = vld [vmem:[%s968_s1 + $0x80] ss:$8 sps:$4 sm:$0xff]   ;;  %v538_v5 = vshrl.u32 %v537_v4, 7 }
  0x17   :  { %445 = vmatpush1.bf16.msra.mxu0 %v661_v22  ;;  %v722_v1 = vld [vmem:[%s968_s1 + $0x180] ss:$8 sps:$4 sm:$0xff]  }
  0x18   :  { %488 = vmatpush1.bf16.msra.mxu1 %v662_v23  ;;  %446 = vmatprep.subr.bf16.mxu0 %v663_v24  ;;  %v723_v2 = vld [vmem:[%s969_s0] ss:$16 sps:$4 sm:$0xff]   ;;  %v726_v3 = vld [vmem:[%s969_s0 + $0x8] ss:$16 sps:$4 sm:$0xff]   ;;  %v539_v6 = vsub.s32 0, %v538_v5  ;;  %v543_v8 = vsub.s32 1, %v538_v5 }
  0x19   :  { %489 = vmatprep.subr.bf16.mxu1 %v665_v25  ;;  %v535_v7 = vld [vmem:[%s970_s2] sm:$0x3] }
  0x1a   :  { %v540_v9 = vrot.slane %v535_v7, %v539_v6  ;;  %v544_v13 = vrot.slane %v535_v7, %v543_v8 }
  0x1b   :  { %447 = vmatpush1.bf16.msra.mxu0 %v667_v26 }
  0x1c   :  { %490 = vmatpush1.bf16.msra.mxu1 %v668_v27  ;;  %448 = vmatprep.subr.bf16.mxu0 %v669_v28 }
  0x1d   :  { %491 = vmatprep.subr.bf16.mxu1 %v671_v29 }
  0x1f   :  { %449 = vmatpush1.bf16.msra.mxu0 %v673_v30 }
  0x20   :  { %492 = vmatpush1.bf16.msra.mxu1 %v674_v31  ;;  %450 = vmatprep.subr.bf16.mxu0 %v675_v32 }
  0x21   :  { %493 = vmatprep.subr.bf16.mxu1 %v677_v33 }
  0x23   :  { %451 = vmatpush2.bf16.msra.mxu0 %v679_v34 }
  0x24   :  { %494 = vmatpush2.bf16.msra.mxu1 %v680_v35  ;;  %452 = vmatprep.subr.bf16.mxu0 %v681_v36 }
  0x25   :  { %495 = vmatprep.subr.bf16.mxu1 %v683_v37 }
  0x27   :  { %453 = vmatpush2.bf16.msra.mxu0 %v685_v38 }
  0x28   :  { %496 = vmatpush2.bf16.msra.mxu1 %v686_v39  ;;  %454 = vmatprep.subr.bf16.mxu0 %v687_v40 }
  0x29   :  { %497 = vmatprep.subr.bf16.mxu1 %v689_v41 }
  0x2b   :  { %455 = vmatpush2.bf16.msra.mxu0 %v691_v42 }
  0x2c   :  { %498 = vmatpush2.bf16.msra.mxu1 %v692_v43  ;;  %456 = vmatprep.subr.bf16.mxu0 %v693_v44 }
  0x2d   :  { %499 = vmatprep.subr.bf16.mxu1 %v695_v45 }
  0x2f   :  { %457 = vmatpush2.bf16.msra.mxu0 %v697_v46 }
  0x30   :  { %500 = vmatpush2.bf16.msra.mxu1 %v698_v48  ;;  %458 = vmatprep.subr.bf16.mxu0 %v699_v49 }
  0x31   :  { %501 = vmatprep.subr.bf16.mxu1 %v701_v50 }
  0x33   :  { %459 = vmatpush2.bf16.msra.mxu0 %v703_v52 }
  0x34   :  { %502 = vmatpush2.bf16.msra.mxu1 %v704_v53  ;;  %460 = vmatprep.subr.bf16.mxu0 %v705_v54 }
  0x35   :  { %503 = vmatprep.subr.bf16.mxu1 %v707_v55 }
  0x37   :  { %461 = vmatpush2.bf16.msra.mxu0 %v709_v56 }
  0x38   :  { %504 = vmatpush2.bf16.msra.mxu1 %v710_v57  ;;  %462 = vmatprep.subr.bf16.mxu0 %v711_v58 }
  0x39   :  { %505 = vmatprep.subr.bf16.mxu1 %v713_v59 }
  0x3b   :  { %463 = vmatpush2.bf16.msra.mxu0 %v715_v60 }
  0x3c   :  { %506 = vmatpush2.bf16.msra.mxu1 %v716_v61  ;;  %464 = vmatprep.subr.bf16.mxu0 %v717_v62 }
  0x3d   :  { %507 = vmatprep.subr.bf16.mxu1 %v719_v63 }
  0x3f   :  { %465 = vmatpush2.bf16.msra.mxu0 %v721_v0 }
  0x40   :  { %508 = vmatpush2.bf16.msra.mxu1 %v722_v1 }
  0x42   :  { %467 = vmatmul.mubr.bf16.vlgmr.msra.gmra.mxu0 %v723_v2 }
  0x43   :  { %510 = vmatmul.mubr.bf16.vlgmr.msra.gmra.mxu1 %v726_v3 }
 0x102   :  { %v468_v10 = vpop.f32.mrf.mxu0 }
 0x103   :  { %v511_v11 = vpop.f32.mrf.mxu1 }
 0x104   :  { %v512_v12 = vadd.f32 %v511_v11, %v468_v10  ;;  %v470_v14 = vpop.f32.mrf.mxu0 }
 0x105   :  { %v513_v15 = vpop.f32.mrf.mxu1 }
 0x106   :  { %v547_v16 = vadd.f32 %v540_v9, %v512_v12  ;;  %v514_v17 = vadd.f32 %v513_v15, %v470_v14  ;;  %v472_v18 = vpop.f32.mrf.mxu0 }
 0x107   :  { %v515_v19 = vpop.f32.mrf.mxu1 }
 0x108   :  { %551 = vst [vmem:[%s971_s3] sm:$0xff] %v547_v16  ;;  %v548_v20 = vadd.f32 %v544_v13, %v514_v17  ;;  %v516_v21 = vadd.f32 %v515_v19, %v472_v18  ;;  %v474_v22 = vpop.f32.mrf.mxu0 }
 0x109   :  { %v517_v23 = vpop.f32.mrf.mxu1 }
 0x10a   :  { %552 = vst [vmem:[%s971_s3 + $0x8] sm:$0xff] %v548_v20  ;;  %v549_v24 = vadd.f32 %v540_v9, %v516_v21  ;;  %v518_v25 = vadd.f32 %v517_v23, %v474_v22 }
 0x10c   :  { %553 = vst [vmem:[%s971_s3 + $0x10] sm:$0xff] %v549_v24  ;;  %v550_v26 = vadd.f32 %v544_v13, %v518_v25 }
 0x10e   :  { %554 = vst [vmem:[%s971_s3 + $0x18] sm:$0xff] %v550_v26 }

// kernel: crnn_forward.28
= control target key start
LH: loop header
LB: loop body
LE: loop exit
PB: predicated region body
PF: predicated region fallthrough
CT: control target
= control target key end

     0   :  { %v2001_v0 = vmov 0.0   ;;  %vm2002_vm0 = vmmov 0   ;;  %s2003_s7 = smov 64   ;;  %s2004_s8 = smov 32   ;;  %v2005_v40 = vmov 1983009808   ;;  %v228_v42 = vlaneseq  ;;  %s2432_s1 = inlined_call_operand.vmem [shape: f32[32,128], index: 1, kind: input, shape index: {}]   ;;  %s2433_s2 = inlined_call_operand.vmem [shape: f32[32,128], index: 2, kind: input, shape index: {}]   ;;  %s2434_s0 = inlined_call_operand.vmem [shape: f32[7,2,256], index: 0, kind: input, shape index: {}]   ;;  %s2435_s3 = inlined_call_operand.vmem [shape: f32[7,2,32], index: 3, kind: output, shape index: {0}]   ;;  %s2436_s4 = inlined_call_operand.vmem [shape: f32[7,2,32], index: 4, kind: output, shape index: {1}]  }
   0x1   :  { %1730 = vmatprep.subr.mxu0 %v2001_v0  ;;  %v2035_v1 = vld [vmem:[%s2432_s1 + $0x18] sm:$0xff]  ;;  %1741 = vmatprep.subr.mxu1 %v2001_v0  ;;  %v2041_v2 = vld [vmem:[%s2432_s1 + $0x10] sm:$0xff]  ;;  %v2060_v5 = vld [vmem:[%s2432_s1 + $0x8] sm:$0xff]  ;;  %v226_v41 = vunpack.c.l.s4 %v2005_v40  ;;  %vm235_vm1 = vcmask 254976   ;;  %vm25_vm2 = vcmask 261120  }
   0x2   :  { %v2046_v3 = vld [vmem:[%s2433_s2 + $0x18] sm:$0xff]  ;;  %1731 = vmatpush3.msra.mxu0 %v2035_v1  ;;  %v2053_v4 = vld [vmem:[%s2433_s2 + $0x10] sm:$0xff]  ;;  %v2067_v6 = vld [vmem:[%s2433_s2 + $0x8] sm:$0xff]  ;;  %1738 = vmatprep.mubr.msk.f32.mxu0 %vm2002_vm0, %v2001_v0  ;;  %v229_v44 = vshrl.u32 %v228_v42, 7 }
   0x3   :  { %1742 = vmatpush3.msra.mxu1 %v2046_v3  ;;  %1732 = vmatprep.subr.mxu0 %v2001_v0  ;;  %v2074_v7 = vld [vmem:[%s2432_s1] sm:$0xff]  ;;  %v1611_v9 = vld [vmem:[%s2434_s0 + $0x18] sm:$0xf]  ;;  %v227_v43 = vunpack.c.0.s8 %v226_v41  ;;  %v1617_v55 = vld [vmem:[%s2434_s0 + $0x14] sm:$0xf] }
   0x4   :  { %1743 = vmatprep.subr.mxu1 %v2001_v0  ;;  %1733 = vmatpush3.msra.mxu0 %v2041_v2  ;;  %v2082_v8 = vld [vmem:[%s2433_s2] sm:$0xff]  ;;  %v173_v11 = vrot.slane %v1611_v9, 2  ;;  %v400_v58 = vrot.slane %v1617_v55, 2 }
   0x5   :  { %1744 = vmatpush3.msra.mxu1 %v2053_v4  ;;  %1734 = vmatprep.subr.mxu0 %v2001_v0  ;;  %v24_v10 = vld [vmem:[%s2434_s0] sm:$0xf]  ;;  %v2133_v45 = vsub.s32 %v227_v43, %v229_v44  ;;  %v1615_v54 = vld [vmem:[%s2434_s0 + $0x4] sm:$0xf] }
   0x6   :  { %1745 = vmatprep.subr.mxu1 %v2001_v0  ;;  %1735 = vmatpush3.msra.mxu0 %v2060_v5 }
   0x7   :  { %1736 = vmatprep.subr.mxu0 %v2001_v0  ;;  %1746 = vmatpush3.msra.mxu1 %v2067_v6 }
   0x8   :  { %1737 = vmatpush3.msra.mxu0 %v2074_v7  ;;  %1747 = vmatprep.subr.mxu1 %v2001_v0 }
   0x9   :  { %1739 = vmatmul.mubr.f32.vlgmr.msra.gmra.mxu0 %v2001_v0  ;;  %1748 = vmatpush3.msra.mxu1 %v2082_v8 }
   0xa   :  { %1749 = vmatprep.mubr.msk.f32.mxu1 %vm2002_vm0, %v2001_v0  ;;  %1752 = vmatprep.subr.mxu0 %v2001_v0 }
   0xb   :  { %1750 = vmatmul.mubr.f32.vlgmr.msra.gmra.mxu1 %v2001_v0  ;;  %1753 = vmatpush3.msra.mxu0 %v2035_v1 }
   0xc   :  { %1754 = vmatprep.subr.mxu0 %v2001_v0  ;;  %1763 = vmatprep.subr.mxu1 %v2001_v0 }
   0xd   :  { %1755 = vmatpush3.msra.mxu0 %v2041_v2  ;;  %1764 = vmatpush3.msra.mxu1 %v2046_v3 }
   0xe   :  { %1756 = vmatprep.subr.mxu0 %v2001_v0  ;;  %1765 = vmatprep.subr.mxu1 %v2001_v0 }
   0xf   :  { %1757 = vmatpush3.msra.mxu0 %v2060_v5  ;;  %1760 = vmatprep.mubr.msk.f32.mxu0 %vm2002_vm0, %v2001_v0 }
  0x10   :  { %1758 = vmatprep.subr.mxu0 %v2001_v0  ;;  %1766 = vmatpush3.msra.mxu1 %v2053_v4 }
  0x11   :  { %1759 = vmatpush3.msra.mxu0 %v2074_v7  ;;  %1767 = vmatprep.subr.mxu1 %v2001_v0 }
  0x12   :  { %1768 = vmatpush3.msra.mxu1 %v2067_v6  ;;  %1771 = vmatprep.mubr.msk.f32.mxu1 %vm2002_vm0, %v2001_v0 }
  0x13   :  { %1769 = vmatprep.subr.mxu1 %v2001_v0  ;;  %1774 = vmatprep.subr.mxu0 %v2001_v0 }
  0x14   :  { %1770 = vmatpush3.msra.mxu1 %v2082_v8 }
  0x15   :  { %1785 = vmatprep.subr.mxu1 %v2001_v0 }
  0xc9   :  { %v95_v12 = vpop.f32.mrf.mxu0 }
  0xca   :  { %v99_v13 = vadd.f32 %v95_v12, %v24_v10 }
  0xcb   :  { %v1740_v14 = vpop.f32.mrf.mxu0  ;;  %v168_v15 = vpop.f32.mrf.mxu1 }
  0xcc   :  { %1889 = vtanh.f32 %v99_v13  ;;  %v175_v16 = vadd.f32 %v173_v11, %v168_v15  ;;  %v1612_v20 = vmul.f32 -1.442695, %v99_v13 }
  0xcd   :  { %v1751_v17 = vpop.f32.mrf.mxu1 }
  0xce   :  { %1891 = vtanh.f32 %v175_v16  ;;  %v1613_v21 = vmul.f32 -1.442695, %v175_v16 }
  0xcf   :  { %1893 = vpow2.f32 %v1612_v20 }
  0xd0   :  { %1895 = vpow2.f32 %v1613_v21 }
  0xd9   :  { %v1890_v18 = vpop.eup %1889 }
  0xda   :  { %185 = vrot.lane.b32.xlu0 %v1890_v18, %s2003_s7 }
  0xdb   :  { %v1892_v19 = vpop.eup %1891 }
  0xdc   :  { %v1894_v22 = vpop.eup %1893 }
  0xdd   :  { %v179_v23 = vadd.f32 1.0, %v1894_v22  ;;  %v1896_v24 = vpop.eup %1895 }
  0xde   :  { %209 = vrot.lane.b32.xlu0 %v1892_v19, %s2003_s7  ;;  %v203_v25 = vadd.f32 1.0, %v1896_v24 }
  0xdf   :  { %1897 = vrcp.f32 %v179_v23 }
  0xe0   :  { %1899 = vrcp.f32 %v203_v25 }
  0xec   :  { %v1898_v26 = vpop.eup %1897 }
  0xed   :  { %v1900_v29 = vpop.eup %1899  ;;  %v183_v32 = vmul.f32 0.0, %v1898_v26 }
  0xee   :  { %v207_v35 = vmul.f32 0.0, %v1900_v29 }
 0x14c   :  { %v186_v27 = vpop.permute.xlu0 %185 }
 0x14d   :  { %v188_v28 = vmul.f32 %v1898_v26, %v186_v27 }
 0x14f   :  { %190 = vrot.lane.b32.xlu1 %v188_v28, %s2004_s8 }
 0x150   :  { %v210_v30 = vpop.permute.xlu0 %209 }
 0x151   :  { %v212_v31 = vmul.f32 %v1900_v29, %v210_v30 }
 0x153   :  { %214 = vrot.lane.b32.xlu1 %v212_v31, %s2004_s8 }
 0x1c1   :  { %v191_v33 = vpop.permute.xlu1 %190 }
 0x1c2   :  { %v2125_v34 = vadd.f32 %v191_v33, %v183_v32 }
 0x1c4   :  { %1901 = vtanh.f32 %v2125_v34 }
 0x1c5   :  { %v215_v36 = vpop.permute.xlu1 %214 }
 0x1c6   :  { %v2128_v37 = vadd.f32 %v215_v36, %v207_v35 }
 0x1c8   :  { %1903 = vtanh.f32 %v2128_v37 }
 0x1d1   :  { %v1902_v38 = vpop.eup %1901 }
 0x1d2   :  { %196 = vrot.lane.b32.xlu0 %v1902_v38, %s2003_s7  ;;  %v1623_v38 = vld [vmem:[%s2434_s0 + $0x8] sm:$0xf] }
 0x1d5   :  { %v1904_v39 = vpop.eup %1903 }
 0x1d6   :  { %220 = vrot.lane.b32.xlu1 %v1904_v39, %s2003_s7  ;;  %v1625_v39 = vld [vmem:[%s2434_s0 + $0x10] sm:$0xf] }
 0x1d7   :  { %v627_v42 = vrot.slane %v1625_v39, 2 }
 0x244   :  { %v197_v46 = vpop.permute.xlu0 %196 }
 0x245   :  { %v199_v47 = vmul.f32 %v1898_v26, %v197_v46 }
 0x247   :  { %v231_v48 = vrot.slane %v199_v47, %v2133_v45 }
 0x248   :  { %v221_v49 = vpop.permute.xlu1 %220 }
 0x249   :  { %v223_v50 = vmul.f32 %v1900_v29, %v221_v49  ;;  %232 = vrot.lane.b32.xlu0 %v231_v48, %s2004_s8 }
 0x24b   :  { %v244_v51 = vrot.slane %v223_v50, %v2133_v45 }
 0x24d   :  { %245 = vrot.lane.b32.xlu1 %v244_v51, %s2004_s8 }
 0x2bb   :  { %v233_v52 = vpop.permute.xlu0 %232 }
 0x2bc   :  { %236 = vst.msk [vmem:[%s2435_s3] sm:$0x3] %vm235_vm1, %v233_v52  ;;  %1761 = vmatmul.mubr.msk.f32.vlgmr.msra.gmra.mxu0 %vm25_vm2, %v233_v52 }
 0x2bd   :  { %1775 = vmatpush3.msra.mxu0 %v2035_v1  ;;  %1782 = vmatprep.mubr.msk.f32.mxu0 %vm2002_vm0, %v2001_v0 }
 0x2be   :  { %1776 = vmatprep.subr.mxu0 %v2001_v0 }
 0x2bf   :  { %v246_v53 = vpop.permute.xlu1 %245  ;;  %1777 = vmatpush3.msra.mxu0 %v2041_v2 }
 0x2c0   :  { %1614 = vst.msk [vmem:[%s2436_s4 + $0xc] sm:$0x3] %vm235_vm1, %v246_v53  ;;  %1772 = vmatmul.mubr.msk.f32.vlgmr.msra.gmra.mxu1 %vm25_vm2, %v246_v53  ;;  %1778 = vmatprep.subr.mxu0 %v2001_v0 }
 0x2c1   :  { %1779 = vmatpush3.msra.mxu0 %v2060_v5  ;;  %1786 = vmatpush3.msra.mxu1 %v2046_v3 }
 0x2c2   :  { %1780 = vmatprep.subr.mxu0 %v2001_v0  ;;  %1787 = vmatprep.subr.mxu1 %v2001_v0 }
 0x2c3   :  { %1781 = vmatpush3.msra.mxu0 %v2074_v7  ;;  %1788 = vmatpush3.msra.mxu1 %v2053_v4 }
 0x2c4   :  { %1789 = vmatprep.subr.mxu1 %v2001_v0  ;;  %1793 = vmatprep.mubr.msk.f32.mxu1 %vm2002_vm0, %v2001_v0 }
 0x2c5   :  { %1790 = vmatpush3.msra.mxu1 %v2067_v6  ;;  %1796 = vmatprep.subr.mxu0 %v2001_v0 }
 0x2c6   :  { %1791 = vmatprep.subr.mxu1 %v2001_v0 }
 0x2c7   :  { %1792 = vmatpush3.msra.mxu1 %v2082_v8 }
 0x2c8   :  { %1807 = vmatprep.subr.mxu1 %v2001_v0 }
 0x37c   :  { %v320_v56 = vpop.f32.mrf.mxu0 }
 0x37d   :  { %v324_v57 = vadd.f32 %v1615_v54, %v320_v56 }
 0x37e   :  { %v1762_v59 = vpop.f32.mrf.mxu0 }
 0x37f   :  { %1905 = vtanh.f32 %v324_v57  ;;  %v1619_v10 = vmul.f32 -1.442695, %v324_v57 }
 0x380   :  { %v395_v60 = vpop.f32.mrf.mxu1 }
 0x381   :  { %v402_v61 = vadd.f32 %v400_v58, %v395_v60 }
 0x382   :  { %v1773_v62 = vpop.f32.mrf.mxu1 }
 0x383   :  { %1907 = vtanh.f32 %v402_v61  ;;  %v1620_v11 = vmul.f32 -1.442695, %v402_v61 }
 0x384   :  { %1909 = vpow2.f32 %v1619_v10 }
 0x385   :  { %1911 = vpow2.f32 %v1620_v11 }
 0x38c   :  { %v1906_v63 = vpop.eup %1905 }
 0x38d   :  { %412 = vrot.lane.b32.xlu0 %v1906_v63, %s2003_s7 }
 0x390   :  { %v1908_v9 = vpop.eup %1907 }
 0x391   :  { %436 = vrot.lane.b32.xlu1 %v1908_v9, %s2003_s7  ;;  %v1910_v12 = vpop.eup %1909 }
 0x392   :  { %v406_v13 = vadd.f32 1.0, %v1910_v12  ;;  %v1912_v14 = vpop.eup %1911 }
 0x393   :  { %v430_v15 = vadd.f32 1.0, %v1912_v14 }
 0x394   :  { %1913 = vrcp.f32 %v406_v13 }
 0x395   :  { %1915 = vrcp.f32 %v430_v15 }
 0x3a1   :  { %v1914_v16 = vpop.eup %1913 }
 0x3a2   :  { %v1916_v19 = vpop.eup %1915  ;;  %v410_v22 = vmul.f32 %v1914_v16, %v2125_v34 }
 0x3a3   :  { %v434_v25 = vmul.f32 %v1916_v19, %v2128_v37 }
 0x3ff   :  { %v413_v17 = vpop.permute.xlu0 %412 }
 0x400   :  { %v415_v18 = vmul.f32 %v1914_v16, %v413_v17 }
 0x402   :  { %417 = vrot.lane.b32.xlu0 %v415_v18, %s2004_s8 }
 0x403   :  { %v437_v20 = vpop.permute.xlu1 %436 }
 0x404   :  { %v439_v21 = vmul.f32 %v1916_v19, %v437_v20 }
 0x406   :  { %441 = vrot.lane.b32.xlu1 %v439_v21, %s2004_s8 }
 0x474   :  { %v418_v23 = vpop.permute.xlu0 %417 }
 0x475   :  { %v2180_v24 = vadd.f32 %v418_v23, %v410_v22  ;;  %v1631_v23 = vld [vmem:[%s2434_s0 + $0xc] sm:$0xf] }
 0x477   :  { %1917 = vtanh.f32 %v2180_v24 }
 0x478   :  { %v442_v26 = vpop.permute.xlu1 %441 }
 0x479   :  { %v2184_v27 = vadd.f32 %v442_v26, %v434_v25  ;;  %v852_v26 = vrot.slane %v1631_v23, 2 }
 0x47b   :  { %1919 = vtanh.f32 %v2184_v27 }
 0x484   :  { %v1918_v28 = vpop.eup %1917 }
 0x485   :  { %423 = vrot.lane.b32.xlu0 %v1918_v28, %s2003_s7 }
 0x488   :  { %v1920_v29 = vpop.eup %1919 }
 0x489   :  { %447 = vrot.lane.b32.xlu1 %v1920_v29, %s2003_s7 }
 0x4f7   :  { %v424_v30 = vpop.permute.xlu0 %423 }
 0x4f8   :  { %v426_v31 = vmul.f32 %v1914_v16, %v424_v30 }
 0x4fa   :  { %v458_v32 = vrot.slane %v426_v31, %v2133_v45 }
 0x4fb   :  { %v448_v33 = vpop.permute.xlu1 %447 }
 0x4fc   :  { %v450_v34 = vmul.f32 %v1916_v19, %v448_v33  ;;  %459 = vrot.lane.b32.xlu0 %v458_v32, %s2004_s8 }
 0x4fe   :  { %v471_v35 = vrot.slane %v450_v34, %v2133_v45 }
 0x500   :  { %472 = vrot.lane.b32.xlu1 %v471_v35, %s2004_s8 }
 0x56e   :  { %v460_v36 = vpop.permute.xlu0 %459 }
 0x56f   :  { %1621 = vst.msk [vmem:[%s2435_s3 + $0x2] sm:$0x3] %vm235_vm1, %v460_v36  ;;  %1783 = vmatmul.mubr.msk.f32.vlgmr.msra.gmra.mxu0 %vm25_vm2, %v460_v36 }
 0x570   :  { %1797 = vmatpush3.msra.mxu0 %v2035_v1  ;;  %1804 = vmatprep.mubr.msk.f32.mxu0 %vm2002_vm0, %v2001_v0 }
 0x571   :  { %1798 = vmatprep.subr.mxu0 %v2001_v0 }
 0x572   :  { %v473_v37 = vpop.permute.xlu1 %472  ;;  %1799 = vmatpush3.msra.mxu0 %v2041_v2 }
 0x573   :  { %1622 = vst.msk [vmem:[%s2436_s4 + $0xa] sm:$0x3] %vm235_vm1, %v473_v37  ;;  %1794 = vmatmul.mubr.msk.f32.vlgmr.msra.gmra.mxu1 %vm25_vm2, %v473_v37  ;;  %1800 = vmatprep.subr.mxu0 %v2001_v0 }
 0x574   :  { %1801 = vmatpush3.msra.mxu0 %v2060_v5  ;;  %1808 = vmatpush3.msra.mxu1 %v2046_v3 }
 0x575   :  { %1802 = vmatprep.subr.mxu0 %v2001_v0  ;;  %1809 = vmatprep.subr.mxu1 %v2001_v0 }
 0x576   :  { %1803 = vmatpush3.msra.mxu0 %v2074_v7  ;;  %1810 = vmatpush3.msra.mxu1 %v2053_v4 }
 0x577   :  { %1811 = vmatprep.subr.mxu1 %v2001_v0  ;;  %1815 = vmatprep.mubr.msk.f32.mxu1 %vm2002_vm0, %v2001_v0 }
 0x578   :  { %1812 = vmatpush3.msra.mxu1 %v2067_v6  ;;  %1818 = vmatprep.subr.mxu0 %v2001_v0 }
 0x579   :  { %1813 = vmatprep.subr.mxu1 %v2001_v0 }
 0x57a   :  { %1814 = vmatpush3.msra.mxu1 %v2082_v8 }
 0x57b   :  { %1829 = vmatprep.subr.mxu1 %v2001_v0 }
 0x62f   :  { %v547_v40 = vpop.f32.mrf.mxu0 }
 0x630   :  { %v551_v41 = vadd.f32 %v1623_v38, %v547_v40 }
 0x631   :  { %v1784_v43 = vpop.f32.mrf.mxu0 }
 0x632   :  { %1921 = vtanh.f32 %v551_v41  ;;  %v1627_v50 = vmul.f32 -1.442695, %v551_v41 }
 0x633   :  { %v622_v44 = vpop.f32.mrf.mxu1 }
 0x634   :  { %v629_v46 = vadd.f32 %v627_v42, %v622_v44 }
 0x635   :  { %v1795_v47 = vpop.f32.mrf.mxu1 }
 0x636   :  { %1923 = vtanh.f32 %v629_v46  ;;  %v1628_v51 = vmul.f32 -1.442695, %v629_v46 }
 0x637   :  { %1925 = vpow2.f32 %v1627_v50 }
 0x638   :  { %1927 = vpow2.f32 %v1628_v51 }
 0x63f   :  { %v1922_v48 = vpop.eup %1921 }
 0x640   :  { %639 = vrot.lane.b32.xlu0 %v1922_v48, %s2003_s7 }
 0x643   :  { %v1924_v49 = vpop.eup %1923 }
 0x644   :  { %663 = vrot.lane.b32.xlu1 %v1924_v49, %s2003_s7  ;;  %v1926_v52 = vpop.eup %1925 }
 0x645   :  { %v633_v53 = vadd.f32 1.0, %v1926_v52  ;;  %v1928_v54 = vpop.eup %1927 }
 0x646   :  { %v657_v55 = vadd.f32 1.0, %v1928_v54 }
 0x647   :  { %1929 = vrcp.f32 %v633_v53 }
 0x648   :  { %1931 = vrcp.f32 %v657_v55 }
 0x654   :  { %v1930_v56 = vpop.eup %1929 }
 0x655   :  { %v1932_v59 = vpop.eup %1931  ;;  %v637_v62 = vmul.f32 %v1930_v56, %v2180_v24 }
 0x656   :  { %v661_v10 = vmul.f32 %v1932_v59, %v2184_v27 }
 0x6b2   :  { %v640_v57 = vpop.permute.xlu0 %639 }
 0x6b3   :  { %v642_v58 = vmul.f32 %v1930_v56, %v640_v57 }
 0x6b5   :  { %644 = vrot.lane.b32.xlu0 %v642_v58, %s2004_s8 }
 0x6b6   :  { %v664_v60 = vpop.permute.xlu1 %663 }
 0x6b7   :  { %v666_v61 = vmul.f32 %v1932_v59, %v664_v60 }
 0x6b9   :  { %668 = vrot.lane.b32.xlu1 %v666_v61, %s2004_s8 }
 0x727   :  { %v645_v63 = vpop.permute.xlu0 %644 }
 0x728   :  { %v2234_v9 = vadd.f32 %v645_v63, %v637_v62  ;;  %v1638_v62 = vld [vmem:[%s2434_s0 + $0x10] sm:$0xf]  ;;  %v1640_v63 = vld [vmem:[%s2434_s0 + $0x8] sm:$0xf] }
 0x72a   :  { %1933 = vtanh.f32 %v2234_v9 }
 0x72b   :  { %v669_v11 = vpop.permute.xlu1 %668 }
 0x72c   :  { %v2238_v12 = vadd.f32 %v669_v11, %v661_v10  ;;  %v1077_v11 = vrot.slane %v1640_v63, 2 }
 0x72e   :  { %1935 = vtanh.f32 %v2238_v12 }
 0x737   :  { %v1934_v13 = vpop.eup %1933 }
 0x738   :  { %650 = vrot.lane.b32.xlu0 %v1934_v13, %s2003_s7 }
 0x73b   :  { %v1936_v14 = vpop.eup %1935 }
 0x73c   :  { %674 = vrot.lane.b32.xlu1 %v1936_v14, %s2003_s7 }
 0x7aa   :  { %v651_v15 = vpop.permute.xlu0 %650 }
 0x7ab   :  { %v653_v16 = vmul.f32 %v1930_v56, %v651_v15 }
 0x7ad   :  { %v685_v17 = vrot.slane %v653_v16, %v2133_v45 }
 0x7ae   :  { %v675_v18 = vpop.permute.xlu1 %674 }
 0x7af   :  { %v677_v19 = vmul.f32 %v1932_v59, %v675_v18  ;;  %686 = vrot.lane.b32.xlu0 %v685_v17, %s2004_s8 }
 0x7b1   :  { %v698_v20 = vrot.slane %v677_v19, %v2133_v45 }
 0x7b3   :  { %699 = vrot.lane.b32.xlu1 %v698_v20, %s2004_s8 }
 0x821   :  { %v687_v21 = vpop.permute.xlu0 %686 }
 0x822   :  { %1629 = vst.msk [vmem:[%s2435_s3 + $0x4] sm:$0x3] %vm235_vm1, %v687_v21  ;;  %1805 = vmatmul.mubr.msk.f32.vlgmr.msra.gmra.mxu0 %vm25_vm2, %v687_v21 }
 0x823   :  { %1819 = vmatpush3.msra.mxu0 %v2035_v1  ;;  %1826 = vmatprep.mubr.msk.f32.mxu0 %vm2002_vm0, %v2001_v0 }
 0x824   :  { %1820 = vmatprep.subr.mxu0 %v2001_v0 }
 0x825   :  { %v700_v22 = vpop.permute.xlu1 %699  ;;  %1821 = vmatpush3.msra.mxu0 %v2041_v2 }
 0x826   :  { %1630 = vst.msk [vmem:[%s2436_s4 + $0x8] sm:$0x3] %vm235_vm1, %v700_v22  ;;  %1816 = vmatmul.mubr.msk.f32.vlgmr.msra.gmra.mxu1 %vm25_vm2, %v700_v22  ;;  %1822 = vmatprep.subr.mxu0 %v2001_v0 }
 0x827   :  { %1823 = vmatpush3.msra.mxu0 %v2060_v5  ;;  %1830 = vmatpush3.msra.mxu1 %v2046_v3 }
 0x828   :  { %1824 = vmatprep.subr.mxu0 %v2001_v0  ;;  %1831 = vmatprep.subr.mxu1 %v2001_v0 }
 0x829   :  { %1825 = vmatpush3.msra.mxu0 %v2074_v7  ;;  %1832 = vmatpush3.msra.mxu1 %v2053_v4 }
 0x82a   :  { %1833 = vmatprep.subr.mxu1 %v2001_v0  ;;  %1837 = vmatprep.mubr.msk.f32.mxu1 %vm2002_vm0, %v2001_v0 }
 0x82b   :  { %1834 = vmatpush3.msra.mxu1 %v2067_v6  ;;  %1840 = vmatprep.subr.mxu0 %v2001_v0 }
 0x82c   :  { %1835 = vmatprep.subr.mxu1 %v2001_v0 }
 0x82d   :  { %1836 = vmatpush3.msra.mxu1 %v2082_v8 }
 0x82e   :  { %1851 = vmatprep.subr.mxu1 %v2001_v0 }
 0x8e2   :  { %v774_v24 = vpop.f32.mrf.mxu0 }
 0x8e3   :  { %v778_v25 = vadd.f32 %v1631_v23, %v774_v24 }
 0x8e4   :  { %v1806_v27 = vpop.f32.mrf.mxu0 }
 0x8e5   :  { %1937 = vtanh.f32 %v778_v25  ;;  %v1634_v33 = vmul.f32 -1.442695, %v778_v25 }
 0x8e6   :  { %v847_v28 = vpop.f32.mrf.mxu1 }
 0x8e7   :  { %v854_v29 = vadd.f32 %v852_v26, %v847_v28 }
 0x8e8   :  { %v1817_v30 = vpop.f32.mrf.mxu1 }
 0x8e9   :  { %1939 = vtanh.f32 %v854_v29  ;;  %v1635_v34 = vmul.f32 -1.442695, %v854_v29 }
 0x8ea   :  { %1941 = vpow2.f32 %v1634_v33 }
 0x8eb   :  { %1943 = vpow2.f32 %v1635_v34 }
 0x8f2   :  { %v1938_v31 = vpop.eup %1937 }
 0x8f3   :  { %864 = vrot.lane.b32.xlu0 %v1938_v31, %s2003_s7 }
 0x8f6   :  { %v1940_v32 = vpop.eup %1939 }
 0x8f7   :  { %888 = vrot.lane.b32.xlu1 %v1940_v32, %s2003_s7  ;;  %v1942_v35 = vpop.eup %1941 }
 0x8f8   :  { %v858_v36 = vadd.f32 1.0, %v1942_v35  ;;  %v1944_v37 = vpop.eup %1943 }
 0x8f9   :  { %v882_v38 = vadd.f32 1.0, %v1944_v37 }
 0x8fa   :  { %1945 = vrcp.f32 %v858_v36 }
 0x8fb   :  { %1947 = vrcp.f32 %v882_v38 }
 0x907   :  { %v1946_v39 = vpop.eup %1945 }
 0x908   :  { %v1948_v42 = vpop.eup %1947  ;;  %v862_v46 = vmul.f32 %v1946_v39, %v2234_v9 }
 0x909   :  { %v886_v49 = vmul.f32 %v1948_v42, %v2238_v12 }
 0x965   :  { %v865_v40 = vpop.permute.xlu0 %864 }
 0x966   :  { %v867_v41 = vmul.f32 %v1946_v39, %v865_v40 }
 0x968   :  { %869 = vrot.lane.b32.xlu0 %v867_v41, %s2004_s8 }
 0x969   :  { %v889_v43 = vpop.permute.xlu1 %888 }
 0x96a   :  { %v891_v44 = vmul.f32 %v1948_v42, %v889_v43 }
 0x96c   :  { %893 = vrot.lane.b32.xlu1 %v891_v44, %s2004_s8 }
 0x9da   :  { %v870_v47 = vpop.permute.xlu0 %869 }
 0x9db   :  { %v2285_v48 = vadd.f32 %v870_v47, %v862_v46 }
 0x9dd   :  { %1949 = vtanh.f32 %v2285_v48 }
 0x9de   :  { %v894_v50 = vpop.permute.xlu1 %893 }
 0x9df   :  { %v2289_v51 = vadd.f32 %v894_v50, %v886_v49 }
 0x9e1   :  { %1951 = vtanh.f32 %v2289_v51 }
 0x9ea   :  { %v1950_v52 = vpop.eup %1949 }
 0x9eb   :  { %875 = vrot.lane.b32.xlu0 %v1950_v52, %s2003_s7 }
 0x9ee   :  { %v1952_v53 = vpop.eup %1951 }
 0x9ef   :  { %899 = vrot.lane.b32.xlu1 %v1952_v53, %s2003_s7 }
 0xa5d   :  { %v876_v54 = vpop.permute.xlu0 %875 }
 0xa5e   :  { %v878_v55 = vmul.f32 %v1946_v39, %v876_v54 }
 0xa60   :  { %v910_v56 = vrot.slane %v878_v55, %v2133_v45 }
 0xa61   :  { %v900_v57 = vpop.permute.xlu1 %899 }
 0xa62   :  { %v902_v58 = vmul.f32 %v1948_v42, %v900_v57  ;;  %911 = vrot.lane.b32.xlu0 %v910_v56, %s2004_s8 }
 0xa64   :  { %v923_v59 = vrot.slane %v902_v58, %v2133_v45 }
 0xa66   :  { %924 = vrot.lane.b32.xlu1 %v923_v59, %s2004_s8 }
 0xad4   :  { %v912_v60 = vpop.permute.xlu0 %911 }
 0xad5   :  { %1636 = vst.msk [vmem:[%s2435_s3 + $0x6] sm:$0x3] %vm235_vm1, %v912_v60  ;;  %1827 = vmatmul.mubr.msk.f32.vlgmr.msra.gmra.mxu0 %vm25_vm2, %v912_v60 }
 0xad6   :  { %1841 = vmatpush3.msra.mxu0 %v2035_v1  ;;  %1848 = vmatprep.mubr.msk.f32.mxu0 %vm2002_vm0, %v2001_v0 }
 0xad7   :  { %1842 = vmatprep.subr.mxu0 %v2001_v0 }
 0xad8   :  { %v925_v61 = vpop.permute.xlu1 %924  ;;  %1843 = vmatpush3.msra.mxu0 %v2041_v2 }
 0xad9   :  { %1637 = vst.msk [vmem:[%s2436_s4 + $0x6] sm:$0x3] %vm235_vm1, %v925_v61  ;;  %1838 = vmatmul.mubr.msk.f32.vlgmr.msra.gmra.mxu1 %vm25_vm2, %v925_v61  ;;  %1844 = vmatprep.subr.mxu0 %v2001_v0 }
 0xada   :  { %1845 = vmatpush3.msra.mxu0 %v2060_v5  ;;  %1852 = vmatpush3.msra.mxu1 %v2046_v3 }
 0xadb   :  { %1846 = vmatprep.subr.mxu0 %v2001_v0  ;;  %1853 = vmatprep.subr.mxu1 %v2001_v0 }
 0xadc   :  { %1847 = vmatpush3.msra.mxu0 %v2074_v7  ;;  %1854 = vmatpush3.msra.mxu1 %v2053_v4 }
 0xadd   :  { %1855 = vmatprep.subr.mxu1 %v2001_v0  ;;  %1859 = vmatprep.mubr.msk.f32.mxu1 %vm2002_vm0, %v2001_v0 }
 0xade   :  { %1856 = vmatpush3.msra.mxu1 %v2067_v6  ;;  %1862 = vmatprep.subr.mxu0 %v2001_v0 }
 0xadf   :  { %1857 = vmatprep.subr.mxu1 %v2001_v0 }
 0xae0   :  { %1858 = vmatpush3.msra.mxu1 %v2082_v8 }
 0xae1   :  { %1873 = vmatprep.subr.mxu1 %v2001_v0 }
 0xb95   :  { %v998_v9 = vpop.f32.mrf.mxu0 }
 0xb96   :  { %v1002_v10 = vadd.f32 %v1638_v62, %v998_v9 }
 0xb97   :  { %v1828_v12 = vpop.f32.mrf.mxu0 }
 0xb98   :  { %1953 = vtanh.f32 %v1002_v10  ;;  %v1642_v18 = vmul.f32 -1.442695, %v1002_v10 }
 0xb99   :  { %v1072_v13 = vpop.f32.mrf.mxu1 }
 0xb9a   :  { %v1079_v14 = vadd.f32 %v1077_v11, %v1072_v13 }
 0xb9b   :  { %v1839_v15 = vpop.f32.mrf.mxu1 }
 0xb9c   :  { %1955 = vtanh.f32 %v1079_v14  ;;  %v1643_v19 = vmul.f32 -1.442695, %v1079_v14 }
 0xb9d   :  { %1957 = vpow2.f32 %v1642_v18 }
 0xb9e   :  { %1959 = vpow2.f32 %v1643_v19 }
 0xba5   :  { %v1954_v16 = vpop.eup %1953 }
 0xba6   :  { %1089 = vrot.lane.b32.xlu0 %v1954_v16, %s2003_s7 }
 0xba9   :  { %v1956_v17 = vpop.eup %1955 }
 0xbaa   :  { %1113 = vrot.lane.b32.xlu1 %v1956_v17, %s2003_s7  ;;  %v1958_v20 = vpop.eup %1957 }
 0xbab   :  { %v1083_v21 = vadd.f32 1.0, %v1958_v20  ;;  %v1960_v22 = vpop.eup %1959 }
 0xbac   :  { %v1107_v23 = vadd.f32 1.0, %v1960_v22  ;;  %v1654_v22 = vld [vmem:[%s2434_s0 + $0x18] sm:$0xf] }
 0xbad   :  { %1961 = vrcp.f32 %v1083_v21 }
 0xbae   :  { %1963 = vrcp.f32 %v1107_v23  ;;  %v1453_v23 = vld [vmem:[%s2434_s0] sm:$0xf] }
 0xbba   :  { %v1962_v24 = vpop.eup %1961 }
 0xbbb   :  { %v1964_v27 = vpop.eup %1963  ;;  %v1087_v30 = vmul.f32 %v1962_v24, %v2285_v48 }
 0xbbc   :  { %v1111_v33 = vmul.f32 %v1964_v27, %v2289_v51 }
 0xc18   :  { %v1090_v25 = vpop.permute.xlu0 %1089 }
 0xc19   :  { %v1092_v26 = vmul.f32 %v1962_v24, %v1090_v25 }
 0xc1b   :  { %1094 = vrot.lane.b32.xlu0 %v1092_v26, %s2004_s8  ;;  %v1527_v26 = vrot.slane %v1453_v23, 2 }
 0xc1c   :  { %v1114_v28 = vpop.permute.xlu1 %1113 }
 0xc1d   :  { %v1116_v29 = vmul.f32 %v1964_v27, %v1114_v28 }
 0xc1f   :  { %1118 = vrot.lane.b32.xlu1 %v1116_v29, %s2004_s8 }
 0xc8d   :  { %v1095_v31 = vpop.permute.xlu0 %1094 }
 0xc8e   :  { %v2339_v32 = vadd.f32 %v1095_v31, %v1087_v30 }
 0xc90   :  { %1965 = vtanh.f32 %v2339_v32 }
 0xc91   :  { %v1119_v34 = vpop.permute.xlu1 %1118 }
 0xc92   :  { %v2343_v35 = vadd.f32 %v1119_v34, %v1111_v33 }
 0xc94   :  { %1967 = vtanh.f32 %v2343_v35 }
 0xc9d   :  { %v1966_v36 = vpop.eup %1965 }
 0xc9e   :  { %1100 = vrot.lane.b32.xlu0 %v1966_v36, %s2003_s7 }
 0xca1   :  { %v1968_v37 = vpop.eup %1967 }
 0xca2   :  { %1124 = vrot.lane.b32.xlu1 %v1968_v37, %s2003_s7 }
 0xd10   :  { %v1101_v38 = vpop.permute.xlu0 %1100 }
 0xd11   :  { %v1103_v39 = vmul.f32 %v1962_v24, %v1101_v38 }
 0xd13   :  { %v1135_v40 = vrot.slane %v1103_v39, %v2133_v45 }
 0xd14   :  { %v1125_v41 = vpop.permute.xlu1 %1124 }
 0xd15   :  { %v1127_v42 = vmul.f32 %v1964_v27, %v1125_v41  ;;  %1136 = vrot.lane.b32.xlu0 %v1135_v40, %s2004_s8 }
 0xd17   :  { %v1148_v43 = vrot.slane %v1127_v42, %v2133_v45 }
 0xd19   :  { %1149 = vrot.lane.b32.xlu1 %v1148_v43, %s2004_s8 }
 0xd87   :  { %v1137_v44 = vpop.permute.xlu0 %1136 }
 0xd88   :  { %1644 = vst.msk [vmem:[%s2435_s3 + $0x8] sm:$0x3] %vm235_vm1, %v1137_v44  ;;  %1849 = vmatmul.mubr.msk.f32.vlgmr.msra.gmra.mxu0 %vm25_vm2, %v1137_v44 }
 0xd89   :  { %1863 = vmatpush3.msra.mxu0 %v2035_v1  ;;  %1870 = vmatprep.mubr.msk.f32.mxu0 %vm2002_vm0, %v2001_v0  ;;  %v1646_v1 = vld [vmem:[%s2434_s0 + $0x14] sm:$0xf] }
 0xd8a   :  { %1864 = vmatprep.subr.mxu0 %v2001_v0 }
 0xd8b   :  { %v1150_v46 = vpop.permute.xlu1 %1149  ;;  %1865 = vmatpush3.msra.mxu0 %v2041_v2  ;;  %v1648_v2 = vld [vmem:[%s2434_s0 + $0x4] sm:$0xf] }
 0xd8c   :  { %1645 = vst.msk [vmem:[%s2436_s4 + $0x4] sm:$0x3] %vm235_vm1, %v1150_v46  ;;  %1860 = vmatmul.mubr.msk.f32.vlgmr.msra.gmra.mxu1 %vm25_vm2, %v1150_v46  ;;  %1866 = vmatprep.subr.mxu0 %v2001_v0 }
 0xd8d   :  { %1867 = vmatpush3.msra.mxu0 %v2060_v5  ;;  %1874 = vmatpush3.msra.mxu1 %v2046_v3  ;;  %v1302_v5 = vrot.slane %v1648_v2, 2 }
 0xd8e   :  { %1868 = vmatprep.subr.mxu0 %v2001_v0  ;;  %1875 = vmatprep.subr.mxu1 %v2001_v0 }
 0xd8f   :  { %1869 = vmatpush3.msra.mxu0 %v2074_v7  ;;  %1876 = vmatpush3.msra.mxu1 %v2053_v4 }
 0xd90   :  { %1877 = vmatprep.subr.mxu1 %v2001_v0  ;;  %1881 = vmatprep.mubr.msk.f32.mxu1 %vm2002_vm0, %v2001_v0 }
 0xd91   :  { %1878 = vmatpush3.msra.mxu1 %v2067_v6 }
 0xd92   :  { %1879 = vmatprep.subr.mxu1 %v2001_v0 }
 0xd93   :  { %1880 = vmatpush3.msra.mxu1 %v2082_v8 }
 0xe48   :  { %v1223_v3 = vpop.f32.mrf.mxu0 }
 0xe49   :  { %v1227_v4 = vadd.f32 %v1646_v1, %v1223_v3 }
 0xe4a   :  { %v1850_v7 = vpop.f32.mrf.mxu0 }
 0xe4b   :  { %1969 = vtanh.f32 %v1227_v4  ;;  %v1650_v49 = vmul.f32 -1.442695, %v1227_v4 }
 0xe4c   :  { %v1297_v47 = vpop.f32.mrf.mxu1 }
 0xe4d   :  { %v1304_v48 = vadd.f32 %v1302_v5, %v1297_v47 }
 0xe4e   :  { %v1861_v6 = vpop.f32.mrf.mxu1 }
 0xe4f   :  { %1971 = vtanh.f32 %v1304_v48  ;;  %v1651_v50 = vmul.f32 -1.442695, %v1304_v48 }
 0xe50   :  { %1973 = vpow2.f32 %v1650_v49 }
 0xe51   :  { %1975 = vpow2.f32 %v1651_v50 }
 0xe58   :  { %v1970_v0 = vpop.eup %1969 }
 0xe59   :  { %1314 = vrot.lane.b32.xlu0 %v1970_v0, %s2003_s7 }
 0xe5c   :  { %v1972_v8 = vpop.eup %1971 }
 0xe5d   :  { %1338 = vrot.lane.b32.xlu1 %v1972_v8, %s2003_s7  ;;  %v1974_v51 = vpop.eup %1973 }
 0xe5e   :  { %v1308_v52 = vadd.f32 1.0, %v1974_v51  ;;  %v1976_v53 = vpop.eup %1975 }
 0xe5f   :  { %v1332_v54 = vadd.f32 1.0, %v1976_v53 }
 0xe60   :  { %1977 = vrcp.f32 %v1308_v52 }
 0xe61   :  { %1979 = vrcp.f32 %v1332_v54 }
 0xe6d   :  { %v1978_v55 = vpop.eup %1977 }
 0xe6e   :  { %v1980_v58 = vpop.eup %1979  ;;  %v1312_v61 = vmul.f32 %v1978_v55, %v2339_v32 }
 0xe6f   :  { %v1336_v9 = vmul.f32 %v1980_v58, %v2343_v35 }
 0xecb   :  { %v1315_v56 = vpop.permute.xlu0 %1314 }
 0xecc   :  { %v1317_v57 = vmul.f32 %v1978_v55, %v1315_v56 }
 0xece   :  { %1319 = vrot.lane.b32.xlu0 %v1317_v57, %s2004_s8 }
 0xecf   :  { %v1339_v59 = vpop.permute.xlu1 %1338 }
 0xed0   :  { %v1341_v60 = vmul.f32 %v1980_v58, %v1339_v59 }
 0xed2   :  { %1343 = vrot.lane.b32.xlu1 %v1341_v60, %s2004_s8 }
 0xf40   :  { %v1320_v62 = vpop.permute.xlu0 %1319 }
 0xf41   :  { %v1322_v63 = vadd.f32 %v1320_v62, %v1312_v61 }
 0xf43   :  { %1981 = vtanh.f32 %v1322_v63 }
 0xf44   :  { %v1344_v10 = vpop.permute.xlu1 %1343 }
 0xf45   :  { %v1346_v11 = vadd.f32 %v1344_v10, %v1336_v9 }
 0xf47   :  { %1983 = vtanh.f32 %v1346_v11 }
 0xf50   :  { %v1982_v12 = vpop.eup %1981 }
 0xf51   :  { %1325 = vrot.lane.b32.xlu0 %v1982_v12, %s2003_s7 }
 0xf54   :  { %v1984_v13 = vpop.eup %1983 }
 0xf55   :  { %1349 = vrot.lane.b32.xlu1 %v1984_v13, %s2003_s7 }
 0xfc3   :  { %v1326_v14 = vpop.permute.xlu0 %1325 }
 0xfc4   :  { %v1328_v15 = vmul.f32 %v1978_v55, %v1326_v14 }
 0xfc6   :  { %v1360_v16 = vrot.slane %v1328_v15, %v2133_v45 }
 0xfc7   :  { %v1350_v17 = vpop.permute.xlu1 %1349 }
 0xfc8   :  { %v1352_v18 = vmul.f32 %v1980_v58, %v1350_v17  ;;  %1361 = vrot.lane.b32.xlu0 %v1360_v16, %s2004_s8 }
 0xfca   :  { %v1373_v19 = vrot.slane %v1352_v18, %v2133_v45 }
 0xfcc   :  { %1374 = vrot.lane.b32.xlu1 %v1373_v19, %s2004_s8 }
0x103a   :  { %v1362_v20 = vpop.permute.xlu0 %1361 }
0x103b   :  { %1652 = vst.msk [vmem:[%s2435_s3 + $0xa] sm:$0x3] %vm235_vm1, %v1362_v20  ;;  %1871 = vmatmul.mubr.msk.f32.vlgmr.msra.gmra.mxu0 %vm25_vm2, %v1362_v20 }
0x103e   :  { %v1375_v21 = vpop.permute.xlu1 %1374 }
0x103f   :  { %1653 = vst.msk [vmem:[%s2436_s4 + $0x2] sm:$0x3] %vm235_vm1, %v1375_v21  ;;  %1882 = vmatmul.mubr.msk.f32.vlgmr.msra.gmra.mxu1 %vm25_vm2, %v1375_v21 }
0x10fb   :  { %v1448_v24 = vpop.f32.mrf.mxu0 }
0x10fc   :  { %v1452_v25 = vadd.f32 %v1654_v22, %v1448_v24 }
0x10fd   :  { %v1872_v27 = vpop.f32.mrf.mxu0 }
0x10fe   :  { %1985 = vtanh.f32 %v1452_v25  ;;  %v1657_v33 = vmul.f32 -1.442695, %v1452_v25 }
0x10ff   :  { %v1522_v28 = vpop.f32.mrf.mxu1 }
0x1100   :  { %v1529_v29 = vadd.f32 %v1527_v26, %v1522_v28 }
0x1101   :  { %v1883_v30 = vpop.f32.mrf.mxu1 }
0x1102   :  { %1987 = vtanh.f32 %v1529_v29  ;;  %v1658_v34 = vmul.f32 -1.442695, %v1529_v29 }
0x1103   :  { %1989 = vpow2.f32 %v1657_v33 }
0x1104   :  { %1991 = vpow2.f32 %v1658_v34 }
0x110b   :  { %v1986_v31 = vpop.eup %1985 }
0x110c   :  { %1539 = vrot.lane.b32.xlu0 %v1986_v31, %s2003_s7 }
0x110f   :  { %v1988_v32 = vpop.eup %1987 }
0x1110   :  { %1563 = vrot.lane.b32.xlu1 %v1988_v32, %s2003_s7  ;;  %v1990_v35 = vpop.eup %1989 }
0x1111   :  { %v1533_v36 = vadd.f32 1.0, %v1990_v35  ;;  %v1992_v37 = vpop.eup %1991 }
0x1112   :  { %v1557_v38 = vadd.f32 1.0, %v1992_v37 }
0x1113   :  { %1993 = vrcp.f32 %v1533_v36 }
0x1114   :  { %1995 = vrcp.f32 %v1557_v38 }
0x1120   :  { %v1994_v39 = vpop.eup %1993 }
0x1121   :  { %v1996_v42 = vpop.eup %1995  ;;  %v1537_v46 = vmul.f32 %v1994_v39, %v1322_v63 }
0x1122   :  { %v1561_v3 = vmul.f32 %v1996_v42, %v1346_v11 }
0x117e   :  { %v1540_v40 = vpop.permute.xlu0 %1539 }
0x117f   :  { %v1542_v41 = vmul.f32 %v1994_v39, %v1540_v40 }
0x1181   :  { %1544 = vrot.lane.b32.xlu0 %v1542_v41, %s2004_s8 }
0x1182   :  { %v1564_v43 = vpop.permute.xlu1 %1563 }
0x1183   :  { %v1566_v44 = vmul.f32 %v1996_v42, %v1564_v43 }
0x1185   :  { %1568 = vrot.lane.b32.xlu1 %v1566_v44, %s2004_s8 }
0x11f3   :  { %v1545_v1 = vpop.permute.xlu0 %1544 }
0x11f4   :  { %v1547_v2 = vadd.f32 %v1545_v1, %v1537_v46 }
0x11f6   :  { %1997 = vtanh.f32 %v1547_v2 }
0x11f7   :  { %v1569_v4 = vpop.permute.xlu1 %1568 }
0x11f8   :  { %v1571_v5 = vadd.f32 %v1569_v4, %v1561_v3 }
0x11fa   :  { %1999 = vtanh.f32 %v1571_v5 }
0x1203   :  { %v1998_v7 = vpop.eup %1997 }
0x1204   :  { %1550 = vrot.lane.b32.xlu0 %v1998_v7, %s2003_s7 }
0x1207   :  { %v2000_v47 = vpop.eup %1999 }
0x1208   :  { %1574 = vrot.lane.b32.xlu1 %v2000_v47, %s2003_s7 }
0x1276   :  { %v1551_v48 = vpop.permute.xlu0 %1550 }
0x1277   :  { %v1553_v6 = vmul.f32 %v1994_v39, %v1551_v48 }
0x1279   :  { %v1585_v0 = vrot.slane %v1553_v6, %v2133_v45 }
0x127a   :  { %v1575_v8 = vpop.permute.xlu1 %1574 }
0x127b   :  { %v1577_v49 = vmul.f32 %v1996_v42, %v1575_v8  ;;  %1586 = vrot.lane.b32.xlu0 %v1585_v0, %s2004_s8 }
0x127d   :  { %v1598_v50 = vrot.slane %v1577_v49, %v2133_v45 }
0x127f   :  { %1599 = vrot.lane.b32.xlu1 %v1598_v50, %s2004_s8 }
0x12ed   :  { %v1587_v51 = vpop.permute.xlu0 %1586 }
0x12ee   :  { %1659 = vst.msk [vmem:[%s2435_s3 + $0xc] sm:$0x3] %vm235_vm1, %v1587_v51 }
0x12f1   :  { %v1600_v52 = vpop.permute.xlu1 %1599 }
0x12f2   :  { %1602 = vst.msk [vmem:[%s2436_s4] sm:$0x3] %vm235_vm1, %v1600_v52 }

// kernel: crnn_forward.29
= control target key start
LH: loop header
LB: loop body
LE: loop exit
PB: predicated region body
PF: predicated region fallthrough
CT: control target
= control target key end

     0   :  { %v256_v1 = vmov 0   ;;  %v191_v18 = vlaneseq  ;;  %s343_s1 = inlined_call_operand.vmem [shape: bf16[128,256], index: 1, kind: input, shape index: {}]   ;;  %s344_s0 = inlined_call_operand.vmem [shape: bf16[16,128], index: 0, kind: input, shape index: {}]   ;;  %s345_s2 = inlined_call_operand.vmem [shape: f32[1,256], index: 2, kind: input, shape index: {}]   ;;  %s346_s3 = inlined_call_operand.vmem [shape: f32[16,256], index: 3, kind: output, shape index: {}]  }
   0x1   :  { %v231_v0 = vld [vmem:[%s343_s1 + $0x74] ss:$8 sps:$4 sm:$0xff]   ;;  %163 = vmatprep.mubr.bf16.mxu0 %v256_v1  ;;  %v233_v2 = vld [vmem:[%s343_s1 + $0x70] ss:$8 sps:$4 sm:$0xff]   ;;  %v234_v3 = vld [vmem:[%s343_s1 + $0x64] ss:$8 sps:$4 sm:$0xff]  }
   0x2   :  { %131 = vmatprep.subr.bf16.mxu0 %v231_v0  ;;  %v236_v4 = vld [vmem:[%s343_s1 + $0x60] ss:$8 sps:$4 sm:$0xff]   ;;  %v237_v5 = vld [vmem:[%s343_s1 + $0x54] ss:$8 sps:$4 sm:$0xff]   ;;  %v239_v6 = vld [vmem:[%s343_s1 + $0x50] ss:$8 sps:$4 sm:$0xff]  }
   0x3   :  { %132 = vmatpush1.bf16.msra.mxu0 %v233_v2  ;;  %v240_v7 = vld [vmem:[%s343_s1 + $0x44] ss:$8 sps:$4 sm:$0xff]   ;;  %v242_v8 = vld [vmem:[%s343_s1 + $0x40] ss:$8 sps:$4 sm:$0xff]   ;;  %v243_v9 = vld [vmem:[%s343_s1 + $0x34] ss:$8 sps:$4 sm:$0xff]  }
   0x4   :  { %133 = vmatprep.subr.bf16.mxu0 %v234_v3  ;;  %v245_v10 = vld [vmem:[%s343_s1 + $0x30] ss:$8 sps:$4 sm:$0xff]   ;;  %v246_v11 = vld [vmem:[%s343_s1 + $0x24] ss:$8 sps:$4 sm:$0xff]   ;;  %v248_v12 = vld [vmem:[%s343_s1 + $0x20] ss:$8 sps:$4 sm:$0xff]  }
   0x5   :  { %v249_v13 = vld [vmem:[%s343_s1 + $0x14] ss:$8 sps:$4 sm:$0xff]   ;;  %v251_v14 = vld [vmem:[%s343_s1 + $0x10] ss:$8 sps:$4 sm:$0xff]   ;;  %v252_v15 = vld [vmem:[%s343_s1 + $0x4] ss:$8 sps:$4 sm:$0xff]  }
   0x6   :  { %v254_v16 = vld [vmem:[%s343_s1] ss:$8 sps:$4 sm:$0xff]   ;;  %v192_v19 = vshrl.u32 %v191_v18, 7 }
   0x7   :  { %134 = vmatpush1.bf16.msra.mxu0 %v236_v4  ;;  %v255_v17 = vld [vmem:[%s344_s0] sm:$0xff]  }
   0x8   :  { %135 = vmatprep.subr.bf16.mxu0 %v237_v5  ;;  %v193_v20 = vsub.s32 0, %v192_v19  ;;  %v189_v21 = vld [vmem:[%s345_s2] sm:$0x3]  ;;  %v197_v22 = vsub.s32 1, %v192_v19 }
   0xa   :  { %v194_v23 = vrot.slane %v189_v21, %v193_v20  ;;  %v198_v24 = vrot.slane %v189_v21, %v197_v22 }
   0xb   :  { %136 = vmatpush1.bf16.msra.mxu0 %v239_v6 }
   0xc   :  { %137 = vmatprep.subr.bf16.mxu0 %v240_v7 }
   0xf   :  { %138 = vmatpush1.bf16.msra.mxu0 %v242_v8 }
  0x10   :  { %139 = vmatprep.subr.bf16.mxu0 %v243_v9 }
  0x13   :  { %140 = vmatpush1.bf16.msra.mxu0 %v245_v10 }
  0x14   :  { %141 = vmatprep.subr.bf16.mxu0 %v246_v11 }
  0x17   :  { %142 = vmatpush1.bf16.msra.mxu0 %v248_v12 }
  0x18   :  { %143 = vmatprep.subr.bf16.mxu0 %v249_v13 }
  0x1b   :  { %144 = vmatpush1.bf16.msra.mxu0 %v251_v14 }
  0x1c   :  { %145 = vmatprep.subr.bf16.mxu0 %v252_v15 }
  0x1f   :  { %146 = vmatpush1.bf16.msra.mxu0 %v254_v16 }
  0x22   :  { %164 = vmatmul.mubr.bf16.vlgmr.msra.gmra.mxu0 %v255_v17 }
  0xe2   :  { %v165_v25 = vpop.f32.mrf.mxu0 }
  0xe3   :  { %v201_v26 = vadd.f32 %v194_v23, %v165_v25 }
  0xe4   :  { %v167_v27 = vpop.f32.mrf.mxu0 }
  0xe5   :  { %205 = vst [vmem:[%s346_s3] sm:$0xff] %v201_v26  ;;  %v202_v28 = vadd.f32 %v198_v24, %v167_v27 }
  0xe6   :  { %v169_v29 = vpop.f32.mrf.mxu0 }
  0xe7   :  { %206 = vst [vmem:[%s346_s3 + $0x8] sm:$0xff] %v202_v28  ;;  %v203_v30 = vadd.f32 %v194_v23, %v169_v29 }
  0xe8   :  { %v171_v31 = vpop.f32.mrf.mxu0 }
  0xe9   :  { %207 = vst [vmem:[%s346_s3 + $0x10] sm:$0xff] %v203_v30  ;;  %v204_v32 = vadd.f32 %v198_v24, %v171_v31 }
  0xeb   :  { %208 = vst [vmem:[%s346_s3 + $0x18] sm:$0xff] %v204_v32 }

// kernel: crnn_forward.31
= control target key start
LH: loop header
LB: loop body
LE: loop exit
PB: predicated region body
PF: predicated region fallthrough
CT: control target
= control target key end

     0   :  { %v210_v0 = vmov 0.0   ;;  %vm211_vm0 = vmmov 0   ;;  %s268_s1 = inlined_call_operand.vmem [shape: bf16[128,128], index: 1, kind: input, shape index: {}]   ;;  %s269_s0 = inlined_call_operand.vmem [shape: bf16[16,128], index: 0, kind: input, shape index: {}]   ;;  %s270_s2 = inlined_call_operand.vmem [shape: f32[1,128], index: 2, kind: input, shape index: {}]   ;;  %s271_s3 = inlined_call_operand.vmem [shape: f32[16,128], index: 3, kind: output, shape index: {}]  }
   0x1   :  { %179 = vmatprep.subr.bf16.mxu0 %v210_v0  ;;  %v201_v1 = vld [vmem:[%s268_s1 + $0x38] sm:$0xff]   ;;  %195 = vmatprep.mubr.msk.bf16.mxu0 %vm211_vm0, %v210_v0  ;;  %v202_v2 = vld [vmem:[%s268_s1 + $0x30] sm:$0xff]   ;;  %v203_v3 = vld [vmem:[%s268_s1 + $0x28] sm:$0xff]  }
   0x2   :  { %180 = vmatpush3.bf16.msra.mxu0 %v201_v1  ;;  %v204_v4 = vld [vmem:[%s268_s1 + $0x20] sm:$0xff]   ;;  %v205_v5 = vld [vmem:[%s268_s1 + $0x18] sm:$0xff]   ;;  %v206_v6 = vld [vmem:[%s268_s1 + $0x10] sm:$0xff]  }
   0x3   :  { %181 = vmatprep.subr.bf16.mxu0 %v210_v0  ;;  %v207_v7 = vld [vmem:[%s268_s1 + $0x8] sm:$0xff]   ;;  %v208_v8 = vld [vmem:[%s268_s1] sm:$0xff]  }
   0x4   :  { %v209_v9 = vld [vmem:[%s269_s0] sm:$0xff]  }
   0x5   :  { %v169_v10 = vld [vmem:[%s270_s2] ss:$0 sm:$0xff] }
   0x6   :  { %182 = vmatpush3.bf16.msra.mxu0 %v202_v2 }
   0x7   :  { %183 = vmatprep.subr.bf16.mxu0 %v210_v0 }
   0xa   :  { %184 = vmatpush3.bf16.msra.mxu0 %v203_v3 }
   0xb   :  { %185 = vmatprep.subr.bf16.mxu0 %v210_v0 }
   0xe   :  { %186 = vmatpush3.bf16.msra.mxu0 %v204_v4 }
   0xf   :  { %187 = vmatprep.subr.bf16.mxu0 %v210_v0 }
  0x12   :  { %188 = vmatpush3.bf16.msra.mxu0 %v205_v5 }
  0x13   :  { %189 = vmatprep.subr.bf16.mxu0 %v210_v0 }
  0x16   :  { %190 = vmatpush3.bf16.msra.mxu0 %v206_v6 }
  0x17   :  { %191 = vmatprep.subr.bf16.mxu0 %v210_v0 }
  0x1a   :  { %192 = vmatpush3.bf16.msra.mxu0 %v207_v7 }
  0x1b   :  { %193 = vmatprep.subr.bf16.mxu0 %v210_v0 }
  0x1e   :  { %194 = vmatpush3.bf16.msra.mxu0 %v208_v8 }
  0x21   :  { %196 = vmatmul.mubr.bf16.vlgmr.msra.gmra.mxu0 %v209_v9 }
  0xe1   :  { %v129_v11 = vpop.f32.mrf.mxu0 }
  0xe2   :  { %v152_v12 = vadd.f32 %v169_v10, %v129_v11 }
  0xe3   :  { %v197_v13 = vpop.f32.mrf.mxu0 }
  0xe4   :  { %154 = vst [vmem:[%s271_s3] sm:$0xff] %v152_v12 }
  0xe5   :  { %v132_v14 = vpop.f32.mrf.mxu0 }
  0xe6   :  { %v153_v15 = vadd.f32 %v169_v10, %v132_v14 }
  0xe7   :  { %v198_v16 = vpop.f32.mrf.mxu0 }
  0xe8   :  { %155 = vst [vmem:[%s271_s3 + $0x8] sm:$0xff] %v153_v15 }

</bundles_post_ra>
